<compile_context>
chip_gen: v7x
topology: tpu7x:2x2x1
jax: 0.10.0
libtpu: 0.0.40
codegen_flags: <defaults>
</compile_context>

<pallas_src>
import functools

import jax
import jax.numpy as jnp
from jax.experimental import pallas as pl
from jax.experimental.pallas import tpu as pltpu

LANE = 128


def _round_up(x, m):
    return (x + m - 1) // m * m


def _pad_last(x, target):
    c = x.shape[-1]
    if c >= target:
        return x
    return jnp.pad(x, [(0, 0)] * (x.ndim - 1) + [(0, target - c)])


# --------------------------------------------------------------------------
# Pallas kernels
# --------------------------------------------------------------------------
def _mm_bn_act_kernel(x_ref, w_ref, s_ref, t_ref, o_ref, *, relu):
    # (tm, K)@(K, N) on the MXU (bf16 in, f32 acc), BN affine (+ReLU) on the VPU.
    acc = jnp.dot(x_ref[...], w_ref[...], preferred_element_type=jnp.float32)
    y = acc * s_ref[...] + t_ref[...]
    if relu:
        y = jnp.maximum(y, 0.0)
    o_ref[...] = y.astype(o_ref.dtype)


def _mm_bn_res_act_kernel(x_ref, w_ref, s_ref, t_ref, r_ref, o_ref, *, relu):
    # Same, plus a fused residual (skip-connection) add before the ReLU.
    acc = jnp.dot(x_ref[...], w_ref[...], preferred_element_type=jnp.float32)
    y = acc * s_ref[...] + t_ref[...] + r_ref[...].astype(jnp.float32)
    if relu:
        y = jnp.maximum(y, 0.0)
    o_ref[...] = y.astype(o_ref.dtype)


def _conv_tap_kernel(*refs, kh, kw, stride, ho, wo, relu):
    """Direct KxK conv: accumulate the taps on the MXU; no im2col in HBM.

    refs = [phase_0 .. phase_{stride*stride-1}, w_taps, scale, shift, out]
      phase_p : (1, Hp_p, Wp_p, Cin_pad)   stride-phase of the padded input
      w_taps  : (kh*kw, Cin_pad, Cout_pad) bf16
      scale/shift : (1, Cout_pad) f32 (conv bias already folded into shift)
      out     : (1, ho, wo, Cout_pad) bf16
    """
    nph = stride * stride
    ph_refs = refs[:nph]
    w_ref, s_ref, t_ref, o_ref = refs[nph:nph + 4]

    acc = [None] * ho
    for i in range(kh):
        for j in range(kw):
            w_t = w_ref[i * kw + j]                          # (Cin_pad, Cout_pad)
            ph = ph_refs[(i % stride) * stride + (j % stride)]
            a = i // stride
            b = j // stride
            for h in range(ho):
                lhs = ph[0, a + h, b:b + wo, :]              # (wo, Cin_pad)
                d = jnp.dot(lhs, w_t, preferred_element_type=jnp.float32)
                acc[h] = d if acc[h] is None else acc[h] + d

    sc = s_ref[...]
    sh = t_ref[...]
    for h in range(ho):
        y = acc[h] * sc + sh
        if relu:
            y = jnp.maximum(y, 0.0)
        o_ref[0, h, :, :] = y.astype(o_ref.dtype)


def _maxpool_tap_kernel(*refs, ho, wo):
    # 3x3 stride-2 maxpool: running max over the 9 taps of the phase-split map.
    ph_refs = refs[:4]
    o_ref = refs[4]
    m = None
    for i in range(3):
        for j in range(3):
            ph = ph_refs[(i % 2) * 2 + (j % 2)]
            v = ph[0, i // 2:i // 2 + ho, j // 2:j // 2 + wo, :]
            m = v if m is None else jnp.maximum(m, v)
    o_ref[0] = m


# --------------------------------------------------------------------------
# Pallas wrappers (host-side glue is pure indexing / padding)
# --------------------------------------------------------------------------
def fused_matmul_bn_act(x2, w_mat, scale, shift, *, residual=None, relu=True):
    """out = act((x2 @ w_mat) * scale + shift [+ residual]); bf16 in/out."""
    M, K = x2.shape
    Kw, N = w_mat.shape
    assert K == Kw
    m8 = _round_up(M, 8)
    if m8 >= 1024:
        tm = 512
    elif m8 >= 256:
        tm = _round_up((m8 + 1) // 2, 8)   # >=2 parallel steps (v7x has 2 TCs)
    else:
        tm = m8
    m_pad = _round_up(m8, tm)
    x2 = jnp.pad(x2, ((0, m_pad - M), (0, 0)))

    in_specs = [
        pl.BlockSpec((tm, K), lambda i: (i, 0)),
        pl.BlockSpec((K, N), lambda i: (0, 0)),
        pl.BlockSpec((1, N), lambda i: (0, 0)),
        pl.BlockSpec((1, N), lambda i: (0, 0)),
    ]
    args = [x2, w_mat, scale, shift]
    if residual is not None:
        r = jnp.pad(residual, ((0, m_pad - M), (0, 0)))
        in_specs.append(pl.BlockSpec((tm, N), lambda i: (i, 0)))
        args.append(r)
        kernel = functools.partial(_mm_bn_res_act_kernel, relu=relu)
    else:
        kernel = functools.partial(_mm_bn_act_kernel, relu=relu)

    out = pl.pallas_call(
        kernel,
        out_shape=jax.ShapeDtypeStruct((m_pad, N), jnp.bfloat16),
        grid=(m_pad // tm,),
        in_specs=in_specs,
        out_specs=pl.BlockSpec((tm, N), lambda i: (i, 0)),
        compiler_params=pltpu.CompilerParams(
            dimension_semantics=("parallel",)),
    )(*args)
    return out[:M]   # padded rows carry garbage epilogue output; drop them


def _prep_w_taps(w_oihw, cin_pad, cout_pad):
    cout, cin, kh, kw = w_oihw.shape
    w = jnp.transpose(w_oihw, (2, 3, 1, 0))                  # (kh, kw, cin, cout)
    w = jnp.pad(w, ((0, 0), (0, 0), (0, cin_pad - cin), (0, cout_pad - cout)))
    return w.reshape(kh * kw, cin_pad, cout_pad).astype(jnp.bfloat16)


def _prep_w_mat(w_oihw, cin_pad, cout_pad):
    cout, cin, kh, kw = w_oihw.shape
    w = jnp.transpose(w_oihw, (2, 3, 1, 0))
    w = jnp.pad(w, ((0, 0), (0, 0), (0, cin_pad - cin), (0, cout_pad - cout)))
    return w.reshape(kh * kw * cin_pad, cout_pad).astype(jnp.bfloat16)


def _fold_bias_bn(bias, bn_scale, bn_shift, cout_pad):
    # (conv + bias) * scale + shift == conv * scale + (bias * scale + shift)
    scale = bn_scale.astype(jnp.float32)
    shift = bias.astype(jnp.float32) * scale + bn_shift.astype(jnp.float32)
    cout = scale.shape[0]
    scale = jnp.pad(scale, (0, cout_pad - cout)).reshape(1, cout_pad)
    shift = jnp.pad(shift, (0, cout_pad - cout)).reshape(1, cout_pad)
    return scale, shift


def _phase_split(xp, stride):
    if stride == 1:
        return [xp]
    return [xp[:, pi::stride, pj::stride, :]
            for pi in range(stride) for pj in range(stride)]


def conv1x1_bn_act(x, w_oihw, bias, bn_scale, bn_shift, *, relu=True,
                   residual=None):
    """1x1 conv + eval-BN [+residual] [+ReLU] as one lane-dense Pallas matmul."""
    n, h, w_, cp = x.shape
    cout = w_oihw.shape[0]
    cout_pad = _round_up(cout, LANE)
    w_mat = _prep_w_mat(w_oihw, cp, cout_pad)
    scale, shift = _fold_bias_bn(bias, bn_scale, bn_shift, cout_pad)
    x2 = x.reshape(n * h * w_, cp)
    r2 = None
    if residual is not None:
        r2 = _pad_last(residual, cout_pad).reshape(n * h * w_, cout_pad)
    out = fused_matmul_bn_act(x2, w_mat, scale, shift, residual=r2, relu=relu)
    return out.reshape(n, h, w_, cout_pad)


def conv_kxk_bn_act(x, w_oihw, bias, bn_scale, bn_shift, *, stride, pad,
                    relu=True):
    """KxK conv + eval-BN [+ReLU] via in-VMEM tap accumulation (no im2col)."""
    n, h, w_, cp = x.shape
    cout, cin, kh, kw = w_oihw.shape
    cout_pad = _round_up(cout, LANE)
    ho = (h + 2 * pad - kh) // stride + 1
    wo = (w_ + 2 * pad - kw) // stride + 1
    w_taps = _prep_w_taps(w_oihw, cp, cout_pad)
    scale, shift = _fold_bias_bn(bias, bn_scale, bn_shift, cout_pad)
    xp = jnp.pad(x, ((0, 0), (pad, pad), (pad, pad), (0, 0)))
    phases = _phase_split(xp, stride)

    kernel = functools.partial(_conv_tap_kernel, kh=kh, kw=kw, stride=stride,
                               ho=ho, wo=wo, relu=relu)
    in_specs = [pl.BlockSpec((1,) + p.shape[1:], lambda i: (i, 0, 0, 0))
                for p in phases]
    in_specs += [
        pl.BlockSpec(w_taps.shape, lambda i: (0, 0, 0)),
        pl.BlockSpec((1, cout_pad), lambda i: (0, 0)),
        pl.BlockSpec((1, cout_pad), lambda i: (0, 0)),
    ]
    out = pl.pallas_call(
        kernel,
        out_shape=jax.ShapeDtypeStruct((n, ho, wo, cout_pad), jnp.bfloat16),
        grid=(n,),
        in_specs=in_specs,
        out_specs=pl.BlockSpec((1, ho, wo, cout_pad), lambda i: (i, 0, 0, 0)),
        compiler_params=pltpu.CompilerParams(
            dimension_semantics=("parallel",)),
    )(*phases, w_taps, scale, shift)
    return out


def maxpool_3x3_s2_p1(x):
    """nn.MaxPool2d(3, stride=2, padding=1) in NHWC (lane-padded channels).

    Inputs are post-ReLU (>= 0) and padded channels are exactly zero, so
    spatial zero-padding is equivalent to PyTorch's -inf padding here.
    """
    n, h, w_, c = x.shape
    ho = (h + 2 - 3) // 2 + 1
    wo = (w_ + 2 - 3) // 2 + 1
    xp = jnp.pad(x, ((0, 0), (1, 1), (1, 1), (0, 0)))
    phases = _phase_split(xp, 2)
    kernel = functools.partial(_maxpool_tap_kernel, ho=ho, wo=wo)
    in_specs = [pl.BlockSpec((1,) + p.shape[1:], lambda i: (i, 0, 0, 0))
                for p in phases]
    out = pl.pallas_call(
        kernel,
        out_shape=jax.ShapeDtypeStruct((n, ho, wo, c), x.dtype),
        grid=(n,),
        in_specs=in_specs,
        out_specs=pl.BlockSpec((1, ho, wo, c), lambda i: (i, 0, 0, 0)),
        compiler_params=pltpu.CompilerParams(
            dimension_semantics=("parallel",)),
    )(*phases)
    return out


def im2col(x_nhwc, kh, kw, stride, pad):
    """Patch extraction used only for the 3-channel stem (tiny expansion)."""
    n, h, w_, c = x_nhwc.shape
    xp = jnp.pad(x_nhwc, ((0, 0), (pad, pad), (pad, pad), (0, 0)))
    ho = (h + 2 * pad - kh) // stride + 1
    wo = (w_ + 2 * pad - kw) // stride + 1
    cols = [xp[:, i:i + stride * ho:stride, j:j + stride * wo:stride, :]
            for i in range(kh) for j in range(kw)]
    patches = jnp.concatenate(cols, axis=-1)          # (n, ho, wo, kh*kw*c)
    return patches.reshape(n * ho * wo, kh * kw * c), ho, wo


# --------------------------------------------------------------------------
# Parameter init (deterministic, synthetic)
# --------------------------------------------------------------------------
class ParamGen:
    def __init__(self, key):
        self._key = key

    def normal(self, shape):
        self._key, sub = jax.random.split(self._key)
        return jax.random.normal(sub, shape, jnp.float32)

    def conv(self, shape):  # (Cout, Cin, KH, KW)
        fan_in = shape[1] * shape[2] * shape[3]
        return self.normal(shape) * (1.0 / jnp.sqrt(jnp.float32(fan_in)))


def make_bn(pg, c, eps=1e-5):
    """Eval-mode BatchNorm folded into per-channel scale/shift."""
    gamma = 1.0 + 0.1 * pg.normal((c,))
    beta = 0.1 * pg.normal((c,))
    mean = 0.1 * pg.normal((c,))
    var = 0.9 + 0.1 * jnp.abs(pg.normal((c,)))
    scale = gamma / jnp.sqrt(var + eps)
    shift = beta - mean * scale
    return scale, shift


def init_deep_resnet(key, in_channels, base, channel_sizes, widths):
    pg = ParamGen(key)
    params = {
        "stem_w": pg.conv((base, in_channels, 7, 7)),
        "stem_b": 0.1 * pg.normal((base,)),
        "stem_bn": make_bn(pg, base),
        "levels": [],
    }
    in_ch = base
    for li, (width, cout) in enumerate(zip(widths, channel_sizes)):
        blocks = []
        for bi in range(width):
            cin = in_ch if bi == 0 else cout
            mid = cout // 4
            blocks.append({
                "w1": pg.conv((mid, cin, 1, 1)),
                "b1": 0.1 * pg.normal((mid,)),
                "bn1": make_bn(pg, mid),
                "w2": pg.conv((mid, mid, 3, 3)),
                "b2": 0.1 * pg.normal((mid,)),
                "bn2": make_bn(pg, mid),
                "w3": pg.conv((cout, mid, 1, 1)),
                "b3": 0.1 * pg.normal((cout,)),
                "bn3": make_bn(pg, cout),
                "downsample": (li > 0) and (bi == 0),
            })
        params["levels"].append(blocks)
        in_ch = cout
    return params


# --------------------------------------------------------------------------
# Forward pass (BottleNeckBlock v1, DropPath(p=0)=Identity, head=Identity)
# --------------------------------------------------------------------------
def bottleneck_block_v1(x, p):
    ds = p["downsample"]
    # conv1 (1x1) -> bn1 -> relu
    y = conv1x1_bn_act(x, p["w1"], p["b1"], *p["bn1"], relu=True)
    # conv2 (3x3, stride 2 if downsample) -> bn2 -> relu (tap-accumulation kernel)
    y = conv_kxk_bn_act(y, p["w2"], p["b2"], *p["bn2"],
                        stride=2 if ds else 1, pad=1, relu=True)
    # skip: AvgPool2d(k=1, s=2) == strided subsample; the channel zero-fill is
    # implicit in the lane-padded layout (padded channels are exact zeros).
    skip = x[:, ::2, ::2, :] if ds else x
    # conv3 (1x1) -> bn3 -> (+skip) -> relu, fused into one Pallas kernel
    y = conv1x1_bn_act(y, p["w3"], p["b3"], *p["bn3"], relu=True, residual=skip)
    return y


def deep_resnet_forward(x_nchw, params):
    x = jnp.transpose(x_nchw, (0, 2, 3, 1)).astype(jnp.bfloat16)  # NCHW -> NHWC
    n = x.shape[0]
    # Stem: Conv7x7 s2 p3 -> BN -> ReLU.  Cin=3 so the im2col expansion is only
    # ~150 KB; all 128-channel 3x3 convs below avoid im2col entirely.
    patches, ho, wo = im2col(x, 7, 7, 2, 3)
    base = params["stem_w"].shape[0]
    cout_pad = _round_up(base, LANE)
    w_mat = _prep_w_mat(params["stem_w"], x.shape[-1], cout_pad)
    scale, shift = _fold_bias_bn(params["stem_b"], *params["stem_bn"], cout_pad)
    y = fused_matmul_bn_act(patches, w_mat, scale, shift, relu=True)
    y = y.reshape(n, ho, wo, cout_pad)
    # MaxPool 3x3 s2 p1
    y = maxpool_3x3_s2_p1(y)
    for blocks in params["levels"]:
        for blk in blocks:
            y = bottleneck_block_v1(y, blk)
    # head=False -> classifier is Identity; drop lane padding, back to NCHW f32
    cout_final = params["levels"][-1][-1]["w3"].shape[0]
    y = y[..., :cout_final].astype(jnp.float32)
    return jnp.transpose(y, (0, 3, 1, 2))


# --------------------------------------------------------------------------
if __name__ == "__main__":
    # Small DeepResNet instance (same architecture family, reduced sizes):
    # version='v1', bottleneck=True, channel_sizes=(16,32,64,128),
    # widths=(1,1,1,1), in_channels=3, base_channel_size=8, bias=True, head=False
    key = jax.random.PRNGKey(0)
    k_params, k_x = jax.random.split(key)

    in_channels = 3
    base = 8
    channel_sizes = (16, 32, 64, 128)
    widths = (1, 1, 1, 1)

    params = init_deep_resnet(k_params, in_channels, base, channel_sizes, widths)
    x = jax.random.normal(k_x, (2, in_channels, 32, 32), jnp.float32)

    # params captured by closure so Python bools ("downsample") stay static.
    fwd = jax.jit(lambda xx: deep_resnet_forward(xx, params))
    y = jax.block_until_ready(fwd(x))

    # 32 -> stem /2 -> 16 -> maxpool /2 -> 8 -> levels /1,/2,/2,/2 -> 1
    assert y.shape == (2, channel_sizes[-1], 1, 1), y.shape
    assert bool(jnp.all(jnp.isfinite(y)))
    print("KERNEL_OK")
</pallas_src>

<mosaic_0001>
module attributes {stable_mosaic.version = 11 : i64} {
  func.func @_mm_bn_act_kernel(%arg0: i32, %arg1: memref<256x147xbf16, #tpu.memory_space<vmem>>, %arg2: memref<147x128xbf16, #tpu.memory_space<vmem>>, %arg3: memref<1x128xf32, #tpu.memory_space<vmem>>, %arg4: memref<1x128xf32, #tpu.memory_space<vmem>>, %arg5: memref<256x128xbf16, #tpu.memory_space<vmem>>) attributes {dimension_semantics = [#tpu.dimension_semantics<parallel>], iteration_bounds = array<i64: 2>, scalar_prefetch = 0 : i64, scratch_operands = 0 : i64, tpu.core_type = #tpu.core_type<tc>, window_params = [{transform_indices = @transform_0, window_bounds = array<i64: 256, 147>}, {pipeline_mode = #tpu.pipeline_mode<synchronous>, transform_indices = @transform_1, window_bounds = array<i64: 147, 128>}, {pipeline_mode = #tpu.pipeline_mode<synchronous>, transform_indices = @transform_2, window_bounds = array<i64: 1, 128>}, {pipeline_mode = #tpu.pipeline_mode<synchronous>, transform_indices = @transform_3, window_bounds = array<i64: 1, 128>}, {transform_indices = @transform_4, window_bounds = array<i64: 256, 128>}]} {
    %c0 = arith.constant 0 : index
    %c0_0 = arith.constant 0 : index
    %0 = vector.load %arg1[%c0, %c0_0] : memref<256x147xbf16, #tpu.memory_space<vmem>>, vector<256x147xbf16>
    %c0_1 = arith.constant 0 : index
    %c0_2 = arith.constant 0 : index
    %1 = vector.load %arg2[%c0_1, %c0_2] : memref<147x128xbf16, #tpu.memory_space<vmem>>, vector<147x128xbf16>
    %cst = arith.constant dense<0.000000e+00> : vector<256x128xf32>
    %2 = tpu.matmul %0, %1, %cst {dimension_numbers = #tpu.dot_dimension_numbers<[1], [0], [0], [1], [0, 0, 1, 1], [], []>} : vector<256x147xbf16>, vector<147x128xbf16>, vector<256x128xf32> -> vector<256x128xf32>
    %c0_3 = arith.constant 0 : index
    %c0_4 = arith.constant 0 : index
    %3 = vector.load %arg3[%c0_3, %c0_4] : memref<1x128xf32, #tpu.memory_space<vmem>>, vector<1x128xf32>
    %4 = vector.broadcast %3 : vector<1x128xf32> to vector<256x128xf32>
    %5 = arith.mulf %2, %4 : vector<256x128xf32>
    %c0_5 = arith.constant 0 : index
    %c0_6 = arith.constant 0 : index
    %6 = vector.load %arg4[%c0_5, %c0_6] : memref<1x128xf32, #tpu.memory_space<vmem>>, vector<1x128xf32>
    %7 = vector.broadcast %6 : vector<1x128xf32> to vector<256x128xf32>
    %8 = arith.addf %5, %7 : vector<256x128xf32>
    %cst_7 = arith.constant 0.000000e+00 : f32
    %9 = vector.broadcast %cst_7 : f32 to vector<256x128xf32>
    %10 = arith.maximumf %8, %9 : vector<256x128xf32>
    %11 = arith.truncf %10 : vector<256x128xf32> to vector<256x128xbf16>
    %c0_8 = arith.constant 0 : index
    %c0_9 = arith.constant 0 : index
    %12 = vector.load %arg5[%c0_8, %c0_9] : memref<256x128xbf16, #tpu.memory_space<vmem>>, vector<256x128xbf16>
    tpu.vector_store %arg5[%c0_8, %c0_9], %11 {strides = array<i32>} : memref<256x128xbf16, #tpu.memory_space<vmem>>, vector<256x128xbf16>,
    return
  }
  func.func @transform_0(%arg0: i32) -> (i32, i32) {
    %c0_i32 = arith.constant 0 : i32
    %c0_i32_0 = arith.constant 0 : i32
    return %arg0, %c0_i32 : i32, i32
  }
  func.func @transform_1(%arg0: i32) -> (i32, i32) {
    %c0_i32 = arith.constant 0 : i32
    %c0_i32_0 = arith.constant 0 : i32
    %c0_i32_1 = arith.constant 0 : i32
    return %c0_i32, %c0_i32_0 : i32, i32
  }
  func.func @transform_2(%arg0: i32) -> (i32, i32) {
    %c0_i32 = arith.constant 0 : i32
    %c0_i32_0 = arith.constant 0 : i32
    %c0_i32_1 = arith.constant 0 : i32
    return %c0_i32, %c0_i32_0 : i32, i32
  }
  func.func @transform_3(%arg0: i32) -> (i32, i32) {
    %c0_i32 = arith.constant 0 : i32
    %c0_i32_0 = arith.constant 0 : i32
    %c0_i32_1 = arith.constant 0 : i32
    return %c0_i32, %c0_i32_0 : i32, i32
  }
  func.func @transform_4(%arg0: i32) -> (i32, i32) {
    %c0_i32 = arith.constant 0 : i32
    %c0_i32_0 = arith.constant 0 : i32
    return %arg0, %c0_i32 : i32, i32
  }
}

module attributes {stable_mosaic.version = 11 : i64} {
  func.func @_mm_bn_act_kernel(%arg0: i32, %arg1: memref<128x128xbf16, #tpu.memory_space<vmem>>, %arg2: memref<128x128xbf16, #tpu.memory_space<vmem>>, %arg3: memref<1x128xf32, #tpu.memory_space<vmem>>, %arg4: memref<1x128xf32, #tpu.memory_space<vmem>>, %arg5: memref<128x128xbf16, #tpu.memory_space<vmem>>) attributes {dimension_semantics = [#tpu.dimension_semantics<parallel>], iteration_bounds = array<i64: 1>, scalar_prefetch = 0 : i64, scratch_operands = 0 : i64, tpu.core_type = #tpu.core_type<tc>, window_params = [{transform_indices = @transform_0, window_bounds = array<i64: 128, 128>}, {pipeline_mode = #tpu.pipeline_mode<synchronous>, transform_indices = @transform_1, window_bounds = array<i64: 128, 128>}, {pipeline_mode = #tpu.pipeline_mode<synchronous>, transform_indices = @transform_2, window_bounds = array<i64: 1, 128>}, {pipeline_mode = #tpu.pipeline_mode<synchronous>, transform_indices = @transform_3, window_bounds = array<i64: 1, 128>}, {transform_indices = @transform_4, window_bounds = array<i64: 128, 128>}]} {
    %c0 = arith.constant 0 : index
    %c0_0 = arith.constant 0 : index
    %0 = vector.load %arg1[%c0, %c0_0] : memref<128x128xbf16, #tpu.memory_space<vmem>>, vector<128x128xbf16>
    %c0_1 = arith.constant 0 : index
    %c0_2 = arith.constant 0 : index
    %1 = vector.load %arg2[%c0_1, %c0_2] : memref<128x128xbf16, #tpu.memory_space<vmem>>, vector<128x128xbf16>
    %cst = arith.constant dense<0.000000e+00> : vector<128x128xf32>
    %2 = tpu.matmul %0, %1, %cst {dimension_numbers = #tpu.dot_dimension_numbers<[1], [0], [0], [1], [0, 0, 1, 1], [], []>} : vector<128x128xbf16>, vector<128x128xbf16>, vector<128x128xf32> -> vector<128x128xf32>
    %c0_3 = arith.constant 0 : index
    %c0_4 = arith.constant 0 : index
    %3 = vector.load %arg3[%c0_3, %c0_4] : memref<1x128xf32, #tpu.memory_space<vmem>>, vector<1x128xf32>
    %4 = vector.broadcast %3 : vector<1x128xf32> to vector<128x128xf32>
    %5 = arith.mulf %2, %4 : vector<128x128xf32>
    %c0_5 = arith.constant 0 : index
    %c0_6 = arith.constant 0 : index
    %6 = vector.load %arg4[%c0_5, %c0_6] : memref<1x128xf32, #tpu.memory_space<vmem>>, vector<1x128xf32>
    %7 = vector.broadcast %6 : vector<1x128xf32> to vector<128x128xf32>
    %8 = arith.addf %5, %7 : vector<128x128xf32>
    %cst_7 = arith.constant 0.000000e+00 : f32
    %9 = vector.broadcast %cst_7 : f32 to vector<128x128xf32>
    %10 = arith.maximumf %8, %9 : vector<128x128xf32>
    %11 = arith.truncf %10 : vector<128x128xf32> to vector<128x128xbf16>
    %c0_8 = arith.constant 0 : index
    %c0_9 = arith.constant 0 : index
    %12 = vector.load %arg5[%c0_8, %c0_9] : memref<128x128xbf16, #tpu.memory_space<vmem>>, vector<128x128xbf16>
    tpu.vector_store %arg5[%c0_8, %c0_9], %11 {strides = array<i32>} : memref<128x128xbf16, #tpu.memory_space<vmem>>, vector<128x128xbf16>,
    return
  }
  func.func @transform_0(%arg0: i32) -> (i32, i32) {
    %c0_i32 = arith.constant 0 : i32
    %c0_i32_0 = arith.constant 0 : i32
    return %arg0, %c0_i32 : i32, i32
  }
  func.func @transform_1(%arg0: i32) -> (i32, i32) {
    %c0_i32 = arith.constant 0 : i32
    %c0_i32_0 = arith.constant 0 : i32
    %c0_i32_1 = arith.constant 0 : i32
    return %c0_i32, %c0_i32_0 : i32, i32
  }
  func.func @transform_2(%arg0: i32) -> (i32, i32) {
    %c0_i32 = arith.constant 0 : i32
    %c0_i32_0 = arith.constant 0 : i32
    %c0_i32_1 = arith.constant 0 : i32
    return %c0_i32, %c0_i32_0 : i32, i32
  }
  func.func @transform_3(%arg0: i32) -> (i32, i32) {
    %c0_i32 = arith.constant 0 : i32
    %c0_i32_0 = arith.constant 0 : i32
    %c0_i32_1 = arith.constant 0 : i32
    return %c0_i32, %c0_i32_0 : i32, i32
  }
  func.func @transform_4(%arg0: i32) -> (i32, i32) {
    %c0_i32 = arith.constant 0 : i32
    %c0_i32_0 = arith.constant 0 : i32
    return %arg0, %c0_i32 : i32, i32
  }
}

module attributes {stable_mosaic.version = 11 : i64} {
  func.func @_maxpool_tap_kernel(%arg0: i32, %arg1: memref<1x9x9x128xbf16, #tpu.memory_space<vmem>>, %arg2: memref<1x9x9x128xbf16, #tpu.memory_space<vmem>>, %arg3: memref<1x9x9x128xbf16, #tpu.memory_space<vmem>>, %arg4: memref<1x9x9x128xbf16, #tpu.memory_space<vmem>>, %arg5: memref<1x8x8x128xbf16, #tpu.memory_space<vmem>>) attributes {dimension_semantics = [#tpu.dimension_semantics<parallel>], iteration_bounds = array<i64: 2>, scalar_prefetch = 0 : i64, scratch_operands = 0 : i64, tpu.core_type = #tpu.core_type<tc>, window_params = [{transform_indices = @transform_0, window_bounds = array<i64: 1, 9, 9, 128>}, {transform_indices = @transform_1, window_bounds = array<i64: 1, 9, 9, 128>}, {transform_indices = @transform_2, window_bounds = array<i64: 1, 9, 9, 128>}, {transform_indices = @transform_3, window_bounds = array<i64: 1, 9, 9, 128>}, {transform_indices = @transform_4, window_bounds = array<i64: 1, 8, 8, 128>}]} {
    %c0 = arith.constant 0 : index
    %c0_0 = arith.constant 0 : index
    %c0_1 = arith.constant 0 : index
    %c0_2 = arith.constant 0 : index
    %0 = vector.load %arg1[%c0, %c0_0, %c0_1, %c0_2] : memref<1x9x9x128xbf16, #tpu.memory_space<vmem>>, vector<1x8x8x128xbf16>
    %1 = vector.shape_cast %0 : vector<1x8x8x128xbf16> to vector<8x8x128xbf16>
    %c0_3 = arith.constant 0 : index
    %c0_4 = arith.constant 0 : index
    %c0_5 = arith.constant 0 : index
    %c0_6 = arith.constant 0 : index
    %2 = vector.load %arg2[%c0_3, %c0_4, %c0_5, %c0_6] : memref<1x9x9x128xbf16, #tpu.memory_space<vmem>>, vector<1x8x8x128xbf16>
    %3 = vector.shape_cast %2 : vector<1x8x8x128xbf16> to vector<8x8x128xbf16>
    %4 = arith.maximumf %1, %3 : vector<8x8x128xbf16>
    %c0_7 = arith.constant 0 : index
    %c0_8 = arith.constant 0 : index
    %c1 = arith.constant 1 : index
    %c0_9 = arith.constant 0 : index
    %5 = vector.load %arg1[%c0_7, %c0_8, %c1, %c0_9] : memref<1x9x9x128xbf16, #tpu.memory_space<vmem>>, vector<1x8x8x128xbf16>
    %6 = vector.shape_cast %5 : vector<1x8x8x128xbf16> to vector<8x8x128xbf16>
    %7 = arith.maximumf %4, %6 : vector<8x8x128xbf16>
    %c0_10 = arith.constant 0 : index
    %c0_11 = arith.constant 0 : index
    %c0_12 = arith.constant 0 : index
    %c0_13 = arith.constant 0 : index
    %8 = vector.load %arg3[%c0_10, %c0_11, %c0_12, %c0_13] : memref<1x9x9x128xbf16, #tpu.memory_space<vmem>>, vector<1x8x8x128xbf16>
    %9 = vector.shape_cast %8 : vector<1x8x8x128xbf16> to vector<8x8x128xbf16>
    %10 = arith.maximumf %7, %9 : vector<8x8x128xbf16>
    %c0_14 = arith.constant 0 : index
    %c0_15 = arith.constant 0 : index
    %c0_16 = arith.constant 0 : index
    %c0_17 = arith.constant 0 : index
    %11 = vector.load %arg4[%c0_14, %c0_15, %c0_16, %c0_17] : memref<1x9x9x128xbf16, #tpu.memory_space<vmem>>, vector<1x8x8x128xbf16>
    %12 = vector.shape_cast %11 : vector<1x8x8x128xbf16> to vector<8x8x128xbf16>
    %13 = arith.maximumf %10, %12 : vector<8x8x128xbf16>
    %c0_18 = arith.constant 0 : index
    %c0_19 = arith.constant 0 : index
    %c1_20 = arith.constant 1 : index
    %c0_21 = arith.constant 0 : index
    %14 = vector.load %arg3[%c0_18, %c0_19, %c1_20, %c0_21] : memref<1x9x9x128xbf16, #tpu.memory_space<vmem>>, vector<1x8x8x128xbf16>
    %15 = vector.shape_cast %14 : vector<1x8x8x128xbf16> to vector<8x8x128xbf16>
    %16 = arith.maximumf %13, %15 : vector<8x8x128xbf16>
    %c0_22 = arith.constant 0 : index
    %c1_23 = arith.constant 1 : index
    %c0_24 = arith.constant 0 : index
    %c0_25 = arith.constant 0 : index
    %17 = vector.load %arg1[%c0_22, %c1_23, %c0_24, %c0_25] : memref<1x9x9x128xbf16, #tpu.memory_space<vmem>>, vector<1x8x8x128xbf16>
    %18 = vector.shape_cast %17 : vector<1x8x8x128xbf16> to vector<8x8x128xbf16>
    %19 = arith.maximumf %16, %18 : vector<8x8x128xbf16>
    %c0_26 = arith.constant 0 : index
    %c1_27 = arith.constant 1 : index
    %c0_28 = arith.constant 0 : index
    %c0_29 = arith.constant 0 : index
    %20 = vector.load %arg2[%c0_26, %c1_27, %c0_28, %c0_29] : memref<1x9x9x128xbf16, #tpu.memory_space<vmem>>, vector<1x8x8x128xbf16>
    %21 = vector.shape_cast %20 : vector<1x8x8x128xbf16> to vector<8x8x128xbf16>
    %22 = arith.maximumf %19, %21 : vector<8x8x128xbf16>
    %c0_30 = arith.constant 0 : index
    %c1_31 = arith.constant 1 : index
    %c1_32 = arith.constant 1 : index
    %c0_33 = arith.constant 0 : index
    %23 = vector.load %arg1[%c0_30, %c1_31, %c1_32, %c0_33] : memref<1x9x9x128xbf16, #tpu.memory_space<vmem>>, vector<1x8x8x128xbf16>
    %24 = vector.shape_cast %23 : vector<1x8x8x128xbf16> to vector<8x8x128xbf16>
    %25 = arith.maximumf %22, %24 : vector<8x8x128xbf16>
    %c0_34 = arith.constant 0 : index
    %c0_35 = arith.constant 0 : index
    %c0_36 = arith.constant 0 : index
    %c0_37 = arith.constant 0 : index
    %26 = vector.load %arg5[%c0_34, %c0_35, %c0_36, %c0_37] : memref<1x8x8x128xbf16, #tpu.memory_space<vmem>>, vector<1x8x8x128xbf16>
    %27 = vector.shape_cast %26 : vector<1x8x8x128xbf16> to vector<8x8x128xbf16>
    %28 = vector.shape_cast %25 : vector<8x8x128xbf16> to vector<1x8x8x128xbf16>
    tpu.vector_store %arg5[%c0_34, %c0_35, %c0_36, %c0_37], %28 {strides = array<i32>} : memref<1x8x8x128xbf16, #tpu.memory_space<vmem>>, vector<1x8x8x128xbf16>,
    return
  }
  func.func @transform_0(%arg0: i32) -> (i32, i32, i32, i32) {
    %c0_i32 = arith.constant 0 : i32
    %c0_i32_0 = arith.constant 0 : i32
    %c0_i32_1 = arith.constant 0 : i32
    %c0_i32_2 = arith.constant 0 : i32
    return %arg0, %c0_i32, %c0_i32_0, %c0_i32_1 : i32, i32, i32, i32
  }
  func.func @transform_1(%arg0: i32) -> (i32, i32, i32, i32) {
    %c0_i32 = arith.constant 0 : i32
    %c0_i32_0 = arith.constant 0 : i32
    %c0_i32_1 = arith.constant 0 : i32
    %c0_i32_2 = arith.constant 0 : i32
    return %arg0, %c0_i32, %c0_i32_0, %c0_i32_1 : i32, i32, i32, i32
  }
  func.func @transform_2(%arg0: i32) -> (i32, i32, i32, i32) {
    %c0_i32 = arith.constant 0 : i32
    %c0_i32_0 = arith.constant 0 : i32
    %c0_i32_1 = arith.constant 0 : i32
    %c0_i32_2 = arith.constant 0 : i32
    return %arg0, %c0_i32, %c0_i32_0, %c0_i32_1 : i32, i32, i32, i32
  }
  func.func @transform_3(%arg0: i32) -> (i32, i32, i32, i32) {
    %c0_i32 = arith.constant 0 : i32
    %c0_i32_0 = arith.constant 0 : i32
    %c0_i32_1 = arith.constant 0 : i32
    %c0_i32_2 = arith.constant 0 : i32
    return %arg0, %c0_i32, %c0_i32_0, %c0_i32_1 : i32, i32, i32, i32
  }
  func.func @transform_4(%arg0: i32) -> (i32, i32, i32, i32) {
    %c0_i32 = arith.constant 0 : i32
    %c0_i32_0 = arith.constant 0 : i32
    %c0_i32_1 = arith.constant 0 : i32
    %c0_i32_2 = arith.constant 0 : i32
    return %arg0, %c0_i32, %c0_i32_0, %c0_i32_1 : i32, i32, i32, i32
  }
}

module attributes {stable_mosaic.version = 11 : i64} {
  func.func @_conv_tap_kernel(%arg0: i32, %arg1: memref<1x10x10x128xbf16, #tpu.memory_space<vmem>>, %arg2: memref<9x128x128xbf16, #tpu.memory_space<vmem>>, %arg3: memref<1x128xf32, #tpu.memory_space<vmem>>, %arg4: memref<1x128xf32, #tpu.memory_space<vmem>>, %arg5: memref<1x8x8x128xbf16, #tpu.memory_space<vmem>>) attributes {dimension_semantics = [#tpu.dimension_semantics<parallel>], iteration_bounds = array<i64: 2>, scalar_prefetch = 0 : i64, scratch_operands = 0 : i64, tpu.core_type = #tpu.core_type<tc>, window_params = [{transform_indices = @transform_0, window_bounds = array<i64: 1, 10, 10, 128>}, {pipeline_mode = #tpu.pipeline_mode<synchronous>, transform_indices = @transform_1, window_bounds = array<i64: 9, 128, 128>}, {pipeline_mode = #tpu.pipeline_mode<synchronous>, transform_indices = @transform_2, window_bounds = array<i64: 1, 128>}, {pipeline_mode = #tpu.pipeline_mode<synchronous>, transform_indices = @transform_3, window_bounds = array<i64: 1, 128>}, {transform_indices = @transform_4, window_bounds = array<i64: 1, 8, 8, 128>}]} {
    %c0 = arith.constant 0 : index
    %c0_0 = arith.constant 0 : index
    %c0_1 = arith.constant 0 : index
    %0 = vector.load %arg2[%c0, %c0_0, %c0_1] : memref<9x128x128xbf16, #tpu.memory_space<vmem>>, vector<1x128x128xbf16>
    %1 = vector.shape_cast %0 : vector<1x128x128xbf16> to vector<128x128xbf16>
    %c0_2 = arith.constant 0 : index
    %c0_3 = arith.constant 0 : index
    %c0_4 = arith.constant 0 : index
    %c0_5 = arith.constant 0 : index
    %2 = vector.load %arg1[%c0_2, %c0_3, %c0_4, %c0_5] : memref<1x10x10x128xbf16, #tpu.memory_space<vmem>>, vector<1x1x8x128xbf16>
    %3 = vector.shape_cast %2 : vector<1x1x8x128xbf16> to vector<8x128xbf16>
    %cst = arith.constant dense<0.000000e+00> : vector<8x128xf32>
    %4 = tpu.matmul %3, %1, %cst {dimension_numbers = #tpu.dot_dimension_numbers<[1], [0], [0], [1], [0, 0, 1, 1], [], []>} : vector<8x128xbf16>, vector<128x128xbf16>, vector<8x128xf32> -> vector<8x128xf32>
    %c0_6 = arith.constant 0 : index
    %c1 = arith.constant 1 : index
    %c0_7 = arith.constant 0 : index
    %c0_8 = arith.constant 0 : index
    %5 = vector.load %arg1[%c0_6, %c1, %c0_7, %c0_8] : memref<1x10x10x128xbf16, #tpu.memory_space<vmem>>, vector<1x1x8x128xbf16>
    %6 = vector.shape_cast %5 : vector<1x1x8x128xbf16> to vector<8x128xbf16>
    %cst_9 = arith.constant dense<0.000000e+00> : vector<8x128xf32>
    %7 = tpu.matmul %6, %1, %cst_9 {dimension_numbers = #tpu.dot_dimension_numbers<[1], [0], [0], [1], [0, 0, 1, 1], [], []>} : vector<8x128xbf16>, vector<128x128xbf16>, vector<8x128xf32> -> vector<8x128xf32>
    %c0_10 = arith.constant 0 : index
    %c2 = arith.constant 2 : index
    %c0_11 = arith.constant 0 : index
    %c0_12 = arith.constant 0 : index
    %8 = vector.load %arg1[%c0_10, %c2, %c0_11, %c0_12] : memref<1x10x10x128xbf16, #tpu.memory_space<vmem>>, vector<1x1x8x128xbf16>
    %9 = vector.shape_cast %8 : vector<1x1x8x128xbf16> to vector<8x128xbf16>
    %cst_13 = arith.constant dense<0.000000e+00> : vector<8x128xf32>
    %10 = tpu.matmul %9, %1, %cst_13 {dimension_numbers = #tpu.dot_dimension_numbers<[1], [0], [0], [1], [0, 0, 1, 1], [], []>} : vector<8x128xbf16>, vector<128x128xbf16>, vector<8x128xf32> -> vector<8x128xf32>
    %c0_14 = arith.constant 0 : index
    %c3 = arith.constant 3 : index
    %c0_15 = arith.constant 0 : index
    %c0_16 = arith.constant 0 : index
    %11 = vector.load %arg1[%c0_14, %c3, %c0_15, %c0_16] : memref<1x10x10x128xbf16, #tpu.memory_space<vmem>>, vector<1x1x8x128xbf16>
    %12 = vector.shape_cast %11 : vector<1x1x8x128xbf16> to vector<8x128xbf16>
    %cst_17 = arith.constant dense<0.000000e+00> : vector<8x128xf32>
    %13 = tpu.matmul %12, %1, %cst_17 {dimension_numbers = #tpu.dot_dimension_numbers<[1], [0], [0], [1], [0, 0, 1, 1], [], []>} : vector<8x128xbf16>, vector<128x128xbf16>, vector<8x128xf32> -> vector<8x128xf32>
    %c0_18 = arith.constant 0 : index
    %c4 = arith.constant 4 : index
    %c0_19 = arith.constant 0 : index
    %c0_20 = arith.constant 0 : index
    %14 = vector.load %arg1[%c0_18, %c4, %c0_19, %c0_20] : memref<1x10x10x128xbf16, #tpu.memory_space<vmem>>, vector<1x1x8x128xbf16>
    %15 = vector.shape_cast %14 : vector<1x1x8x128xbf16> to vector<8x128xbf16>
    %cst_21 = arith.constant dense<0.000000e+00> : vector<8x128xf32>
    %16 = tpu.matmul %15, %1, %cst_21 {dimension_numbers = #tpu.dot_dimension_numbers<[1], [0], [0], [1], [0, 0, 1, 1], [], []>} : vector<8x128xbf16>, vector<128x128xbf16>, vector<8x128xf32> -> vector<8x128xf32>
    %c0_22 = arith.constant 0 : index
    %c5 = arith.constant 5 : index
    %c0_23 = arith.constant 0 : index
    %c0_24 = arith.constant 0 : index
    %17 = vector.load %arg1[%c0_22, %c5, %c0_23, %c0_24] : memref<1x10x10x128xbf16, #tpu.memory_space<vmem>>, vector<1x1x8x128xbf16>
    %18 = vector.shape_cast %17 : vector<1x1x8x128xbf16> to vector<8x128xbf16>
    %cst_25 = arith.constant dense<0.000000e+00> : vector<8x128xf32>
    %19 = tpu.matmul %18, %1, %cst_25 {dimension_numbers = #tpu.dot_dimension_numbers<[1], [0], [0], [1], [0, 0, 1, 1], [], []>} : vector<8x128xbf16>, vector<128x128xbf16>, vector<8x128xf32> -> vector<8x128xf32>
    %c0_26 = arith.constant 0 : index
    %c6 = arith.constant 6 : index
    %c0_27 = arith.constant 0 : index
    %c0_28 = arith.constant 0 : index
    %20 = vector.load %arg1[%c0_26, %c6, %c0_27, %c0_28] : memref<1x10x10x128xbf16, #tpu.memory_space<vmem>>, vector<1x1x8x128xbf16>
    %21 = vector.shape_cast %20 : vector<1x1x8x128xbf16> to vector<8x128xbf16>
    %cst_29 = arith.constant dense<0.000000e+00> : vector<8x128xf32>
    %22 = tpu.matmul %21, %1, %cst_29 {dimension_numbers = #tpu.dot_dimension_numbers<[1], [0], [0], [1], [0, 0, 1, 1], [], []>} : vector<8x128xbf16>, vector<128x128xbf16>, vector<8x128xf32> -> vector<8x128xf32>
    %c0_30 = arith.constant 0 : index
    %c7 = arith.constant 7 : index
    %c0_31 = arith.constant 0 : index
    %c0_32 = arith.constant 0 : index
    %23 = vector.load %arg1[%c0_30, %c7, %c0_31, %c0_32] : memref<1x10x10x128xbf16, #tpu.memory_space<vmem>>, vector<1x1x8x128xbf16>
    %24 = vector.shape_cast %23 : vector<1x1x8x128xbf16> to vector<8x128xbf16>
    %cst_33 = arith.constant dense<0.000000e+00> : vector<8x128xf32>
    %25 = tpu.matmul %24, %1, %cst_33 {dimension_numbers = #tpu.dot_dimension_numbers<[1], [0], [0], [1], [0, 0, 1, 1], [], []>} : vector<8x128xbf16>, vector<128x128xbf16>, vector<8x128xf32> -> vector<8x128xf32>
    %c1_34 = arith.constant 1 : index
    %c0_35 = arith.constant 0 : index
    %c0_36 = arith.constant 0 : index
    %26 = vector.load %arg2[%c1_34, %c0_35, %c0_36] : memref<9x128x128xbf16, #tpu.memory_space<vmem>>, vector<1x128x128xbf16>
    %27 = vector.shape_cast %26 : vector<1x128x128xbf16> to vector<128x128xbf16>
    %c0_37 = arith.constant 0 : index
    %c0_38 = arith.constant 0 : index
    %c1_39 = arith.constant 1 : index
    %c0_40 = arith.constant 0 : index
    %28 = vector.load %arg1[%c0_37, %c0_38, %c1_39, %c0_40] : memref<1x10x10x128xbf16, #tpu.memory_space<vmem>>, vector<1x1x8x128xbf16>
    %29 = vector.shape_cast %28 : vector<1x1x8x128xbf16> to vector<8x128xbf16>
    %cst_41 = arith.constant dense<0.000000e+00> : vector<8x128xf32>
    %30 = tpu.matmul %29, %27, %cst_41 {dimension_numbers = #tpu.dot_dimension_numbers<[1], [0], [0], [1], [0, 0, 1, 1], [], []>} : vector<8x128xbf16>, vector<128x128xbf16>, vector<8x128xf32> -> vector<8x128xf32>
    %31 = arith.addf %4, %30 : vector<8x128xf32>
    %c0_42 = arith.constant 0 : index
    %c1_43 = arith.constant 1 : index
    %c1_44 = arith.constant 1 : index
    %c0_45 = arith.constant 0 : index
    %32 = vector.load %arg1[%c0_42, %c1_43, %c1_44, %c0_45] : memref<1x10x10x128xbf16, #tpu.memory_space<vmem>>, vector<1x1x8x128xbf16>
    %33 = vector.shape_cast %32 : vector<1x1x8x128xbf16> to vector<8x128xbf16>
    %cst_46 = arith.constant dense<0.000000e+00> : vector<8x128xf32>
    %34 = tpu.matmul %33, %27, %cst_46 {dimension_numbers = #tpu.dot_dimension_numbers<[1], [0], [0], [1], [0, 0, 1, 1], [], []>} : vector<8x128xbf16>, vector<128x128xbf16>, vector<8x128xf32> -> vector<8x128xf32>
    %35 = arith.addf %7, %34 : vector<8x128xf32>
    %c0_47 = arith.constant 0 : index
    %c2_48 = arith.constant 2 : index
    %c1_49 = arith.constant 1 : index
    %c0_50 = arith.constant 0 : index
    %36 = vector.load %arg1[%c0_47, %c2_48, %c1_49, %c0_50] : memref<1x10x10x128xbf16, #tpu.memory_space<vmem>>, vector<1x1x8x128xbf16>
    %37 = vector.shape_cast %36 : vector<1x1x8x128xbf16> to vector<8x128xbf16>
    %cst_51 = arith.constant dense<0.000000e+00> : vector<8x128xf32>
    %38 = tpu.matmul %37, %27, %cst_51 {dimension_numbers = #tpu.dot_dimension_numbers<[1], [0], [0], [1], [0, 0, 1, 1], [], []>} : vector<8x128xbf16>, vector<128x128xbf16>, vector<8x128xf32> -> vector<8x128xf32>
    %39 = arith.addf %10, %38 : vector<8x128xf32>
    %c0_52 = arith.constant 0 : index
    %c3_53 = arith.constant 3 : index
    %c1_54 = arith.constant 1 : index
    %c0_55 = arith.constant 0 : index
    %40 = vector.load %arg1[%c0_52, %c3_53, %c1_54, %c0_55] : memref<1x10x10x128xbf16, #tpu.memory_space<vmem>>, vector<1x1x8x128xbf16>
    %41 = vector.shape_cast %40 : vector<1x1x8x128xbf16> to vector<8x128xbf16>
    %cst_56 = arith.constant dense<0.000000e+00> : vector<8x128xf32>
    %42 = tpu.matmul %41, %27, %cst_56 {dimension_numbers = #tpu.dot_dimension_numbers<[1], [0], [0], [1], [0, 0, 1, 1], [], []>} : vector<8x128xbf16>, vector<128x128xbf16>, vector<8x128xf32> -> vector<8x128xf32>
    %43 = arith.addf %13, %42 : vector<8x128xf32>
    %c0_57 = arith.constant 0 : index
    %c4_58 = arith.constant 4 : index
    %c1_59 = arith.constant 1 : index
    %c0_60 = arith.constant 0 : index
    %44 = vector.load %arg1[%c0_57, %c4_58, %c1_59, %c0_60] : memref<1x10x10x128xbf16, #tpu.memory_space<vmem>>, vector<1x1x8x128xbf16>
    %45 = vector.shape_cast %44 : vector<1x1x8x128xbf16> to vector<8x128xbf16>
    %cst_61 = arith.constant dense<0.000000e+00> : vector<8x128xf32>
    %46 = tpu.matmul %45, %27, %cst_61 {dimension_numbers = #tpu.dot_dimension_numbers<[1], [0], [0], [1], [0, 0, 1, 1], [], []>} : vector<8x128xbf16>, vector<128x128xbf16>, vector<8x128xf32> -> vector<8x128xf32>
    %47 = arith.addf %16, %46 : vector<8x128xf32>
    %c0_62 = arith.constant 0 : index
    %c5_63 = arith.constant 5 : index
    %c1_64 = arith.constant 1 : index
    %c0_65 = arith.constant 0 : index
    %48 = vector.load %arg1[%c0_62, %c5_63, %c1_64, %c0_65] : memref<1x10x10x128xbf16, #tpu.memory_space<vmem>>, vector<1x1x8x128xbf16>
    %49 = vector.shape_cast %48 : vector<1x1x8x128xbf16> to vector<8x128xbf16>
    %cst_66 = arith.constant dense<0.000000e+00> : vector<8x128xf32>
    %50 = tpu.matmul %49, %27, %cst_66 {dimension_numbers = #tpu.dot_dimension_numbers<[1], [0], [0], [1], [0, 0, 1, 1], [], []>} : vector<8x128xbf16>, vector<128x128xbf16>, vector<8x128xf32> -> vector<8x128xf32>
    %51 = arith.addf %19, %50 : vector<8x128xf32>
    %c0_67 = arith.constant 0 : index
    %c6_68 = arith.constant 6 : index
    %c1_69 = arith.constant 1 : index
    %c0_70 = arith.constant 0 : index
    %52 = vector.load %arg1[%c0_67, %c6_68, %c1_69, %c0_70] : memref<1x10x10x128xbf16, #tpu.memory_space<vmem>>, vector<1x1x8x128xbf16>
    %53 = vector.shape_cast %52 : vector<1x1x8x128xbf16> to vector<8x128xbf16>
    %cst_71 = arith.constant dense<0.000000e+00> : vector<8x128xf32>
    %54 = tpu.matmul %53, %27, %cst_71 {dimension_numbers = #tpu.dot_dimension_numbers<[1], [0], [0], [1], [0, 0, 1, 1], [], []>} : vector<8x128xbf16>, vector<128x128xbf16>, vector<8x128xf32> -> vector<8x128xf32>
    %55 = arith.addf %22, %54 : vector<8x128xf32>
    %c0_72 = arith.constant 0 : index
    %c7_73 = arith.constant 7 : index
    %c1_74 = arith.constant 1 : index
    %c0_75 = arith.constant 0 : index
    %56 = vector.load %arg1[%c0_72, %c7_73, %c1_74, %c0_75] : memref<1x10x10x128xbf16, #tpu.memory_space<vmem>>, vector<1x1x8x128xbf16>
    %57 = vector.shape_cast %56 : vector<1x1x8x128xbf16> to vector<8x128xbf16>
    %cst_76 = arith.constant dense<0.000000e+00> : vector<8x128xf32>
    %58 = tpu.matmul %57, %27, %cst_76 {dimension_numbers = #tpu.dot_dimension_numbers<[1], [0], [0], [1], [0, 0, 1, 1], [], []>} : vector<8x128xbf16>, vector<128x128xbf16>, vector<8x128xf32> -> vector<8x128xf32>
    %59 = arith.addf %25, %58 : vector<8x128xf32>
    %c2_77 = arith.constant 2 : index
    %c0_78 = arith.constant 0 : index
    %c0_79 = arith.constant 0 : index
    %60 = vector.load %arg2[%c2_77, %c0_78, %c0_79] : memref<9x128x128xbf16, #tpu.memory_space<vmem>>, vector<1x128x128xbf16>
    %61 = vector.shape_cast %60 : vector<1x128x128xbf16> to vector<128x128xbf16>
    %c0_80 = arith.constant 0 : index
    %c0_81 = arith.constant 0 : index
    %c2_82 = arith.constant 2 : index
    %c0_83 = arith.constant 0 : index
    %62 = vector.load %arg1[%c0_80, %c0_81, %c2_82, %c0_83] : memref<1x10x10x128xbf16, #tpu.memory_space<vmem>>, vector<1x1x8x128xbf16>
    %63 = vector.shape_cast %62 : vector<1x1x8x128xbf16> to vector<8x128xbf16>
    %cst_84 = arith.constant dense<0.000000e+00> : vector<8x128xf32>
    %64 = tpu.matmul %63, %61, %cst_84 {dimension_numbers = #tpu.dot_dimension_numbers<[1], [0], [0], [1], [0, 0, 1, 1], [], []>} : vector<8x128xbf16>, vector<128x128xbf16>, vector<8x128xf32> -> vector<8x128xf32>
    %65 = arith.addf %31, %64 : vector<8x128xf32>
    %c0_85 = arith.constant 0 : index
    %c1_86 = arith.constant 1 : index
    %c2_87 = arith.constant 2 : index
    %c0_88 = arith.constant 0 : index
    %66 = vector.load %arg1[%c0_85, %c1_86, %c2_87, %c0_88] : memref<1x10x10x128xbf16, #tpu.memory_space<vmem>>, vector<1x1x8x128xbf16>
    %67 = vector.shape_cast %66 : vector<1x1x8x128xbf16> to vector<8x128xbf16>
    %cst_89 = arith.constant dense<0.000000e+00> : vector<8x128xf32>
    %68 = tpu.matmul %67, %61, %cst_89 {dimension_numbers = #tpu.dot_dimension_numbers<[1], [0], [0], [1], [0, 0, 1, 1], [], []>} : vector<8x128xbf16>, vector<128x128xbf16>, vector<8x128xf32> -> vector<8x128xf32>
    %69 = arith.addf %35, %68 : vector<8x128xf32>
    %c0_90 = arith.constant 0 : index
    %c2_91 = arith.constant 2 : index
    %c2_92 = arith.constant 2 : index
    %c0_93 = arith.constant 0 : index
    %70 = vector.load %arg1[%c0_90, %c2_91, %c2_92, %c0_93] : memref<1x10x10x128xbf16, #tpu.memory_space<vmem>>, vector<1x1x8x128xbf16>
    %71 = vector.shape_cast %70 : vector<1x1x8x128xbf16> to vector<8x128xbf16>
    %cst_94 = arith.constant dense<0.000000e+00> : vector<8x128xf32>
    %72 = tpu.matmul %71, %61, %cst_94 {dimension_numbers = #tpu.dot_dimension_numbers<[1], [0], [0], [1], [0, 0, 1, 1], [], []>} : vector<8x128xbf16>, vector<128x128xbf16>, vector<8x128xf32> -> vector<8x128xf32>
    %73 = arith.addf %39, %72 : vector<8x128xf32>
    %c0_95 = arith.constant 0 : index
    %c3_96 = arith.constant 3 : index
    %c2_97 = arith.constant 2 : index
    %c0_98 = arith.constant 0 : index
    %74 = vector.load %arg1[%c0_95, %c3_96, %c2_97, %c0_98] : memref<1x10x10x128xbf16, #tpu.memory_space<vmem>>, vector<1x1x8x128xbf16>
    %75 = vector.shape_cast %74 : vector<1x1x8x128xbf16> to vector<8x128xbf16>
    %cst_99 = arith.constant dense<0.000000e+00> : vector<8x128xf32>
    %76 = tpu.matmul %75, %61, %cst_99 {dimension_numbers = #tpu.dot_dimension_numbers<[1], [0], [0], [1], [0, 0, 1, 1], [], []>} : vector<8x128xbf16>, vector<128x128xbf16>, vector<8x128xf32> -> vector<8x128xf32>
    %77 = arith.addf %43, %76 : vector<8x128xf32>
    %c0_100 = arith.constant 0 : index
    %c4_101 = arith.constant 4 : index
    %c2_102 = arith.constant 2 : index
    %c0_103 = arith.constant 0 : index
    %78 = vector.load %arg1[%c0_100, %c4_101, %c2_102, %c0_103] : memref<1x10x10x128xbf16, #tpu.memory_space<vmem>>, vector<1x1x8x128xbf16>
    %79 = vector.shape_cast %78 : vector<1x1x8x128xbf16> to vector<8x128xbf16>
    %cst_104 = arith.constant dense<0.000000e+00> : vector<8x128xf32>
    %80 = tpu.matmul %79, %61, %cst_104 {dimension_numbers = #tpu.dot_dimension_numbers<[1], [0], [0], [1], [0, 0, 1, 1], [], []>} : vector<8x128xbf16>, vector<128x128xbf16>, vector<8x128xf32> -> vector<8x128xf32>
    %81 = arith.addf %47, %80 : vector<8x128xf32>
    %c0_105 = arith.constant 0 : index
    %c5_106 = arith.constant 5 : index
    %c2_107 = arith.constant 2 : index
    %c0_108 = arith.constant 0 : index
    %82 = vector.load %arg1[%c0_105, %c5_106, %c2_107, %c0_108] : memref<1x10x10x128xbf16, #tpu.memory_space<vmem>>, vector<1x1x8x128xbf16>
    %83 = vector.shape_cast %82 : vector<1x1x8x128xbf16> to vector<8x128xbf16>
    %cst_109 = arith.constant dense<0.000000e+00> : vector<8x128xf32>
    %84 = tpu.matmul %83, %61, %cst_109 {dimension_numbers = #tpu.dot_dimension_numbers<[1], [0], [0], [1], [0, 0, 1, 1], [], []>} : vector<8x128xbf16>, vector<128x128xbf16>, vector<8x128xf32> -> vector<8x128xf32>
    %85 = arith.addf %51, %84 : vector<8x128xf32>
    %c0_110 = arith.constant 0 : index
    %c6_111 = arith.constant 6 : index
    %c2_112 = arith.constant 2 : index
    %c0_113 = arith.constant 0 : index
    %86 = vector.load %arg1[%c0_110, %c6_111, %c2_112, %c0_113] : memref<1x10x10x128xbf16, #tpu.memory_space<vmem>>, vector<1x1x8x128xbf16>
    %87 = vector.shape_cast %86 : vector<1x1x8x128xbf16> to vector<8x128xbf16>
    %cst_114 = arith.constant dense<0.000000e+00> : vector<8x128xf32>
    %88 = tpu.matmul %87, %61, %cst_114 {dimension_numbers = #tpu.dot_dimension_numbers<[1], [0], [0], [1], [0, 0, 1, 1], [], []>} : vector<8x128xbf16>, vector<128x128xbf16>, vector<8x128xf32> -> vector<8x128xf32>
    %89 = arith.addf %55, %88 : vector<8x128xf32>
    %c0_115 = arith.constant 0 : index
    %c7_116 = arith.constant 7 : index
    %c2_117 = arith.constant 2 : index
    %c0_118 = arith.constant 0 : index
    %90 = vector.load %arg1[%c0_115, %c7_116, %c2_117, %c0_118] : memref<1x10x10x128xbf16, #tpu.memory_space<vmem>>, vector<1x1x8x128xbf16>
    %91 = vector.shape_cast %90 : vector<1x1x8x128xbf16> to vector<8x128xbf16>
    %cst_119 = arith.constant dense<0.000000e+00> : vector<8x128xf32>
    %92 = tpu.matmul %91, %61, %cst_119 {dimension_numbers = #tpu.dot_dimension_numbers<[1], [0], [0], [1], [0, 0, 1, 1], [], []>} : vector<8x128xbf16>, vector<128x128xbf16>, vector<8x128xf32> -> vector<8x128xf32>
    %93 = arith.addf %59, %92 : vector<8x128xf32>
    %c3_120 = arith.constant 3 : index
    %c0_121 = arith.constant 0 : index
    %c0_122 = arith.constant 0 : index
    %94 = vector.load %arg2[%c3_120, %c0_121, %c0_122] : memref<9x128x128xbf16, #tpu.memory_space<vmem>>, vector<1x128x128xbf16>
    %95 = vector.shape_cast %94 : vector<1x128x128xbf16> to vector<128x128xbf16>
    %c0_123 = arith.constant 0 : index
    %c1_124 = arith.constant 1 : index
    %c0_125 = arith.constant 0 : index
    %c0_126 = arith.constant 0 : index
    %96 = vector.load %arg1[%c0_123, %c1_124, %c0_125, %c0_126] : memref<1x10x10x128xbf16, #tpu.memory_space<vmem>>, vector<1x1x8x128xbf16>
    %97 = vector.shape_cast %96 : vector<1x1x8x128xbf16> to vector<8x128xbf16>
    %cst_127 = arith.constant dense<0.000000e+00> : vector<8x128xf32>
    %98 = tpu.matmul %97, %95, %cst_127 {dimension_numbers = #tpu.dot_dimension_numbers<[1], [0], [0], [1], [0, 0, 1, 1], [], []>} : vector<8x128xbf16>, vector<128x128xbf16>, vector<8x128xf32> -> vector<8x128xf32>
    %99 = arith.addf %65, %98 : vector<8x128xf32>
    %c0_128 = arith.constant 0 : index
    %c2_129 = arith.constant 2 : index
    %c0_130 = arith.constant 0 : index
    %c0_131 = arith.constant 0 : index
    %100 = vector.load %arg1[%c0_128, %c2_129, %c0_130, %c0_131] : memref<1x10x10x128xbf16, #tpu.memory_space<vmem>>, vector<1x1x8x128xbf16>
    %101 = vector.shape_cast %100 : vector<1x1x8x128xbf16> to vector<8x128xbf16>
    %cst_132 = arith.constant dense<0.000000e+00> : vector<8x128xf32>
    %102 = tpu.matmul %101, %95, %cst_132 {dimension_numbers = #tpu.dot_dimension_numbers<[1], [0], [0], [1], [0, 0, 1, 1], [], []>} : vector<8x128xbf16>, vector<128x128xbf16>, vector<8x128xf32> -> vector<8x128xf32>
    %103 = arith.addf %69, %102 : vector<8x128xf32>
    %c0_133 = arith.constant 0 : index
    %c3_134 = arith.constant 3 : index
    %c0_135 = arith.constant 0 : index
    %c0_136 = arith.constant 0 : index
    %104 = vector.load %arg1[%c0_133, %c3_134, %c0_135, %c0_136] : memref<1x10x10x128xbf16, #tpu.memory_space<vmem>>, vector<1x1x8x128xbf16>
    %105 = vector.shape_cast %104 : vector<1x1x8x128xbf16> to vector<8x128xbf16>
    %cst_137 = arith.constant dense<0.000000e+00> : vector<8x128xf32>
    %106 = tpu.matmul %105, %95, %cst_137 {dimension_numbers = #tpu.dot_dimension_numbers<[1], [0], [0], [1], [0, 0, 1, 1], [], []>} : vector<8x128xbf16>, vector<128x128xbf16>, vector<8x128xf32> -> vector<8x128xf32>
    %107 = arith.addf %73, %106 : vector<8x128xf32>
    %c0_138 = arith.constant 0 : index
    %c4_139 = arith.constant 4 : index
    %c0_140 = arith.constant 0 : index
    %c0_141 = arith.constant 0 : index
    %108 = vector.load %arg1[%c0_138, %c4_139, %c0_140, %c0_141] : memref<1x10x10x128xbf16, #tpu.memory_space<vmem>>, vector<1x1x8x128xbf16>
    %109 = vector.shape_cast %108 : vector<1x1x8x128xbf16> to vector<8x128xbf16>
    %cst_142 = arith.constant dense<0.000000e+00> : vector<8x128xf32>
    %110 = tpu.matmul %109, %95, %cst_142 {dimension_numbers = #tpu.dot_dimension_numbers<[1], [0], [0], [1], [0, 0, 1, 1], [], []>} : vector<8x128xbf16>, vector<128x128xbf16>, vector<8x128xf32> -> vector<8x128xf32>
    %111 = arith.addf %77, %110 : vector<8x128xf32>
    %c0_143 = arith.constant 0 : index
    %c5_144 = arith.constant 5 : index
    %c0_145 = arith.constant 0 : index
    %c0_146 = arith.constant 0 : index
    %112 = vector.load %arg1[%c0_143, %c5_144, %c0_145, %c0_146] : memref<1x10x10x128xbf16, #tpu.memory_space<vmem>>, vector<1x1x8x128xbf16>
    %113 = vector.shape_cast %112 : vector<1x1x8x128xbf16> to vector<8x128xbf16>
    %cst_147 = arith.constant dense<0.000000e+00> : vector<8x128xf32>
    %114 = tpu.matmul %113, %95, %cst_147 {dimension_numbers = #tpu.dot_dimension_numbers<[1], [0], [0], [1], [0, 0, 1, 1], [], []>} : vector<8x128xbf16>, vector<128x128xbf16>, vector<8x128xf32> -> vector<8x128xf32>
    %115 = arith.addf %81, %114 : vector<8x128xf32>
    %c0_148 = arith.constant 0 : index
    %c6_149 = arith.constant 6 : index
    %c0_150 = arith.constant 0 : index
    %c0_151 = arith.constant 0 : index
    %116 = vector.load %arg1[%c0_148, %c6_149, %c0_150, %c0_151] : memref<1x10x10x128xbf16, #tpu.memory_space<vmem>>, vector<1x1x8x128xbf16>
    %117 = vector.shape_cast %116 : vector<1x1x8x128xbf16> to vector<8x128xbf16>
    %cst_152 = arith.constant dense<0.000000e+00> : vector<8x128xf32>
    %118 = tpu.matmul %117, %95, %cst_152 {dimension_numbers = #tpu.dot_dimension_numbers<[1], [0], [0], [1], [0, 0, 1, 1], [], []>} : vector<8x128xbf16>, vector<128x128xbf16>, vector<8x128xf32> -> vector<8x128xf32>
    %119 = arith.addf %85, %118 : vector<8x128xf32>
    %c0_153 = arith.constant 0 : index
    %c7_154 = arith.constant 7 : index
    %c0_155 = arith.constant 0 : index
    %c0_156 = arith.constant 0 : index
    %120 = vector.load %arg1[%c0_153, %c7_154, %c0_155, %c0_156] : memref<1x10x10x128xbf16, #tpu.memory_space<vmem>>, vector<1x1x8x128xbf16>
    %121 = vector.shape_cast %120 : vector<1x1x8x128xbf16> to vector<8x128xbf16>
    %cst_157 = arith.constant dense<0.000000e+00> : vector<8x128xf32>
    %122 = tpu.matmul %121, %95, %cst_157 {dimension_numbers = #tpu.dot_dimension_numbers<[1], [0], [0], [1], [0, 0, 1, 1], [], []>} : vector<8x128xbf16>, vector<128x128xbf16>, vector<8x128xf32> -> vector<8x128xf32>
    %123 = arith.addf %89, %122 : vector<8x128xf32>
    %c0_158 = arith.constant 0 : index
    %c8 = arith.constant 8 : index
    %c0_159 = arith.constant 0 : index
    %c0_160 = arith.constant 0 : index
    %124 = vector.load %arg1[%c0_158, %c8, %c0_159, %c0_160] : memref<1x10x10x128xbf16, #tpu.memory_space<vmem>>, vector<1x1x8x128xbf16>
    %125 = vector.shape_cast %124 : vector<1x1x8x128xbf16> to vector<8x128xbf16>
    %cst_161 = arith.constant dense<0.000000e+00> : vector<8x128xf32>
    %126 = tpu.matmul %125, %95, %cst_161 {dimension_numbers = #tpu.dot_dimension_numbers<[1], [0], [0], [1], [0, 0, 1, 1], [], []>} : vector<8x128xbf16>, vector<128x128xbf16>, vector<8x128xf32> -> vector<8x128xf32>
    %127 = arith.addf %93, %126 : vector<8x128xf32>
    %c4_162 = arith.constant 4 : index
    %c0_163 = arith.constant 0 : index
    %c0_164 = arith.constant 0 : index
    %128 = vector.load %arg2[%c4_162, %c0_163, %c0_164] : memref<9x128x128xbf16, #tpu.memory_space<vmem>>, vector<1x128x128xbf16>
    %129 = vector.shape_cast %128 : vector<1x128x128xbf16> to vector<128x128xbf16>
    %c0_165 = arith.constant 0 : index
    %c1_166 = arith.constant 1 : index
    %c1_167 = arith.constant 1 : index
    %c0_168 = arith.constant 0 : index
    %130 = vector.load %arg1[%c0_165, %c1_166, %c1_167, %c0_168] : memref<1x10x10x128xbf16, #tpu.memory_space<vmem>>, vector<1x1x8x128xbf16>
    %131 = vector.shape_cast %130 : vector<1x1x8x128xbf16> to vector<8x128xbf16>
    %cst_169 = arith.constant dense<0.000000e+00> : vector<8x128xf32>
    %132 = tpu.matmul %131, %129, %cst_169 {dimension_numbers = #tpu.dot_dimension_numbers<[1], [0], [0], [1], [0, 0, 1, 1], [], []>} : vector<8x128xbf16>, vector<128x128xbf16>, vector<8x128xf32> -> vector<8x128xf32>
    %133 = arith.addf %99, %132 : vector<8x128xf32>
    %c0_170 = arith.constant 0 : index
    %c2_171 = arith.constant 2 : index
    %c1_172 = arith.constant 1 : index
    %c0_173 = arith.constant 0 : index
    %134 = vector.load %arg1[%c0_170, %c2_171, %c1_172, %c0_173] : memref<1x10x10x128xbf16, #tpu.memory_space<vmem>>, vector<1x1x8x128xbf16>
    %135 = vector.shape_cast %134 : vector<1x1x8x128xbf16> to vector<8x128xbf16>
    %cst_174 = arith.constant dense<0.000000e+00> : vector<8x128xf32>
    %136 = tpu.matmul %135, %129, %cst_174 {dimension_numbers = #tpu.dot_dimension_numbers<[1], [0], [0], [1], [0, 0, 1, 1], [], []>} : vector<8x128xbf16>, vector<128x128xbf16>, vector<8x128xf32> -> vector<8x128xf32>
    %137 = arith.addf %103, %136 : vector<8x128xf32>
    %c0_175 = arith.constant 0 : index
    %c3_176 = arith.constant 3 : index
    %c1_177 = arith.constant 1 : index
    %c0_178 = arith.constant 0 : index
    %138 = vector.load %arg1[%c0_175, %c3_176, %c1_177, %c0_178] : memref<1x10x10x128xbf16, #tpu.memory_space<vmem>>, vector<1x1x8x128xbf16>
    %139 = vector.shape_cast %138 : vector<1x1x8x128xbf16> to vector<8x128xbf16>
    %cst_179 = arith.constant dense<0.000000e+00> : vector<8x128xf32>
    %140 = tpu.matmul %139, %129, %cst_179 {dimension_numbers = #tpu.dot_dimension_numbers<[1], [0], [0], [1], [0, 0, 1, 1], [], []>} : vector<8x128xbf16>, vector<128x128xbf16>, vector<8x128xf32> -> vector<8x128xf32>
    %141 = arith.addf %107, %140 : vector<8x128xf32>
    %c0_180 = arith.constant 0 : index
    %c4_181 = arith.constant 4 : index
    %c1_182 = arith.constant 1 : index
    %c0_183 = arith.constant 0 : index
    %142 = vector.load %arg1[%c0_180, %c4_181, %c1_182, %c0_183] : memref<1x10x10x128xbf16, #tpu.memory_space<vmem>>, vector<1x1x8x128xbf16>
    %143 = vector.shape_cast %142 : vector<1x1x8x128xbf16> to vector<8x128xbf16>
    %cst_184 = arith.constant dense<0.000000e+00> : vector<8x128xf32>
    %144 = tpu.matmul %143, %129, %cst_184 {dimension_numbers = #tpu.dot_dimension_numbers<[1], [0], [0], [1], [0, 0, 1, 1], [], []>} : vector<8x128xbf16>, vector<128x128xbf16>, vector<8x128xf32> -> vector<8x128xf32>
    %145 = arith.addf %111, %144 : vector<8x128xf32>
    %c0_185 = arith.constant 0 : index
    %c5_186 = arith.constant 5 : index
    %c1_187 = arith.constant 1 : index
    %c0_188 = arith.constant 0 : index
    %146 = vector.load %arg1[%c0_185, %c5_186, %c1_187, %c0_188] : memref<1x10x10x128xbf16, #tpu.memory_space<vmem>>, vector<1x1x8x128xbf16>
    %147 = vector.shape_cast %146 : vector<1x1x8x128xbf16> to vector<8x128xbf16>
    %cst_189 = arith.constant dense<0.000000e+00> : vector<8x128xf32>
    %148 = tpu.matmul %147, %129, %cst_189 {dimension_numbers = #tpu.dot_dimension_numbers<[1], [0], [0], [1], [0, 0, 1, 1], [], []>} : vector<8x128xbf16>, vector<128x128xbf16>, vector<8x128xf32> -> vector<8x128xf32>
    %149 = arith.addf %115, %148 : vector<8x128xf32>
    %c0_190 = arith.constant 0 : index
    %c6_191 = arith.constant 6 : index
    %c1_192 = arith.constant 1 : index
    %c0_193 = arith.constant 0 : index
    %150 = vector.load %arg1[%c0_190, %c6_191, %c1_192, %c0_193] : memref<1x10x10x128xbf16, #tpu.memory_space<vmem>>, vector<1x1x8x128xbf16>
    %151 = vector.shape_cast %150 : vector<1x1x8x128xbf16> to vector<8x128xbf16>
    %cst_194 = arith.constant dense<0.000000e+00> : vector<8x128xf32>
    %152 = tpu.matmul %151, %129, %cst_194 {dimension_numbers = #tpu.dot_dimension_numbers<[1], [0], [0], [1], [0, 0, 1, 1], [], []>} : vector<8x128xbf16>, vector<128x128xbf16>, vector<8x128xf32> -> vector<8x128xf32>
    %153 = arith.addf %119, %152 : vector<8x128xf32>
    %c0_195 = arith.constant 0 : index
    %c7_196 = arith.constant 7 : index
    %c1_197 = arith.constant 1 : index
    %c0_198 = arith.constant 0 : index
    %154 = vector.load %arg1[%c0_195, %c7_196, %c1_197, %c0_198] : memref<1x10x10x128xbf16, #tpu.memory_space<vmem>>, vector<1x1x8x128xbf16>
    %155 = vector.shape_cast %154 : vector<1x1x8x128xbf16> to vector<8x128xbf16>
    %cst_199 = arith.constant dense<0.000000e+00> : vector<8x128xf32>
    %156 = tpu.matmul %155, %129, %cst_199 {dimension_numbers = #tpu.dot_dimension_numbers<[1], [0], [0], [1], [0, 0, 1, 1], [], []>} : vector<8x128xbf16>, vector<128x128xbf16>, vector<8x128xf32> -> vector<8x128xf32>
    %157 = arith.addf %123, %156 : vector<8x128xf32>
    %c0_200 = arith.constant 0 : index
    %c8_201 = arith.constant 8 : index
    %c1_202 = arith.constant 1 : index
    %c0_203 = arith.constant 0 : index
    %158 = vector.load %arg1[%c0_200, %c8_201, %c1_202, %c0_203] : memref<1x10x10x128xbf16, #tpu.memory_space<vmem>>, vector<1x1x8x128xbf16>
    %159 = vector.shape_cast %158 : vector<1x1x8x128xbf16> to vector<8x128xbf16>
    %cst_204 = arith.constant dense<0.000000e+00> : vector<8x128xf32>
    %160 = tpu.matmul %159, %129, %cst_204 {dimension_numbers = #tpu.dot_dimension_numbers<[1], [0], [0], [1], [0, 0, 1, 1], [], []>} : vector<8x128xbf16>, vector<128x128xbf16>, vector<8x128xf32> -> vector<8x128xf32>
    %161 = arith.addf %127, %160 : vector<8x128xf32>
    %c5_205 = arith.constant 5 : index
    %c0_206 = arith.constant 0 : index
    %c0_207 = arith.constant 0 : index
    %162 = vector.load %arg2[%c5_205, %c0_206, %c0_207] : memref<9x128x128xbf16, #tpu.memory_space<vmem>>, vector<1x128x128xbf16>
    %163 = vector.shape_cast %162 : vector<1x128x128xbf16> to vector<128x128xbf16>
    %c0_208 = arith.constant 0 : index
    %c1_209 = arith.constant 1 : index
    %c2_210 = arith.constant 2 : index
    %c0_211 = arith.constant 0 : index
    %164 = vector.load %arg1[%c0_208, %c1_209, %c2_210, %c0_211] : memref<1x10x10x128xbf16, #tpu.memory_space<vmem>>, vector<1x1x8x128xbf16>
    %165 = vector.shape_cast %164 : vector<1x1x8x128xbf16> to vector<8x128xbf16>
    %cst_212 = arith.constant dense<0.000000e+00> : vector<8x128xf32>
    %166 = tpu.matmul %165, %163, %cst_212 {dimension_numbers = #tpu.dot_dimension_numbers<[1], [0], [0], [1], [0, 0, 1, 1], [], []>} : vector<8x128xbf16>, vector<128x128xbf16>, vector<8x128xf32> -> vector<8x128xf32>
    %167 = arith.addf %133, %166 : vector<8x128xf32>
    %c0_213 = arith.constant 0 : index
    %c2_214 = arith.constant 2 : index
    %c2_215 = arith.constant 2 : index
    %c0_216 = arith.constant 0 : index
    %168 = vector.load %arg1[%c0_213, %c2_214, %c2_215, %c0_216] : memref<1x10x10x128xbf16, #tpu.memory_space<vmem>>, vector<1x1x8x128xbf16>
    %169 = vector.shape_cast %168 : vector<1x1x8x128xbf16> to vector<8x128xbf16>
    %cst_217 = arith.constant dense<0.000000e+00> : vector<8x128xf32>
    %170 = tpu.matmul %169, %163, %cst_217 {dimension_numbers = #tpu.dot_dimension_numbers<[1], [0], [0], [1], [0, 0, 1, 1], [], []>} : vector<8x128xbf16>, vector<128x128xbf16>, vector<8x128xf32> -> vector<8x128xf32>
    %171 = arith.addf %137, %170 : vector<8x128xf32>
    %c0_218 = arith.constant 0 : index
    %c3_219 = arith.constant 3 : index
    %c2_220 = arith.constant 2 : index
    %c0_221 = arith.constant 0 : index
    %172 = vector.load %arg1[%c0_218, %c3_219, %c2_220, %c0_221] : memref<1x10x10x128xbf16, #tpu.memory_space<vmem>>, vector<1x1x8x128xbf16>
    %173 = vector.shape_cast %172 : vector<1x1x8x128xbf16> to vector<8x128xbf16>
    %cst_222 = arith.constant dense<0.000000e+00> : vector<8x128xf32>
    %174 = tpu.matmul %173, %163, %cst_222 {dimension_numbers = #tpu.dot_dimension_numbers<[1], [0], [0], [1], [0, 0, 1, 1], [], []>} : vector<8x128xbf16>, vector<128x128xbf16>, vector<8x128xf32> -> vector<8x128xf32>
    %175 = arith.addf %141, %174 : vector<8x128xf32>
    %c0_223 = arith.constant 0 : index
    %c4_224 = arith.constant 4 : index
    %c2_225 = arith.constant 2 : index
    %c0_226 = arith.constant 0 : index
    %176 = vector.load %arg1[%c0_223, %c4_224, %c2_225, %c0_226] : memref<1x10x10x128xbf16, #tpu.memory_space<vmem>>, vector<1x1x8x128xbf16>
    %177 = vector.shape_cast %176 : vector<1x1x8x128xbf16> to vector<8x128xbf16>
    %cst_227 = arith.constant dense<0.000000e+00> : vector<8x128xf32>
    %178 = tpu.matmul %177, %163, %cst_227 {dimension_numbers = #tpu.dot_dimension_numbers<[1], [0], [0], [1], [0, 0, 1, 1], [], []>} : vector<8x128xbf16>, vector<128x128xbf16>, vector<8x128xf32> -> vector<8x128xf32>
    %179 = arith.addf %145, %178 : vector<8x128xf32>
    %c0_228 = arith.constant 0 : index
    %c5_229 = arith.constant 5 : index
    %c2_230 = arith.constant 2 : index
    %c0_231 = arith.constant 0 : index
    %180 = vector.load %arg1[%c0_228, %c5_229, %c2_230, %c0_231] : memref<1x10x10x128xbf16, #tpu.memory_space<vmem>>, vector<1x1x8x128xbf16>
    %181 = vector.shape_cast %180 : vector<1x1x8x128xbf16> to vector<8x128xbf16>
    %cst_232 = arith.constant dense<0.000000e+00> : vector<8x128xf32>
    %182 = tpu.matmul %181, %163, %cst_232 {dimension_numbers = #tpu.dot_dimension_numbers<[1], [0], [0], [1], [0, 0, 1, 1], [], []>} : vector<8x128xbf16>, vector<128x128xbf16>, vector<8x128xf32> -> vector<8x128xf32>
    %183 = arith.addf %149, %182 : vector<8x128xf32>
    %c0_233 = arith.constant 0 : index
    %c6_234 = arith.constant 6 : index
    %c2_235 = arith.constant 2 : index
    %c0_236 = arith.constant 0 : index
    %184 = vector.load %arg1[%c0_233, %c6_234, %c2_235, %c0_236] : memref<1x10x10x128xbf16, #tpu.memory_space<vmem>>, vector<1x1x8x128xbf16>
    %185 = vector.shape_cast %184 : vector<1x1x8x128xbf16> to vector<8x128xbf16>
    %cst_237 = arith.constant dense<0.000000e+00> : vector<8x128xf32>
    %186 = tpu.matmul %185, %163, %cst_237 {dimension_numbers = #tpu.dot_dimension_numbers<[1], [0], [0], [1], [0, 0, 1, 1], [], []>} : vector<8x128xbf16>, vector<128x128xbf16>, vector<8x128xf32> -> vector<8x128xf32>
    %187 = arith.addf %153, %186 : vector<8x128xf32>
    %c0_238 = arith.constant 0 : index
    %c7_239 = arith.constant 7 : index
    %c2_240 = arith.constant 2 : index
    %c0_241 = arith.constant 0 : index
    %188 = vector.load %arg1[%c0_238, %c7_239, %c2_240, %c0_241] : memref<1x10x10x128xbf16, #tpu.memory_space<vmem>>, vector<1x1x8x128xbf16>
    %189 = vector.shape_cast %188 : vector<1x1x8x128xbf16> to vector<8x128xbf16>
    %cst_242 = arith.constant dense<0.000000e+00> : vector<8x128xf32>
    %190 = tpu.matmul %189, %163, %cst_242 {dimension_numbers = #tpu.dot_dimension_numbers<[1], [0], [0], [1], [0, 0, 1, 1], [], []>} : vector<8x128xbf16>, vector<128x128xbf16>, vector<8x128xf32> -> vector<8x128xf32>
    %191 = arith.addf %157, %190 : vector<8x128xf32>
    %c0_243 = arith.constant 0 : index
    %c8_244 = arith.constant 8 : index
    %c2_245 = arith.constant 2 : index
    %c0_246 = arith.constant 0 : index
    %192 = vector.load %arg1[%c0_243, %c8_244, %c2_245, %c0_246] : memref<1x10x10x128xbf16, #tpu.memory_space<vmem>>, vector<1x1x8x128xbf16>
    %193 = vector.shape_cast %192 : vector<1x1x8x128xbf16> to vector<8x128xbf16>
    %cst_247 = arith.constant dense<0.000000e+00> : vector<8x128xf32>
    %194 = tpu.matmul %193, %163, %cst_247 {dimension_numbers = #tpu.dot_dimension_numbers<[1], [0], [0], [1], [0, 0, 1, 1], [], []>} : vector<8x128xbf16>, vector<128x128xbf16>, vector<8x128xf32> -> vector<8x128xf32>
    %195 = arith.addf %161, %194 : vector<8x128xf32>
    %c6_248 = arith.constant 6 : index
    %c0_249 = arith.constant 0 : index
    %c0_250 = arith.constant 0 : index
    %196 = vector.load %arg2[%c6_248, %c0_249, %c0_250] : memref<9x128x128xbf16, #tpu.memory_space<vmem>>, vector<1x128x128xbf16>
    %197 = vector.shape_cast %196 : vector<1x128x128xbf16> to vector<128x128xbf16>
    %c0_251 = arith.constant 0 : index
    %c2_252 = arith.constant 2 : index
    %c0_253 = arith.constant 0 : index
    %c0_254 = arith.constant 0 : index
    %198 = vector.load %arg1[%c0_251, %c2_252, %c0_253, %c0_254] : memref<1x10x10x128xbf16, #tpu.memory_space<vmem>>, vector<1x1x8x128xbf16>
    %199 = vector.shape_cast %198 : vector<1x1x8x128xbf16> to vector<8x128xbf16>
    %cst_255 = arith.constant dense<0.000000e+00> : vector<8x128xf32>
    %200 = tpu.matmul %199, %197, %cst_255 {dimension_numbers = #tpu.dot_dimension_numbers<[1], [0], [0], [1], [0, 0, 1, 1], [], []>} : vector<8x128xbf16>, vector<128x128xbf16>, vector<8x128xf32> -> vector<8x128xf32>
    %201 = arith.addf %167, %200 : vector<8x128xf32>
    %c0_256 = arith.constant 0 : index
    %c3_257 = arith.constant 3 : index
    %c0_258 = arith.constant 0 : index
    %c0_259 = arith.constant 0 : index
    %202 = vector.load %arg1[%c0_256, %c3_257, %c0_258, %c0_259] : memref<1x10x10x128xbf16, #tpu.memory_space<vmem>>, vector<1x1x8x128xbf16>
    %203 = vector.shape_cast %202 : vector<1x1x8x128xbf16> to vector<8x128xbf16>
    %cst_260 = arith.constant dense<0.000000e+00> : vector<8x128xf32>
    %204 = tpu.matmul %203, %197, %cst_260 {dimension_numbers = #tpu.dot_dimension_numbers<[1], [0], [0], [1], [0, 0, 1, 1], [], []>} : vector<8x128xbf16>, vector<128x128xbf16>, vector<8x128xf32> -> vector<8x128xf32>
    %205 = arith.addf %171, %204 : vector<8x128xf32>
    %c0_261 = arith.constant 0 : index
    %c4_262 = arith.constant 4 : index
    %c0_263 = arith.constant 0 : index
    %c0_264 = arith.constant 0 : index
    %206 = vector.load %arg1[%c0_261, %c4_262, %c0_263, %c0_264] : memref<1x10x10x128xbf16, #tpu.memory_space<vmem>>, vector<1x1x8x128xbf16>
    %207 = vector.shape_cast %206 : vector<1x1x8x128xbf16> to vector<8x128xbf16>
    %cst_265 = arith.constant dense<0.000000e+00> : vector<8x128xf32>
    %208 = tpu.matmul %207, %197, %cst_265 {dimension_numbers = #tpu.dot_dimension_numbers<[1], [0], [0], [1], [0, 0, 1, 1], [], []>} : vector<8x128xbf16>, vector<128x128xbf16>, vector<8x128xf32> -> vector<8x128xf32>
    %209 = arith.addf %175, %208 : vector<8x128xf32>
    %c0_266 = arith.constant 0 : index
    %c5_267 = arith.constant 5 : index
    %c0_268 = arith.constant 0 : index
    %c0_269 = arith.constant 0 : index
    %210 = vector.load %arg1[%c0_266, %c5_267, %c0_268, %c0_269] : memref<1x10x10x128xbf16, #tpu.memory_space<vmem>>, vector<1x1x8x128xbf16>
    %211 = vector.shape_cast %210 : vector<1x1x8x128xbf16> to vector<8x128xbf16>
    %cst_270 = arith.constant dense<0.000000e+00> : vector<8x128xf32>
    %212 = tpu.matmul %211, %197, %cst_270 {dimension_numbers = #tpu.dot_dimension_numbers<[1], [0], [0], [1], [0, 0, 1, 1], [], []>} : vector<8x128xbf16>, vector<128x128xbf16>, vector<8x128xf32> -> vector<8x128xf32>
    %213 = arith.addf %179, %212 : vector<8x128xf32>
    %c0_271 = arith.constant 0 : index
    %c6_272 = arith.constant 6 : index
    %c0_273 = arith.constant 0 : index
    %c0_274 = arith.constant 0 : index
    %214 = vector.load %arg1[%c0_271, %c6_272, %c0_273, %c0_274] : memref<1x10x10x128xbf16, #tpu.memory_space<vmem>>, vector<1x1x8x128xbf16>
    %215 = vector.shape_cast %214 : vector<1x1x8x128xbf16> to vector<8x128xbf16>
    %cst_275 = arith.constant dense<0.000000e+00> : vector<8x128xf32>
    %216 = tpu.matmul %215, %197, %cst_275 {dimension_numbers = #tpu.dot_dimension_numbers<[1], [0], [0], [1], [0, 0, 1, 1], [], []>} : vector<8x128xbf16>, vector<128x128xbf16>, vector<8x128xf32> -> vector<8x128xf32>
    %217 = arith.addf %183, %216 : vector<8x128xf32>
    %c0_276 = arith.constant 0 : index
    %c7_277 = arith.constant 7 : index
    %c0_278 = arith.constant 0 : index
    %c0_279 = arith.constant 0 : index
    %218 = vector.load %arg1[%c0_276, %c7_277, %c0_278, %c0_279] : memref<1x10x10x128xbf16, #tpu.memory_space<vmem>>, vector<1x1x8x128xbf16>
    %219 = vector.shape_cast %218 : vector<1x1x8x128xbf16> to vector<8x128xbf16>
    %cst_280 = arith.constant dense<0.000000e+00> : vector<8x128xf32>
    %220 = tpu.matmul %219, %197, %cst_280 {dimension_numbers = #tpu.dot_dimension_numbers<[1], [0], [0], [1], [0, 0, 1, 1], [], []>} : vector<8x128xbf16>, vector<128x128xbf16>, vector<8x128xf32> -> vector<8x128xf32>
    %221 = arith.addf %187, %220 : vector<8x128xf32>
    %c0_281 = arith.constant 0 : index
    %c8_282 = arith.constant 8 : index
    %c0_283 = arith.constant 0 : index
    %c0_284 = arith.constant 0 : index
    %222 = vector.load %arg1[%c0_281, %c8_282, %c0_283, %c0_284] : memref<1x10x10x128xbf16, #tpu.memory_space<vmem>>, vector<1x1x8x128xbf16>
    %223 = vector.shape_cast %222 : vector<1x1x8x128xbf16> to vector<8x128xbf16>
    %cst_285 = arith.constant dense<0.000000e+00> : vector<8x128xf32>
    %224 = tpu.matmul %223, %197, %cst_285 {dimension_numbers = #tpu.dot_dimension_numbers<[1], [0], [0], [1], [0, 0, 1, 1], [], []>} : vector<8x128xbf16>, vector<128x128xbf16>, vector<8x128xf32> -> vector<8x128xf32>
    %225 = arith.addf %191, %224 : vector<8x128xf32>
    %c0_286 = arith.constant 0 : index
    %c9 = arith.constant 9 : index
    %c0_287 = arith.constant 0 : index
    %c0_288 = arith.constant 0 : index
    %226 = vector.load %arg1[%c0_286, %c9, %c0_287, %c0_288] : memref<1x10x10x128xbf16, #tpu.memory_space<vmem>>, vector<1x1x8x128xbf16>
    %227 = vector.shape_cast %226 : vector<1x1x8x128xbf16> to vector<8x128xbf16>
    %cst_289 = arith.constant dense<0.000000e+00> : vector<8x128xf32>
    %228 = tpu.matmul %227, %197, %cst_289 {dimension_numbers = #tpu.dot_dimension_numbers<[1], [0], [0], [1], [0, 0, 1, 1], [], []>} : vector<8x128xbf16>, vector<128x128xbf16>, vector<8x128xf32> -> vector<8x128xf32>
    %229 = arith.addf %195, %228 : vector<8x128xf32>
    %c7_290 = arith.constant 7 : index
    %c0_291 = arith.constant 0 : index
    %c0_292 = arith.constant 0 : index
    %230 = vector.load %arg2[%c7_290, %c0_291, %c0_292] : memref<9x128x128xbf16, #tpu.memory_space<vmem>>, vector<1x128x128xbf16>
    %231 = vector.shape_cast %230 : vector<1x128x128xbf16> to vector<128x128xbf16>
    %c0_293 = arith.constant 0 : index
    %c2_294 = arith.constant 2 : index
    %c1_295 = arith.constant 1 : index
    %c0_296 = arith.constant 0 : index
    %232 = vector.load %arg1[%c0_293, %c2_294, %c1_295, %c0_296] : memref<1x10x10x128xbf16, #tpu.memory_space<vmem>>, vector<1x1x8x128xbf16>
    %233 = vector.shape_cast %232 : vector<1x1x8x128xbf16> to vector<8x128xbf16>
    %cst_297 = arith.constant dense<0.000000e+00> : vector<8x128xf32>
    %234 = tpu.matmul %233, %231, %cst_297 {dimension_numbers = #tpu.dot_dimension_numbers<[1], [0], [0], [1], [0, 0, 1, 1], [], []>} : vector<8x128xbf16>, vector<128x128xbf16>, vector<8x128xf32> -> vector<8x128xf32>
    %235 = arith.addf %201, %234 : vector<8x128xf32>
    %c0_298 = arith.constant 0 : index
    %c3_299 = arith.constant 3 : index
    %c1_300 = arith.constant 1 : index
    %c0_301 = arith.constant 0 : index
    %236 = vector.load %arg1[%c0_298, %c3_299, %c1_300, %c0_301] : memref<1x10x10x128xbf16, #tpu.memory_space<vmem>>, vector<1x1x8x128xbf16>
    %237 = vector.shape_cast %236 : vector<1x1x8x128xbf16> to vector<8x128xbf16>
    %cst_302 = arith.constant dense<0.000000e+00> : vector<8x128xf32>
    %238 = tpu.matmul %237, %231, %cst_302 {dimension_numbers = #tpu.dot_dimension_numbers<[1], [0], [0], [1], [0, 0, 1, 1], [], []>} : vector<8x128xbf16>, vector<128x128xbf16>, vector<8x128xf32> -> vector<8x128xf32>
    %239 = arith.addf %205, %238 : vector<8x128xf32>
    %c0_303 = arith.constant 0 : index
    %c4_304 = arith.constant 4 : index
    %c1_305 = arith.constant 1 : index
    %c0_306 = arith.constant 0 : index
    %240 = vector.load %arg1[%c0_303, %c4_304, %c1_305, %c0_306] : memref<1x10x10x128xbf16, #tpu.memory_space<vmem>>, vector<1x1x8x128xbf16>
    %241 = vector.shape_cast %240 : vector<1x1x8x128xbf16> to vector<8x128xbf16>
    %cst_307 = arith.constant dense<0.000000e+00> : vector<8x128xf32>
    %242 = tpu.matmul %241, %231, %cst_307 {dimension_numbers = #tpu.dot_dimension_numbers<[1], [0], [0], [1], [0, 0, 1, 1], [], []>} : vector<8x128xbf16>, vector<128x128xbf16>, vector<8x128xf32> -> vector<8x128xf32>
    %243 = arith.addf %209, %242 : vector<8x128xf32>
    %c0_308 = arith.constant 0 : index
    %c5_309 = arith.constant 5 : index
    %c1_310 = arith.constant 1 : index
    %c0_311 = arith.constant 0 : index
    %244 = vector.load %arg1[%c0_308, %c5_309, %c1_310, %c0_311] : memref<1x10x10x128xbf16, #tpu.memory_space<vmem>>, vector<1x1x8x128xbf16>
    %245 = vector.shape_cast %244 : vector<1x1x8x128xbf16> to vector<8x128xbf16>
    %cst_312 = arith.constant dense<0.000000e+00> : vector<8x128xf32>
    %246 = tpu.matmul %245, %231, %cst_312 {dimension_numbers = #tpu.dot_dimension_numbers<[1], [0], [0], [1], [0, 0, 1, 1], [], []>} : vector<8x128xbf16>, vector<128x128xbf16>, vector<8x128xf32> -> vector<8x128xf32>
    %247 = arith.addf %213, %246 : vector<8x128xf32>
    %c0_313 = arith.constant 0 : index
    %c6_314 = arith.constant 6 : index
    %c1_315 = arith.constant 1 : index
    %c0_316 = arith.constant 0 : index
    %248 = vector.load %arg1[%c0_313, %c6_314, %c1_315, %c0_316] : memref<1x10x10x128xbf16, #tpu.memory_space<vmem>>, vector<1x1x8x128xbf16>
    %249 = vector.shape_cast %248 : vector<1x1x8x128xbf16> to vector<8x128xbf16>
    %cst_317 = arith.constant dense<0.000000e+00> : vector<8x128xf32>
    %250 = tpu.matmul %249, %231, %cst_317 {dimension_numbers = #tpu.dot_dimension_numbers<[1], [0], [0], [1], [0, 0, 1, 1], [], []>} : vector<8x128xbf16>, vector<128x128xbf16>, vector<8x128xf32> -> vector<8x128xf32>
    %251 = arith.addf %217, %250 : vector<8x128xf32>
    %c0_318 = arith.constant 0 : index
    %c7_319 = arith.constant 7 : index
    %c1_320 = arith.constant 1 : index
    %c0_321 = arith.constant 0 : index
    %252 = vector.load %arg1[%c0_318, %c7_319, %c1_320, %c0_321] : memref<1x10x10x128xbf16, #tpu.memory_space<vmem>>, vector<1x1x8x128xbf16>
    %253 = vector.shape_cast %252 : vector<1x1x8x128xbf16> to vector<8x128xbf16>
    %cst_322 = arith.constant dense<0.000000e+00> : vector<8x128xf32>
    %254 = tpu.matmul %253, %231, %cst_322 {dimension_numbers = #tpu.dot_dimension_numbers<[1], [0], [0], [1], [0, 0, 1, 1], [], []>} : vector<8x128xbf16>, vector<128x128xbf16>, vector<8x128xf32> -> vector<8x128xf32>
    %255 = arith.addf %221, %254 : vector<8x128xf32>
    %c0_323 = arith.constant 0 : index
    %c8_324 = arith.constant 8 : index
    %c1_325 = arith.constant 1 : index
    %c0_326 = arith.constant 0 : index
    %256 = vector.load %arg1[%c0_323, %c8_324, %c1_325, %c0_326] : memref<1x10x10x128xbf16, #tpu.memory_space<vmem>>, vector<1x1x8x128xbf16>
    %257 = vector.shape_cast %256 : vector<1x1x8x128xbf16> to vector<8x128xbf16>
    %cst_327 = arith.constant dense<0.000000e+00> : vector<8x128xf32>
    %258 = tpu.matmul %257, %231, %cst_327 {dimension_numbers = #tpu.dot_dimension_numbers<[1], [0], [0], [1], [0, 0, 1, 1], [], []>} : vector<8x128xbf16>, vector<128x128xbf16>, vector<8x128xf32> -> vector<8x128xf32>
    %259 = arith.addf %225, %258 : vector<8x128xf32>
    %c0_328 = arith.constant 0 : index
    %c9_329 = arith.constant 9 : index
    %c1_330 = arith.constant 1 : index
    %c0_331 = arith.constant 0 : index
    %260 = vector.load %arg1[%c0_328, %c9_329, %c1_330, %c0_331] : memref<1x10x10x128xbf16, #tpu.memory_space<vmem>>, vector<1x1x8x128xbf16>
    %261 = vector.shape_cast %260 : vector<1x1x8x128xbf16> to vector<8x128xbf16>
    %cst_332 = arith.constant dense<0.000000e+00> : vector<8x128xf32>
    %262 = tpu.matmul %261, %231, %cst_332 {dimension_numbers = #tpu.dot_dimension_numbers<[1], [0], [0], [1], [0, 0, 1, 1], [], []>} : vector<8x128xbf16>, vector<128x128xbf16>, vector<8x128xf32> -> vector<8x128xf32>
    %263 = arith.addf %229, %262 : vector<8x128xf32>
    %c8_333 = arith.constant 8 : index
    %c0_334 = arith.constant 0 : index
    %c0_335 = arith.constant 0 : index
    %264 = vector.load %arg2[%c8_333, %c0_334, %c0_335] : memref<9x128x128xbf16, #tpu.memory_space<vmem>>, vector<1x128x128xbf16>
    %265 = vector.shape_cast %264 : vector<1x128x128xbf16> to vector<128x128xbf16>
    %c0_336 = arith.constant 0 : index
    %c2_337 = arith.constant 2 : index
    %c2_338 = arith.constant 2 : index
    %c0_339 = arith.constant 0 : index
    %266 = vector.load %arg1[%c0_336, %c2_337, %c2_338, %c0_339] : memref<1x10x10x128xbf16, #tpu.memory_space<vmem>>, vector<1x1x8x128xbf16>
    %267 = vector.shape_cast %266 : vector<1x1x8x128xbf16> to vector<8x128xbf16>
    %cst_340 = arith.constant dense<0.000000e+00> : vector<8x128xf32>
    %268 = tpu.matmul %267, %265, %cst_340 {dimension_numbers = #tpu.dot_dimension_numbers<[1], [0], [0], [1], [0, 0, 1, 1], [], []>} : vector<8x128xbf16>, vector<128x128xbf16>, vector<8x128xf32> -> vector<8x128xf32>
    %269 = arith.addf %235, %268 : vector<8x128xf32>
    %c0_341 = arith.constant 0 : index
    %c3_342 = arith.constant 3 : index
    %c2_343 = arith.constant 2 : index
    %c0_344 = arith.constant 0 : index
    %270 = vector.load %arg1[%c0_341, %c3_342, %c2_343, %c0_344] : memref<1x10x10x128xbf16, #tpu.memory_space<vmem>>, vector<1x1x8x128xbf16>
    %271 = vector.shape_cast %270 : vector<1x1x8x128xbf16> to vector<8x128xbf16>
    %cst_345 = arith.constant dense<0.000000e+00> : vector<8x128xf32>
    %272 = tpu.matmul %271, %265, %cst_345 {dimension_numbers = #tpu.dot_dimension_numbers<[1], [0], [0], [1], [0, 0, 1, 1], [], []>} : vector<8x128xbf16>, vector<128x128xbf16>, vector<8x128xf32> -> vector<8x128xf32>
    %273 = arith.addf %239, %272 : vector<8x128xf32>
    %c0_346 = arith.constant 0 : index
    %c4_347 = arith.constant 4 : index
    %c2_348 = arith.constant 2 : index
    %c0_349 = arith.constant 0 : index
    %274 = vector.load %arg1[%c0_346, %c4_347, %c2_348, %c0_349] : memref<1x10x10x128xbf16, #tpu.memory_space<vmem>>, vector<1x1x8x128xbf16>
    %275 = vector.shape_cast %274 : vector<1x1x8x128xbf16> to vector<8x128xbf16>
    %cst_350 = arith.constant dense<0.000000e+00> : vector<8x128xf32>
    %276 = tpu.matmul %275, %265, %cst_350 {dimension_numbers = #tpu.dot_dimension_numbers<[1], [0], [0], [1], [0, 0, 1, 1], [], []>} : vector<8x128xbf16>, vector<128x128xbf16>, vector<8x128xf32> -> vector<8x128xf32>
    %277 = arith.addf %243, %276 : vector<8x128xf32>
    %c0_351 = arith.constant 0 : index
    %c5_352 = arith.constant 5 : index
    %c2_353 = arith.constant 2 : index
    %c0_354 = arith.constant 0 : index
    %278 = vector.load %arg1[%c0_351, %c5_352, %c2_353, %c0_354] : memref<1x10x10x128xbf16, #tpu.memory_space<vmem>>, vector<1x1x8x128xbf16>
    %279 = vector.shape_cast %278 : vector<1x1x8x128xbf16> to vector<8x128xbf16>
    %cst_355 = arith.constant dense<0.000000e+00> : vector<8x128xf32>
    %280 = tpu.matmul %279, %265, %cst_355 {dimension_numbers = #tpu.dot_dimension_numbers<[1], [0], [0], [1], [0, 0, 1, 1], [], []>} : vector<8x128xbf16>, vector<128x128xbf16>, vector<8x128xf32> -> vector<8x128xf32>
    %281 = arith.addf %247, %280 : vector<8x128xf32>
    %c0_356 = arith.constant 0 : index
    %c6_357 = arith.constant 6 : index
    %c2_358 = arith.constant 2 : index
    %c0_359 = arith.constant 0 : index
    %282 = vector.load %arg1[%c0_356, %c6_357, %c2_358, %c0_359] : memref<1x10x10x128xbf16, #tpu.memory_space<vmem>>, vector<1x1x8x128xbf16>
    %283 = vector.shape_cast %282 : vector<1x1x8x128xbf16> to vector<8x128xbf16>
    %cst_360 = arith.constant dense<0.000000e+00> : vector<8x128xf32>
    %284 = tpu.matmul %283, %265, %cst_360 {dimension_numbers = #tpu.dot_dimension_numbers<[1], [0], [0], [1], [0, 0, 1, 1], [], []>} : vector<8x128xbf16>, vector<128x128xbf16>, vector<8x128xf32> -> vector<8x128xf32>
    %285 = arith.addf %251, %284 : vector<8x128xf32>
    %c0_361 = arith.constant 0 : index
    %c7_362 = arith.constant 7 : index
    %c2_363 = arith.constant 2 : index
    %c0_364 = arith.constant 0 : index
    %286 = vector.load %arg1[%c0_361, %c7_362, %c2_363, %c0_364] : memref<1x10x10x128xbf16, #tpu.memory_space<vmem>>, vector<1x1x8x128xbf16>
    %287 = vector.shape_cast %286 : vector<1x1x8x128xbf16> to vector<8x128xbf16>
    %cst_365 = arith.constant dense<0.000000e+00> : vector<8x128xf32>
    %288 = tpu.matmul %287, %265, %cst_365 {dimension_numbers = #tpu.dot_dimension_numbers<[1], [0], [0], [1], [0, 0, 1, 1], [], []>} : vector<8x128xbf16>, vector<128x128xbf16>, vector<8x128xf32> -> vector<8x128xf32>
    %289 = arith.addf %255, %288 : vector<8x128xf32>
    %c0_366 = arith.constant 0 : index
    %c8_367 = arith.constant 8 : index
    %c2_368 = arith.constant 2 : index
    %c0_369 = arith.constant 0 : index
    %290 = vector.load %arg1[%c0_366, %c8_367, %c2_368, %c0_369] : memref<1x10x10x128xbf16, #tpu.memory_space<vmem>>, vector<1x1x8x128xbf16>
    %291 = vector.shape_cast %290 : vector<1x1x8x128xbf16> to vector<8x128xbf16>
    %cst_370 = arith.constant dense<0.000000e+00> : vector<8x128xf32>
    %292 = tpu.matmul %291, %265, %cst_370 {dimension_numbers = #tpu.dot_dimension_numbers<[1], [0], [0], [1], [0, 0, 1, 1], [], []>} : vector<8x128xbf16>, vector<128x128xbf16>, vector<8x128xf32> -> vector<8x128xf32>
    %293 = arith.addf %259, %292 : vector<8x128xf32>
    %c0_371 = arith.constant 0 : index
    %c9_372 = arith.constant 9 : index
    %c2_373 = arith.constant 2 : index
    %c0_374 = arith.constant 0 : index
    %294 = vector.load %arg1[%c0_371, %c9_372, %c2_373, %c0_374] : memref<1x10x10x128xbf16, #tpu.memory_space<vmem>>, vector<1x1x8x128xbf16>
    %295 = vector.shape_cast %294 : vector<1x1x8x128xbf16> to vector<8x128xbf16>
    %cst_375 = arith.constant dense<0.000000e+00> : vector<8x128xf32>
    %296 = tpu.matmul %295, %265, %cst_375 {dimension_numbers = #tpu.dot_dimension_numbers<[1], [0], [0], [1], [0, 0, 1, 1], [], []>} : vector<8x128xbf16>, vector<128x128xbf16>, vector<8x128xf32> -> vector<8x128xf32>
    %297 = arith.addf %263, %296 : vector<8x128xf32>
    %c0_376 = arith.constant 0 : index
    %c0_377 = arith.constant 0 : index
    %298 = vector.load %arg3[%c0_376, %c0_377] : memref<1x128xf32, #tpu.memory_space<vmem>>, vector<1x128xf32>
    %c0_378 = arith.constant 0 : index
    %c0_379 = arith.constant 0 : index
    %299 = vector.load %arg4[%c0_378, %c0_379] : memref<1x128xf32, #tpu.memory_space<vmem>>, vector<1x128xf32>
    %300 = vector.broadcast %298 : vector<1x128xf32> to vector<8x128xf32>
    %301 = arith.mulf %269, %300 : vector<8x128xf32>
    %302 = vector.broadcast %299 : vector<1x128xf32> to vector<8x128xf32>
    %303 = arith.addf %301, %302 : vector<8x128xf32>
    %cst_380 = arith.constant 0.000000e+00 : f32
    %304 = vector.broadcast %cst_380 : f32 to vector<8x128xf32>
    %305 = arith.maximumf %303, %304 : vector<8x128xf32>
    %306 = arith.truncf %305 : vector<8x128xf32> to vector<8x128xbf16>
    %c0_381 = arith.constant 0 : index
    %c0_382 = arith.constant 0 : index
    %c0_383 = arith.constant 0 : index
    %c0_384 = arith.constant 0 : index
    %307 = vector.load %arg5[%c0_381, %c0_382, %c0_383, %c0_384] : memref<1x8x8x128xbf16, #tpu.memory_space<vmem>>, vector<1x1x8x128xbf16>
    %308 = vector.shape_cast %307 : vector<1x1x8x128xbf16> to vector<8x128xbf16>
    %309 = vector.shape_cast %306 : vector<8x128xbf16> to vector<1x1x8x128xbf16>
    tpu.vector_store %arg5[%c0_381, %c0_382, %c0_383, %c0_384], %309 {strides = array<i32>} : memref<1x8x8x128xbf16, #tpu.memory_space<vmem>>, vector<1x1x8x128xbf16>,
    %310 = vector.broadcast %298 : vector<1x128xf32> to vector<8x128xf32>
    %311 = arith.mulf %273, %310 : vector<8x128xf32>
    %312 = vector.broadcast %299 : vector<1x128xf32> to vector<8x128xf32>
    %313 = arith.addf %311, %312 : vector<8x128xf32>
    %cst_385 = arith.constant 0.000000e+00 : f32
    %314 = vector.broadcast %cst_385 : f32 to vector<8x128xf32>
    %315 = arith.maximumf %313, %314 : vector<8x128xf32>
    %316 = arith.truncf %315 : vector<8x128xf32> to vector<8x128xbf16>
    %c0_386 = arith.constant 0 : index
    %c1_387 = arith.constant 1 : index
    %c0_388 = arith.constant 0 : index
    %c0_389 = arith.constant 0 : index
    %317 = vector.load %arg5[%c0_386, %c1_387, %c0_388, %c0_389] : memref<1x8x8x128xbf16, #tpu.memory_space<vmem>>, vector<1x1x8x128xbf16>
    %318 = vector.shape_cast %317 : vector<1x1x8x128xbf16> to vector<8x128xbf16>
    %319 = vector.shape_cast %316 : vector<8x128xbf16> to vector<1x1x8x128xbf16>
    tpu.vector_store %arg5[%c0_386, %c1_387, %c0_388, %c0_389], %319 {strides = array<i32>} : memref<1x8x8x128xbf16, #tpu.memory_space<vmem>>, vector<1x1x8x128xbf16>,
    %320 = vector.broadcast %298 : vector<1x128xf32> to vector<8x128xf32>
    %321 = arith.mulf %277, %320 : vector<8x128xf32>
    %322 = vector.broadcast %299 : vector<1x128xf32> to vector<8x128xf32>
    %323 = arith.addf %321, %322 : vector<8x128xf32>
    %cst_390 = arith.constant 0.000000e+00 : f32
    %324 = vector.broadcast %cst_390 : f32 to vector<8x128xf32>
    %325 = arith.maximumf %323, %324 : vector<8x128xf32>
    %326 = arith.truncf %325 : vector<8x128xf32> to vector<8x128xbf16>
    %c0_391 = arith.constant 0 : index
    %c2_392 = arith.constant 2 : index
    %c0_393 = arith.constant 0 : index
    %c0_394 = arith.constant 0 : index
    %327 = vector.load %arg5[%c0_391, %c2_392, %c0_393, %c0_394] : memref<1x8x8x128xbf16, #tpu.memory_space<vmem>>, vector<1x1x8x128xbf16>
    %328 = vector.shape_cast %327 : vector<1x1x8x128xbf16> to vector<8x128xbf16>
    %329 = vector.shape_cast %326 : vector<8x128xbf16> to vector<1x1x8x128xbf16>
    tpu.vector_store %arg5[%c0_391, %c2_392, %c0_393, %c0_394], %329 {strides = array<i32>} : memref<1x8x8x128xbf16, #tpu.memory_space<vmem>>, vector<1x1x8x128xbf16>,
    %330 = vector.broadcast %298 : vector<1x128xf32> to vector<8x128xf32>
    %331 = arith.mulf %281, %330 : vector<8x128xf32>
    %332 = vector.broadcast %299 : vector<1x128xf32> to vector<8x128xf32>
    %333 = arith.addf %331, %332 : vector<8x128xf32>
    %cst_395 = arith.constant 0.000000e+00 : f32
    %334 = vector.broadcast %cst_395 : f32 to vector<8x128xf32>
    %335 = arith.maximumf %333, %334 : vector<8x128xf32>
    %336 = arith.truncf %335 : vector<8x128xf32> to vector<8x128xbf16>
    %c0_396 = arith.constant 0 : index
    %c3_397 = arith.constant 3 : index
    %c0_398 = arith.constant 0 : index
    %c0_399 = arith.constant 0 : index
    %337 = vector.load %arg5[%c0_396, %c3_397, %c0_398, %c0_399] : memref<1x8x8x128xbf16, #tpu.memory_space<vmem>>, vector<1x1x8x128xbf16>
    %338 = vector.shape_cast %337 : vector<1x1x8x128xbf16> to vector<8x128xbf16>
    %339 = vector.shape_cast %336 : vector<8x128xbf16> to vector<1x1x8x128xbf16>
    tpu.vector_store %arg5[%c0_396, %c3_397, %c0_398, %c0_399], %339 {strides = array<i32>} : memref<1x8x8x128xbf16, #tpu.memory_space<vmem>>, vector<1x1x8x128xbf16>,
    %340 = vector.broadcast %298 : vector<1x128xf32> to vector<8x128xf32>
    %341 = arith.mulf %285, %340 : vector<8x128xf32>
    %342 = vector.broadcast %299 : vector<1x128xf32> to vector<8x128xf32>
    %343 = arith.addf %341, %342 : vector<8x128xf32>
    %cst_400 = arith.constant 0.000000e+00 : f32
    %344 = vector.broadcast %cst_400 : f32 to vector<8x128xf32>
    %345 = arith.maximumf %343, %344 : vector<8x128xf32>
    %346 = arith.truncf %345 : vector<8x128xf32> to vector<8x128xbf16>
    %c0_401 = arith.constant 0 : index
    %c4_402 = arith.constant 4 : index
    %c0_403 = arith.constant 0 : index
    %c0_404 = arith.constant 0 : index
    %347 = vector.load %arg5[%c0_401, %c4_402, %c0_403, %c0_404] : memref<1x8x8x128xbf16, #tpu.memory_space<vmem>>, vector<1x1x8x128xbf16>
    %348 = vector.shape_cast %347 : vector<1x1x8x128xbf16> to vector<8x128xbf16>
    %349 = vector.shape_cast %346 : vector<8x128xbf16> to vector<1x1x8x128xbf16>
    tpu.vector_store %arg5[%c0_401, %c4_402, %c0_403, %c0_404], %349 {strides = array<i32>} : memref<1x8x8x128xbf16, #tpu.memory_space<vmem>>, vector<1x1x8x128xbf16>,
    %350 = vector.broadcast %298 : vector<1x128xf32> to vector<8x128xf32>
    %351 = arith.mulf %289, %350 : vector<8x128xf32>
    %352 = vector.broadcast %299 : vector<1x128xf32> to vector<8x128xf32>
    %353 = arith.addf %351, %352 : vector<8x128xf32>
    %cst_405 = arith.constant 0.000000e+00 : f32
    %354 = vector.broadcast %cst_405 : f32 to vector<8x128xf32>
    %355 = arith.maximumf %353, %354 : vector<8x128xf32>
    %356 = arith.truncf %355 : vector<8x128xf32> to vector<8x128xbf16>
    %c0_406 = arith.constant 0 : index
    %c5_407 = arith.constant 5 : index
    %c0_408 = arith.constant 0 : index
    %c0_409 = arith.constant 0 : index
    %357 = vector.load %arg5[%c0_406, %c5_407, %c0_408, %c0_409] : memref<1x8x8x128xbf16, #tpu.memory_space<vmem>>, vector<1x1x8x128xbf16>
    %358 = vector.shape_cast %357 : vector<1x1x8x128xbf16> to vector<8x128xbf16>
    %359 = vector.shape_cast %356 : vector<8x128xbf16> to vector<1x1x8x128xbf16>
    tpu.vector_store %arg5[%c0_406, %c5_407, %c0_408, %c0_409], %359 {strides = array<i32>} : memref<1x8x8x128xbf16, #tpu.memory_space<vmem>>, vector<1x1x8x128xbf16>,
    %360 = vector.broadcast %298 : vector<1x128xf32> to vector<8x128xf32>
    %361 = arith.mulf %293, %360 : vector<8x128xf32>
    %362 = vector.broadcast %299 : vector<1x128xf32> to vector<8x128xf32>
    %363 = arith.addf %361, %362 : vector<8x128xf32>
    %cst_410 = arith.constant 0.000000e+00 : f32
    %364 = vector.broadcast %cst_410 : f32 to vector<8x128xf32>
    %365 = arith.maximumf %363, %364 : vector<8x128xf32>
    %366 = arith.truncf %365 : vector<8x128xf32> to vector<8x128xbf16>
    %c0_411 = arith.constant 0 : index
    %c6_412 = arith.constant 6 : index
    %c0_413 = arith.constant 0 : index
    %c0_414 = arith.constant 0 : index
    %367 = vector.load %arg5[%c0_411, %c6_412, %c0_413, %c0_414] : memref<1x8x8x128xbf16, #tpu.memory_space<vmem>>, vector<1x1x8x128xbf16>
    %368 = vector.shape_cast %367 : vector<1x1x8x128xbf16> to vector<8x128xbf16>
    %369 = vector.shape_cast %366 : vector<8x128xbf16> to vector<1x1x8x128xbf16>
    tpu.vector_store %arg5[%c0_411, %c6_412, %c0_413, %c0_414], %369 {strides = array<i32>} : memref<1x8x8x128xbf16, #tpu.memory_space<vmem>>, vector<1x1x8x128xbf16>,
    %370 = vector.broadcast %298 : vector<1x128xf32> to vector<8x128xf32>
    %371 = arith.mulf %297, %370 : vector<8x128xf32>
    %372 = vector.broadcast %299 : vector<1x128xf32> to vector<8x128xf32>
    %373 = arith.addf %371, %372 : vector<8x128xf32>
    %cst_415 = arith.constant 0.000000e+00 : f32
    %374 = vector.broadcast %cst_415 : f32 to vector<8x128xf32>
    %375 = arith.maximumf %373, %374 : vector<8x128xf32>
    %376 = arith.truncf %375 : vector<8x128xf32> to vector<8x128xbf16>
    %c0_416 = arith.constant 0 : index
    %c7_417 = arith.constant 7 : index
    %c0_418 = arith.constant 0 : index
    %c0_419 = arith.constant 0 : index
    %377 = vector.load %arg5[%c0_416, %c7_417, %c0_418, %c0_419] : memref<1x8x8x128xbf16, #tpu.memory_space<vmem>>, vector<1x1x8x128xbf16>
    %378 = vector.shape_cast %377 : vector<1x1x8x128xbf16> to vector<8x128xbf16>
    %379 = vector.shape_cast %376 : vector<8x128xbf16> to vector<1x1x8x128xbf16>
    tpu.vector_store %arg5[%c0_416, %c7_417, %c0_418, %c0_419], %379 {strides = array<i32>} : memref<1x8x8x128xbf16, #tpu.memory_space<vmem>>, vector<1x1x8x128xbf16>,
    return
  }
  func.func @transform_0(%arg0: i32) -> (i32, i32, i32, i32) {
    %c0_i32 = arith.constant 0 : i32
    %c0_i32_0 = arith.constant 0 : i32
    %c0_i32_1 = arith.constant 0 : i32
    %c0_i32_2 = arith.constant 0 : i32
    return %arg0, %c0_i32, %c0_i32_0, %c0_i32_1 : i32, i32, i32, i32
  }
  func.func @transform_1(%arg0: i32) -> (i32, i32, i32) {
    %c0_i32 = arith.constant 0 : i32
    %c0_i32_0 = arith.constant 0 : i32
    %c0_i32_1 = arith.constant 0 : i32
    %c0_i32_2 = arith.constant 0 : i32
    return %c0_i32, %c0_i32_0, %c0_i32_1 : i32, i32, i32
  }
  func.func @transform_2(%arg0: i32) -> (i32, i32) {
    %c0_i32 = arith.constant 0 : i32
    %c0_i32_0 = arith.constant 0 : i32
    %c0_i32_1 = arith.constant 0 : i32
    return %c0_i32, %c0_i32_0 : i32, i32
  }
  func.func @transform_3(%arg0: i32) -> (i32, i32) {
    %c0_i32 = arith.constant 0 : i32
    %c0_i32_0 = arith.constant 0 : i32
    %c0_i32_1 = arith.constant 0 : i32
    return %c0_i32, %c0_i32_0 : i32, i32
  }
  func.func @transform_4(%arg0: i32) -> (i32, i32, i32, i32) {
    %c0_i32 = arith.constant 0 : i32
    %c0_i32_0 = arith.constant 0 : i32
    %c0_i32_1 = arith.constant 0 : i32
    %c0_i32_2 = arith.constant 0 : i32
    return %arg0, %c0_i32, %c0_i32_0, %c0_i32_1 : i32, i32, i32, i32
  }
}

module attributes {stable_mosaic.version = 11 : i64} {
  func.func @_mm_bn_res_act_kernel(%arg0: i32, %arg1: memref<128x128xbf16, #tpu.memory_space<vmem>>, %arg2: memref<128x128xbf16, #tpu.memory_space<vmem>>, %arg3: memref<1x128xf32, #tpu.memory_space<vmem>>, %arg4: memref<1x128xf32, #tpu.memory_space<vmem>>, %arg5: memref<128x128xbf16, #tpu.memory_space<vmem>>, %arg6: memref<128x128xbf16, #tpu.memory_space<vmem>>) attributes {dimension_semantics = [#tpu.dimension_semantics<parallel>], iteration_bounds = array<i64: 1>, scalar_prefetch = 0 : i64, scratch_operands = 0 : i64, tpu.core_type = #tpu.core_type<tc>, window_params = [{transform_indices = @transform_0, window_bounds = array<i64: 128, 128>}, {pipeline_mode = #tpu.pipeline_mode<synchronous>, transform_indices = @transform_1, window_bounds = array<i64: 128, 128>}, {pipeline_mode = #tpu.pipeline_mode<synchronous>, transform_indices = @transform_2, window_bounds = array<i64: 1, 128>}, {pipeline_mode = #tpu.pipeline_mode<synchronous>, transform_indices = @transform_3, window_bounds = array<i64: 1, 128>}, {transform_indices = @transform_4, window_bounds = array<i64: 128, 128>}, {transform_indices = @transform_5, window_bounds = array<i64: 128, 128>}]} {
    %c0 = arith.constant 0 : index
    %c0_0 = arith.constant 0 : index
    %0 = vector.load %arg1[%c0, %c0_0] : memref<128x128xbf16, #tpu.memory_space<vmem>>, vector<128x128xbf16>
    %c0_1 = arith.constant 0 : index
    %c0_2 = arith.constant 0 : index
    %1 = vector.load %arg2[%c0_1, %c0_2] : memref<128x128xbf16, #tpu.memory_space<vmem>>, vector<128x128xbf16>
    %cst = arith.constant dense<0.000000e+00> : vector<128x128xf32>
    %2 = tpu.matmul %0, %1, %cst {dimension_numbers = #tpu.dot_dimension_numbers<[1], [0], [0], [1], [0, 0, 1, 1], [], []>} : vector<128x128xbf16>, vector<128x128xbf16>, vector<128x128xf32> -> vector<128x128xf32>
    %c0_3 = arith.constant 0 : index
    %c0_4 = arith.constant 0 : index
    %3 = vector.load %arg3[%c0_3, %c0_4] : memref<1x128xf32, #tpu.memory_space<vmem>>, vector<1x128xf32>
    %4 = vector.broadcast %3 : vector<1x128xf32> to vector<128x128xf32>
    %5 = arith.mulf %2, %4 : vector<128x128xf32>
    %c0_5 = arith.constant 0 : index
    %c0_6 = arith.constant 0 : index
    %6 = vector.load %arg4[%c0_5, %c0_6] : memref<1x128xf32, #tpu.memory_space<vmem>>, vector<1x128xf32>
    %7 = vector.broadcast %6 : vector<1x128xf32> to vector<128x128xf32>
    %8 = arith.addf %5, %7 : vector<128x128xf32>
    %c0_7 = arith.constant 0 : index
    %c0_8 = arith.constant 0 : index
    %9 = vector.load %arg5[%c0_7, %c0_8] : memref<128x128xbf16, #tpu.memory_space<vmem>>, vector<128x128xbf16>
    %10 = arith.extf %9 : vector<128x128xbf16> to vector<128x128xf32>
    %11 = arith.addf %8, %10 : vector<128x128xf32>
    %cst_9 = arith.constant 0.000000e+00 : f32
    %12 = vector.broadcast %cst_9 : f32 to vector<128x128xf32>
    %13 = arith.maximumf %11, %12 : vector<128x128xf32>
    %14 = arith.truncf %13 : vector<128x128xf32> to vector<128x128xbf16>
    %c0_10 = arith.constant 0 : index
    %c0_11 = arith.constant 0 : index
    %15 = vector.load %arg6[%c0_10, %c0_11] : memref<128x128xbf16, #tpu.memory_space<vmem>>, vector<128x128xbf16>
    tpu.vector_store %arg6[%c0_10, %c0_11], %14 {strides = array<i32>} : memref<128x128xbf16, #tpu.memory_space<vmem>>, vector<128x128xbf16>,
    return
  }
  func.func @transform_0(%arg0: i32) -> (i32, i32) {
    %c0_i32 = arith.constant 0 : i32
    %c0_i32_0 = arith.constant 0 : i32
    return %arg0, %c0_i32 : i32, i32
  }
  func.func @transform_1(%arg0: i32) -> (i32, i32) {
    %c0_i32 = arith.constant 0 : i32
    %c0_i32_0 = arith.constant 0 : i32
    %c0_i32_1 = arith.constant 0 : i32
    return %c0_i32, %c0_i32_0 : i32, i32
  }
  func.func @transform_2(%arg0: i32) -> (i32, i32) {
    %c0_i32 = arith.constant 0 : i32
    %c0_i32_0 = arith.constant 0 : i32
    %c0_i32_1 = arith.constant 0 : i32
    return %c0_i32, %c0_i32_0 : i32, i32
  }
  func.func @transform_3(%arg0: i32) -> (i32, i32) {
    %c0_i32 = arith.constant 0 : i32
    %c0_i32_0 = arith.constant 0 : i32
    %c0_i32_1 = arith.constant 0 : i32
    return %c0_i32, %c0_i32_0 : i32, i32
  }
  func.func @transform_4(%arg0: i32) -> (i32, i32) {
    %c0_i32 = arith.constant 0 : i32
    %c0_i32_0 = arith.constant 0 : i32
    return %arg0, %c0_i32 : i32, i32
  }
  func.func @transform_5(%arg0: i32) -> (i32, i32) {
    %c0_i32 = arith.constant 0 : i32
    %c0_i32_0 = arith.constant 0 : i32
    return %arg0, %c0_i32 : i32, i32
  }
}

module attributes {stable_mosaic.version = 11 : i64} {
  func.func @_mm_bn_res_act_kernel(%arg0: i32, %arg1: memref<32x128xbf16, #tpu.memory_space<vmem>>, %arg2: memref<128x128xbf16, #tpu.memory_space<vmem>>, %arg3: memref<1x128xf32, #tpu.memory_space<vmem>>, %arg4: memref<1x128xf32, #tpu.memory_space<vmem>>, %arg5: memref<32x128xbf16, #tpu.memory_space<vmem>>, %arg6: memref<32x128xbf16, #tpu.memory_space<vmem>>) attributes {dimension_semantics = [#tpu.dimension_semantics<parallel>], iteration_bounds = array<i64: 1>, scalar_prefetch = 0 : i64, scratch_operands = 0 : i64, tpu.core_type = #tpu.core_type<tc>, window_params = [{transform_indices = @transform_0, window_bounds = array<i64: 32, 128>}, {pipeline_mode = #tpu.pipeline_mode<synchronous>, transform_indices = @transform_1, window_bounds = array<i64: 128, 128>}, {pipeline_mode = #tpu.pipeline_mode<synchronous>, transform_indices = @transform_2, window_bounds = array<i64: 1, 128>}, {pipeline_mode = #tpu.pipeline_mode<synchronous>, transform_indices = @transform_3, window_bounds = array<i64: 1, 128>}, {transform_indices = @transform_4, window_bounds = array<i64: 32, 128>}, {transform_indices = @transform_5, window_bounds = array<i64: 32, 128>}]} {
    %c0 = arith.constant 0 : index
    %c0_0 = arith.constant 0 : index
    %0 = vector.load %arg1[%c0, %c0_0] : memref<32x128xbf16, #tpu.memory_space<vmem>>, vector<32x128xbf16>
    %c0_1 = arith.constant 0 : index
    %c0_2 = arith.constant 0 : index
    %1 = vector.load %arg2[%c0_1, %c0_2] : memref<128x128xbf16, #tpu.memory_space<vmem>>, vector<128x128xbf16>
    %cst = arith.constant dense<0.000000e+00> : vector<32x128xf32>
    %2 = tpu.matmul %0, %1, %cst {dimension_numbers = #tpu.dot_dimension_numbers<[1], [0], [0], [1], [0, 0, 1, 1], [], []>} : vector<32x128xbf16>, vector<128x128xbf16>, vector<32x128xf32> -> vector<32x128xf32>
    %c0_3 = arith.constant 0 : index
    %c0_4 = arith.constant 0 : index
    %3 = vector.load %arg3[%c0_3, %c0_4] : memref<1x128xf32, #tpu.memory_space<vmem>>, vector<1x128xf32>
    %4 = vector.broadcast %3 : vector<1x128xf32> to vector<32x128xf32>
    %5 = arith.mulf %2, %4 : vector<32x128xf32>
    %c0_5 = arith.constant 0 : index
    %c0_6 = arith.constant 0 : index
    %6 = vector.load %arg4[%c0_5, %c0_6] : memref<1x128xf32, #tpu.memory_space<vmem>>, vector<1x128xf32>
    %7 = vector.broadcast %6 : vector<1x128xf32> to vector<32x128xf32>
    %8 = arith.addf %5, %7 : vector<32x128xf32>
    %c0_7 = arith.constant 0 : index
    %c0_8 = arith.constant 0 : index
    %9 = vector.load %arg5[%c0_7, %c0_8] : memref<32x128xbf16, #tpu.memory_space<vmem>>, vector<32x128xbf16>
    %10 = arith.extf %9 : vector<32x128xbf16> to vector<32x128xf32>
    %11 = arith.addf %8, %10 : vector<32x128xf32>
    %cst_9 = arith.constant 0.000000e+00 : f32
    %12 = vector.broadcast %cst_9 : f32 to vector<32x128xf32>
    %13 = arith.maximumf %11, %12 : vector<32x128xf32>
    %14 = arith.truncf %13 : vector<32x128xf32> to vector<32x128xbf16>
    %c0_10 = arith.constant 0 : index
    %c0_11 = arith.constant 0 : index
    %15 = vector.load %arg6[%c0_10, %c0_11] : memref<32x128xbf16, #tpu.memory_space<vmem>>, vector<32x128xbf16>
    tpu.vector_store %arg6[%c0_10, %c0_11], %14 {strides = array<i32>} : memref<32x128xbf16, #tpu.memory_space<vmem>>, vector<32x128xbf16>,
    return
  }
  func.func @transform_0(%arg0: i32) -> (i32, i32) {
    %c0_i32 = arith.constant 0 : i32
    %c0_i32_0 = arith.constant 0 : i32
    return %arg0, %c0_i32 : i32, i32
  }
  func.func @transform_1(%arg0: i32) -> (i32, i32) {
    %c0_i32 = arith.constant 0 : i32
    %c0_i32_0 = arith.constant 0 : i32
    %c0_i32_1 = arith.constant 0 : i32
    return %c0_i32, %c0_i32_0 : i32, i32
  }
  func.func @transform_2(%arg0: i32) -> (i32, i32) {
    %c0_i32 = arith.constant 0 : i32
    %c0_i32_0 = arith.constant 0 : i32
    %c0_i32_1 = arith.constant 0 : i32
    return %c0_i32, %c0_i32_0 : i32, i32
  }
  func.func @transform_3(%arg0: i32) -> (i32, i32) {
    %c0_i32 = arith.constant 0 : i32
    %c0_i32_0 = arith.constant 0 : i32
    %c0_i32_1 = arith.constant 0 : i32
    return %c0_i32, %c0_i32_0 : i32, i32
  }
  func.func @transform_4(%arg0: i32) -> (i32, i32) {
    %c0_i32 = arith.constant 0 : i32
    %c0_i32_0 = arith.constant 0 : i32
    return %arg0, %c0_i32 : i32, i32
  }
  func.func @transform_5(%arg0: i32) -> (i32, i32) {
    %c0_i32 = arith.constant 0 : i32
    %c0_i32_0 = arith.constant 0 : i32
    return %arg0, %c0_i32 : i32, i32
  }
}

module attributes {stable_mosaic.version = 11 : i64} {
  func.func @_conv_tap_kernel(%arg0: i32, %arg1: memref<1x5x5x128xbf16, #tpu.memory_space<vmem>>, %arg2: memref<1x5x5x128xbf16, #tpu.memory_space<vmem>>, %arg3: memref<1x5x5x128xbf16, #tpu.memory_space<vmem>>, %arg4: memref<1x5x5x128xbf16, #tpu.memory_space<vmem>>, %arg5: memref<9x128x128xbf16, #tpu.memory_space<vmem>>, %arg6: memref<1x128xf32, #tpu.memory_space<vmem>>, %arg7: memref<1x128xf32, #tpu.memory_space<vmem>>, %arg8: memref<1x4x4x128xbf16, #tpu.memory_space<vmem>>) attributes {dimension_semantics = [#tpu.dimension_semantics<parallel>], iteration_bounds = array<i64: 2>, scalar_prefetch = 0 : i64, scratch_operands = 0 : i64, tpu.core_type = #tpu.core_type<tc>, window_params = [{transform_indices = @transform_0, window_bounds = array<i64: 1, 5, 5, 128>}, {transform_indices = @transform_1, window_bounds = array<i64: 1, 5, 5, 128>}, {transform_indices = @transform_2, window_bounds = array<i64: 1, 5, 5, 128>}, {transform_indices = @transform_3, window_bounds = array<i64: 1, 5, 5, 128>}, {pipeline_mode = #tpu.pipeline_mode<synchronous>, transform_indices = @transform_4, window_bounds = array<i64: 9, 128, 128>}, {pipeline_mode = #tpu.pipeline_mode<synchronous>, transform_indices = @transform_5, window_bounds = array<i64: 1, 128>}, {pipeline_mode = #tpu.pipeline_mode<synchronous>, transform_indices = @transform_6, window_bounds = array<i64: 1, 128>}, {transform_indices = @transform_7, window_bounds = array<i64: 1, 4, 4, 128>}]} {
    %c0 = arith.constant 0 : index
    %c0_0 = arith.constant 0 : index
    %c0_1 = arith.constant 0 : index
    %0 = vector.load %arg5[%c0, %c0_0, %c0_1] : memref<9x128x128xbf16, #tpu.memory_space<vmem>>, vector<1x128x128xbf16>
    %1 = vector.shape_cast %0 : vector<1x128x128xbf16> to vector<128x128xbf16>
    %c0_2 = arith.constant 0 : index
    %c0_3 = arith.constant 0 : index
    %c0_4 = arith.constant 0 : index
    %c0_5 = arith.constant 0 : index
    %2 = vector.load %arg1[%c0_2, %c0_3, %c0_4, %c0_5] : memref<1x5x5x128xbf16, #tpu.memory_space<vmem>>, vector<1x1x4x128xbf16>
    %3 = vector.shape_cast %2 : vector<1x1x4x128xbf16> to vector<4x128xbf16>
    %cst = arith.constant dense<0.000000e+00> : vector<4x128xf32>
    %4 = tpu.matmul %3, %1, %cst {dimension_numbers = #tpu.dot_dimension_numbers<[1], [0], [0], [1], [0, 0, 1, 1], [], []>} : vector<4x128xbf16>, vector<128x128xbf16>, vector<4x128xf32> -> vector<4x128xf32>
    %c0_6 = arith.constant 0 : index
    %c1 = arith.constant 1 : index
    %c0_7 = arith.constant 0 : index
    %c0_8 = arith.constant 0 : index
    %5 = vector.load %arg1[%c0_6, %c1, %c0_7, %c0_8] : memref<1x5x5x128xbf16, #tpu.memory_space<vmem>>, vector<1x1x4x128xbf16>
    %6 = vector.shape_cast %5 : vector<1x1x4x128xbf16> to vector<4x128xbf16>
    %cst_9 = arith.constant dense<0.000000e+00> : vector<4x128xf32>
    %7 = tpu.matmul %6, %1, %cst_9 {dimension_numbers = #tpu.dot_dimension_numbers<[1], [0], [0], [1], [0, 0, 1, 1], [], []>} : vector<4x128xbf16>, vector<128x128xbf16>, vector<4x128xf32> -> vector<4x128xf32>
    %c0_10 = arith.constant 0 : index
    %c2 = arith.constant 2 : index
    %c0_11 = arith.constant 0 : index
    %c0_12 = arith.constant 0 : index
    %8 = vector.load %arg1[%c0_10, %c2, %c0_11, %c0_12] : memref<1x5x5x128xbf16, #tpu.memory_space<vmem>>, vector<1x1x4x128xbf16>
    %9 = vector.shape_cast %8 : vector<1x1x4x128xbf16> to vector<4x128xbf16>
    %cst_13 = arith.constant dense<0.000000e+00> : vector<4x128xf32>
    %10 = tpu.matmul %9, %1, %cst_13 {dimension_numbers = #tpu.dot_dimension_numbers<[1], [0], [0], [1], [0, 0, 1, 1], [], []>} : vector<4x128xbf16>, vector<128x128xbf16>, vector<4x128xf32> -> vector<4x128xf32>
    %c0_14 = arith.constant 0 : index
    %c3 = arith.constant 3 : index
    %c0_15 = arith.constant 0 : index
    %c0_16 = arith.constant 0 : index
    %11 = vector.load %arg1[%c0_14, %c3, %c0_15, %c0_16] : memref<1x5x5x128xbf16, #tpu.memory_space<vmem>>, vector<1x1x4x128xbf16>
    %12 = vector.shape_cast %11 : vector<1x1x4x128xbf16> to vector<4x128xbf16>
    %cst_17 = arith.constant dense<0.000000e+00> : vector<4x128xf32>
    %13 = tpu.matmul %12, %1, %cst_17 {dimension_numbers = #tpu.dot_dimension_numbers<[1], [0], [0], [1], [0, 0, 1, 1], [], []>} : vector<4x128xbf16>, vector<128x128xbf16>, vector<4x128xf32> -> vector<4x128xf32>
    %c1_18 = arith.constant 1 : index
    %c0_19 = arith.constant 0 : index
    %c0_20 = arith.constant 0 : index
    %14 = vector.load %arg5[%c1_18, %c0_19, %c0_20] : memref<9x128x128xbf16, #tpu.memory_space<vmem>>, vector<1x128x128xbf16>
    %15 = vector.shape_cast %14 : vector<1x128x128xbf16> to vector<128x128xbf16>
    %c0_21 = arith.constant 0 : index
    %c0_22 = arith.constant 0 : index
    %c0_23 = arith.constant 0 : index
    %c0_24 = arith.constant 0 : index
    %16 = vector.load %arg2[%c0_21, %c0_22, %c0_23, %c0_24] : memref<1x5x5x128xbf16, #tpu.memory_space<vmem>>, vector<1x1x4x128xbf16>
    %17 = vector.shape_cast %16 : vector<1x1x4x128xbf16> to vector<4x128xbf16>
    %cst_25 = arith.constant dense<0.000000e+00> : vector<4x128xf32>
    %18 = tpu.matmul %17, %15, %cst_25 {dimension_numbers = #tpu.dot_dimension_numbers<[1], [0], [0], [1], [0, 0, 1, 1], [], []>} : vector<4x128xbf16>, vector<128x128xbf16>, vector<4x128xf32> -> vector<4x128xf32>
    %19 = arith.addf %4, %18 : vector<4x128xf32>
    %c0_26 = arith.constant 0 : index
    %c1_27 = arith.constant 1 : index
    %c0_28 = arith.constant 0 : index
    %c0_29 = arith.constant 0 : index
    %20 = vector.load %arg2[%c0_26, %c1_27, %c0_28, %c0_29] : memref<1x5x5x128xbf16, #tpu.memory_space<vmem>>, vector<1x1x4x128xbf16>
    %21 = vector.shape_cast %20 : vector<1x1x4x128xbf16> to vector<4x128xbf16>
    %cst_30 = arith.constant dense<0.000000e+00> : vector<4x128xf32>
    %22 = tpu.matmul %21, %15, %cst_30 {dimension_numbers = #tpu.dot_dimension_numbers<[1], [0], [0], [1], [0, 0, 1, 1], [], []>} : vector<4x128xbf16>, vector<128x128xbf16>, vector<4x128xf32> -> vector<4x128xf32>
    %23 = arith.addf %7, %22 : vector<4x128xf32>
    %c0_31 = arith.constant 0 : index
    %c2_32 = arith.constant 2 : index
    %c0_33 = arith.constant 0 : index
    %c0_34 = arith.constant 0 : index
    %24 = vector.load %arg2[%c0_31, %c2_32, %c0_33, %c0_34] : memref<1x5x5x128xbf16, #tpu.memory_space<vmem>>, vector<1x1x4x128xbf16>
    %25 = vector.shape_cast %24 : vector<1x1x4x128xbf16> to vector<4x128xbf16>
    %cst_35 = arith.constant dense<0.000000e+00> : vector<4x128xf32>
    %26 = tpu.matmul %25, %15, %cst_35 {dimension_numbers = #tpu.dot_dimension_numbers<[1], [0], [0], [1], [0, 0, 1, 1], [], []>} : vector<4x128xbf16>, vector<128x128xbf16>, vector<4x128xf32> -> vector<4x128xf32>
    %27 = arith.addf %10, %26 : vector<4x128xf32>
    %c0_36 = arith.constant 0 : index
    %c3_37 = arith.constant 3 : index
    %c0_38 = arith.constant 0 : index
    %c0_39 = arith.constant 0 : index
    %28 = vector.load %arg2[%c0_36, %c3_37, %c0_38, %c0_39] : memref<1x5x5x128xbf16, #tpu.memory_space<vmem>>, vector<1x1x4x128xbf16>
    %29 = vector.shape_cast %28 : vector<1x1x4x128xbf16> to vector<4x128xbf16>
    %cst_40 = arith.constant dense<0.000000e+00> : vector<4x128xf32>
    %30 = tpu.matmul %29, %15, %cst_40 {dimension_numbers = #tpu.dot_dimension_numbers<[1], [0], [0], [1], [0, 0, 1, 1], [], []>} : vector<4x128xbf16>, vector<128x128xbf16>, vector<4x128xf32> -> vector<4x128xf32>
    %31 = arith.addf %13, %30 : vector<4x128xf32>
    %c2_41 = arith.constant 2 : index
    %c0_42 = arith.constant 0 : index
    %c0_43 = arith.constant 0 : index
    %32 = vector.load %arg5[%c2_41, %c0_42, %c0_43] : memref<9x128x128xbf16, #tpu.memory_space<vmem>>, vector<1x128x128xbf16>
    %33 = vector.shape_cast %32 : vector<1x128x128xbf16> to vector<128x128xbf16>
    %c0_44 = arith.constant 0 : index
    %c0_45 = arith.constant 0 : index
    %c1_46 = arith.constant 1 : index
    %c0_47 = arith.constant 0 : index
    %34 = vector.load %arg1[%c0_44, %c0_45, %c1_46, %c0_47] : memref<1x5x5x128xbf16, #tpu.memory_space<vmem>>, vector<1x1x4x128xbf16>
    %35 = vector.shape_cast %34 : vector<1x1x4x128xbf16> to vector<4x128xbf16>
    %cst_48 = arith.constant dense<0.000000e+00> : vector<4x128xf32>
    %36 = tpu.matmul %35, %33, %cst_48 {dimension_numbers = #tpu.dot_dimension_numbers<[1], [0], [0], [1], [0, 0, 1, 1], [], []>} : vector<4x128xbf16>, vector<128x128xbf16>, vector<4x128xf32> -> vector<4x128xf32>
    %37 = arith.addf %19, %36 : vector<4x128xf32>
    %c0_49 = arith.constant 0 : index
    %c1_50 = arith.constant 1 : index
    %c1_51 = arith.constant 1 : index
    %c0_52 = arith.constant 0 : index
    %38 = vector.load %arg1[%c0_49, %c1_50, %c1_51, %c0_52] : memref<1x5x5x128xbf16, #tpu.memory_space<vmem>>, vector<1x1x4x128xbf16>
    %39 = vector.shape_cast %38 : vector<1x1x4x128xbf16> to vector<4x128xbf16>
    %cst_53 = arith.constant dense<0.000000e+00> : vector<4x128xf32>
    %40 = tpu.matmul %39, %33, %cst_53 {dimension_numbers = #tpu.dot_dimension_numbers<[1], [0], [0], [1], [0, 0, 1, 1], [], []>} : vector<4x128xbf16>, vector<128x128xbf16>, vector<4x128xf32> -> vector<4x128xf32>
    %41 = arith.addf %23, %40 : vector<4x128xf32>
    %c0_54 = arith.constant 0 : index
    %c2_55 = arith.constant 2 : index
    %c1_56 = arith.constant 1 : index
    %c0_57 = arith.constant 0 : index
    %42 = vector.load %arg1[%c0_54, %c2_55, %c1_56, %c0_57] : memref<1x5x5x128xbf16, #tpu.memory_space<vmem>>, vector<1x1x4x128xbf16>
    %43 = vector.shape_cast %42 : vector<1x1x4x128xbf16> to vector<4x128xbf16>
    %cst_58 = arith.constant dense<0.000000e+00> : vector<4x128xf32>
    %44 = tpu.matmul %43, %33, %cst_58 {dimension_numbers = #tpu.dot_dimension_numbers<[1], [0], [0], [1], [0, 0, 1, 1], [], []>} : vector<4x128xbf16>, vector<128x128xbf16>, vector<4x128xf32> -> vector<4x128xf32>
    %45 = arith.addf %27, %44 : vector<4x128xf32>
    %c0_59 = arith.constant 0 : index
    %c3_60 = arith.constant 3 : index
    %c1_61 = arith.constant 1 : index
    %c0_62 = arith.constant 0 : index
    %46 = vector.load %arg1[%c0_59, %c3_60, %c1_61, %c0_62] : memref<1x5x5x128xbf16, #tpu.memory_space<vmem>>, vector<1x1x4x128xbf16>
    %47 = vector.shape_cast %46 : vector<1x1x4x128xbf16> to vector<4x128xbf16>
    %cst_63 = arith.constant dense<0.000000e+00> : vector<4x128xf32>
    %48 = tpu.matmul %47, %33, %cst_63 {dimension_numbers = #tpu.dot_dimension_numbers<[1], [0], [0], [1], [0, 0, 1, 1], [], []>} : vector<4x128xbf16>, vector<128x128xbf16>, vector<4x128xf32> -> vector<4x128xf32>
    %49 = arith.addf %31, %48 : vector<4x128xf32>
    %c3_64 = arith.constant 3 : index
    %c0_65 = arith.constant 0 : index
    %c0_66 = arith.constant 0 : index
    %50 = vector.load %arg5[%c3_64, %c0_65, %c0_66] : memref<9x128x128xbf16, #tpu.memory_space<vmem>>, vector<1x128x128xbf16>
    %51 = vector.shape_cast %50 : vector<1x128x128xbf16> to vector<128x128xbf16>
    %c0_67 = arith.constant 0 : index
    %c0_68 = arith.constant 0 : index
    %c0_69 = arith.constant 0 : index
    %c0_70 = arith.constant 0 : index
    %52 = vector.load %arg3[%c0_67, %c0_68, %c0_69, %c0_70] : memref<1x5x5x128xbf16, #tpu.memory_space<vmem>>, vector<1x1x4x128xbf16>
    %53 = vector.shape_cast %52 : vector<1x1x4x128xbf16> to vector<4x128xbf16>
    %cst_71 = arith.constant dense<0.000000e+00> : vector<4x128xf32>
    %54 = tpu.matmul %53, %51, %cst_71 {dimension_numbers = #tpu.dot_dimension_numbers<[1], [0], [0], [1], [0, 0, 1, 1], [], []>} : vector<4x128xbf16>, vector<128x128xbf16>, vector<4x128xf32> -> vector<4x128xf32>
    %55 = arith.addf %37, %54 : vector<4x128xf32>
    %c0_72 = arith.constant 0 : index
    %c1_73 = arith.constant 1 : index
    %c0_74 = arith.constant 0 : index
    %c0_75 = arith.constant 0 : index
    %56 = vector.load %arg3[%c0_72, %c1_73, %c0_74, %c0_75] : memref<1x5x5x128xbf16, #tpu.memory_space<vmem>>, vector<1x1x4x128xbf16>
    %57 = vector.shape_cast %56 : vector<1x1x4x128xbf16> to vector<4x128xbf16>
    %cst_76 = arith.constant dense<0.000000e+00> : vector<4x128xf32>
    %58 = tpu.matmul %57, %51, %cst_76 {dimension_numbers = #tpu.dot_dimension_numbers<[1], [0], [0], [1], [0, 0, 1, 1], [], []>} : vector<4x128xbf16>, vector<128x128xbf16>, vector<4x128xf32> -> vector<4x128xf32>
    %59 = arith.addf %41, %58 : vector<4x128xf32>
    %c0_77 = arith.constant 0 : index
    %c2_78 = arith.constant 2 : index
    %c0_79 = arith.constant 0 : index
    %c0_80 = arith.constant 0 : index
    %60 = vector.load %arg3[%c0_77, %c2_78, %c0_79, %c0_80] : memref<1x5x5x128xbf16, #tpu.memory_space<vmem>>, vector<1x1x4x128xbf16>
    %61 = vector.shape_cast %60 : vector<1x1x4x128xbf16> to vector<4x128xbf16>
    %cst_81 = arith.constant dense<0.000000e+00> : vector<4x128xf32>
    %62 = tpu.matmul %61, %51, %cst_81 {dimension_numbers = #tpu.dot_dimension_numbers<[1], [0], [0], [1], [0, 0, 1, 1], [], []>} : vector<4x128xbf16>, vector<128x128xbf16>, vector<4x128xf32> -> vector<4x128xf32>
    %63 = arith.addf %45, %62 : vector<4x128xf32>
    %c0_82 = arith.constant 0 : index
    %c3_83 = arith.constant 3 : index
    %c0_84 = arith.constant 0 : index
    %c0_85 = arith.constant 0 : index
    %64 = vector.load %arg3[%c0_82, %c3_83, %c0_84, %c0_85] : memref<1x5x5x128xbf16, #tpu.memory_space<vmem>>, vector<1x1x4x128xbf16>
    %65 = vector.shape_cast %64 : vector<1x1x4x128xbf16> to vector<4x128xbf16>
    %cst_86 = arith.constant dense<0.000000e+00> : vector<4x128xf32>
    %66 = tpu.matmul %65, %51, %cst_86 {dimension_numbers = #tpu.dot_dimension_numbers<[1], [0], [0], [1], [0, 0, 1, 1], [], []>} : vector<4x128xbf16>, vector<128x128xbf16>, vector<4x128xf32> -> vector<4x128xf32>
    %67 = arith.addf %49, %66 : vector<4x128xf32>
    %c4 = arith.constant 4 : index
    %c0_87 = arith.constant 0 : index
    %c0_88 = arith.constant 0 : index
    %68 = vector.load %arg5[%c4, %c0_87, %c0_88] : memref<9x128x128xbf16, #tpu.memory_space<vmem>>, vector<1x128x128xbf16>
    %69 = vector.shape_cast %68 : vector<1x128x128xbf16> to vector<128x128xbf16>
    %c0_89 = arith.constant 0 : index
    %c0_90 = arith.constant 0 : index
    %c0_91 = arith.constant 0 : index
    %c0_92 = arith.constant 0 : index
    %70 = vector.load %arg4[%c0_89, %c0_90, %c0_91, %c0_92] : memref<1x5x5x128xbf16, #tpu.memory_space<vmem>>, vector<1x1x4x128xbf16>
    %71 = vector.shape_cast %70 : vector<1x1x4x128xbf16> to vector<4x128xbf16>
    %cst_93 = arith.constant dense<0.000000e+00> : vector<4x128xf32>
    %72 = tpu.matmul %71, %69, %cst_93 {dimension_numbers = #tpu.dot_dimension_numbers<[1], [0], [0], [1], [0, 0, 1, 1], [], []>} : vector<4x128xbf16>, vector<128x128xbf16>, vector<4x128xf32> -> vector<4x128xf32>
    %73 = arith.addf %55, %72 : vector<4x128xf32>
    %c0_94 = arith.constant 0 : index
    %c1_95 = arith.constant 1 : index
    %c0_96 = arith.constant 0 : index
    %c0_97 = arith.constant 0 : index
    %74 = vector.load %arg4[%c0_94, %c1_95, %c0_96, %c0_97] : memref<1x5x5x128xbf16, #tpu.memory_space<vmem>>, vector<1x1x4x128xbf16>
    %75 = vector.shape_cast %74 : vector<1x1x4x128xbf16> to vector<4x128xbf16>
    %cst_98 = arith.constant dense<0.000000e+00> : vector<4x128xf32>
    %76 = tpu.matmul %75, %69, %cst_98 {dimension_numbers = #tpu.dot_dimension_numbers<[1], [0], [0], [1], [0, 0, 1, 1], [], []>} : vector<4x128xbf16>, vector<128x128xbf16>, vector<4x128xf32> -> vector<4x128xf32>
    %77 = arith.addf %59, %76 : vector<4x128xf32>
    %c0_99 = arith.constant 0 : index
    %c2_100 = arith.constant 2 : index
    %c0_101 = arith.constant 0 : index
    %c0_102 = arith.constant 0 : index
    %78 = vector.load %arg4[%c0_99, %c2_100, %c0_101, %c0_102] : memref<1x5x5x128xbf16, #tpu.memory_space<vmem>>, vector<1x1x4x128xbf16>
    %79 = vector.shape_cast %78 : vector<1x1x4x128xbf16> to vector<4x128xbf16>
    %cst_103 = arith.constant dense<0.000000e+00> : vector<4x128xf32>
    %80 = tpu.matmul %79, %69, %cst_103 {dimension_numbers = #tpu.dot_dimension_numbers<[1], [0], [0], [1], [0, 0, 1, 1], [], []>} : vector<4x128xbf16>, vector<128x128xbf16>, vector<4x128xf32> -> vector<4x128xf32>
    %81 = arith.addf %63, %80 : vector<4x128xf32>
    %c0_104 = arith.constant 0 : index
    %c3_105 = arith.constant 3 : index
    %c0_106 = arith.constant 0 : index
    %c0_107 = arith.constant 0 : index
    %82 = vector.load %arg4[%c0_104, %c3_105, %c0_106, %c0_107] : memref<1x5x5x128xbf16, #tpu.memory_space<vmem>>, vector<1x1x4x128xbf16>
    %83 = vector.shape_cast %82 : vector<1x1x4x128xbf16> to vector<4x128xbf16>
    %cst_108 = arith.constant dense<0.000000e+00> : vector<4x128xf32>
    %84 = tpu.matmul %83, %69, %cst_108 {dimension_numbers = #tpu.dot_dimension_numbers<[1], [0], [0], [1], [0, 0, 1, 1], [], []>} : vector<4x128xbf16>, vector<128x128xbf16>, vector<4x128xf32> -> vector<4x128xf32>
    %85 = arith.addf %67, %84 : vector<4x128xf32>
    %c5 = arith.constant 5 : index
    %c0_109 = arith.constant 0 : index
    %c0_110 = arith.constant 0 : index
    %86 = vector.load %arg5[%c5, %c0_109, %c0_110] : memref<9x128x128xbf16, #tpu.memory_space<vmem>>, vector<1x128x128xbf16>
    %87 = vector.shape_cast %86 : vector<1x128x128xbf16> to vector<128x128xbf16>
    %c0_111 = arith.constant 0 : index
    %c0_112 = arith.constant 0 : index
    %c1_113 = arith.constant 1 : index
    %c0_114 = arith.constant 0 : index
    %88 = vector.load %arg3[%c0_111, %c0_112, %c1_113, %c0_114] : memref<1x5x5x128xbf16, #tpu.memory_space<vmem>>, vector<1x1x4x128xbf16>
    %89 = vector.shape_cast %88 : vector<1x1x4x128xbf16> to vector<4x128xbf16>
    %cst_115 = arith.constant dense<0.000000e+00> : vector<4x128xf32>
    %90 = tpu.matmul %89, %87, %cst_115 {dimension_numbers = #tpu.dot_dimension_numbers<[1], [0], [0], [1], [0, 0, 1, 1], [], []>} : vector<4x128xbf16>, vector<128x128xbf16>, vector<4x128xf32> -> vector<4x128xf32>
    %91 = arith.addf %73, %90 : vector<4x128xf32>
    %c0_116 = arith.constant 0 : index
    %c1_117 = arith.constant 1 : index
    %c1_118 = arith.constant 1 : index
    %c0_119 = arith.constant 0 : index
    %92 = vector.load %arg3[%c0_116, %c1_117, %c1_118, %c0_119] : memref<1x5x5x128xbf16, #tpu.memory_space<vmem>>, vector<1x1x4x128xbf16>
    %93 = vector.shape_cast %92 : vector<1x1x4x128xbf16> to vector<4x128xbf16>
    %cst_120 = arith.constant dense<0.000000e+00> : vector<4x128xf32>
    %94 = tpu.matmul %93, %87, %cst_120 {dimension_numbers = #tpu.dot_dimension_numbers<[1], [0], [0], [1], [0, 0, 1, 1], [], []>} : vector<4x128xbf16>, vector<128x128xbf16>, vector<4x128xf32> -> vector<4x128xf32>
    %95 = arith.addf %77, %94 : vector<4x128xf32>
    %c0_121 = arith.constant 0 : index
    %c2_122 = arith.constant 2 : index
    %c1_123 = arith.constant 1 : index
    %c0_124 = arith.constant 0 : index
    %96 = vector.load %arg3[%c0_121, %c2_122, %c1_123, %c0_124] : memref<1x5x5x128xbf16, #tpu.memory_space<vmem>>, vector<1x1x4x128xbf16>
    %97 = vector.shape_cast %96 : vector<1x1x4x128xbf16> to vector<4x128xbf16>
    %cst_125 = arith.constant dense<0.000000e+00> : vector<4x128xf32>
    %98 = tpu.matmul %97, %87, %cst_125 {dimension_numbers = #tpu.dot_dimension_numbers<[1], [0], [0], [1], [0, 0, 1, 1], [], []>} : vector<4x128xbf16>, vector<128x128xbf16>, vector<4x128xf32> -> vector<4x128xf32>
    %99 = arith.addf %81, %98 : vector<4x128xf32>
    %c0_126 = arith.constant 0 : index
    %c3_127 = arith.constant 3 : index
    %c1_128 = arith.constant 1 : index
    %c0_129 = arith.constant 0 : index
    %100 = vector.load %arg3[%c0_126, %c3_127, %c1_128, %c0_129] : memref<1x5x5x128xbf16, #tpu.memory_space<vmem>>, vector<1x1x4x128xbf16>
    %101 = vector.shape_cast %100 : vector<1x1x4x128xbf16> to vector<4x128xbf16>
    %cst_130 = arith.constant dense<0.000000e+00> : vector<4x128xf32>
    %102 = tpu.matmul %101, %87, %cst_130 {dimension_numbers = #tpu.dot_dimension_numbers<[1], [0], [0], [1], [0, 0, 1, 1], [], []>} : vector<4x128xbf16>, vector<128x128xbf16>, vector<4x128xf32> -> vector<4x128xf32>
    %103 = arith.addf %85, %102 : vector<4x128xf32>
    %c6 = arith.constant 6 : index
    %c0_131 = arith.constant 0 : index
    %c0_132 = arith.constant 0 : index
    %104 = vector.load %arg5[%c6, %c0_131, %c0_132] : memref<9x128x128xbf16, #tpu.memory_space<vmem>>, vector<1x128x128xbf16>
    %105 = vector.shape_cast %104 : vector<1x128x128xbf16> to vector<128x128xbf16>
    %c0_133 = arith.constant 0 : index
    %c1_134 = arith.constant 1 : index
    %c0_135 = arith.constant 0 : index
    %c0_136 = arith.constant 0 : index
    %106 = vector.load %arg1[%c0_133, %c1_134, %c0_135, %c0_136] : memref<1x5x5x128xbf16, #tpu.memory_space<vmem>>, vector<1x1x4x128xbf16>
    %107 = vector.shape_cast %106 : vector<1x1x4x128xbf16> to vector<4x128xbf16>
    %cst_137 = arith.constant dense<0.000000e+00> : vector<4x128xf32>
    %108 = tpu.matmul %107, %105, %cst_137 {dimension_numbers = #tpu.dot_dimension_numbers<[1], [0], [0], [1], [0, 0, 1, 1], [], []>} : vector<4x128xbf16>, vector<128x128xbf16>, vector<4x128xf32> -> vector<4x128xf32>
    %109 = arith.addf %91, %108 : vector<4x128xf32>
    %c0_138 = arith.constant 0 : index
    %c2_139 = arith.constant 2 : index
    %c0_140 = arith.constant 0 : index
    %c0_141 = arith.constant 0 : index
    %110 = vector.load %arg1[%c0_138, %c2_139, %c0_140, %c0_141] : memref<1x5x5x128xbf16, #tpu.memory_space<vmem>>, vector<1x1x4x128xbf16>
    %111 = vector.shape_cast %110 : vector<1x1x4x128xbf16> to vector<4x128xbf16>
    %cst_142 = arith.constant dense<0.000000e+00> : vector<4x128xf32>
    %112 = tpu.matmul %111, %105, %cst_142 {dimension_numbers = #tpu.dot_dimension_numbers<[1], [0], [0], [1], [0, 0, 1, 1], [], []>} : vector<4x128xbf16>, vector<128x128xbf16>, vector<4x128xf32> -> vector<4x128xf32>
    %113 = arith.addf %95, %112 : vector<4x128xf32>
    %c0_143 = arith.constant 0 : index
    %c3_144 = arith.constant 3 : index
    %c0_145 = arith.constant 0 : index
    %c0_146 = arith.constant 0 : index
    %114 = vector.load %arg1[%c0_143, %c3_144, %c0_145, %c0_146] : memref<1x5x5x128xbf16, #tpu.memory_space<vmem>>, vector<1x1x4x128xbf16>
    %115 = vector.shape_cast %114 : vector<1x1x4x128xbf16> to vector<4x128xbf16>
    %cst_147 = arith.constant dense<0.000000e+00> : vector<4x128xf32>
    %116 = tpu.matmul %115, %105, %cst_147 {dimension_numbers = #tpu.dot_dimension_numbers<[1], [0], [0], [1], [0, 0, 1, 1], [], []>} : vector<4x128xbf16>, vector<128x128xbf16>, vector<4x128xf32> -> vector<4x128xf32>
    %117 = arith.addf %99, %116 : vector<4x128xf32>
    %c0_148 = arith.constant 0 : index
    %c4_149 = arith.constant 4 : index
    %c0_150 = arith.constant 0 : index
    %c0_151 = arith.constant 0 : index
    %118 = vector.load %arg1[%c0_148, %c4_149, %c0_150, %c0_151] : memref<1x5x5x128xbf16, #tpu.memory_space<vmem>>, vector<1x1x4x128xbf16>
    %119 = vector.shape_cast %118 : vector<1x1x4x128xbf16> to vector<4x128xbf16>
    %cst_152 = arith.constant dense<0.000000e+00> : vector<4x128xf32>
    %120 = tpu.matmul %119, %105, %cst_152 {dimension_numbers = #tpu.dot_dimension_numbers<[1], [0], [0], [1], [0, 0, 1, 1], [], []>} : vector<4x128xbf16>, vector<128x128xbf16>, vector<4x128xf32> -> vector<4x128xf32>
    %121 = arith.addf %103, %120 : vector<4x128xf32>
    %c7 = arith.constant 7 : index
    %c0_153 = arith.constant 0 : index
    %c0_154 = arith.constant 0 : index
    %122 = vector.load %arg5[%c7, %c0_153, %c0_154] : memref<9x128x128xbf16, #tpu.memory_space<vmem>>, vector<1x128x128xbf16>
    %123 = vector.shape_cast %122 : vector<1x128x128xbf16> to vector<128x128xbf16>
    %c0_155 = arith.constant 0 : index
    %c1_156 = arith.constant 1 : index
    %c0_157 = arith.constant 0 : index
    %c0_158 = arith.constant 0 : index
    %124 = vector.load %arg2[%c0_155, %c1_156, %c0_157, %c0_158] : memref<1x5x5x128xbf16, #tpu.memory_space<vmem>>, vector<1x1x4x128xbf16>
    %125 = vector.shape_cast %124 : vector<1x1x4x128xbf16> to vector<4x128xbf16>
    %cst_159 = arith.constant dense<0.000000e+00> : vector<4x128xf32>
    %126 = tpu.matmul %125, %123, %cst_159 {dimension_numbers = #tpu.dot_dimension_numbers<[1], [0], [0], [1], [0, 0, 1, 1], [], []>} : vector<4x128xbf16>, vector<128x128xbf16>, vector<4x128xf32> -> vector<4x128xf32>
    %127 = arith.addf %109, %126 : vector<4x128xf32>
    %c0_160 = arith.constant 0 : index
    %c2_161 = arith.constant 2 : index
    %c0_162 = arith.constant 0 : index
    %c0_163 = arith.constant 0 : index
    %128 = vector.load %arg2[%c0_160, %c2_161, %c0_162, %c0_163] : memref<1x5x5x128xbf16, #tpu.memory_space<vmem>>, vector<1x1x4x128xbf16>
    %129 = vector.shape_cast %128 : vector<1x1x4x128xbf16> to vector<4x128xbf16>
    %cst_164 = arith.constant dense<0.000000e+00> : vector<4x128xf32>
    %130 = tpu.matmul %129, %123, %cst_164 {dimension_numbers = #tpu.dot_dimension_numbers<[1], [0], [0], [1], [0, 0, 1, 1], [], []>} : vector<4x128xbf16>, vector<128x128xbf16>, vector<4x128xf32> -> vector<4x128xf32>
    %131 = arith.addf %113, %130 : vector<4x128xf32>
    %c0_165 = arith.constant 0 : index
    %c3_166 = arith.constant 3 : index
    %c0_167 = arith.constant 0 : index
    %c0_168 = arith.constant 0 : index
    %132 = vector.load %arg2[%c0_165, %c3_166, %c0_167, %c0_168] : memref<1x5x5x128xbf16, #tpu.memory_space<vmem>>, vector<1x1x4x128xbf16>
    %133 = vector.shape_cast %132 : vector<1x1x4x128xbf16> to vector<4x128xbf16>
    %cst_169 = arith.constant dense<0.000000e+00> : vector<4x128xf32>
    %134 = tpu.matmul %133, %123, %cst_169 {dimension_numbers = #tpu.dot_dimension_numbers<[1], [0], [0], [1], [0, 0, 1, 1], [], []>} : vector<4x128xbf16>, vector<128x128xbf16>, vector<4x128xf32> -> vector<4x128xf32>
    %135 = arith.addf %117, %134 : vector<4x128xf32>
    %c0_170 = arith.constant 0 : index
    %c4_171 = arith.constant 4 : index
    %c0_172 = arith.constant 0 : index
    %c0_173 = arith.constant 0 : index
    %136 = vector.load %arg2[%c0_170, %c4_171, %c0_172, %c0_173] : memref<1x5x5x128xbf16, #tpu.memory_space<vmem>>, vector<1x1x4x128xbf16>
    %137 = vector.shape_cast %136 : vector<1x1x4x128xbf16> to vector<4x128xbf16>
    %cst_174 = arith.constant dense<0.000000e+00> : vector<4x128xf32>
    %138 = tpu.matmul %137, %123, %cst_174 {dimension_numbers = #tpu.dot_dimension_numbers<[1], [0], [0], [1], [0, 0, 1, 1], [], []>} : vector<4x128xbf16>, vector<128x128xbf16>, vector<4x128xf32> -> vector<4x128xf32>
    %139 = arith.addf %121, %138 : vector<4x128xf32>
    %c8 = arith.constant 8 : index
    %c0_175 = arith.constant 0 : index
    %c0_176 = arith.constant 0 : index
    %140 = vector.load %arg5[%c8, %c0_175, %c0_176] : memref<9x128x128xbf16, #tpu.memory_space<vmem>>, vector<1x128x128xbf16>
    %141 = vector.shape_cast %140 : vector<1x128x128xbf16> to vector<128x128xbf16>
    %c0_177 = arith.constant 0 : index
    %c1_178 = arith.constant 1 : index
    %c1_179 = arith.constant 1 : index
    %c0_180 = arith.constant 0 : index
    %142 = vector.load %arg1[%c0_177, %c1_178, %c1_179, %c0_180] : memref<1x5x5x128xbf16, #tpu.memory_space<vmem>>, vector<1x1x4x128xbf16>
    %143 = vector.shape_cast %142 : vector<1x1x4x128xbf16> to vector<4x128xbf16>
    %cst_181 = arith.constant dense<0.000000e+00> : vector<4x128xf32>
    %144 = tpu.matmul %143, %141, %cst_181 {dimension_numbers = #tpu.dot_dimension_numbers<[1], [0], [0], [1], [0, 0, 1, 1], [], []>} : vector<4x128xbf16>, vector<128x128xbf16>, vector<4x128xf32> -> vector<4x128xf32>
    %145 = arith.addf %127, %144 : vector<4x128xf32>
    %c0_182 = arith.constant 0 : index
    %c2_183 = arith.constant 2 : index
    %c1_184 = arith.constant 1 : index
    %c0_185 = arith.constant 0 : index
    %146 = vector.load %arg1[%c0_182, %c2_183, %c1_184, %c0_185] : memref<1x5x5x128xbf16, #tpu.memory_space<vmem>>, vector<1x1x4x128xbf16>
    %147 = vector.shape_cast %146 : vector<1x1x4x128xbf16> to vector<4x128xbf16>
    %cst_186 = arith.constant dense<0.000000e+00> : vector<4x128xf32>
    %148 = tpu.matmul %147, %141, %cst_186 {dimension_numbers = #tpu.dot_dimension_numbers<[1], [0], [0], [1], [0, 0, 1, 1], [], []>} : vector<4x128xbf16>, vector<128x128xbf16>, vector<4x128xf32> -> vector<4x128xf32>
    %149 = arith.addf %131, %148 : vector<4x128xf32>
    %c0_187 = arith.constant 0 : index
    %c3_188 = arith.constant 3 : index
    %c1_189 = arith.constant 1 : index
    %c0_190 = arith.constant 0 : index
    %150 = vector.load %arg1[%c0_187, %c3_188, %c1_189, %c0_190] : memref<1x5x5x128xbf16, #tpu.memory_space<vmem>>, vector<1x1x4x128xbf16>
    %151 = vector.shape_cast %150 : vector<1x1x4x128xbf16> to vector<4x128xbf16>
    %cst_191 = arith.constant dense<0.000000e+00> : vector<4x128xf32>
    %152 = tpu.matmul %151, %141, %cst_191 {dimension_numbers = #tpu.dot_dimension_numbers<[1], [0], [0], [1], [0, 0, 1, 1], [], []>} : vector<4x128xbf16>, vector<128x128xbf16>, vector<4x128xf32> -> vector<4x128xf32>
    %153 = arith.addf %135, %152 : vector<4x128xf32>
    %c0_192 = arith.constant 0 : index
    %c4_193 = arith.constant 4 : index
    %c1_194 = arith.constant 1 : index
    %c0_195 = arith.constant 0 : index
    %154 = vector.load %arg1[%c0_192, %c4_193, %c1_194, %c0_195] : memref<1x5x5x128xbf16, #tpu.memory_space<vmem>>, vector<1x1x4x128xbf16>
    %155 = vector.shape_cast %154 : vector<1x1x4x128xbf16> to vector<4x128xbf16>
    %cst_196 = arith.constant dense<0.000000e+00> : vector<4x128xf32>
    %156 = tpu.matmul %155, %141, %cst_196 {dimension_numbers = #tpu.dot_dimension_numbers<[1], [0], [0], [1], [0, 0, 1, 1], [], []>} : vector<4x128xbf16>, vector<128x128xbf16>, vector<4x128xf32> -> vector<4x128xf32>
    %157 = arith.addf %139, %156 : vector<4x128xf32>
    %c0_197 = arith.constant 0 : index
    %c0_198 = arith.constant 0 : index
    %158 = vector.load %arg6[%c0_197, %c0_198] : memref<1x128xf32, #tpu.memory_space<vmem>>, vector<1x128xf32>
    %c0_199 = arith.constant 0 : index
    %c0_200 = arith.constant 0 : index
    %159 = vector.load %arg7[%c0_199, %c0_200] : memref<1x128xf32, #tpu.memory_space<vmem>>, vector<1x128xf32>
    %160 = vector.broadcast %158 : vector<1x128xf32> to vector<4x128xf32>
    %161 = arith.mulf %145, %160 : vector<4x128xf32>
    %162 = vector.broadcast %159 : vector<1x128xf32> to vector<4x128xf32>
    %163 = arith.addf %161, %162 : vector<4x128xf32>
    %cst_201 = arith.constant 0.000000e+00 : f32
    %164 = vector.broadcast %cst_201 : f32 to vector<4x128xf32>
    %165 = arith.maximumf %163, %164 : vector<4x128xf32>
    %166 = arith.truncf %165 : vector<4x128xf32> to vector<4x128xbf16>
    %c0_202 = arith.constant 0 : index
    %c0_203 = arith.constant 0 : index
    %c0_204 = arith.constant 0 : index
    %c0_205 = arith.constant 0 : index
    %167 = vector.load %arg8[%c0_202, %c0_203, %c0_204, %c0_205] : memref<1x4x4x128xbf16, #tpu.memory_space<vmem>>, vector<1x1x4x128xbf16>
    %168 = vector.shape_cast %167 : vector<1x1x4x128xbf16> to vector<4x128xbf16>
    %169 = vector.shape_cast %166 : vector<4x128xbf16> to vector<1x1x4x128xbf16>
    tpu.vector_store %arg8[%c0_202, %c0_203, %c0_204, %c0_205], %169 {strides = array<i32>} : memref<1x4x4x128xbf16, #tpu.memory_space<vmem>>, vector<1x1x4x128xbf16>,
    %170 = vector.broadcast %158 : vector<1x128xf32> to vector<4x128xf32>
    %171 = arith.mulf %149, %170 : vector<4x128xf32>
    %172 = vector.broadcast %159 : vector<1x128xf32> to vector<4x128xf32>
    %173 = arith.addf %171, %172 : vector<4x128xf32>
    %cst_206 = arith.constant 0.000000e+00 : f32
    %174 = vector.broadcast %cst_206 : f32 to vector<4x128xf32>
    %175 = arith.maximumf %173, %174 : vector<4x128xf32>
    %176 = arith.truncf %175 : vector<4x128xf32> to vector<4x128xbf16>
    %c0_207 = arith.constant 0 : index
    %c1_208 = arith.constant 1 : index
    %c0_209 = arith.constant 0 : index
    %c0_210 = arith.constant 0 : index
    %177 = vector.load %arg8[%c0_207, %c1_208, %c0_209, %c0_210] : memref<1x4x4x128xbf16, #tpu.memory_space<vmem>>, vector<1x1x4x128xbf16>
    %178 = vector.shape_cast %177 : vector<1x1x4x128xbf16> to vector<4x128xbf16>
    %179 = vector.shape_cast %176 : vector<4x128xbf16> to vector<1x1x4x128xbf16>
    tpu.vector_store %arg8[%c0_207, %c1_208, %c0_209, %c0_210], %179 {strides = array<i32>} : memref<1x4x4x128xbf16, #tpu.memory_space<vmem>>, vector<1x1x4x128xbf16>,
    %180 = vector.broadcast %158 : vector<1x128xf32> to vector<4x128xf32>
    %181 = arith.mulf %153, %180 : vector<4x128xf32>
    %182 = vector.broadcast %159 : vector<1x128xf32> to vector<4x128xf32>
    %183 = arith.addf %181, %182 : vector<4x128xf32>
    %cst_211 = arith.constant 0.000000e+00 : f32
    %184 = vector.broadcast %cst_211 : f32 to vector<4x128xf32>
    %185 = arith.maximumf %183, %184 : vector<4x128xf32>
    %186 = arith.truncf %185 : vector<4x128xf32> to vector<4x128xbf16>
    %c0_212 = arith.constant 0 : index
    %c2_213 = arith.constant 2 : index
    %c0_214 = arith.constant 0 : index
    %c0_215 = arith.constant 0 : index
    %187 = vector.load %arg8[%c0_212, %c2_213, %c0_214, %c0_215] : memref<1x4x4x128xbf16, #tpu.memory_space<vmem>>, vector<1x1x4x128xbf16>
    %188 = vector.shape_cast %187 : vector<1x1x4x128xbf16> to vector<4x128xbf16>
    %189 = vector.shape_cast %186 : vector<4x128xbf16> to vector<1x1x4x128xbf16>
    tpu.vector_store %arg8[%c0_212, %c2_213, %c0_214, %c0_215], %189 {strides = array<i32>} : memref<1x4x4x128xbf16, #tpu.memory_space<vmem>>, vector<1x1x4x128xbf16>,
    %190 = vector.broadcast %158 : vector<1x128xf32> to vector<4x128xf32>
    %191 = arith.mulf %157, %190 : vector<4x128xf32>
    %192 = vector.broadcast %159 : vector<1x128xf32> to vector<4x128xf32>
    %193 = arith.addf %191, %192 : vector<4x128xf32>
    %cst_216 = arith.constant 0.000000e+00 : f32
    %194 = vector.broadcast %cst_216 : f32 to vector<4x128xf32>
    %195 = arith.maximumf %193, %194 : vector<4x128xf32>
    %196 = arith.truncf %195 : vector<4x128xf32> to vector<4x128xbf16>
    %c0_217 = arith.constant 0 : index
    %c3_218 = arith.constant 3 : index
    %c0_219 = arith.constant 0 : index
    %c0_220 = arith.constant 0 : index
    %197 = vector.load %arg8[%c0_217, %c3_218, %c0_219, %c0_220] : memref<1x4x4x128xbf16, #tpu.memory_space<vmem>>, vector<1x1x4x128xbf16>
    %198 = vector.shape_cast %197 : vector<1x1x4x128xbf16> to vector<4x128xbf16>
    %199 = vector.shape_cast %196 : vector<4x128xbf16> to vector<1x1x4x128xbf16>
    tpu.vector_store %arg8[%c0_217, %c3_218, %c0_219, %c0_220], %199 {strides = array<i32>} : memref<1x4x4x128xbf16, #tpu.memory_space<vmem>>, vector<1x1x4x128xbf16>,
    return
  }
  func.func @transform_0(%arg0: i32) -> (i32, i32, i32, i32) {
    %c0_i32 = arith.constant 0 : i32
    %c0_i32_0 = arith.constant 0 : i32
    %c0_i32_1 = arith.constant 0 : i32
    %c0_i32_2 = arith.constant 0 : i32
    return %arg0, %c0_i32, %c0_i32_0, %c0_i32_1 : i32, i32, i32, i32
  }
  func.func @transform_1(%arg0: i32) -> (i32, i32, i32, i32) {
    %c0_i32 = arith.constant 0 : i32
    %c0_i32_0 = arith.constant 0 : i32
    %c0_i32_1 = arith.constant 0 : i32
    %c0_i32_2 = arith.constant 0 : i32
    return %arg0, %c0_i32, %c0_i32_0, %c0_i32_1 : i32, i32, i32, i32
  }
  func.func @transform_2(%arg0: i32) -> (i32, i32, i32, i32) {
    %c0_i32 = arith.constant 0 : i32
    %c0_i32_0 = arith.constant 0 : i32
    %c0_i32_1 = arith.constant 0 : i32
    %c0_i32_2 = arith.constant 0 : i32
    return %arg0, %c0_i32, %c0_i32_0, %c0_i32_1 : i32, i32, i32, i32
  }
  func.func @transform_3(%arg0: i32) -> (i32, i32, i32, i32) {
    %c0_i32 = arith.constant 0 : i32
    %c0_i32_0 = arith.constant 0 : i32
    %c0_i32_1 = arith.constant 0 : i32
    %c0_i32_2 = arith.constant 0 : i32
    return %arg0, %c0_i32, %c0_i32_0, %c0_i32_1 : i32, i32, i32, i32
  }
  func.func @transform_4(%arg0: i32) -> (i32, i32, i32) {
    %c0_i32 = arith.constant 0 : i32
    %c0_i32_0 = arith.constant 0 : i32
    %c0_i32_1 = arith.constant 0 : i32
    %c0_i32_2 = arith.constant 0 : i32
    return %c0_i32, %c0_i32_0, %c0_i32_1 : i32, i32, i32
  }
  func.func @transform_5(%arg0: i32) -> (i32, i32) {
    %c0_i32 = arith.constant 0 : i32
    %c0_i32_0 = arith.constant 0 : i32
    %c0_i32_1 = arith.constant 0 : i32
    return %c0_i32, %c0_i32_0 : i32, i32
  }
  func.func @transform_6(%arg0: i32) -> (i32, i32) {
    %c0_i32 = arith.constant 0 : i32
    %c0_i32_0 = arith.constant 0 : i32
    %c0_i32_1 = arith.constant 0 : i32
    return %c0_i32, %c0_i32_0 : i32, i32
  }
  func.func @transform_7(%arg0: i32) -> (i32, i32, i32, i32) {
    %c0_i32 = arith.constant 0 : i32
    %c0_i32_0 = arith.constant 0 : i32
    %c0_i32_1 = arith.constant 0 : i32
    %c0_i32_2 = arith.constant 0 : i32
    return %arg0, %c0_i32, %c0_i32_0, %c0_i32_1 : i32, i32, i32, i32
  }
}

module attributes {stable_mosaic.version = 11 : i64} {
  func.func @_mm_bn_act_kernel(%arg0: i32, %arg1: memref<32x128xbf16, #tpu.memory_space<vmem>>, %arg2: memref<128x128xbf16, #tpu.memory_space<vmem>>, %arg3: memref<1x128xf32, #tpu.memory_space<vmem>>, %arg4: memref<1x128xf32, #tpu.memory_space<vmem>>, %arg5: memref<32x128xbf16, #tpu.memory_space<vmem>>) attributes {dimension_semantics = [#tpu.dimension_semantics<parallel>], iteration_bounds = array<i64: 1>, scalar_prefetch = 0 : i64, scratch_operands = 0 : i64, tpu.core_type = #tpu.core_type<tc>, window_params = [{transform_indices = @transform_0, window_bounds = array<i64: 32, 128>}, {pipeline_mode = #tpu.pipeline_mode<synchronous>, transform_indices = @transform_1, window_bounds = array<i64: 128, 128>}, {pipeline_mode = #tpu.pipeline_mode<synchronous>, transform_indices = @transform_2, window_bounds = array<i64: 1, 128>}, {pipeline_mode = #tpu.pipeline_mode<synchronous>, transform_indices = @transform_3, window_bounds = array<i64: 1, 128>}, {transform_indices = @transform_4, window_bounds = array<i64: 32, 128>}]} {
    %c0 = arith.constant 0 : index
    %c0_0 = arith.constant 0 : index
    %0 = vector.load %arg1[%c0, %c0_0] : memref<32x128xbf16, #tpu.memory_space<vmem>>, vector<32x128xbf16>
    %c0_1 = arith.constant 0 : index
    %c0_2 = arith.constant 0 : index
    %1 = vector.load %arg2[%c0_1, %c0_2] : memref<128x128xbf16, #tpu.memory_space<vmem>>, vector<128x128xbf16>
    %cst = arith.constant dense<0.000000e+00> : vector<32x128xf32>
    %2 = tpu.matmul %0, %1, %cst {dimension_numbers = #tpu.dot_dimension_numbers<[1], [0], [0], [1], [0, 0, 1, 1], [], []>} : vector<32x128xbf16>, vector<128x128xbf16>, vector<32x128xf32> -> vector<32x128xf32>
    %c0_3 = arith.constant 0 : index
    %c0_4 = arith.constant 0 : index
    %3 = vector.load %arg3[%c0_3, %c0_4] : memref<1x128xf32, #tpu.memory_space<vmem>>, vector<1x128xf32>
    %4 = vector.broadcast %3 : vector<1x128xf32> to vector<32x128xf32>
    %5 = arith.mulf %2, %4 : vector<32x128xf32>
    %c0_5 = arith.constant 0 : index
    %c0_6 = arith.constant 0 : index
    %6 = vector.load %arg4[%c0_5, %c0_6] : memref<1x128xf32, #tpu.memory_space<vmem>>, vector<1x128xf32>
    %7 = vector.broadcast %6 : vector<1x128xf32> to vector<32x128xf32>
    %8 = arith.addf %5, %7 : vector<32x128xf32>
    %cst_7 = arith.constant 0.000000e+00 : f32
    %9 = vector.broadcast %cst_7 : f32 to vector<32x128xf32>
    %10 = arith.maximumf %8, %9 : vector<32x128xf32>
    %11 = arith.truncf %10 : vector<32x128xf32> to vector<32x128xbf16>
    %c0_8 = arith.constant 0 : index
    %c0_9 = arith.constant 0 : index
    %12 = vector.load %arg5[%c0_8, %c0_9] : memref<32x128xbf16, #tpu.memory_space<vmem>>, vector<32x128xbf16>
    tpu.vector_store %arg5[%c0_8, %c0_9], %11 {strides = array<i32>} : memref<32x128xbf16, #tpu.memory_space<vmem>>, vector<32x128xbf16>,
    return
  }
  func.func @transform_0(%arg0: i32) -> (i32, i32) {
    %c0_i32 = arith.constant 0 : i32
    %c0_i32_0 = arith.constant 0 : i32
    return %arg0, %c0_i32 : i32, i32
  }
  func.func @transform_1(%arg0: i32) -> (i32, i32) {
    %c0_i32 = arith.constant 0 : i32
    %c0_i32_0 = arith.constant 0 : i32
    %c0_i32_1 = arith.constant 0 : i32
    return %c0_i32, %c0_i32_0 : i32, i32
  }
  func.func @transform_2(%arg0: i32) -> (i32, i32) {
    %c0_i32 = arith.constant 0 : i32
    %c0_i32_0 = arith.constant 0 : i32
    %c0_i32_1 = arith.constant 0 : i32
    return %c0_i32, %c0_i32_0 : i32, i32
  }
  func.func @transform_3(%arg0: i32) -> (i32, i32) {
    %c0_i32 = arith.constant 0 : i32
    %c0_i32_0 = arith.constant 0 : i32
    %c0_i32_1 = arith.constant 0 : i32
    return %c0_i32, %c0_i32_0 : i32, i32
  }
  func.func @transform_4(%arg0: i32) -> (i32, i32) {
    %c0_i32 = arith.constant 0 : i32
    %c0_i32_0 = arith.constant 0 : i32
    return %arg0, %c0_i32 : i32, i32
  }
}

module attributes {stable_mosaic.version = 11 : i64} {
  func.func @_conv_tap_kernel(%arg0: i32, %arg1: memref<1x3x3x128xbf16, #tpu.memory_space<vmem>>, %arg2: memref<1x3x3x128xbf16, #tpu.memory_space<vmem>>, %arg3: memref<1x3x3x128xbf16, #tpu.memory_space<vmem>>, %arg4: memref<1x3x3x128xbf16, #tpu.memory_space<vmem>>, %arg5: memref<9x128x128xbf16, #tpu.memory_space<vmem>>, %arg6: memref<1x128xf32, #tpu.memory_space<vmem>>, %arg7: memref<1x128xf32, #tpu.memory_space<vmem>>, %arg8: memref<1x2x2x128xbf16, #tpu.memory_space<vmem>>) attributes {dimension_semantics = [#tpu.dimension_semantics<parallel>], iteration_bounds = array<i64: 2>, scalar_prefetch = 0 : i64, scratch_operands = 0 : i64, tpu.core_type = #tpu.core_type<tc>, window_params = [{transform_indices = @transform_0, window_bounds = array<i64: 1, 3, 3, 128>}, {transform_indices = @transform_1, window_bounds = array<i64: 1, 3, 3, 128>}, {transform_indices = @transform_2, window_bounds = array<i64: 1, 3, 3, 128>}, {transform_indices = @transform_3, window_bounds = array<i64: 1, 3, 3, 128>}, {pipeline_mode = #tpu.pipeline_mode<synchronous>, transform_indices = @transform_4, window_bounds = array<i64: 9, 128, 128>}, {pipeline_mode = #tpu.pipeline_mode<synchronous>, transform_indices = @transform_5, window_bounds = array<i64: 1, 128>}, {pipeline_mode = #tpu.pipeline_mode<synchronous>, transform_indices = @transform_6, window_bounds = array<i64: 1, 128>}, {transform_indices = @transform_7, window_bounds = array<i64: 1, 2, 2, 128>}]} {
    %c0 = arith.constant 0 : index
    %c0_0 = arith.constant 0 : index
    %c0_1 = arith.constant 0 : index
    %0 = vector.load %arg5[%c0, %c0_0, %c0_1] : memref<9x128x128xbf16, #tpu.memory_space<vmem>>, vector<1x128x128xbf16>
    %1 = vector.shape_cast %0 : vector<1x128x128xbf16> to vector<128x128xbf16>
    %c0_2 = arith.constant 0 : index
    %c0_3 = arith.constant 0 : index
    %c0_4 = arith.constant 0 : index
    %c0_5 = arith.constant 0 : index
    %2 = vector.load %arg1[%c0_2, %c0_3, %c0_4, %c0_5] : memref<1x3x3x128xbf16, #tpu.memory_space<vmem>>, vector<1x1x2x128xbf16>
    %3 = vector.shape_cast %2 : vector<1x1x2x128xbf16> to vector<2x128xbf16>
    %cst = arith.constant dense<0.000000e+00> : vector<2x128xf32>
    %4 = tpu.matmul %3, %1, %cst {dimension_numbers = #tpu.dot_dimension_numbers<[1], [0], [0], [1], [0, 0, 1, 1], [], []>} : vector<2x128xbf16>, vector<128x128xbf16>, vector<2x128xf32> -> vector<2x128xf32>
    %c0_6 = arith.constant 0 : index
    %c1 = arith.constant 1 : index
    %c0_7 = arith.constant 0 : index
    %c0_8 = arith.constant 0 : index
    %5 = vector.load %arg1[%c0_6, %c1, %c0_7, %c0_8] : memref<1x3x3x128xbf16, #tpu.memory_space<vmem>>, vector<1x1x2x128xbf16>
    %6 = vector.shape_cast %5 : vector<1x1x2x128xbf16> to vector<2x128xbf16>
    %cst_9 = arith.constant dense<0.000000e+00> : vector<2x128xf32>
    %7 = tpu.matmul %6, %1, %cst_9 {dimension_numbers = #tpu.dot_dimension_numbers<[1], [0], [0], [1], [0, 0, 1, 1], [], []>} : vector<2x128xbf16>, vector<128x128xbf16>, vector<2x128xf32> -> vector<2x128xf32>
    %c1_10 = arith.constant 1 : index
    %c0_11 = arith.constant 0 : index
    %c0_12 = arith.constant 0 : index
    %8 = vector.load %arg5[%c1_10, %c0_11, %c0_12] : memref<9x128x128xbf16, #tpu.memory_space<vmem>>, vector<1x128x128xbf16>
    %9 = vector.shape_cast %8 : vector<1x128x128xbf16> to vector<128x128xbf16>
    %c0_13 = arith.constant 0 : index
    %c0_14 = arith.constant 0 : index
    %c0_15 = arith.constant 0 : index
    %c0_16 = arith.constant 0 : index
    %10 = vector.load %arg2[%c0_13, %c0_14, %c0_15, %c0_16] : memref<1x3x3x128xbf16, #tpu.memory_space<vmem>>, vector<1x1x2x128xbf16>
    %11 = vector.shape_cast %10 : vector<1x1x2x128xbf16> to vector<2x128xbf16>
    %cst_17 = arith.constant dense<0.000000e+00> : vector<2x128xf32>
    %12 = tpu.matmul %11, %9, %cst_17 {dimension_numbers = #tpu.dot_dimension_numbers<[1], [0], [0], [1], [0, 0, 1, 1], [], []>} : vector<2x128xbf16>, vector<128x128xbf16>, vector<2x128xf32> -> vector<2x128xf32>
    %13 = arith.addf %4, %12 : vector<2x128xf32>
    %c0_18 = arith.constant 0 : index
    %c1_19 = arith.constant 1 : index
    %c0_20 = arith.constant 0 : index
    %c0_21 = arith.constant 0 : index
    %14 = vector.load %arg2[%c0_18, %c1_19, %c0_20, %c0_21] : memref<1x3x3x128xbf16, #tpu.memory_space<vmem>>, vector<1x1x2x128xbf16>
    %15 = vector.shape_cast %14 : vector<1x1x2x128xbf16> to vector<2x128xbf16>
    %cst_22 = arith.constant dense<0.000000e+00> : vector<2x128xf32>
    %16 = tpu.matmul %15, %9, %cst_22 {dimension_numbers = #tpu.dot_dimension_numbers<[1], [0], [0], [1], [0, 0, 1, 1], [], []>} : vector<2x128xbf16>, vector<128x128xbf16>, vector<2x128xf32> -> vector<2x128xf32>
    %17 = arith.addf %7, %16 : vector<2x128xf32>
    %c2 = arith.constant 2 : index
    %c0_23 = arith.constant 0 : index
    %c0_24 = arith.constant 0 : index
    %18 = vector.load %arg5[%c2, %c0_23, %c0_24] : memref<9x128x128xbf16, #tpu.memory_space<vmem>>, vector<1x128x128xbf16>
    %19 = vector.shape_cast %18 : vector<1x128x128xbf16> to vector<128x128xbf16>
    %c0_25 = arith.constant 0 : index
    %c0_26 = arith.constant 0 : index
    %c1_27 = arith.constant 1 : index
    %c0_28 = arith.constant 0 : index
    %20 = vector.load %arg1[%c0_25, %c0_26, %c1_27, %c0_28] : memref<1x3x3x128xbf16, #tpu.memory_space<vmem>>, vector<1x1x2x128xbf16>
    %21 = vector.shape_cast %20 : vector<1x1x2x128xbf16> to vector<2x128xbf16>
    %cst_29 = arith.constant dense<0.000000e+00> : vector<2x128xf32>
    %22 = tpu.matmul %21, %19, %cst_29 {dimension_numbers = #tpu.dot_dimension_numbers<[1], [0], [0], [1], [0, 0, 1, 1], [], []>} : vector<2x128xbf16>, vector<128x128xbf16>, vector<2x128xf32> -> vector<2x128xf32>
    %23 = arith.addf %13, %22 : vector<2x128xf32>
    %c0_30 = arith.constant 0 : index
    %c1_31 = arith.constant 1 : index
    %c1_32 = arith.constant 1 : index
    %c0_33 = arith.constant 0 : index
    %24 = vector.load %arg1[%c0_30, %c1_31, %c1_32, %c0_33] : memref<1x3x3x128xbf16, #tpu.memory_space<vmem>>, vector<1x1x2x128xbf16>
    %25 = vector.shape_cast %24 : vector<1x1x2x128xbf16> to vector<2x128xbf16>
    %cst_34 = arith.constant dense<0.000000e+00> : vector<2x128xf32>
    %26 = tpu.matmul %25, %19, %cst_34 {dimension_numbers = #tpu.dot_dimension_numbers<[1], [0], [0], [1], [0, 0, 1, 1], [], []>} : vector<2x128xbf16>, vector<128x128xbf16>, vector<2x128xf32> -> vector<2x128xf32>
    %27 = arith.addf %17, %26 : vector<2x128xf32>
    %c3 = arith.constant 3 : index
    %c0_35 = arith.constant 0 : index
    %c0_36 = arith.constant 0 : index
    %28 = vector.load %arg5[%c3, %c0_35, %c0_36] : memref<9x128x128xbf16, #tpu.memory_space<vmem>>, vector<1x128x128xbf16>
    %29 = vector.shape_cast %28 : vector<1x128x128xbf16> to vector<128x128xbf16>
    %c0_37 = arith.constant 0 : index
    %c0_38 = arith.constant 0 : index
    %c0_39 = arith.constant 0 : index
    %c0_40 = arith.constant 0 : index
    %30 = vector.load %arg3[%c0_37, %c0_38, %c0_39, %c0_40] : memref<1x3x3x128xbf16, #tpu.memory_space<vmem>>, vector<1x1x2x128xbf16>
    %31 = vector.shape_cast %30 : vector<1x1x2x128xbf16> to vector<2x128xbf16>
    %cst_41 = arith.constant dense<0.000000e+00> : vector<2x128xf32>
    %32 = tpu.matmul %31, %29, %cst_41 {dimension_numbers = #tpu.dot_dimension_numbers<[1], [0], [0], [1], [0, 0, 1, 1], [], []>} : vector<2x128xbf16>, vector<128x128xbf16>, vector<2x128xf32> -> vector<2x128xf32>
    %33 = arith.addf %23, %32 : vector<2x128xf32>
    %c0_42 = arith.constant 0 : index
    %c1_43 = arith.constant 1 : index
    %c0_44 = arith.constant 0 : index
    %c0_45 = arith.constant 0 : index
    %34 = vector.load %arg3[%c0_42, %c1_43, %c0_44, %c0_45] : memref<1x3x3x128xbf16, #tpu.memory_space<vmem>>, vector<1x1x2x128xbf16>
    %35 = vector.shape_cast %34 : vector<1x1x2x128xbf16> to vector<2x128xbf16>
    %cst_46 = arith.constant dense<0.000000e+00> : vector<2x128xf32>
    %36 = tpu.matmul %35, %29, %cst_46 {dimension_numbers = #tpu.dot_dimension_numbers<[1], [0], [0], [1], [0, 0, 1, 1], [], []>} : vector<2x128xbf16>, vector<128x128xbf16>, vector<2x128xf32> -> vector<2x128xf32>
    %37 = arith.addf %27, %36 : vector<2x128xf32>
    %c4 = arith.constant 4 : index
    %c0_47 = arith.constant 0 : index
    %c0_48 = arith.constant 0 : index
    %38 = vector.load %arg5[%c4, %c0_47, %c0_48] : memref<9x128x128xbf16, #tpu.memory_space<vmem>>, vector<1x128x128xbf16>
    %39 = vector.shape_cast %38 : vector<1x128x128xbf16> to vector<128x128xbf16>
    %c0_49 = arith.constant 0 : index
    %c0_50 = arith.constant 0 : index
    %c0_51 = arith.constant 0 : index
    %c0_52 = arith.constant 0 : index
    %40 = vector.load %arg4[%c0_49, %c0_50, %c0_51, %c0_52] : memref<1x3x3x128xbf16, #tpu.memory_space<vmem>>, vector<1x1x2x128xbf16>
    %41 = vector.shape_cast %40 : vector<1x1x2x128xbf16> to vector<2x128xbf16>
    %cst_53 = arith.constant dense<0.000000e+00> : vector<2x128xf32>
    %42 = tpu.matmul %41, %39, %cst_53 {dimension_numbers = #tpu.dot_dimension_numbers<[1], [0], [0], [1], [0, 0, 1, 1], [], []>} : vector<2x128xbf16>, vector<128x128xbf16>, vector<2x128xf32> -> vector<2x128xf32>
    %43 = arith.addf %33, %42 : vector<2x128xf32>
    %c0_54 = arith.constant 0 : index
    %c1_55 = arith.constant 1 : index
    %c0_56 = arith.constant 0 : index
    %c0_57 = arith.constant 0 : index
    %44 = vector.load %arg4[%c0_54, %c1_55, %c0_56, %c0_57] : memref<1x3x3x128xbf16, #tpu.memory_space<vmem>>, vector<1x1x2x128xbf16>
    %45 = vector.shape_cast %44 : vector<1x1x2x128xbf16> to vector<2x128xbf16>
    %cst_58 = arith.constant dense<0.000000e+00> : vector<2x128xf32>
    %46 = tpu.matmul %45, %39, %cst_58 {dimension_numbers = #tpu.dot_dimension_numbers<[1], [0], [0], [1], [0, 0, 1, 1], [], []>} : vector<2x128xbf16>, vector<128x128xbf16>, vector<2x128xf32> -> vector<2x128xf32>
    %47 = arith.addf %37, %46 : vector<2x128xf32>
    %c5 = arith.constant 5 : index
    %c0_59 = arith.constant 0 : index
    %c0_60 = arith.constant 0 : index
    %48 = vector.load %arg5[%c5, %c0_59, %c0_60] : memref<9x128x128xbf16, #tpu.memory_space<vmem>>, vector<1x128x128xbf16>
    %49 = vector.shape_cast %48 : vector<1x128x128xbf16> to vector<128x128xbf16>
    %c0_61 = arith.constant 0 : index
    %c0_62 = arith.constant 0 : index
    %c1_63 = arith.constant 1 : index
    %c0_64 = arith.constant 0 : index
    %50 = vector.load %arg3[%c0_61, %c0_62, %c1_63, %c0_64] : memref<1x3x3x128xbf16, #tpu.memory_space<vmem>>, vector<1x1x2x128xbf16>
    %51 = vector.shape_cast %50 : vector<1x1x2x128xbf16> to vector<2x128xbf16>
    %cst_65 = arith.constant dense<0.000000e+00> : vector<2x128xf32>
    %52 = tpu.matmul %51, %49, %cst_65 {dimension_numbers = #tpu.dot_dimension_numbers<[1], [0], [0], [1], [0, 0, 1, 1], [], []>} : vector<2x128xbf16>, vector<128x128xbf16>, vector<2x128xf32> -> vector<2x128xf32>
    %53 = arith.addf %43, %52 : vector<2x128xf32>
    %c0_66 = arith.constant 0 : index
    %c1_67 = arith.constant 1 : index
    %c1_68 = arith.constant 1 : index
    %c0_69 = arith.constant 0 : index
    %54 = vector.load %arg3[%c0_66, %c1_67, %c1_68, %c0_69] : memref<1x3x3x128xbf16, #tpu.memory_space<vmem>>, vector<1x1x2x128xbf16>
    %55 = vector.shape_cast %54 : vector<1x1x2x128xbf16> to vector<2x128xbf16>
    %cst_70 = arith.constant dense<0.000000e+00> : vector<2x128xf32>
    %56 = tpu.matmul %55, %49, %cst_70 {dimension_numbers = #tpu.dot_dimension_numbers<[1], [0], [0], [1], [0, 0, 1, 1], [], []>} : vector<2x128xbf16>, vector<128x128xbf16>, vector<2x128xf32> -> vector<2x128xf32>
    %57 = arith.addf %47, %56 : vector<2x128xf32>
    %c6 = arith.constant 6 : index
    %c0_71 = arith.constant 0 : index
    %c0_72 = arith.constant 0 : index
    %58 = vector.load %arg5[%c6, %c0_71, %c0_72] : memref<9x128x128xbf16, #tpu.memory_space<vmem>>, vector<1x128x128xbf16>
    %59 = vector.shape_cast %58 : vector<1x128x128xbf16> to vector<128x128xbf16>
    %c0_73 = arith.constant 0 : index
    %c1_74 = arith.constant 1 : index
    %c0_75 = arith.constant 0 : index
    %c0_76 = arith.constant 0 : index
    %60 = vector.load %arg1[%c0_73, %c1_74, %c0_75, %c0_76] : memref<1x3x3x128xbf16, #tpu.memory_space<vmem>>, vector<1x1x2x128xbf16>
    %61 = vector.shape_cast %60 : vector<1x1x2x128xbf16> to vector<2x128xbf16>
    %cst_77 = arith.constant dense<0.000000e+00> : vector<2x128xf32>
    %62 = tpu.matmul %61, %59, %cst_77 {dimension_numbers = #tpu.dot_dimension_numbers<[1], [0], [0], [1], [0, 0, 1, 1], [], []>} : vector<2x128xbf16>, vector<128x128xbf16>, vector<2x128xf32> -> vector<2x128xf32>
    %63 = arith.addf %53, %62 : vector<2x128xf32>
    %c0_78 = arith.constant 0 : index
    %c2_79 = arith.constant 2 : index
    %c0_80 = arith.constant 0 : index
    %c0_81 = arith.constant 0 : index
    %64 = vector.load %arg1[%c0_78, %c2_79, %c0_80, %c0_81] : memref<1x3x3x128xbf16, #tpu.memory_space<vmem>>, vector<1x1x2x128xbf16>
    %65 = vector.shape_cast %64 : vector<1x1x2x128xbf16> to vector<2x128xbf16>
    %cst_82 = arith.constant dense<0.000000e+00> : vector<2x128xf32>
    %66 = tpu.matmul %65, %59, %cst_82 {dimension_numbers = #tpu.dot_dimension_numbers<[1], [0], [0], [1], [0, 0, 1, 1], [], []>} : vector<2x128xbf16>, vector<128x128xbf16>, vector<2x128xf32> -> vector<2x128xf32>
    %67 = arith.addf %57, %66 : vector<2x128xf32>
    %c7 = arith.constant 7 : index
    %c0_83 = arith.constant 0 : index
    %c0_84 = arith.constant 0 : index
    %68 = vector.load %arg5[%c7, %c0_83, %c0_84] : memref<9x128x128xbf16, #tpu.memory_space<vmem>>, vector<1x128x128xbf16>
    %69 = vector.shape_cast %68 : vector<1x128x128xbf16> to vector<128x128xbf16>
    %c0_85 = arith.constant 0 : index
    %c1_86 = arith.constant 1 : index
    %c0_87 = arith.constant 0 : index
    %c0_88 = arith.constant 0 : index
    %70 = vector.load %arg2[%c0_85, %c1_86, %c0_87, %c0_88] : memref<1x3x3x128xbf16, #tpu.memory_space<vmem>>, vector<1x1x2x128xbf16>
    %71 = vector.shape_cast %70 : vector<1x1x2x128xbf16> to vector<2x128xbf16>
    %cst_89 = arith.constant dense<0.000000e+00> : vector<2x128xf32>
    %72 = tpu.matmul %71, %69, %cst_89 {dimension_numbers = #tpu.dot_dimension_numbers<[1], [0], [0], [1], [0, 0, 1, 1], [], []>} : vector<2x128xbf16>, vector<128x128xbf16>, vector<2x128xf32> -> vector<2x128xf32>
    %73 = arith.addf %63, %72 : vector<2x128xf32>
    %c0_90 = arith.constant 0 : index
    %c2_91 = arith.constant 2 : index
    %c0_92 = arith.constant 0 : index
    %c0_93 = arith.constant 0 : index
    %74 = vector.load %arg2[%c0_90, %c2_91, %c0_92, %c0_93] : memref<1x3x3x128xbf16, #tpu.memory_space<vmem>>, vector<1x1x2x128xbf16>
    %75 = vector.shape_cast %74 : vector<1x1x2x128xbf16> to vector<2x128xbf16>
    %cst_94 = arith.constant dense<0.000000e+00> : vector<2x128xf32>
    %76 = tpu.matmul %75, %69, %cst_94 {dimension_numbers = #tpu.dot_dimension_numbers<[1], [0], [0], [1], [0, 0, 1, 1], [], []>} : vector<2x128xbf16>, vector<128x128xbf16>, vector<2x128xf32> -> vector<2x128xf32>
    %77 = arith.addf %67, %76 : vector<2x128xf32>
    %c8 = arith.constant 8 : index
    %c0_95 = arith.constant 0 : index
    %c0_96 = arith.constant 0 : index
    %78 = vector.load %arg5[%c8, %c0_95, %c0_96] : memref<9x128x128xbf16, #tpu.memory_space<vmem>>, vector<1x128x128xbf16>
    %79 = vector.shape_cast %78 : vector<1x128x128xbf16> to vector<128x128xbf16>
    %c0_97 = arith.constant 0 : index
    %c1_98 = arith.constant 1 : index
    %c1_99 = arith.constant 1 : index
    %c0_100 = arith.constant 0 : index
    %80 = vector.load %arg1[%c0_97, %c1_98, %c1_99, %c0_100] : memref<1x3x3x128xbf16, #tpu.memory_space<vmem>>, vector<1x1x2x128xbf16>
    %81 = vector.shape_cast %80 : vector<1x1x2x128xbf16> to vector<2x128xbf16>
    %cst_101 = arith.constant dense<0.000000e+00> : vector<2x128xf32>
    %82 = tpu.matmul %81, %79, %cst_101 {dimension_numbers = #tpu.dot_dimension_numbers<[1], [0], [0], [1], [0, 0, 1, 1], [], []>} : vector<2x128xbf16>, vector<128x128xbf16>, vector<2x128xf32> -> vector<2x128xf32>
    %83 = arith.addf %73, %82 : vector<2x128xf32>
    %c0_102 = arith.constant 0 : index
    %c2_103 = arith.constant 2 : index
    %c1_104 = arith.constant 1 : index
    %c0_105 = arith.constant 0 : index
    %84 = vector.load %arg1[%c0_102, %c2_103, %c1_104, %c0_105] : memref<1x3x3x128xbf16, #tpu.memory_space<vmem>>, vector<1x1x2x128xbf16>
    %85 = vector.shape_cast %84 : vector<1x1x2x128xbf16> to vector<2x128xbf16>
    %cst_106 = arith.constant dense<0.000000e+00> : vector<2x128xf32>
    %86 = tpu.matmul %85, %79, %cst_106 {dimension_numbers = #tpu.dot_dimension_numbers<[1], [0], [0], [1], [0, 0, 1, 1], [], []>} : vector<2x128xbf16>, vector<128x128xbf16>, vector<2x128xf32> -> vector<2x128xf32>
    %87 = arith.addf %77, %86 : vector<2x128xf32>
    %c0_107 = arith.constant 0 : index
    %c0_108 = arith.constant 0 : index
    %88 = vector.load %arg6[%c0_107, %c0_108] : memref<1x128xf32, #tpu.memory_space<vmem>>, vector<1x128xf32>
    %c0_109 = arith.constant 0 : index
    %c0_110 = arith.constant 0 : index
    %89 = vector.load %arg7[%c0_109, %c0_110] : memref<1x128xf32, #tpu.memory_space<vmem>>, vector<1x128xf32>
    %90 = vector.broadcast %88 : vector<1x128xf32> to vector<2x128xf32>
    %91 = arith.mulf %83, %90 : vector<2x128xf32>
    %92 = vector.broadcast %89 : vector<1x128xf32> to vector<2x128xf32>
    %93 = arith.addf %91, %92 : vector<2x128xf32>
    %cst_111 = arith.constant 0.000000e+00 : f32
    %94 = vector.broadcast %cst_111 : f32 to vector<2x128xf32>
    %95 = arith.maximumf %93, %94 : vector<2x128xf32>
    %96 = arith.truncf %95 : vector<2x128xf32> to vector<2x128xbf16>
    %c0_112 = arith.constant 0 : index
    %c0_113 = arith.constant 0 : index
    %c0_114 = arith.constant 0 : index
    %c0_115 = arith.constant 0 : index
    %97 = vector.load %arg8[%c0_112, %c0_113, %c0_114, %c0_115] : memref<1x2x2x128xbf16, #tpu.memory_space<vmem>>, vector<1x1x2x128xbf16>
    %98 = vector.shape_cast %97 : vector<1x1x2x128xbf16> to vector<2x128xbf16>
    %99 = vector.shape_cast %96 : vector<2x128xbf16> to vector<1x1x2x128xbf16>
    tpu.vector_store %arg8[%c0_112, %c0_113, %c0_114, %c0_115], %99 {strides = array<i32>} : memref<1x2x2x128xbf16, #tpu.memory_space<vmem>>, vector<1x1x2x128xbf16>,
    %100 = vector.broadcast %88 : vector<1x128xf32> to vector<2x128xf32>
    %101 = arith.mulf %87, %100 : vector<2x128xf32>
    %102 = vector.broadcast %89 : vector<1x128xf32> to vector<2x128xf32>
    %103 = arith.addf %101, %102 : vector<2x128xf32>
    %cst_116 = arith.constant 0.000000e+00 : f32
    %104 = vector.broadcast %cst_116 : f32 to vector<2x128xf32>
    %105 = arith.maximumf %103, %104 : vector<2x128xf32>
    %106 = arith.truncf %105 : vector<2x128xf32> to vector<2x128xbf16>
    %c0_117 = arith.constant 0 : index
    %c1_118 = arith.constant 1 : index
    %c0_119 = arith.constant 0 : index
    %c0_120 = arith.constant 0 : index
    %107 = vector.load %arg8[%c0_117, %c1_118, %c0_119, %c0_120] : memref<1x2x2x128xbf16, #tpu.memory_space<vmem>>, vector<1x1x2x128xbf16>
    %108 = vector.shape_cast %107 : vector<1x1x2x128xbf16> to vector<2x128xbf16>
    %109 = vector.shape_cast %106 : vector<2x128xbf16> to vector<1x1x2x128xbf16>
    tpu.vector_store %arg8[%c0_117, %c1_118, %c0_119, %c0_120], %109 {strides = array<i32>} : memref<1x2x2x128xbf16, #tpu.memory_space<vmem>>, vector<1x1x2x128xbf16>,
    return
  }
  func.func @transform_0(%arg0: i32) -> (i32, i32, i32, i32) {
    %c0_i32 = arith.constant 0 : i32
    %c0_i32_0 = arith.constant 0 : i32
    %c0_i32_1 = arith.constant 0 : i32
    %c0_i32_2 = arith.constant 0 : i32
    return %arg0, %c0_i32, %c0_i32_0, %c0_i32_1 : i32, i32, i32, i32
  }
  func.func @transform_1(%arg0: i32) -> (i32, i32, i32, i32) {
    %c0_i32 = arith.constant 0 : i32
    %c0_i32_0 = arith.constant 0 : i32
    %c0_i32_1 = arith.constant 0 : i32
    %c0_i32_2 = arith.constant 0 : i32
    return %arg0, %c0_i32, %c0_i32_0, %c0_i32_1 : i32, i32, i32, i32
  }
  func.func @transform_2(%arg0: i32) -> (i32, i32, i32, i32) {
    %c0_i32 = arith.constant 0 : i32
    %c0_i32_0 = arith.constant 0 : i32
    %c0_i32_1 = arith.constant 0 : i32
    %c0_i32_2 = arith.constant 0 : i32
    return %arg0, %c0_i32, %c0_i32_0, %c0_i32_1 : i32, i32, i32, i32
  }
  func.func @transform_3(%arg0: i32) -> (i32, i32, i32, i32) {
    %c0_i32 = arith.constant 0 : i32
    %c0_i32_0 = arith.constant 0 : i32
    %c0_i32_1 = arith.constant 0 : i32
    %c0_i32_2 = arith.constant 0 : i32
    return %arg0, %c0_i32, %c0_i32_0, %c0_i32_1 : i32, i32, i32, i32
  }
  func.func @transform_4(%arg0: i32) -> (i32, i32, i32) {
    %c0_i32 = arith.constant 0 : i32
    %c0_i32_0 = arith.constant 0 : i32
    %c0_i32_1 = arith.constant 0 : i32
    %c0_i32_2 = arith.constant 0 : i32
    return %c0_i32, %c0_i32_0, %c0_i32_1 : i32, i32, i32
  }
  func.func @transform_5(%arg0: i32) -> (i32, i32) {
    %c0_i32 = arith.constant 0 : i32
    %c0_i32_0 = arith.constant 0 : i32
    %c0_i32_1 = arith.constant 0 : i32
    return %c0_i32, %c0_i32_0 : i32, i32
  }
  func.func @transform_6(%arg0: i32) -> (i32, i32) {
    %c0_i32 = arith.constant 0 : i32
    %c0_i32_0 = arith.constant 0 : i32
    %c0_i32_1 = arith.constant 0 : i32
    return %c0_i32, %c0_i32_0 : i32, i32
  }
  func.func @transform_7(%arg0: i32) -> (i32, i32, i32, i32) {
    %c0_i32 = arith.constant 0 : i32
    %c0_i32_0 = arith.constant 0 : i32
    %c0_i32_1 = arith.constant 0 : i32
    %c0_i32_2 = arith.constant 0 : i32
    return %arg0, %c0_i32, %c0_i32_0, %c0_i32_1 : i32, i32, i32, i32
  }
}

module attributes {stable_mosaic.version = 11 : i64} {
  func.func @_mm_bn_res_act_kernel(%arg0: i32, %arg1: memref<8x128xbf16, #tpu.memory_space<vmem>>, %arg2: memref<128x128xbf16, #tpu.memory_space<vmem>>, %arg3: memref<1x128xf32, #tpu.memory_space<vmem>>, %arg4: memref<1x128xf32, #tpu.memory_space<vmem>>, %arg5: memref<8x128xbf16, #tpu.memory_space<vmem>>, %arg6: memref<8x128xbf16, #tpu.memory_space<vmem>>) attributes {dimension_semantics = [#tpu.dimension_semantics<parallel>], iteration_bounds = array<i64: 1>, scalar_prefetch = 0 : i64, scratch_operands = 0 : i64, tpu.core_type = #tpu.core_type<tc>, window_params = [{transform_indices = @transform_0, window_bounds = array<i64: 8, 128>}, {pipeline_mode = #tpu.pipeline_mode<synchronous>, transform_indices = @transform_1, window_bounds = array<i64: 128, 128>}, {pipeline_mode = #tpu.pipeline_mode<synchronous>, transform_indices = @transform_2, window_bounds = array<i64: 1, 128>}, {pipeline_mode = #tpu.pipeline_mode<synchronous>, transform_indices = @transform_3, window_bounds = array<i64: 1, 128>}, {transform_indices = @transform_4, window_bounds = array<i64: 8, 128>}, {transform_indices = @transform_5, window_bounds = array<i64: 8, 128>}]} {
    %c0 = arith.constant 0 : index
    %c0_0 = arith.constant 0 : index
    %0 = vector.load %arg1[%c0, %c0_0] : memref<8x128xbf16, #tpu.memory_space<vmem>>, vector<8x128xbf16>
    %c0_1 = arith.constant 0 : index
    %c0_2 = arith.constant 0 : index
    %1 = vector.load %arg2[%c0_1, %c0_2] : memref<128x128xbf16, #tpu.memory_space<vmem>>, vector<128x128xbf16>
    %cst = arith.constant dense<0.000000e+00> : vector<8x128xf32>
    %2 = tpu.matmul %0, %1, %cst {dimension_numbers = #tpu.dot_dimension_numbers<[1], [0], [0], [1], [0, 0, 1, 1], [], []>} : vector<8x128xbf16>, vector<128x128xbf16>, vector<8x128xf32> -> vector<8x128xf32>
    %c0_3 = arith.constant 0 : index
    %c0_4 = arith.constant 0 : index
    %3 = vector.load %arg3[%c0_3, %c0_4] : memref<1x128xf32, #tpu.memory_space<vmem>>, vector<1x128xf32>
    %4 = vector.broadcast %3 : vector<1x128xf32> to vector<8x128xf32>
    %5 = arith.mulf %2, %4 : vector<8x128xf32>
    %c0_5 = arith.constant 0 : index
    %c0_6 = arith.constant 0 : index
    %6 = vector.load %arg4[%c0_5, %c0_6] : memref<1x128xf32, #tpu.memory_space<vmem>>, vector<1x128xf32>
    %7 = vector.broadcast %6 : vector<1x128xf32> to vector<8x128xf32>
    %8 = arith.addf %5, %7 : vector<8x128xf32>
    %c0_7 = arith.constant 0 : index
    %c0_8 = arith.constant 0 : index
    %9 = vector.load %arg5[%c0_7, %c0_8] : memref<8x128xbf16, #tpu.memory_space<vmem>>, vector<8x128xbf16>
    %10 = arith.extf %9 : vector<8x128xbf16> to vector<8x128xf32>
    %11 = arith.addf %8, %10 : vector<8x128xf32>
    %cst_9 = arith.constant 0.000000e+00 : f32
    %12 = vector.broadcast %cst_9 : f32 to vector<8x128xf32>
    %13 = arith.maximumf %11, %12 : vector<8x128xf32>
    %14 = arith.truncf %13 : vector<8x128xf32> to vector<8x128xbf16>
    %c0_10 = arith.constant 0 : index
    %c0_11 = arith.constant 0 : index
    %15 = vector.load %arg6[%c0_10, %c0_11] : memref<8x128xbf16, #tpu.memory_space<vmem>>, vector<8x128xbf16>
    tpu.vector_store %arg6[%c0_10, %c0_11], %14 {strides = array<i32>} : memref<8x128xbf16, #tpu.memory_space<vmem>>, vector<8x128xbf16>,
    return
  }
  func.func @transform_0(%arg0: i32) -> (i32, i32) {
    %c0_i32 = arith.constant 0 : i32
    %c0_i32_0 = arith.constant 0 : i32
    return %arg0, %c0_i32 : i32, i32
  }
  func.func @transform_1(%arg0: i32) -> (i32, i32) {
    %c0_i32 = arith.constant 0 : i32
    %c0_i32_0 = arith.constant 0 : i32
    %c0_i32_1 = arith.constant 0 : i32
    return %c0_i32, %c0_i32_0 : i32, i32
  }
  func.func @transform_2(%arg0: i32) -> (i32, i32) {
    %c0_i32 = arith.constant 0 : i32
    %c0_i32_0 = arith.constant 0 : i32
    %c0_i32_1 = arith.constant 0 : i32
    return %c0_i32, %c0_i32_0 : i32, i32
  }
  func.func @transform_3(%arg0: i32) -> (i32, i32) {
    %c0_i32 = arith.constant 0 : i32
    %c0_i32_0 = arith.constant 0 : i32
    %c0_i32_1 = arith.constant 0 : i32
    return %c0_i32, %c0_i32_0 : i32, i32
  }
  func.func @transform_4(%arg0: i32) -> (i32, i32) {
    %c0_i32 = arith.constant 0 : i32
    %c0_i32_0 = arith.constant 0 : i32
    return %arg0, %c0_i32 : i32, i32
  }
  func.func @transform_5(%arg0: i32) -> (i32, i32) {
    %c0_i32 = arith.constant 0 : i32
    %c0_i32_0 = arith.constant 0 : i32
    return %arg0, %c0_i32 : i32, i32
  }
}

module attributes {stable_mosaic.version = 11 : i64} {
  func.func @_mm_bn_act_kernel(%arg0: i32, %arg1: memref<8x128xbf16, #tpu.memory_space<vmem>>, %arg2: memref<128x128xbf16, #tpu.memory_space<vmem>>, %arg3: memref<1x128xf32, #tpu.memory_space<vmem>>, %arg4: memref<1x128xf32, #tpu.memory_space<vmem>>, %arg5: memref<8x128xbf16, #tpu.memory_space<vmem>>) attributes {dimension_semantics = [#tpu.dimension_semantics<parallel>], iteration_bounds = array<i64: 1>, scalar_prefetch = 0 : i64, scratch_operands = 0 : i64, tpu.core_type = #tpu.core_type<tc>, window_params = [{transform_indices = @transform_0, window_bounds = array<i64: 8, 128>}, {pipeline_mode = #tpu.pipeline_mode<synchronous>, transform_indices = @transform_1, window_bounds = array<i64: 128, 128>}, {pipeline_mode = #tpu.pipeline_mode<synchronous>, transform_indices = @transform_2, window_bounds = array<i64: 1, 128>}, {pipeline_mode = #tpu.pipeline_mode<synchronous>, transform_indices = @transform_3, window_bounds = array<i64: 1, 128>}, {transform_indices = @transform_4, window_bounds = array<i64: 8, 128>}]} {
    %c0 = arith.constant 0 : index
    %c0_0 = arith.constant 0 : index
    %0 = vector.load %arg1[%c0, %c0_0] : memref<8x128xbf16, #tpu.memory_space<vmem>>, vector<8x128xbf16>
    %c0_1 = arith.constant 0 : index
    %c0_2 = arith.constant 0 : index
    %1 = vector.load %arg2[%c0_1, %c0_2] : memref<128x128xbf16, #tpu.memory_space<vmem>>, vector<128x128xbf16>
    %cst = arith.constant dense<0.000000e+00> : vector<8x128xf32>
    %2 = tpu.matmul %0, %1, %cst {dimension_numbers = #tpu.dot_dimension_numbers<[1], [0], [0], [1], [0, 0, 1, 1], [], []>} : vector<8x128xbf16>, vector<128x128xbf16>, vector<8x128xf32> -> vector<8x128xf32>
    %c0_3 = arith.constant 0 : index
    %c0_4 = arith.constant 0 : index
    %3 = vector.load %arg3[%c0_3, %c0_4] : memref<1x128xf32, #tpu.memory_space<vmem>>, vector<1x128xf32>
    %4 = vector.broadcast %3 : vector<1x128xf32> to vector<8x128xf32>
    %5 = arith.mulf %2, %4 : vector<8x128xf32>
    %c0_5 = arith.constant 0 : index
    %c0_6 = arith.constant 0 : index
    %6 = vector.load %arg4[%c0_5, %c0_6] : memref<1x128xf32, #tpu.memory_space<vmem>>, vector<1x128xf32>
    %7 = vector.broadcast %6 : vector<1x128xf32> to vector<8x128xf32>
    %8 = arith.addf %5, %7 : vector<8x128xf32>
    %cst_7 = arith.constant 0.000000e+00 : f32
    %9 = vector.broadcast %cst_7 : f32 to vector<8x128xf32>
    %10 = arith.maximumf %8, %9 : vector<8x128xf32>
    %11 = arith.truncf %10 : vector<8x128xf32> to vector<8x128xbf16>
    %c0_8 = arith.constant 0 : index
    %c0_9 = arith.constant 0 : index
    %12 = vector.load %arg5[%c0_8, %c0_9] : memref<8x128xbf16, #tpu.memory_space<vmem>>, vector<8x128xbf16>
    tpu.vector_store %arg5[%c0_8, %c0_9], %11 {strides = array<i32>} : memref<8x128xbf16, #tpu.memory_space<vmem>>, vector<8x128xbf16>,
    return
  }
  func.func @transform_0(%arg0: i32) -> (i32, i32) {
    %c0_i32 = arith.constant 0 : i32
    %c0_i32_0 = arith.constant 0 : i32
    return %arg0, %c0_i32 : i32, i32
  }
  func.func @transform_1(%arg0: i32) -> (i32, i32) {
    %c0_i32 = arith.constant 0 : i32
    %c0_i32_0 = arith.constant 0 : i32
    %c0_i32_1 = arith.constant 0 : i32
    return %c0_i32, %c0_i32_0 : i32, i32
  }
  func.func @transform_2(%arg0: i32) -> (i32, i32) {
    %c0_i32 = arith.constant 0 : i32
    %c0_i32_0 = arith.constant 0 : i32
    %c0_i32_1 = arith.constant 0 : i32
    return %c0_i32, %c0_i32_0 : i32, i32
  }
  func.func @transform_3(%arg0: i32) -> (i32, i32) {
    %c0_i32 = arith.constant 0 : i32
    %c0_i32_0 = arith.constant 0 : i32
    %c0_i32_1 = arith.constant 0 : i32
    return %c0_i32, %c0_i32_0 : i32, i32
  }
  func.func @transform_4(%arg0: i32) -> (i32, i32) {
    %c0_i32 = arith.constant 0 : i32
    %c0_i32_0 = arith.constant 0 : i32
    return %arg0, %c0_i32 : i32, i32
  }
}

module attributes {stable_mosaic.version = 11 : i64} {
  func.func @_conv_tap_kernel(%arg0: i32, %arg1: memref<1x2x2x128xbf16, #tpu.memory_space<vmem>>, %arg2: memref<1x2x2x128xbf16, #tpu.memory_space<vmem>>, %arg3: memref<1x2x2x128xbf16, #tpu.memory_space<vmem>>, %arg4: memref<1x2x2x128xbf16, #tpu.memory_space<vmem>>, %arg5: memref<9x128x128xbf16, #tpu.memory_space<vmem>>, %arg6: memref<1x128xf32, #tpu.memory_space<vmem>>, %arg7: memref<1x128xf32, #tpu.memory_space<vmem>>, %arg8: memref<1x1x1x128xbf16, #tpu.memory_space<vmem>>) attributes {dimension_semantics = [#tpu.dimension_semantics<parallel>], iteration_bounds = array<i64: 2>, scalar_prefetch = 0 : i64, scratch_operands = 0 : i64, tpu.core_type = #tpu.core_type<tc>, window_params = [{transform_indices = @transform_0, window_bounds = array<i64: 1, 2, 2, 128>}, {transform_indices = @transform_1, window_bounds = array<i64: 1, 2, 2, 128>}, {transform_indices = @transform_2, window_bounds = array<i64: 1, 2, 2, 128>}, {transform_indices = @transform_3, window_bounds = array<i64: 1, 2, 2, 128>}, {pipeline_mode = #tpu.pipeline_mode<synchronous>, transform_indices = @transform_4, window_bounds = array<i64: 9, 128, 128>}, {pipeline_mode = #tpu.pipeline_mode<synchronous>, transform_indices = @transform_5, window_bounds = array<i64: 1, 128>}, {pipeline_mode = #tpu.pipeline_mode<synchronous>, transform_indices = @transform_6, window_bounds = array<i64: 1, 128>}, {transform_indices = @transform_7, window_bounds = array<i64: 1, 1, 1, 128>}]} {
    %c0 = arith.constant 0 : index
    %c0_0 = arith.constant 0 : index
    %c0_1 = arith.constant 0 : index
    %0 = vector.load %arg5[%c0, %c0_0, %c0_1] : memref<9x128x128xbf16, #tpu.memory_space<vmem>>, vector<1x128x128xbf16>
    %1 = vector.shape_cast %0 : vector<1x128x128xbf16> to vector<128x128xbf16>
    %c0_2 = arith.constant 0 : index
    %c0_3 = arith.constant 0 : index
    %c0_4 = arith.constant 0 : index
    %c0_5 = arith.constant 0 : index
    %2 = vector.load %arg1[%c0_2, %c0_3, %c0_4, %c0_5] : memref<1x2x2x128xbf16, #tpu.memory_space<vmem>>, vector<1x1x1x128xbf16>
    %3 = vector.shape_cast %2 : vector<1x1x1x128xbf16> to vector<1x128xbf16>
    %cst = arith.constant dense<0.000000e+00> : vector<1x128xf32>
    %4 = tpu.matmul %3, %1, %cst {dimension_numbers = #tpu.dot_dimension_numbers<[1], [0], [0], [1], [0, 0, 1, 1], [], []>} : vector<1x128xbf16>, vector<128x128xbf16>, vector<1x128xf32> -> vector<1x128xf32>
    %c1 = arith.constant 1 : index
    %c0_6 = arith.constant 0 : index
    %c0_7 = arith.constant 0 : index
    %5 = vector.load %arg5[%c1, %c0_6, %c0_7] : memref<9x128x128xbf16, #tpu.memory_space<vmem>>, vector<1x128x128xbf16>
    %6 = vector.shape_cast %5 : vector<1x128x128xbf16> to vector<128x128xbf16>
    %c0_8 = arith.constant 0 : index
    %c0_9 = arith.constant 0 : index
    %c0_10 = arith.constant 0 : index
    %c0_11 = arith.constant 0 : index
    %7 = vector.load %arg2[%c0_8, %c0_9, %c0_10, %c0_11] : memref<1x2x2x128xbf16, #tpu.memory_space<vmem>>, vector<1x1x1x128xbf16>
    %8 = vector.shape_cast %7 : vector<1x1x1x128xbf16> to vector<1x128xbf16>
    %cst_12 = arith.constant dense<0.000000e+00> : vector<1x128xf32>
    %9 = tpu.matmul %8, %6, %cst_12 {dimension_numbers = #tpu.dot_dimension_numbers<[1], [0], [0], [1], [0, 0, 1, 1], [], []>} : vector<1x128xbf16>, vector<128x128xbf16>, vector<1x128xf32> -> vector<1x128xf32>
    %10 = arith.addf %4, %9 : vector<1x128xf32>
    %c2 = arith.constant 2 : index
    %c0_13 = arith.constant 0 : index
    %c0_14 = arith.constant 0 : index
    %11 = vector.load %arg5[%c2, %c0_13, %c0_14] : memref<9x128x128xbf16, #tpu.memory_space<vmem>>, vector<1x128x128xbf16>
    %12 = vector.shape_cast %11 : vector<1x128x128xbf16> to vector<128x128xbf16>
    %c0_15 = arith.constant 0 : index
    %c0_16 = arith.constant 0 : index
    %c1_17 = arith.constant 1 : index
    %c0_18 = arith.constant 0 : index
    %13 = vector.load %arg1[%c0_15, %c0_16, %c1_17, %c0_18] : memref<1x2x2x128xbf16, #tpu.memory_space<vmem>>, vector<1x1x1x128xbf16>
    %14 = vector.shape_cast %13 : vector<1x1x1x128xbf16> to vector<1x128xbf16>
    %cst_19 = arith.constant dense<0.000000e+00> : vector<1x128xf32>
    %15 = tpu.matmul %14, %12, %cst_19 {dimension_numbers = #tpu.dot_dimension_numbers<[1], [0], [0], [1], [0, 0, 1, 1], [], []>} : vector<1x128xbf16>, vector<128x128xbf16>, vector<1x128xf32> -> vector<1x128xf32>
    %16 = arith.addf %10, %15 : vector<1x128xf32>
    %c3 = arith.constant 3 : index
    %c0_20 = arith.constant 0 : index
    %c0_21 = arith.constant 0 : index
    %17 = vector.load %arg5[%c3, %c0_20, %c0_21] : memref<9x128x128xbf16, #tpu.memory_space<vmem>>, vector<1x128x128xbf16>
    %18 = vector.shape_cast %17 : vector<1x128x128xbf16> to vector<128x128xbf16>
    %c0_22 = arith.constant 0 : index
    %c0_23 = arith.constant 0 : index
    %c0_24 = arith.constant 0 : index
    %c0_25 = arith.constant 0 : index
    %19 = vector.load %arg3[%c0_22, %c0_23, %c0_24, %c0_25] : memref<1x2x2x128xbf16, #tpu.memory_space<vmem>>, vector<1x1x1x128xbf16>
    %20 = vector.shape_cast %19 : vector<1x1x1x128xbf16> to vector<1x128xbf16>
    %cst_26 = arith.constant dense<0.000000e+00> : vector<1x128xf32>
    %21 = tpu.matmul %20, %18, %cst_26 {dimension_numbers = #tpu.dot_dimension_numbers<[1], [0], [0], [1], [0, 0, 1, 1], [], []>} : vector<1x128xbf16>, vector<128x128xbf16>, vector<1x128xf32> -> vector<1x128xf32>
    %22 = arith.addf %16, %21 : vector<1x128xf32>
    %c4 = arith.constant 4 : index
    %c0_27 = arith.constant 0 : index
    %c0_28 = arith.constant 0 : index
    %23 = vector.load %arg5[%c4, %c0_27, %c0_28] : memref<9x128x128xbf16, #tpu.memory_space<vmem>>, vector<1x128x128xbf16>
    %24 = vector.shape_cast %23 : vector<1x128x128xbf16> to vector<128x128xbf16>
    %c0_29 = arith.constant 0 : index
    %c0_30 = arith.constant 0 : index
    %c0_31 = arith.constant 0 : index
    %c0_32 = arith.constant 0 : index
    %25 = vector.load %arg4[%c0_29, %c0_30, %c0_31, %c0_32] : memref<1x2x2x128xbf16, #tpu.memory_space<vmem>>, vector<1x1x1x128xbf16>
    %26 = vector.shape_cast %25 : vector<1x1x1x128xbf16> to vector<1x128xbf16>
    %cst_33 = arith.constant dense<0.000000e+00> : vector<1x128xf32>
    %27 = tpu.matmul %26, %24, %cst_33 {dimension_numbers = #tpu.dot_dimension_numbers<[1], [0], [0], [1], [0, 0, 1, 1], [], []>} : vector<1x128xbf16>, vector<128x128xbf16>, vector<1x128xf32> -> vector<1x128xf32>
    %28 = arith.addf %22, %27 : vector<1x128xf32>
    %c5 = arith.constant 5 : index
    %c0_34 = arith.constant 0 : index
    %c0_35 = arith.constant 0 : index
    %29 = vector.load %arg5[%c5, %c0_34, %c0_35] : memref<9x128x128xbf16, #tpu.memory_space<vmem>>, vector<1x128x128xbf16>
    %30 = vector.shape_cast %29 : vector<1x128x128xbf16> to vector<128x128xbf16>
    %c0_36 = arith.constant 0 : index
    %c0_37 = arith.constant 0 : index
    %c1_38 = arith.constant 1 : index
    %c0_39 = arith.constant 0 : index
    %31 = vector.load %arg3[%c0_36, %c0_37, %c1_38, %c0_39] : memref<1x2x2x128xbf16, #tpu.memory_space<vmem>>, vector<1x1x1x128xbf16>
    %32 = vector.shape_cast %31 : vector<1x1x1x128xbf16> to vector<1x128xbf16>
    %cst_40 = arith.constant dense<0.000000e+00> : vector<1x128xf32>
    %33 = tpu.matmul %32, %30, %cst_40 {dimension_numbers = #tpu.dot_dimension_numbers<[1], [0], [0], [1], [0, 0, 1, 1], [], []>} : vector<1x128xbf16>, vector<128x128xbf16>, vector<1x128xf32> -> vector<1x128xf32>
    %34 = arith.addf %28, %33 : vector<1x128xf32>
    %c6 = arith.constant 6 : index
    %c0_41 = arith.constant 0 : index
    %c0_42 = arith.constant 0 : index
    %35 = vector.load %arg5[%c6, %c0_41, %c0_42] : memref<9x128x128xbf16, #tpu.memory_space<vmem>>, vector<1x128x128xbf16>
    %36 = vector.shape_cast %35 : vector<1x128x128xbf16> to vector<128x128xbf16>
    %c0_43 = arith.constant 0 : index
    %c1_44 = arith.constant 1 : index
    %c0_45 = arith.constant 0 : index
    %c0_46 = arith.constant 0 : index
    %37 = vector.load %arg1[%c0_43, %c1_44, %c0_45, %c0_46] : memref<1x2x2x128xbf16, #tpu.memory_space<vmem>>, vector<1x1x1x128xbf16>
    %38 = vector.shape_cast %37 : vector<1x1x1x128xbf16> to vector<1x128xbf16>
    %cst_47 = arith.constant dense<0.000000e+00> : vector<1x128xf32>
    %39 = tpu.matmul %38, %36, %cst_47 {dimension_numbers = #tpu.dot_dimension_numbers<[1], [0], [0], [1], [0, 0, 1, 1], [], []>} : vector<1x128xbf16>, vector<128x128xbf16>, vector<1x128xf32> -> vector<1x128xf32>
    %40 = arith.addf %34, %39 : vector<1x128xf32>
    %c7 = arith.constant 7 : index
    %c0_48 = arith.constant 0 : index
    %c0_49 = arith.constant 0 : index
    %41 = vector.load %arg5[%c7, %c0_48, %c0_49] : memref<9x128x128xbf16, #tpu.memory_space<vmem>>, vector<1x128x128xbf16>
    %42 = vector.shape_cast %41 : vector<1x128x128xbf16> to vector<128x128xbf16>
    %c0_50 = arith.constant 0 : index
    %c1_51 = arith.constant 1 : index
    %c0_52 = arith.constant 0 : index
    %c0_53 = arith.constant 0 : index
    %43 = vector.load %arg2[%c0_50, %c1_51, %c0_52, %c0_53] : memref<1x2x2x128xbf16, #tpu.memory_space<vmem>>, vector<1x1x1x128xbf16>
    %44 = vector.shape_cast %43 : vector<1x1x1x128xbf16> to vector<1x128xbf16>
    %cst_54 = arith.constant dense<0.000000e+00> : vector<1x128xf32>
    %45 = tpu.matmul %44, %42, %cst_54 {dimension_numbers = #tpu.dot_dimension_numbers<[1], [0], [0], [1], [0, 0, 1, 1], [], []>} : vector<1x128xbf16>, vector<128x128xbf16>, vector<1x128xf32> -> vector<1x128xf32>
    %46 = arith.addf %40, %45 : vector<1x128xf32>
    %c8 = arith.constant 8 : index
    %c0_55 = arith.constant 0 : index
    %c0_56 = arith.constant 0 : index
    %47 = vector.load %arg5[%c8, %c0_55, %c0_56] : memref<9x128x128xbf16, #tpu.memory_space<vmem>>, vector<1x128x128xbf16>
    %48 = vector.shape_cast %47 : vector<1x128x128xbf16> to vector<128x128xbf16>
    %c0_57 = arith.constant 0 : index
    %c1_58 = arith.constant 1 : index
    %c1_59 = arith.constant 1 : index
    %c0_60 = arith.constant 0 : index
    %49 = vector.load %arg1[%c0_57, %c1_58, %c1_59, %c0_60] : memref<1x2x2x128xbf16, #tpu.memory_space<vmem>>, vector<1x1x1x128xbf16>
    %50 = vector.shape_cast %49 : vector<1x1x1x128xbf16> to vector<1x128xbf16>
    %cst_61 = arith.constant dense<0.000000e+00> : vector<1x128xf32>
    %51 = tpu.matmul %50, %48, %cst_61 {dimension_numbers = #tpu.dot_dimension_numbers<[1], [0], [0], [1], [0, 0, 1, 1], [], []>} : vector<1x128xbf16>, vector<128x128xbf16>, vector<1x128xf32> -> vector<1x128xf32>
    %52 = arith.addf %46, %51 : vector<1x128xf32>
    %c0_62 = arith.constant 0 : index
    %c0_63 = arith.constant 0 : index
    %53 = vector.load %arg6[%c0_62, %c0_63] : memref<1x128xf32, #tpu.memory_space<vmem>>, vector<1x128xf32>
    %c0_64 = arith.constant 0 : index
    %c0_65 = arith.constant 0 : index
    %54 = vector.load %arg7[%c0_64, %c0_65] : memref<1x128xf32, #tpu.memory_space<vmem>>, vector<1x128xf32>
    %55 = arith.mulf %52, %53 : vector<1x128xf32>
    %56 = arith.addf %55, %54 : vector<1x128xf32>
    %cst_66 = arith.constant 0.000000e+00 : f32
    %57 = vector.broadcast %cst_66 : f32 to vector<1x128xf32>
    %58 = arith.maximumf %56, %57 : vector<1x128xf32>
    %59 = arith.truncf %58 : vector<1x128xf32> to vector<1x128xbf16>
    %c0_67 = arith.constant 0 : index
    %c0_68 = arith.constant 0 : index
    %c0_69 = arith.constant 0 : index
    %c0_70 = arith.constant 0 : index
    %60 = vector.load %arg8[%c0_67, %c0_68, %c0_69, %c0_70] : memref<1x1x1x128xbf16, #tpu.memory_space<vmem>>, vector<1x1x1x128xbf16>
    %61 = vector.shape_cast %60 : vector<1x1x1x128xbf16> to vector<1x128xbf16>
    %62 = vector.shape_cast %59 : vector<1x128xbf16> to vector<1x1x1x128xbf16>
    tpu.vector_store %arg8[%c0_67, %c0_68, %c0_69, %c0_70], %62 {strides = array<i32>} : memref<1x1x1x128xbf16, #tpu.memory_space<vmem>>, vector<1x1x1x128xbf16>,
    return
  }
  func.func @transform_0(%arg0: i32) -> (i32, i32, i32, i32) {
    %c0_i32 = arith.constant 0 : i32
    %c0_i32_0 = arith.constant 0 : i32
    %c0_i32_1 = arith.constant 0 : i32
    %c0_i32_2 = arith.constant 0 : i32
    return %arg0, %c0_i32, %c0_i32_0, %c0_i32_1 : i32, i32, i32, i32
  }
  func.func @transform_1(%arg0: i32) -> (i32, i32, i32, i32) {
    %c0_i32 = arith.constant 0 : i32
    %c0_i32_0 = arith.constant 0 : i32
    %c0_i32_1 = arith.constant 0 : i32
    %c0_i32_2 = arith.constant 0 : i32
    return %arg0, %c0_i32, %c0_i32_0, %c0_i32_1 : i32, i32, i32, i32
  }
  func.func @transform_2(%arg0: i32) -> (i32, i32, i32, i32) {
    %c0_i32 = arith.constant 0 : i32
    %c0_i32_0 = arith.constant 0 : i32
    %c0_i32_1 = arith.constant 0 : i32
    %c0_i32_2 = arith.constant 0 : i32
    return %arg0, %c0_i32, %c0_i32_0, %c0_i32_1 : i32, i32, i32, i32
  }
  func.func @transform_3(%arg0: i32) -> (i32, i32, i32, i32) {
    %c0_i32 = arith.constant 0 : i32
    %c0_i32_0 = arith.constant 0 : i32
    %c0_i32_1 = arith.constant 0 : i32
    %c0_i32_2 = arith.constant 0 : i32
    return %arg0, %c0_i32, %c0_i32_0, %c0_i32_1 : i32, i32, i32, i32
  }
  func.func @transform_4(%arg0: i32) -> (i32, i32, i32) {
    %c0_i32 = arith.constant 0 : i32
    %c0_i32_0 = arith.constant 0 : i32
    %c0_i32_1 = arith.constant 0 : i32
    %c0_i32_2 = arith.constant 0 : i32
    return %c0_i32, %c0_i32_0, %c0_i32_1 : i32, i32, i32
  }
  func.func @transform_5(%arg0: i32) -> (i32, i32) {
    %c0_i32 = arith.constant 0 : i32
    %c0_i32_0 = arith.constant 0 : i32
    %c0_i32_1 = arith.constant 0 : i32
    return %c0_i32, %c0_i32_0 : i32, i32
  }
  func.func @transform_6(%arg0: i32) -> (i32, i32) {
    %c0_i32 = arith.constant 0 : i32
    %c0_i32_0 = arith.constant 0 : i32
    %c0_i32_1 = arith.constant 0 : i32
    return %c0_i32, %c0_i32_0 : i32, i32
  }
  func.func @transform_7(%arg0: i32) -> (i32, i32, i32, i32) {
    %c0_i32 = arith.constant 0 : i32
    %c0_i32_0 = arith.constant 0 : i32
    %c0_i32_1 = arith.constant 0 : i32
    %c0_i32_2 = arith.constant 0 : i32
    return %arg0, %c0_i32, %c0_i32_0, %c0_i32_1 : i32, i32, i32, i32
  }
}

</mosaic_0001>

<bundles_post_ra>
// kernel: _lambda_.15
= control target key start
LH: loop header
LB: loop body
LE: loop exit
PB: predicated region body
PF: predicated region fallthrough
CT: control target
= control target key end

     0   :  { %s965_s15 = smov 0   ;;  %s1340_s0 = inlined_call_operand.vmem [shape: bf16[2,9,9,128], index: 0, kind: input, shape index: {}]   ;;  %s1341_s1 = inlined_call_operand.vmem [shape: bf16[2,9,9,128], index: 1, kind: input, shape index: {}]   ;;  %s1342_s2 = inlined_call_operand.vmem [shape: bf16[2,9,9,128], index: 2, kind: input, shape index: {}]   ;;  %s1343_s3 = inlined_call_operand.vmem [shape: bf16[2,9,9,128], index: 3, kind: input, shape index: {}]   ;;  %s1344_s4 = inlined_call_operand.vmem [shape: bf16[2,8,8,128], index: 4, kind: output, shape index: {}]  }
   0x1 LB: > { %s858_s16 = sadd.s32 4294967295, %s938_s15   ;;  %p862_p0 = scmp.ge.s32.totalorder %s938_s15, 1  ;;  %s938_s15 = sphi %s965_s15, %s14_s15  }
   0x2   : > { %p192_p1 = scmp.lt.s32.totalorder %s938_s15, 3 }
   0x4   : > { %p193_p2 = pnand %p862_p0, %p192_p1 }
   0x5   : > { %p233_p3 = scmp.lt.s32.totalorder (!%p193_p2), %s858_s16, 1  ;;  %vm290_vm0 = vsmask.f32 (!%p193_p2), 3328  ;;  %vm291_vm1 = vsmask.f32 (!%p193_p2), 7440 }
   0x6   : > { %196 = sbr.rel (%p193_p2) target bundleno = 99 (0x63), region = 36  ;;  %vm1071_vm2 = vmor (!%p193_p2), %vm290_vm0, %vm291_vm1 }
   0xd   : > { %s1348_s16 = smov (!%p233_p3, %s858_s16), 1 }
   0xe   : > { %s976_s17 = smul.u32 72, %s1348_s16  ;;  %s895_s30 = sshll.u32 %s1348_s16, 5 }
   0xf   : > { %s257_s7 = scalar_lea.vmem %s1344_s4, %s895_s30 }
  0x10   : > { %s982_s20 = scalar_lea.vmem %s1341_s1, %s976_s17  ;;  %s988_s23 = scalar_lea.vmem %s1340_s0, %s976_s17 }
  0x11   : > { %v991_v0 = vld [vmem:[%s982_s20] sm:$0xf]  ;;  %v997_v2 = vld [vmem:[%s988_s23 + $0x8] sm:$0xf]  ;;  %v1000_v3 = vld [vmem:[%s988_s23 + $0x10] sm:$0xf]  ;;  %s1095_s26 = scalar_lea.vmem %s1342_s2, %s976_s17  ;;  %s1104_s29 = scalar_lea.vmem %s1343_s3, %s976_s17 }
  0x12   : > { %v994_v1 = vld [vmem:[%s988_s23] sm:$0xf]  ;;  %v1003_v4 = vld [vmem:[%s988_s23 + $0x18] sm:$0xf]  ;;  %v1006_v5 = vld [vmem:[%s982_s20 + $0x8] sm:$0xf] }
  0x13   : > { %v1009_v6 = vld [vmem:[%s982_s20 + $0x10] sm:$0xf]  ;;  %v1012_v7 = vld [vmem:[%s982_s20 + $0x18] sm:$0xf]  ;;  %v1015_v8 = vld [vmem:[%s988_s23 + $0x20] sm:$0xf]  ;;  %v274_v17 = vmax.bf16 %v991_v0, %v994_v1  ;;  %v275_v18 = vmax.bf16 %v1006_v5, %v997_v2 }
  0x14   : > { %v1018_v9 = vld [vmem:[%s982_s20 + $0x20] sm:$0xf]  ;;  %v1021_v10 = vld [vmem:[%s982_s20 + $0x28] sm:$0xf]  ;;  %v1024_v11 = vld [vmem:[%s982_s20 + $0x30] sm:$0xf]  ;;  %v276_v19 = vmax.bf16 %v1009_v6, %v1000_v3  ;;  %v277_v20 = vmax.bf16 %v1012_v7, %v1003_v4 }
  0x15   : > { %v1027_v12 = vld [vmem:[%s988_s23 + $0x28] sm:$0xf]  ;;  %v1030_v13 = vld [vmem:[%s982_s20 + $0x38] sm:$0xf]  ;;  %v282_v14 = vld [vmem:[%s988_s23 + $0x4] sm:$0x1]  ;;  %v278_v22 = vmax.bf16 %v1018_v9, %v1015_v8 }
  0x16   : > { %v1034_v15 = vld [vmem:[%s988_s23 + $0x30] sm:$0xf]  ;;  %v1037_v16 = vld [vmem:[%s988_s23 + $0x38] sm:$0xf]  ;;  %v283_v21 = vld [vmem:[%s988_s23 + $0xc] sm:$0x1]  ;;  %v279_v23 = vmax.bf16 %v1021_v10, %v1027_v12 }
  0x17   : > { %v280_v24 = vmax.bf16 %v1024_v11, %v1034_v15  ;;  %v281_v25 = vmax.bf16 %v1030_v13, %v1037_v16  ;;  %v294_v26 = vshrl.u32 %v994_v1, 16  ;;  %v297_v27 = vshll.u32 %v994_v1, 16  ;;  %v284_v30 = vld [vmem:[%s988_s23 + $0x14] sm:$0x1]  ;;  %v285_v35 = vld [vmem:[%s988_s23 + $0x1c] sm:$0x1] }
  0x18   : > { %v303_v28 = vshll.u32 %v282_v14, 16  ;;  %v308_v29 = vshrl.u32 %v997_v2, 16  ;;  %v311_v31 = vshll.u32 %v997_v2, 16  ;;  %v317_v32 = vshll.u32 %v283_v21, 16  ;;  %v286_v48 = vld [vmem:[%s988_s23 + $0x24] sm:$0x1] }
  0x19   : > { %v322_v33 = vshrl.u32 %v1000_v3, 16  ;;  %v325_v34 = vshll.u32 %v1000_v3, 16  ;;  %v296_v36 = vrot.slane %v294_v26, 4  ;;  %v299_v37 = vrot.slane %v297_v27, 5  ;;  %v287_v58 = vld [vmem:[%s988_s23 + $0x2c] sm:$0x1] }
  0x1a   : > { %v305_v38 = vrot.slane %v303_v28, 5  ;;  %v310_v39 = vrot.slane %v308_v29, 4  ;;  %v313_v40 = vrot.slane %v311_v31, 5  ;;  %v1064_v41 = vrot.slane %v317_v32, 5  ;;  %v288_v27 = vld [vmem:[%s988_s23 + $0x34] sm:$0x1] }
  0x1b   : > { %v324_v42 = vrot.slane %v322_v33, 4  ;;  %v327_v43 = vrot.slane %v325_v34, 5  ;;  %v300_v44 = vor.u32 %v299_v37, %v296_v36  ;;  %v331_v45 = vshll.u32 %v284_v30, 16  ;;  %v289_v36 = vld [vmem:[%s988_s23 + $0x3c] sm:$0x1] }
  0x1c   : > { %v336_v46 = vshrl.u32 %v1003_v4, 16  ;;  %v339_v47 = vshll.u32 %v1003_v4, 16  ;;  %v314_v50 = vor.u32 %v313_v40, %v310_v39  ;;  %v345_v52 = vshll.u32 %v285_v35, 16  ;;  %v1132_v5 = vld [vmem:[%s1095_s26 + $0x20] sm:$0xf] }
  0x1d   : > { %v328_v51 = vor.u32 %v327_v43, %v324_v42  ;;  %v350_v53 = vshrl.u32 %v1015_v8, 16  ;;  %v301_v54 = vrot.slane %v300_v44, 4  ;;  %v333_v55 = vrot.slane %v331_v45, 5  ;;  %v438_v6 = vld [vmem:[%s1104_s29 + $0x8] sm:$0xf] }
  0x1e   : > { %v338_v56 = vrot.slane %v336_v46, 4  ;;  %v341_v57 = vrot.slane %v339_v47, 5  ;;  %v315_v59 = vrot.slane %v314_v50, 4  ;;  %v347_v61 = vrot.slane %v345_v52, 5  ;;  %v439_v4 = vld [vmem:[%s1104_s29 + $0x10] sm:$0xf] }
  0x1f   : > { %v329_v60 = vrot.slane %v328_v51, 4  ;;  %v352_v62 = vrot.slane %v350_v53, 4  ;;  %v306_v63 = vsel %vm1071_vm2, %v301_v54, %v305_v38  ;;  %v353_v21 = vshll.u32 %v1015_v8, 16  ;;  %v440_v7 = vld [vmem:[%s1104_s29 + $0x18] sm:$0xf] }
  0x20   : > { %v342_v14 = vor.u32 %v341_v57, %v338_v56  ;;  %v359_v26 = vshll.u32 %v286_v48, 16  ;;  %v320_v28 = vsel %vm1071_vm2, %v315_v59, %v1064_v41  ;;  %v364_v30 = vshrl.u32 %v1027_v12, 16  ;;  %v441_v10 = vld [vmem:[%s1104_s29 + $0x20] sm:$0xf]  ;;  %v454_v11 = vld [vmem:[%s1095_s26 + $0xc] sm:$0x1] }
  0x21   : > { %v334_v29 = vsel %vm1071_vm2, %v329_v60, %v333_v55  ;;  %v367_v31 = vshll.u32 %v1027_v12, 16  ;;  %v355_v33 = vrot.slane %v353_v21, 5  ;;  %v373_v35 = vshll.u32 %v287_v58, 16  ;;  %v421_v58 = vld [vmem:[%s1095_s26] sm:$0xf] }
  0x22   : > { %v343_v32 = vrot.slane %v342_v14, 4  ;;  %v361_v34 = vrot.slane %v359_v26, 5  ;;  %v366_v37 = vrot.slane %v364_v30, 4  ;;  %v378_v39 = vshrl.u32 %v1034_v15, 16  ;;  %v422_v14 = vld [vmem:[%s1095_s26 + $0x8] sm:$0xf] }
  0x23   : > { %v369_v38 = vrot.slane %v367_v31, 5  ;;  %v381_v40 = vshll.u32 %v1034_v15, 16  ;;  %v356_v42 = vor.u32 %v355_v33, %v352_v62  ;;  %v375_v43 = vrot.slane %v373_v35, 5  ;;  %v1118_v21 = vld [vmem:[%s1095_s26 + $0x10] sm:$0xf] }
  0x24   : > { %v348_v41 = vsel %vm1071_vm2, %v343_v32, %v347_v61  ;;  %v387_v44 = vshll.u32 %v288_v27, 16  ;;  %v380_v46 = vrot.slane %v378_v39, 4  ;;  %v392_v48 = vshrl.u32 %v1037_v16, 16  ;;  %v1121_v26 = vld [vmem:[%s1095_s26 + $0x18] sm:$0xf] }
  0x25   : > { %v370_v45 = vor.u32 %v369_v38, %v366_v37  ;;  %v383_v47 = vrot.slane %v381_v40, 5  ;;  %v357_v50 = vrot.slane %v356_v42, 4  ;;  %v395_v52 = vshll.u32 %v1037_v16, 16  ;;  %v442_v12 = vld [vmem:[%s1104_s29 + $0x28] sm:$0xf] }
  0x26   : > { %v389_v51 = vrot.slane %v387_v44, 5  ;;  %v401_v53 = vshll.u32 %v289_v36, 16  ;;  %v394_v56 = vrot.slane %v392_v48, 4  ;;  %v413_v57 = vmax.bf16 %v306_v63, %v274_v17  ;;  %v453_v32 = vld [vmem:[%s1095_s26 + $0x4] sm:$0x1] }
  0x27   : > { %v371_v54 = vrot.slane %v370_v45, 4  ;;  %v384_v55 = vor.u32 %v383_v47, %v380_v46  ;;  %v362_v59 = vsel %vm1071_vm2, %v357_v50, %v361_v34  ;;  %v397_v60 = vrot.slane %v395_v52, 5  ;;  %v1160_v33 = vld [vmem:[%s1095_s26 + $0x30] sm:$0xf]  ;;  %v455_v48 = vld [vmem:[%s1095_s26 + $0x14] sm:$0x1] }
  0x28   : > { %v403_v61 = vrot.slane %v401_v53, 5  ;;  %v414_v62 = vmax.bf16 %v320_v28, %v275_v18  ;;  %v415_v17 = vmax.bf16 %v334_v29, %v276_v19  ;;  %v416_v2 = vmax.bf16 %v348_v41, %v277_v20  ;;  %v437_v18 = vld [vmem:[%s1104_s29] sm:$0xf]  ;;  %v1147_v20 = vld [vmem:[%s1095_s26 + $0x28] sm:$0xf] }
  0x29   : > { %v376_v0 = vsel %vm1071_vm2, %v371_v54, %v375_v43  ;;  %v385_v1 = vrot.slane %v384_v55, 4  ;;  %v398_v63 = vor.u32 %v397_v60, %v394_v56  ;;  %v417_v27 = vmax.bf16 %v362_v59, %v278_v22  ;;  %v443_v34 = vld [vmem:[%s1104_s29 + $0x30] sm:$0xf]  ;;  %v444_v43 = vld [vmem:[%s1104_s29 + $0x38] sm:$0xf] }
  0x2a   : > { %v418_v28 = vmax.bf16 %v376_v0, %v279_v23  ;;  %v429_v3 = vmax.bf16 %v421_v58, %v413_v57  ;;  %v430_v29 = vmax.bf16 %v422_v14, %v414_v62  ;;  %v431_v8 = vmax.bf16 %v1118_v21, %v415_v17  ;;  %v456_v57 = vld [vmem:[%s1095_s26 + $0x1c] sm:$0x1] }
  0x2b   : > { %v390_v19 = vsel %vm1071_vm2, %v385_v1, %v389_v51  ;;  %v432_v9 = vmax.bf16 %v1121_v26, %v416_v2  ;;  %v399_v22 = vrot.slane %v398_v63, 4  ;;  %v433_v30 = vmax.bf16 %v1132_v5, %v417_v27  ;;  %v457_v2 = vld [vmem:[%s1095_s26 + $0x24] sm:$0x1] }
  0x2c   : > { %v419_v23 = vmax.bf16 %v390_v19, %v280_v24  ;;  %v434_v31 = vmax.bf16 %v1147_v20, %v418_v28  ;;  %v1163_v35 = vmax.bf16 %v437_v18, %v429_v3  ;;  %v1165_v36 = vmax.bf16 %v438_v6, %v430_v29  ;;  %v1175_v24 = vld [vmem:[%s1095_s26 + $0x38] sm:$0xf]  ;;  %v458_v19 = vld [vmem:[%s1095_s26 + $0x2c] sm:$0x1] }
  0x2d   : > { %v1167_v37 = vmax.bf16 %v439_v4, %v431_v8  ;;  %v1169_v38 = vmax.bf16 %v440_v7, %v432_v9  ;;  %v404_v15 = vsel %vm1071_vm2, %v399_v22, %v403_v61  ;;  %v1178_v40 = vmax.bf16 %v441_v10, %v433_v30 }
  0x2e   : > { %v435_v39 = vmax.bf16 %v1160_v33, %v419_v23  ;;  %v1180_v41 = vmax.bf16 %v442_v12, %v434_v31  ;;  %v420_v42 = vmax.bf16 %v404_v15, %v281_v25  ;;  %v462_v44 = vshrl.u32 %v421_v58, 16 }
  0x2f   : > { %v465_v45 = vshll.u32 %v421_v58, 16  ;;  %v471_v46 = vshll.u32 %v453_v32, 16  ;;  %v476_v50 = vshrl.u32 %v422_v14, 16  ;;  %v479_v51 = vshll.u32 %v422_v14, 16 }
  0x30   : > { %v1186_v47 = vmax.bf16 %v443_v34, %v435_v39  ;;  %v485_v52 = vshll.u32 %v454_v11, 16  ;;  %v436_v53 = vmax.bf16 %v1175_v24, %v420_v42  ;;  %v464_v54 = vrot.slane %v462_v44, 4  ;;  %v459_v34 = vld [vmem:[%s1095_s26 + $0x34] sm:$0x1] }
  0x31   : > { %v467_v55 = vrot.slane %v465_v45, 5  ;;  %v473_v56 = vrot.slane %v471_v46, 5  ;;  %v478_v59 = vrot.slane %v476_v50, 4  ;;  %v481_v13 = vrot.slane %v479_v51, 5 }
  0x32   : > { %v1191_v16 = vrot.slane %v485_v52, 5  ;;  %v490_v25 = vshrl.u32 %v1118_v21, 16  ;;  %v1194_v58 = vmax.bf16 %v444_v43, %v436_v53  ;;  %v493_v61 = vshll.u32 %v1118_v21, 16 }
  0x33   : > { %v468_v60 = vor.u32 %v467_v55, %v464_v54  ;;  %v499_v62 = vshll.u32 %v455_v48, 16  ;;  %v482_v14 = vor.u32 %v481_v13, %v478_v59  ;;  %v504_v1 = vshrl.u32 %v1121_v26, 16 }
  0x34   : > { %v492_v0 = vrot.slane %v490_v25, 4  ;;  %v507_v17 = vshll.u32 %v1121_v26, 16  ;;  %v495_v63 = vrot.slane %v493_v61, 5  ;;  %v513_v28 = vshll.u32 %v456_v57, 16  ;;  %v869_v61 = vld [vmem:[%s988_s23 + $0x8] sm:$0xf] }
  0x35   : > { %v469_v18 = vrot.slane %v468_v60, 4  ;;  %v501_v27 = vrot.slane %v499_v62, 5  ;;  %v483_v3 = vrot.slane %v482_v14, 4  ;;  %v506_v6 = vrot.slane %v504_v1, 4  ;;  %v870_v1 = vld [vmem:[%s988_s23 + $0x10] sm:$0xf] }
  0x36   : > { %v509_v4 = vrot.slane %v507_v17, 5  ;;  %v518_v7 = vshrl.u32 %v1132_v5, 16  ;;  %v496_v29 = vor.u32 %v495_v63, %v492_v0  ;;  %v515_v8 = vrot.slane %v513_v28, 5  ;;  %v1238_v28 = vld [vmem:[%s988_s23 + $0x28] sm:$0xf] }
  0x37   : > { %v474_v21 = vsel %vm1071_vm2, %v469_v18, %v473_v56  ;;  %v521_v26 = vshll.u32 %v1132_v5, 16  ;;  %v488_v9 = vsel %vm1071_vm2, %v483_v3, %v1191_v16  ;;  %v527_v22 = vshll.u32 %v457_v2, 16  ;;  %v460_v5 = vld [vmem:[%s1095_s26 + $0x3c] sm:$0x1] }
  0x38   : > { %v510_v10 = vor.u32 %v509_v4, %v506_v6  ;;  %v520_v12 = vrot.slane %v518_v7, 4  ;;  %v497_v23 = vrot.slane %v496_v29, 4  ;;  %v532_v31 = vshrl.u32 %v1147_v20, 16 }
  0x39   : > { %v523_v30 = vrot.slane %v521_v26, 5  ;;  %v535_v32 = vshll.u32 %v1147_v20, 16  ;;  %v529_v15 = vrot.slane %v527_v22, 5  ;;  %v541_v39 = vshll.u32 %v458_v19, 16  ;;  %v878_v19 = vld [vmem:[%s982_s20 + $0x10] sm:$0xf] }
  0x3a   : > { %v511_v11 = vrot.slane %v510_v10, 4  ;;  %v546_v42 = vshrl.u32 %v1160_v33, 16  ;;  %v502_v43 = vsel %vm1071_vm2, %v497_v23, %v501_v27  ;;  %v534_v45 = vrot.slane %v532_v31, 4  ;;  %v1235_v27 = vld [vmem:[%s988_s23 + $0x20] sm:$0xf] }
  0x3b   : > { %v524_v44 = vor.u32 %v523_v30, %v520_v12  ;;  %v537_v46 = vrot.slane %v535_v32, 5  ;;  %v543_v50 = vrot.slane %v541_v39, 5  ;;  %v549_v20 = vshll.u32 %v1160_v33, 16  ;;  %v880_v26 = vld [vmem:[%s982_s20 + $0x20] sm:$0xf] }
  0x3c   : > { %v516_v48 = vsel %vm1071_vm2, %v511_v11, %v515_v8  ;;  %v548_v51 = vrot.slane %v546_v42, 4  ;;  %v555_v54 = vshll.u32 %v459_v34, 16  ;;  %v560_v55 = vshrl.u32 %v1175_v24, 16  ;;  %v885_v22 = vld [vmem:[%s988_s23 + $0xc] sm:$0x1] }
  0x3d   : > { %v525_v52 = vrot.slane %v524_v44, 4  ;;  %v538_v53 = vor.u32 %v537_v46, %v534_v45  ;;  %v551_v56 = vrot.slane %v549_v20, 5  ;;  %v563_v57 = vshll.u32 %v1175_v24, 16  ;;  %v1258_v30 = vld [vmem:[%s988_s23 + $0x38] sm:$0xf] }
  0x3e   : > { %v569_v59 = vshll.u32 %v460_v5, 16  ;;  %v581_v13 = vmax.bf16 %v474_v21, %v1163_v35  ;;  %v557_v33 = vrot.slane %v555_v54, 5  ;;  %v562_v60 = vrot.slane %v560_v55, 4  ;;  %v1227_v35 = vld [vmem:[%s988_s23 + $0x18] sm:$0xf] }
  0x3f   : > { %v530_v16 = vsel %vm1071_vm2, %v525_v52, %v529_v15  ;;  %v539_v25 = vrot.slane %v538_v53, 4  ;;  %v552_v62 = vor.u32 %v551_v56, %v548_v51  ;;  %v565_v14 = vrot.slane %v563_v57, 5  ;;  %v1245_v21 = vld [vmem:[%s988_s23 + $0x30] sm:$0xf]  ;;  %v886_v11 = vld [vmem:[%s988_s23 + $0x14] sm:$0x1] }
  0x40   : > { %v571_v0 = vrot.slane %v569_v59, 5  ;;  %v582_v24 = vmax.bf16 %v488_v9, %v1165_v36  ;;  %v583_v2 = vmax.bf16 %v502_v43, %v1167_v37  ;;  %v584_v18 = vmax.bf16 %v516_v48, %v1169_v38  ;;  %v877_v36 = vld [vmem:[%s982_s20 + $0x8] sm:$0xf]  ;;  %v879_v37 = vld [vmem:[%s982_s20 + $0x18] sm:$0xf] }
  0x41   : > { %v544_v17 = vsel %vm1071_vm2, %v539_v25, %v543_v50  ;;  %v585_v63 = vmax.bf16 %v530_v16, %v1178_v40  ;;  %v553_v3 = vrot.slane %v552_v62, 4  ;;  %v566_v6 = vor.u32 %v565_v14, %v562_v60  ;;  %v881_v9 = vld [vmem:[%s982_s20 + $0x28] sm:$0xf]  ;;  %v882_v39 = vld [vmem:[%s982_s20 + $0x30] sm:$0xf] }
  0x42   : > { %v586_v4 = vmax.bf16 %v544_v17, %v1180_v41  ;;  %v598_v7 = vmax.bf16 %v869_v61, %v581_v13  ;;  %v599_v38 = vmax.bf16 %v870_v1, %v582_v24  ;;  %v600_v40 = vmax.bf16 %v1227_v35, %v583_v2  ;;  %v883_v42 = vld [vmem:[%s982_s20 + $0x38] sm:$0xf]  ;;  %v1279_v45 = vld [vmem:[%s988_s23 + $0x40] sm:$0xf]  ;;  %v887_v51 = vld [vmem:[%s988_s23 + $0x1c] sm:$0x1] }
  0x43   : > { %v601_v29 = vmax.bf16 %v1235_v27, %v584_v18  ;;  %v602_v8 = vmax.bf16 %v1238_v28, %v585_v63  ;;  %v558_v41 = vsel %vm1071_vm2, %v553_v3, %v557_v33  ;;  %v567_v10 = vrot.slane %v566_v6, 4  ;;  %v888_v59 = vld [vmem:[%s988_s23 + $0x24] sm:$0x1]  ;;  %v889_v2 = vld [vmem:[%s988_s23 + $0x2c] sm:$0x1] }
  0x44   : > { %v603_v12 = vmax.bf16 %v1245_v21, %v586_v4  ;;  %v587_v23 = vmax.bf16 %v558_v41, %v1186_v47  ;;  %v1260_v31 = vmax.bf16 %v877_v36, %v598_v7  ;;  %v1262_v32 = vmax.bf16 %v878_v19, %v599_v38 }
  0x45   : > { %v1264_v34 = vmax.bf16 %v879_v37, %v600_v40  ;;  %v572_v15 = vsel %vm1071_vm2, %v567_v10, %v571_v0  ;;  %v1271_v5 = vmax.bf16 %v880_v26, %v601_v29  ;;  %v1273_v43 = vmax.bf16 %v881_v9, %v602_v8  ;;  %v890_v37 = vld [vmem:[%s988_s23 + $0x34] sm:$0x1] }
  0x46   : > { %v632_v47 = vshrl.u32 %v869_v61, 16  ;;  %v1276_v44 = vmax.bf16 %v572_v15, %v1194_v58  ;;  %v604_v46 = vmax.bf16 %v1258_v30, %v587_v23  ;;  %v635_v48 = vshll.u32 %v869_v61, 16  ;;  %v891_v23 = vld [vmem:[%s988_s23 + $0x3c] sm:$0x1] }
  0x47   : > { %v641_v50 = vshll.u32 %v885_v22, 16  ;;  %v646_v52 = vshrl.u32 %v870_v1, 16  ;;  %v649_v53 = vshll.u32 %v870_v1, 16  ;;  %v655_v54 = vshll.u32 %v886_v11, 16 }
  0x48   : > { %v634_v20 = vrot.slane %v632_v47, 4  ;;  %v605_v55 = vmax.bf16 %v1279_v45, %v1276_v44  ;;  %v1285_v56 = vmax.bf16 %v882_v39, %v603_v12  ;;  %v1287_v57 = vmax.bf16 %v883_v42, %v604_v46 }
  0x49   : > { %v637_v58 = vrot.slane %v635_v48, 5  ;;  %v643_v13 = vrot.slane %v641_v50, 5  ;;  %v648_v16 = vrot.slane %v646_v52, 4  ;;  %v651_v25 = vrot.slane %v649_v53, 5 }
  0x4a   : > { %v660_v33 = vshrl.u32 %v1227_v35, 16  ;;  %v657_v61 = vrot.slane %v655_v54, 5  ;;  %v663_v62 = vshll.u32 %v1227_v35, 16  ;;  %v669_v14 = vshll.u32 %v887_v51, 16 }
  0x4b   : > { %v638_v60 = vor.u32 %v637_v58, %v634_v20  ;;  %v652_v0 = vor.u32 %v651_v25, %v648_v16  ;;  %v674_v1 = vshrl.u32 %v1235_v27, 16  ;;  %v677_v17 = vshll.u32 %v1235_v27, 16 }
  0x4c   : > { %v662_v24 = vrot.slane %v660_v33, 4  ;;  %v665_v63 = vrot.slane %v663_v62, 5  ;;  %v671_v36 = vrot.slane %v669_v14, 5  ;;  %v683_v3 = vshll.u32 %v888_v59, 16 }
  0x4d   : > { %v639_v18 = vrot.slane %v638_v60, 4  ;;  %v653_v6 = vrot.slane %v652_v0, 4  ;;  %v676_v4 = vrot.slane %v674_v1, 4  ;;  %v679_v7 = vrot.slane %v677_v17, 5  ;;  %v884_v0 = vld [vmem:[%s982_s20 + $0x40] sm:$0xf] }
  0x4e   : > { %v688_v19 = vshrl.u32 %v1238_v28, 16  ;;  %v666_v38 = vor.u32 %v665_v63, %v662_v24  ;;  %v685_v40 = vrot.slane %v683_v3, 5  ;;  %v691_v27 = vshll.u32 %v1238_v28, 16  ;;  %v892_v28 = vld [vmem:[%s988_s23 + $0x44] sm:$0x1] }
  0x4f   : > { %v644_v35 = vsel %vm1071_vm2, %v639_v18, %v643_v13  ;;  %v658_v29 = vsel %vm1071_vm2, %v653_v6, %v657_v61  ;;  %v680_v8 = vor.u32 %v679_v7, %v676_v4  ;;  %v697_v9 = vshll.u32 %v889_v2, 16 }
  0x50   : > { %v690_v26 = vrot.slane %v688_v19, 4  ;;  %v667_v41 = vrot.slane %v666_v38, 4  ;;  %v693_v10 = vrot.slane %v691_v27, 5  ;;  %v702_v12 = vshrl.u32 %v1245_v21, 16 }
  0x51   : > { %v705_v22 = vshll.u32 %v1245_v21, 16  ;;  %v681_v11 = vrot.slane %v680_v8, 4  ;;  %v699_v15 = vrot.slane %v697_v9, 5  ;;  %v711_v39 = vshll.u32 %v890_v37, 16 }
  0x52   : > { %v716_v42 = vshrl.u32 %v1258_v30, 16  ;;  %v672_v47 = vsel %vm1071_vm2, %v667_v41, %v671_v36  ;;  %v694_v46 = vor.u32 %v693_v10, %v690_v26  ;;  %v704_v48 = vrot.slane %v702_v12, 4 }
  0x53   : > { %v707_v50 = vrot.slane %v705_v22, 5  ;;  %v686_v51 = vsel %vm1071_vm2, %v681_v11, %v685_v40  ;;  %v713_v20 = vrot.slane %v711_v39, 5  ;;  %v719_v52 = vshll.u32 %v1258_v30, 16 }
  0x54   : > { %v718_v21 = vrot.slane %v716_v42, 4  ;;  %v695_v53 = vrot.slane %v694_v46, 4  ;;  %v725_v58 = vshll.u32 %v891_v23, 16  ;;  %v730_v59 = vshrl.u32 %v1279_v45, 16 }
  0x55   : > { %v708_v54 = vor.u32 %v707_v50, %v704_v48  ;;  %v721_v13 = vrot.slane %v719_v52, 5  ;;  %v733_v16 = vshll.u32 %v1279_v45, 16  ;;  %v739_v25 = vshll.u32 %v892_v28, 16 }
  0x56   : > { %v751_v33 = vmax.bf16 %v644_v35, %v1260_v31  ;;  %v700_v60 = vsel %vm1071_vm2, %v695_v53, %v699_v15  ;;  %v727_v62 = vrot.slane %v725_v58, 5  ;;  %v732_v14 = vrot.slane %v730_v59, 4 }
  0x57   : > { %v709_v61 = vrot.slane %v708_v54, 4  ;;  %v722_v30 = vor.u32 %v721_v13, %v718_v21  ;;  %v735_v24 = vrot.slane %v733_v16, 5  ;;  %v741_v1 = vrot.slane %v739_v25, 5 }
  0x58   : > { %v752_v17 = vmax.bf16 %v658_v29, %v1262_v32  ;;  %v753_v31 = vmax.bf16 %v672_v47, %v1264_v34  ;;  %v754_v18 = vmax.bf16 %v686_v51, %v1271_v5  ;;  %v755_v63 = vmax.bf16 %v700_v60, %v1273_v43 }
  0x59   : > { %v714_v2 = vsel %vm1071_vm2, %v709_v61, %v713_v20  ;;  %v723_v36 = vrot.slane %v722_v30, 4  ;;  %v736_v3 = vor.u32 %v735_v24, %v732_v14  ;;  %v622_v32 = vmax.bf16 %v884_v0, %v605_v55 }
  0x5a   : > { %v756_v6 = vmax.bf16 %v714_v2, %v1285_v56  ;;  %v916_v4 = vcombine.low %v751_v33, %v752_v17  ;;  %v917_v7 = vcombine.low %v753_v31, %v754_v18 }
  0x5b   : > { %v728_v19 = vsel %vm1071_vm2, %v723_v36, %v727_v62  ;;  %v737_v37 = vrot.slane %v736_v3, 4 }
  0x5c   : > { %900 = vst [vmem:[%s257_s7] sm:$0xff] %v916_v4   ;;  %v919_v34 = vcombine.low %v755_v63, %v756_v6  ;;  %v757_v5 = vmax.bf16 %v728_v19, %v1287_v57  ;;  %918 = vst [vmem:[%s257_s7 + $0x8] sm:$0xff] %v917_v7  }
  0x5d   : > { %v742_v43 = vsel %vm1071_vm2, %v737_v37, %v741_v1 }
  0x5e   : > { %920 = vst [vmem:[%s257_s7 + $0x10] sm:$0xff] %v919_v34   ;;  %v758_v56 = vmax.bf16 %v742_v43, %v622_v32 }
  0x60   : > { %v921_v35 = vcombine.low %v757_v5, %v758_v56 }
  0x62   : > { %922 = vst [vmem:[%s257_s7 + $0x18] sm:$0xff] %v921_v35  }
  0x63 PF: > { %s14_s15 = sadd.s32 1, %s938_s15  }
  0x64   : > { %p11_p4 = scmp.ge.s32.totalorder %s14_s15, 4  }
  0x66   :  { %13 = sbr.rel (!%p11_p4) target bundleno = 1 (0x1), region = 77 }

// kernel: _lambda_.16
= control target key start
LH: loop header
LB: loop body
LE: loop exit
PB: predicated region body
PF: predicated region fallthrough
CT: control target
= control target key end

     0   :  { %s687_s1 = inlined_call_operand.vmem [shape: bf16[128,128], index: 1, kind: input, shape index: {}]   ;;  %s688_s0 = inlined_call_operand.vmem [shape: bf16[128,128], index: 0, kind: input, shape index: {}]   ;;  %s689_s2 = inlined_call_operand.vmem [shape: f32[1,128], index: 2, kind: input, shape index: {}]   ;;  %s690_s3 = inlined_call_operand.vmem [shape: f32[1,128], index: 3, kind: input, shape index: {}]   ;;  %s691_s4 = inlined_call_operand.vmem [shape: bf16[128,128], index: 4, kind: output, shape index: {}]  }
   0x1   :  { %v550_v0 = vld [vmem:[%s687_s1] sm:$0xff]   ;;  %v551_v1 = vld [vmem:[%s687_s1 + $0x8] sm:$0xff]   ;;  %v552_v2 = vld [vmem:[%s687_s1 + $0x10] sm:$0xff]  }
   0x2   :  { %502 = vmatprep.subr.bf16.mxu0 %v550_v0  ;;  %534 = vmatprep.subr.bf16.mxu1 %v550_v0  ;;  %v553_v3 = vld [vmem:[%s687_s1 + $0x18] sm:$0xff]   ;;  %v558_v4 = vld [vmem:[%s688_s0] sm:$0xff]   ;;  %v555_v7 = vld [vmem:[%s687_s1 + $0x28] sm:$0xff]  }
   0x3   :  { %503 = vmatpush3.bf16.msra.mxu0 %v550_v0  ;;  %542 = vmatpush3.bf16.msra.mxu1 %v550_v0  ;;  %v559_v5 = vld [vmem:[%s688_s0 + $0x20] sm:$0xff]   ;;  %v556_v8 = vld [vmem:[%s687_s1 + $0x30] sm:$0xff]   ;;  %v557_v9 = vld [vmem:[%s687_s1 + $0x38] sm:$0xff]  }
   0x4   :  { %504 = vmatprep.subr.bf16.mxu0 %v551_v1  ;;  %535 = vmatprep.subr.bf16.mxu1 %v551_v1  ;;  %v554_v6 = vld [vmem:[%s687_s1 + $0x20] sm:$0xff]   ;;  %v560_v10 = vld [vmem:[%s688_s0 + $0x8] sm:$0xff]   ;;  %v562_v12 = vld [vmem:[%s688_s0 + $0x10] sm:$0xff]  }
   0x5   :  { %518 = vmatprep.mubr.bf16.mxu0 %v558_v4  ;;  %526 = vmatprep.mubr.bf16.mxu1 %v559_v5  ;;  %v561_v11 = vld [vmem:[%s688_s0 + $0x28] sm:$0xff]   ;;  %v563_v13 = vld [vmem:[%s688_s0 + $0x30] sm:$0xff]   ;;  %v564_v14 = vld [vmem:[%s688_s0 + $0x18] sm:$0xff]  }
   0x6   :  { %v565_v15 = vld [vmem:[%s688_s0 + $0x38] sm:$0xff]   ;;  %v405_v16 = vld [vmem:[%s689_s2] ss:$0 sm:$0xff] }
   0x7   :  { %505 = vmatpush3.bf16.msra.mxu0 %v551_v1  ;;  %543 = vmatpush3.bf16.msra.mxu1 %v551_v1  ;;  %v645_v18 = vld [vmem:[%s690_s3] ss:$0 sm:$0xff] }
   0x8   :  { %506 = vmatprep.subr.bf16.mxu0 %v552_v2  ;;  %536 = vmatprep.subr.bf16.mxu1 %v552_v2 }
   0xb   :  { %507 = vmatpush3.bf16.msra.mxu0 %v552_v2  ;;  %544 = vmatpush3.bf16.msra.mxu1 %v552_v2 }
   0xc   :  { %508 = vmatprep.subr.bf16.mxu0 %v553_v3  ;;  %537 = vmatprep.subr.bf16.mxu1 %v553_v3 }
   0xf   :  { %509 = vmatpush3.bf16.msra.mxu0 %v553_v3  ;;  %545 = vmatpush3.bf16.msra.mxu1 %v553_v3 }
  0x10   :  { %510 = vmatprep.subr.bf16.mxu0 %v554_v6  ;;  %538 = vmatprep.subr.bf16.mxu1 %v554_v6 }
  0x13   :  { %511 = vmatpush3.bf16.msra.mxu0 %v554_v6  ;;  %546 = vmatpush3.bf16.msra.mxu1 %v554_v6 }
  0x14   :  { %512 = vmatprep.subr.bf16.mxu0 %v555_v7  ;;  %539 = vmatprep.subr.bf16.mxu1 %v555_v7 }
  0x17   :  { %513 = vmatpush3.bf16.msra.mxu0 %v555_v7  ;;  %547 = vmatpush3.bf16.msra.mxu1 %v555_v7 }
  0x18   :  { %514 = vmatprep.subr.bf16.mxu0 %v556_v8  ;;  %540 = vmatprep.subr.bf16.mxu1 %v556_v8 }
  0x1b   :  { %515 = vmatpush3.bf16.msra.mxu0 %v556_v8  ;;  %548 = vmatpush3.bf16.msra.mxu1 %v556_v8 }
  0x1c   :  { %516 = vmatprep.subr.bf16.mxu0 %v557_v9  ;;  %541 = vmatprep.subr.bf16.mxu1 %v557_v9 }
  0x1f   :  { %517 = vmatpush3.bf16.msra.mxu0 %v557_v9  ;;  %549 = vmatpush3.bf16.msra.mxu1 %v557_v9 }
  0x22   :  { %519 = vmatmul.mubr.bf16.vlgmr.msra.gmra.mrb[0].mxu0 %v560_v10  ;;  %527 = vmatmul.mubr.bf16.vlgmr.msra.gmra.mrb[0].mxu1 %v561_v11 }
  0x23   :  { %522 = vmatprep.mubr.bf16.mxu0 %v562_v12  ;;  %530 = vmatprep.mubr.bf16.mxu1 %v563_v13 }
  0x2a   :  { %523 = vmatmul.mubr.bf16.gmra.mrb[4].mxu0 %v564_v14  ;;  %531 = vmatmul.mubr.bf16.gmra.mrb[4].mxu1 %v565_v15 }
  0xf5   :  { %v520_v17 = vpop.f32.mrb[0].mxu0  ;;  %v528_v19 = vpop.f32.mrb[0].mxu1 }
  0xf6   :  { %v252_v20 = vmul.f32 %v520_v17, %v405_v16  ;;  %v260_v21 = vmul.f32 %v528_v19, %v405_v16  ;;  %v180_v22 = vpop.f32.mrb[1].mxu0  ;;  %v212_v23 = vpop.f32.mrb[1].mxu1 }
  0xf7   :  { %v250_v24 = vmul.f32 %v405_v16, %v180_v22  ;;  %v258_v25 = vmul.f32 %v405_v16, %v212_v23  ;;  %v521_v26 = vpop.f32.mrb[2].mxu0  ;;  %v529_v27 = vpop.f32.mrb[2].mxu1 }
  0xf8   :  { %v275_v28 = vadd.f32 %v645_v18, %v252_v20  ;;  %v283_v29 = vadd.f32 %v645_v18, %v260_v21  ;;  %v253_v30 = vmul.f32 %v521_v26, %v405_v16  ;;  %v261_v31 = vmul.f32 %v529_v27, %v405_v16  ;;  %v183_v32 = vpop.f32.mrb[3].mxu0  ;;  %v215_v33 = vpop.f32.mrb[3].mxu1 }
  0xf9   :  { %v273_v34 = vadd.f32 %v645_v18, %v250_v24  ;;  %v281_v35 = vadd.f32 %v645_v18, %v258_v25  ;;  %v251_v36 = vmul.f32 %v405_v16, %v183_v32  ;;  %v259_v37 = vmul.f32 %v405_v16, %v215_v33 }
  0xfa   :  { %v276_v38 = vadd.f32 %v645_v18, %v253_v30  ;;  %v284_v39 = vadd.f32 %v645_v18, %v261_v31  ;;  %v291_v42 = vmax.f32 %v275_v28, 0.0  ;;  %v299_v43 = vmax.f32 %v283_v29, 0.0 }
  0xfb   :  { %v274_v40 = vadd.f32 %v645_v18, %v251_v36  ;;  %v282_v41 = vadd.f32 %v645_v18, %v259_v37  ;;  %v289_v46 = vmax.f32 %v273_v34, 0.0  ;;  %v297_v47 = vmax.f32 %v281_v35, 0.0 }
  0xfc   :  { %v292_v44 = vmax.f32 %v276_v38, 0.0  ;;  %v300_v45 = vmax.f32 %v284_v39, 0.0 }
  0xfd   :  { %v290_v48 = vmax.f32 %v274_v40, 0.0  ;;  %v298_v49 = vmax.f32 %v282_v41, 0.0  ;;  %v524_v50 = vpop.f32.mrb[4].mxu0  ;;  %v532_v51 = vpop.f32.mrb[4].mxu1 }
  0xfe   :  { %v447_v52 = vpack.c.bf16 %v292_v44, %v291_v42  ;;  %v467_v53 = vpack.c.bf16 %v300_v45, %v299_v43  ;;  %v256_v54 = vmul.f32 %v524_v50, %v405_v16  ;;  %v264_v55 = vmul.f32 %v532_v51, %v405_v16  ;;  %v196_v56 = vpop.f32.mrb[5].mxu0  ;;  %v228_v57 = vpop.f32.mrb[5].mxu1 }
  0xff   :  { %v442_v58 = vpack.c.bf16 %v290_v48, %v289_v46  ;;  %v462_v59 = vpack.c.bf16 %v298_v49, %v297_v47  ;;  %v254_v60 = vmul.f32 %v405_v16, %v196_v56  ;;  %v262_v61 = vmul.f32 %v405_v16, %v228_v57  ;;  %v525_v62 = vpop.f32.mrb[6].mxu0  ;;  %v533_v63 = vpop.f32.mrb[6].mxu1 }
 0x100   :  { %479 = vst [vmem:[%s691_s4 + $0x8] sm:$0xff] %v447_v52   ;;  %483 = vst [vmem:[%s691_s4 + $0x28] sm:$0xff] %v467_v53   ;;  %v279_v0 = vadd.f32 %v645_v18, %v256_v54  ;;  %v287_v1 = vadd.f32 %v645_v18, %v264_v55  ;;  %v257_v2 = vmul.f32 %v525_v62, %v405_v16  ;;  %v199_v4 = vpop.f32.mrb[7].mxu0  ;;  %v231_v5 = vpop.f32.mrb[7].mxu1 }
 0x101   :  { %v265_v3 = vmul.f32 %v533_v63, %v405_v16  ;;  %443 = vst [vmem:[%s691_s4] sm:$0xff] %v442_v58   ;;  %482 = vst [vmem:[%s691_s4 + $0x20] sm:$0xff] %v462_v59   ;;  %v277_v6 = vadd.f32 %v645_v18, %v254_v60  ;;  %v285_v7 = vadd.f32 %v645_v18, %v262_v61 }
 0x102   :  { %v255_v8 = vmul.f32 %v405_v16, %v199_v4  ;;  %v263_v9 = vmul.f32 %v405_v16, %v231_v5  ;;  %v280_v10 = vadd.f32 %v645_v18, %v257_v2  ;;  %v295_v14 = vmax.f32 %v279_v0, 0.0 }
 0x103   :  { %v288_v11 = vadd.f32 %v645_v18, %v265_v3  ;;  %v303_v15 = vmax.f32 %v287_v1, 0.0  ;;  %v293_v20 = vmax.f32 %v277_v6, 0.0  ;;  %v301_v21 = vmax.f32 %v285_v7, 0.0 }
 0x104   :  { %v278_v12 = vadd.f32 %v645_v18, %v255_v8  ;;  %v286_v13 = vadd.f32 %v645_v18, %v263_v9  ;;  %v296_v17 = vmax.f32 %v280_v10, 0.0 }
 0x105   :  { %v304_v19 = vmax.f32 %v288_v11, 0.0 }
 0x106   :  { %v294_v22 = vmax.f32 %v278_v12, 0.0  ;;  %v302_v23 = vmax.f32 %v286_v13, 0.0  ;;  %v457_v24 = vpack.c.bf16 %v296_v17, %v295_v14 }
 0x107   :  { %v477_v25 = vpack.c.bf16 %v304_v19, %v303_v15 }
 0x108   :  { %v452_v26 = vpack.c.bf16 %v294_v22, %v293_v20  ;;  %v472_v16 = vpack.c.bf16 %v302_v23, %v301_v21  ;;  %481 = vst [vmem:[%s691_s4 + $0x18] sm:$0xff] %v457_v24  }
 0x109   :  { %485 = vst [vmem:[%s691_s4 + $0x38] sm:$0xff] %v477_v25  }
 0x10a   :  { %480 = vst [vmem:[%s691_s4 + $0x10] sm:$0xff] %v452_v26   ;;  %484 = vst [vmem:[%s691_s4 + $0x30] sm:$0xff] %v472_v16  }

// kernel: _lambda_.14
= control target key start
LH: loop header
LB: loop body
LE: loop exit
PB: predicated region body
PF: predicated region fallthrough
CT: control target
= control target key end

     0   :  { %s1355_s15 = smov 0   ;;  %s1548_s0 = inlined_call_operand.vmem [shape: bf16[512,147], index: 0, kind: input, shape index: {}]   ;;  %s1549_s1 = inlined_call_operand.vmem [shape: bf16[147,128], index: 1, kind: input, shape index: {}]   ;;  %s1550_s2 = inlined_call_operand.vmem [shape: f32[1,128], index: 2, kind: input, shape index: {}]   ;;  %s1551_s3 = inlined_call_operand.vmem [shape: f32[1,128], index: 3, kind: input, shape index: {}]   ;;  %s1552_s4 = inlined_call_operand.vmem [shape: bf16[512,128], index: 4, kind: output, shape index: {}]  }
   0x1 LB: > { %s1000_s16 = sadd.s32 4294967295, %s1326_s15   ;;  %p1004_p0 = scmp.ge.s32.totalorder %s1326_s15, 1  ;;  %s1326_s15 = sphi %s1355_s15, %s14_s15  }
   0x2   : > { %p164_p1 = scmp.lt.s32.totalorder %s1326_s15, 3 }
   0x4   : > { %p165_p2 = pnand %p1004_p0, %p164_p1 }
   0x5   : > { %v1262_v0 = vld [vmem:[%s1549_s1] sm:$0xff] (!%p165_p2)   ;;  %v1328_v1 = vmov (!%p165_p2), 0   ;;  %v1263_v2 = vld [vmem:[%s1549_s1 + $0x8] sm:$0xff] (!%p165_p2)   ;;  %v1264_v3 = vld [vmem:[%s1549_s1 + $0x10] sm:$0xff] (!%p165_p2)   ;;  %s1005_s23 = sshll.u32 (!%p165_p2), %s1000_s16, 5  ;;  %vm457_vm0 = vcmask (!%p165_p2), 154624  }
   0x6   : > { %168 = sbr.rel (%p165_p2) target bundleno = 326 (0x146), region = 36  ;;  %513 = vmatprep.subr.bf16.mxu0 (!%p165_p2), %v1328_v1  ;;  %1232 = vmatprep.subr.bf16.mxu1 (!%p165_p2), %v1328_v1  ;;  %p192_p3 = scmp.lt.s32.totalorder (!%p165_p2), %s1005_s23, 63  ;;  %v1265_v4 = vld [vmem:[%s1549_s1 + $0x18] sm:$0xff] (!%p165_p2)   ;;  %v1266_v5 = vld [vmem:[%s1549_s1 + $0x20] sm:$0xff] (!%p165_p2)   ;;  %v1267_v8 = vld [vmem:[%s1549_s1 + $0x28] sm:$0xff] (!%p165_p2)   ;;  %vm506_vm1 = vcmask (!%p165_p2), 1040384  }
   0x7   : > { %514 = vmatpush1.bf16.msra.mxu0 (!%p165_p2), %v1262_v0  ;;  %1242 = vmatpush1.bf16.msra.mxu1 (!%p165_p2), %v1262_v0  ;;  %v1268_v9 = vld [vmem:[%s1549_s1 + $0x30] sm:$0xff] (!%p165_p2)   ;;  %v1269_v10 = vld [vmem:[%s1549_s1 + $0x38] sm:$0xff] (!%p165_p2)   ;;  %vm507_vm2 = vcmask (!%p165_p2), 1041408   ;;  %v1329_v11 = vmov (!%p165_p2), 65535   ;;  %v1270_v13 = vld [vmem:[%s1549_s1 + $0x40] sm:$0xff] (!%p165_p2)  }
   0x8   : > { %515 = vmatprep.subr.bf16.mxu0 (!%p165_p2), %v1328_v1  ;;  %1233 = vmatprep.subr.bf16.mxu1 (!%p165_p2), %v1328_v1  ;;  %v508_v12 = vsel (!%p165_p2), %vm506_vm1, 4294967295, %v1329_v11  ;;  %v1271_v14 = vld [vmem:[%s1549_s1 + $0x48] ss:$0 sps:$4 sm:$0x33] (!%p165_p2)   ;;  %v1452_v47 = vld [vmem:[%s1550_s2] ss:$0 sm:$0xff] (!%p165_p2) }
   0x9   : > { %v509_v15 = vsel (!%p165_p2), %vm507_vm2, %v508_v12, 0  ;;  %v1457_v49 = vld [vmem:[%s1551_s3] ss:$0 sm:$0xff] (!%p165_p2) }
   0xa   : > { %v511_v16 = vand.u32 (!%p165_p2), %v1271_v14, %v509_v15 }
   0xb   : > { %516 = vmatpush1.bf16.msra.mxu0 (!%p165_p2), %v1263_v2  ;;  %1243 = vmatpush1.bf16.msra.mxu1 (!%p165_p2), %v1263_v2 }
   0xc   : > { %517 = vmatprep.subr.bf16.mxu0 (!%p165_p2), %v1328_v1  ;;  %1234 = vmatprep.subr.bf16.mxu1 (!%p165_p2), %v1328_v1 }
   0xd   : > { %s1554_s23 = smov (!%p192_p3, %s1005_s23), 63 }
   0xe   : > { %s1104_s26 = sshll.u32 %s1554_s23, 3  ;;  %s1009_s21 = sshll.u32 %s1554_s23, 2 }
   0xf   : > { %518 = vmatpush1.bf16.msra.mxu0 %v1264_v3  ;;  %1244 = vmatpush1.bf16.msra.mxu1 %v1264_v3  ;;  %s1381_s29 = scalar_lea.vmem %s1548_s0, %s1104_s26  ;;  %s1471_s25 = scalar_lea.vmem %s1552_s4, %s1009_s21 }
  0x10   : > { %519 = vmatprep.subr.bf16.mxu0 %v1328_v1  ;;  %1235 = vmatprep.subr.bf16.mxu1 %v1328_v1  ;;  %v1274_v6 = vld [vmem:[%s1381_s29 + $0x4] ss:$8 sps:$4 sm:$0xff]   ;;  %v1272_v17 = vld [vmem:[%s1381_s29] ss:$8 sps:$4 sm:$0xff]   ;;  %v1278_v19 = vld [vmem:[%s1381_s29 + $0x14] ss:$8 sps:$4 sm:$0xff]  }
  0x11   : > { %v1277_v7 = vld [vmem:[%s1381_s29 + $0x84] ss:$8 sps:$4 sm:$0xff]   ;;  %1052 = vmatprep.mubr.msk.bf16.mxu0 %vm457_vm0, %v1274_v6  ;;  %v1275_v18 = vld [vmem:[%s1381_s29 + $0x80] ss:$8 sps:$4 sm:$0xff]   ;;  %v1280_v20 = vld [vmem:[%s1381_s29 + $0x94] ss:$8 sps:$4 sm:$0xff]  }
  0x12   : > { %1060 = vmatprep.mubr.msk.bf16.mxu1 %vm457_vm0, %v1277_v7  ;;  %v1282_v21 = vld [vmem:[%s1381_s29 + $0x10] ss:$8 sps:$4 sm:$0xff]   ;;  %v1284_v23 = vld [vmem:[%s1381_s29 + $0x24] ss:$8 sps:$4 sm:$0xff]   ;;  %v1288_v25 = vld [vmem:[%s1381_s29 + $0x20] ss:$8 sps:$4 sm:$0xff]  }
  0x13   : > { %520 = vmatpush1.bf16.msra.mxu0 %v1265_v4  ;;  %1245 = vmatpush1.bf16.msra.mxu1 %v1265_v4  ;;  %v1283_v22 = vld [vmem:[%s1381_s29 + $0x90] ss:$8 sps:$4 sm:$0xff]   ;;  %v1286_v24 = vld [vmem:[%s1381_s29 + $0xa4] ss:$8 sps:$4 sm:$0xff]   ;;  %v1289_v26 = vld [vmem:[%s1381_s29 + $0xa0] ss:$8 sps:$4 sm:$0xff]  }
  0x14   : > { %521 = vmatprep.subr.bf16.mxu0 %v1328_v1  ;;  %1236 = vmatprep.subr.bf16.mxu1 %v1328_v1  ;;  %v1290_v27 = vld [vmem:[%s1381_s29 + $0x34] ss:$8 sps:$4 sm:$0xff]   ;;  %v1294_v29 = vld [vmem:[%s1381_s29 + $0x30] ss:$8 sps:$4 sm:$0xff]   ;;  %v1296_v31 = vld [vmem:[%s1381_s29 + $0x44] ss:$8 sps:$4 sm:$0xff]  }
  0x15   : > { %v1292_v28 = vld [vmem:[%s1381_s29 + $0xb4] ss:$8 sps:$4 sm:$0xff]   ;;  %v1295_v30 = vld [vmem:[%s1381_s29 + $0xb0] ss:$8 sps:$4 sm:$0xff]   ;;  %v1298_v32 = vld [vmem:[%s1381_s29 + $0xc4] ss:$8 sps:$4 sm:$0xff]  }
  0x16   : > { %v1300_v33 = vld [vmem:[%s1381_s29 + $0x40] ss:$8 sps:$4 sm:$0xff]   ;;  %v1302_v35 = vld [vmem:[%s1381_s29 + $0x54] ss:$8 sps:$4 sm:$0xff]   ;;  %v1306_v37 = vld [vmem:[%s1381_s29 + $0x50] ss:$8 sps:$4 sm:$0xff]  }
  0x17   : > { %522 = vmatpush1.bf16.msra.mxu0 %v1266_v5  ;;  %1246 = vmatpush1.bf16.msra.mxu1 %v1266_v5  ;;  %v1301_v34 = vld [vmem:[%s1381_s29 + $0xc0] ss:$8 sps:$4 sm:$0xff]   ;;  %v1304_v36 = vld [vmem:[%s1381_s29 + $0xd4] ss:$8 sps:$4 sm:$0xff]   ;;  %v1307_v38 = vld [vmem:[%s1381_s29 + $0xd0] ss:$8 sps:$4 sm:$0xff]  }
  0x18   : > { %523 = vmatprep.subr.bf16.mxu0 %v1328_v1  ;;  %1237 = vmatprep.subr.bf16.mxu1 %v1328_v1  ;;  %v1308_v39 = vld [vmem:[%s1381_s29 + $0x64] ss:$8 sps:$4 sm:$0xff]   ;;  %v1312_v41 = vld [vmem:[%s1381_s29 + $0x60] ss:$8 sps:$4 sm:$0xff]   ;;  %v1314_v43 = vld [vmem:[%s1381_s29 + $0x74] ss:$8 sps:$4 sm:$0xff]  }
  0x19   : > { %v1310_v40 = vld [vmem:[%s1381_s29 + $0xe4] ss:$8 sps:$4 sm:$0xff]   ;;  %v1313_v42 = vld [vmem:[%s1381_s29 + $0xe0] ss:$8 sps:$4 sm:$0xff]   ;;  %v1316_v44 = vld [vmem:[%s1381_s29 + $0xf4] ss:$8 sps:$4 sm:$0xff]  }
  0x1a   : > { %v1318_v45 = vld [vmem:[%s1381_s29 + $0x70] ss:$8 sps:$4 sm:$0xff]  }
  0x1b   : > { %524 = vmatpush1.bf16.msra.mxu0 %v1267_v8  ;;  %1247 = vmatpush1.bf16.msra.mxu1 %v1267_v8  ;;  %v1319_v46 = vld [vmem:[%s1381_s29 + $0xf0] ss:$8 sps:$4 sm:$0xff]  }
  0x1c   : > { %525 = vmatprep.subr.bf16.mxu0 %v1328_v1  ;;  %1238 = vmatprep.subr.bf16.mxu1 %v1328_v1 }
  0x1f   : > { %526 = vmatpush1.bf16.msra.mxu0 %v1268_v9  ;;  %1248 = vmatpush1.bf16.msra.mxu1 %v1268_v9 }
  0x20   : > { %527 = vmatprep.subr.bf16.mxu0 %v1328_v1  ;;  %1239 = vmatprep.subr.bf16.mxu1 %v1328_v1 }
  0x23   : > { %528 = vmatpush1.bf16.msra.mxu0 %v1269_v10  ;;  %1249 = vmatpush1.bf16.msra.mxu1 %v1269_v10 }
  0x24   : > { %529 = vmatprep.subr.bf16.mxu0 %v1328_v1  ;;  %1240 = vmatprep.subr.bf16.mxu1 %v1328_v1 }
  0x27   : > { %530 = vmatpush1.bf16.msra.mxu0 %v1270_v13  ;;  %1250 = vmatpush1.bf16.msra.mxu1 %v1270_v13 }
  0x28   : > { %531 = vmatprep.subr.bf16.mxu0 %v1328_v1  ;;  %1241 = vmatprep.subr.bf16.mxu1 %v1328_v1 }
  0x2b   : > { %532 = vmatpush1.bf16.msra.mxu0 %v511_v16  ;;  %1251 = vmatpush1.bf16.msra.mxu1 %v511_v16 }
  0x2e   : > { %546 = vmatmul.mubr.bf16.vlgmr.msra.gmra.mrb[0].mxu0 %v1272_v17  ;;  %610 = vmatmul.mubr.bf16.vlgmr.msra.gmra.mrb[0].mxu1 %v1275_v18 }
  0x2f   : > { %1053 = vmatprep.mubr.msk.bf16.mxu0 %vm457_vm0, %v1278_v19  ;;  %1061 = vmatprep.mubr.msk.bf16.mxu1 %vm457_vm0, %v1280_v20 }
  0x36   : > { %554 = vmatmul.mubr.bf16.gmra.mrb[4].mxu0 %v1282_v21  ;;  %618 = vmatmul.mubr.bf16.gmra.mrb[4].mxu1 %v1283_v22 }
  0x37   : > { %1054 = vmatprep.mubr.msk.bf16.mxu0 %vm457_vm0, %v1284_v23  ;;  %1062 = vmatprep.mubr.msk.bf16.mxu1 %vm457_vm0, %v1286_v24 }
  0x3e   : > { %562 = vmatmul.mubr.bf16.gmra.mrb[8].mxu0 %v1288_v25  ;;  %626 = vmatmul.mubr.bf16.gmra.mrb[8].mxu1 %v1289_v26 }
  0x3f   : > { %1055 = vmatprep.mubr.msk.bf16.mxu0 %vm457_vm0, %v1290_v27  ;;  %1063 = vmatprep.mubr.msk.bf16.mxu1 %vm457_vm0, %v1292_v28 }
  0x46   : > { %570 = vmatmul.mubr.bf16.gmra.mrb[12].mxu0 %v1294_v29  ;;  %634 = vmatmul.mubr.bf16.gmra.mrb[12].mxu1 %v1295_v30 }
  0x47   : > { %1056 = vmatprep.mubr.msk.bf16.mxu0 %vm457_vm0, %v1296_v31  ;;  %1064 = vmatprep.mubr.msk.bf16.mxu1 %vm457_vm0, %v1298_v32 }
  0x4e   : > { %578 = vmatmul.mubr.bf16.gmra.mrb[16].mxu0 %v1300_v33  ;;  %642 = vmatmul.mubr.bf16.gmra.mrb[16].mxu1 %v1301_v34 }
  0x4f   : > { %1057 = vmatprep.mubr.msk.bf16.mxu0 %vm457_vm0, %v1302_v35  ;;  %1065 = vmatprep.mubr.msk.bf16.mxu1 %vm457_vm0, %v1304_v36 }
  0x56   : > { %586 = vmatmul.mubr.bf16.gmra.mrb[20].mxu0 %v1306_v37  ;;  %650 = vmatmul.mubr.bf16.gmra.mrb[20].mxu1 %v1307_v38 }
  0x57   : > { %1058 = vmatprep.mubr.msk.bf16.mxu0 %vm457_vm0, %v1308_v39  ;;  %1066 = vmatprep.mubr.msk.bf16.mxu1 %vm457_vm0, %v1310_v40 }
  0x5e   : > { %594 = vmatmul.mubr.bf16.gmra.mrb[24].mxu0 %v1312_v41  ;;  %658 = vmatmul.mubr.bf16.gmra.mrb[24].mxu1 %v1313_v42 }
  0x5f   : > { %1059 = vmatprep.mubr.msk.bf16.mxu0 %vm457_vm0, %v1314_v43  ;;  %1067 = vmatprep.mubr.msk.bf16.mxu1 %vm457_vm0, %v1316_v44 }
  0x66   : > { %602 = vmatmul.mubr.bf16.gmra.mrb[28].mxu0 %v1318_v45  ;;  %666 = vmatmul.mubr.bf16.gmra.mrb[28].mxu1 %v1319_v46 }
 0x101   : > { %v547_v48 = vpop.f32.mrb[0].mxu0  ;;  %v611_v50 = vpop.f32.mrb[0].mxu1 }
 0x102   : > { %v681_v51 = vmul.f32 %v1452_v47, %v547_v48  ;;  %v697_v52 = vmul.f32 %v1452_v47, %v611_v50  ;;  %v549_v53 = vpop.f32.mrb[1].mxu0  ;;  %v613_v54 = vpop.f32.mrb[1].mxu1 }
 0x103   : > { %v550_v55 = vpop.f32.mrb[2].mxu0  ;;  %v614_v56 = vpop.f32.mrb[2].mxu1 }
 0x104   : > { %v720_v57 = vadd.f32 %v1457_v49, %v681_v51  ;;  %v736_v58 = vadd.f32 %v1457_v49, %v697_v52  ;;  %v682_v59 = vmul.f32 %v1452_v47, %v550_v55  ;;  %v698_v60 = vmul.f32 %v1452_v47, %v614_v56  ;;  %v552_v61 = vpop.f32.mrb[3].mxu0  ;;  %v616_v62 = vpop.f32.mrb[3].mxu1 }
 0x106   : > { %v721_v63 = vadd.f32 %v1457_v49, %v682_v59  ;;  %v737_v0 = vadd.f32 %v1457_v49, %v698_v60  ;;  %v752_v1 = vmax.f32 %v720_v57, 0.0  ;;  %v768_v2 = vmax.f32 %v736_v58, 0.0 }
 0x108   : > { %v753_v3 = vmax.f32 %v721_v63, 0.0  ;;  %v769_v4 = vmax.f32 %v737_v0, 0.0 }
 0x109   : > { %v555_v5 = vpop.f32.mrb[4].mxu0  ;;  %v619_v6 = vpop.f32.mrb[4].mxu1 }
 0x10a   : > { %v1140_v7 = vpack.c.bf16 %v753_v3, %v752_v1  ;;  %v1180_v8 = vpack.c.bf16 %v769_v4, %v768_v2  ;;  %v683_v9 = vmul.f32 %v1452_v47, %v555_v5  ;;  %v699_v10 = vmul.f32 %v1452_v47, %v619_v6  ;;  %v557_v11 = vpop.f32.mrb[5].mxu0  ;;  %v621_v12 = vpop.f32.mrb[5].mxu1 }
 0x10b   : > { %v558_v13 = vpop.f32.mrb[6].mxu0  ;;  %v622_v14 = vpop.f32.mrb[6].mxu1 }
 0x10c   : > { %1141 = vst [vmem:[%s1471_s25] sm:$0xff] %v1140_v7   ;;  %1224 = vst [vmem:[%s1471_s25 + $0x40] sm:$0xff] %v1180_v8   ;;  %v722_v15 = vadd.f32 %v1457_v49, %v683_v9  ;;  %v738_v16 = vadd.f32 %v1457_v49, %v699_v10  ;;  %v684_v17 = vmul.f32 %v1452_v47, %v558_v13  ;;  %v560_v19 = vpop.f32.mrb[7].mxu0  ;;  %v624_v20 = vpop.f32.mrb[7].mxu1 }
 0x10d   : > { %v700_v18 = vmul.f32 %v1452_v47, %v622_v14 }
 0x10e   : > { %v723_v21 = vadd.f32 %v1457_v49, %v684_v17  ;;  %v754_v23 = vmax.f32 %v722_v15, 0.0  ;;  %v770_v24 = vmax.f32 %v738_v16, 0.0 }
 0x10f   : > { %v739_v22 = vadd.f32 %v1457_v49, %v700_v18 }
 0x110   : > { %v755_v25 = vmax.f32 %v723_v21, 0.0 }
 0x111   : > { %v771_v26 = vmax.f32 %v739_v22, 0.0  ;;  %v563_v27 = vpop.f32.mrb[8].mxu0  ;;  %v627_v28 = vpop.f32.mrb[8].mxu1 }
 0x112   : > { %v1145_v29 = vpack.c.bf16 %v755_v25, %v754_v23  ;;  %v685_v31 = vmul.f32 %v1452_v47, %v563_v27  ;;  %v701_v32 = vmul.f32 %v1452_v47, %v627_v28  ;;  %v565_v33 = vpop.f32.mrb[9].mxu0  ;;  %v629_v34 = vpop.f32.mrb[9].mxu1 }
 0x113   : > { %v1185_v30 = vpack.c.bf16 %v771_v26, %v770_v24  ;;  %v566_v35 = vpop.f32.mrb[10].mxu0  ;;  %v630_v36 = vpop.f32.mrb[10].mxu1 }
 0x114   : > { %1217 = vst [vmem:[%s1471_s25 + $0x8] sm:$0xff] %v1145_v29   ;;  %v724_v37 = vadd.f32 %v1457_v49, %v685_v31  ;;  %v740_v38 = vadd.f32 %v1457_v49, %v701_v32  ;;  %v686_v39 = vmul.f32 %v1452_v47, %v566_v35  ;;  %v702_v40 = vmul.f32 %v1452_v47, %v630_v36  ;;  %v568_v41 = vpop.f32.mrb[11].mxu0  ;;  %v632_v42 = vpop.f32.mrb[11].mxu1 }
 0x115   : > { %1225 = vst [vmem:[%s1471_s25 + $0x48] sm:$0xff] %v1185_v30  }
 0x116   : > { %v725_v43 = vadd.f32 %v1457_v49, %v686_v39  ;;  %v741_v44 = vadd.f32 %v1457_v49, %v702_v40  ;;  %v756_v45 = vmax.f32 %v724_v37, 0.0  ;;  %v772_v46 = vmax.f32 %v740_v38, 0.0 }
 0x118   : > { %v757_v48 = vmax.f32 %v725_v43, 0.0  ;;  %v773_v50 = vmax.f32 %v741_v44, 0.0 }
 0x119   : > { %v571_v51 = vpop.f32.mrb[12].mxu0  ;;  %v635_v52 = vpop.f32.mrb[12].mxu1 }
 0x11a   : > { %v1150_v53 = vpack.c.bf16 %v757_v48, %v756_v45  ;;  %v1190_v54 = vpack.c.bf16 %v773_v50, %v772_v46  ;;  %v687_v55 = vmul.f32 %v1452_v47, %v571_v51  ;;  %v703_v56 = vmul.f32 %v1452_v47, %v635_v52  ;;  %v573_v57 = vpop.f32.mrb[13].mxu0  ;;  %v637_v58 = vpop.f32.mrb[13].mxu1 }
 0x11b   : > { %v574_v59 = vpop.f32.mrb[14].mxu0  ;;  %v638_v60 = vpop.f32.mrb[14].mxu1 }
 0x11c   : > { %1218 = vst [vmem:[%s1471_s25 + $0x10] sm:$0xff] %v1150_v53   ;;  %1226 = vst [vmem:[%s1471_s25 + $0x50] sm:$0xff] %v1190_v54   ;;  %v726_v61 = vadd.f32 %v1457_v49, %v687_v55  ;;  %v742_v62 = vadd.f32 %v1457_v49, %v703_v56  ;;  %v688_v63 = vmul.f32 %v1452_v47, %v574_v59  ;;  %v576_v1 = vpop.f32.mrb[15].mxu0  ;;  %v640_v2 = vpop.f32.mrb[15].mxu1 }
 0x11d   : > { %v704_v0 = vmul.f32 %v1452_v47, %v638_v60 }
 0x11e   : > { %v727_v3 = vadd.f32 %v1457_v49, %v688_v63  ;;  %v758_v5 = vmax.f32 %v726_v61, 0.0  ;;  %v774_v6 = vmax.f32 %v742_v62, 0.0 }
 0x11f   : > { %v743_v4 = vadd.f32 %v1457_v49, %v704_v0 }
 0x120   : > { %v759_v7 = vmax.f32 %v727_v3, 0.0 }
 0x121   : > { %v775_v8 = vmax.f32 %v743_v4, 0.0  ;;  %v579_v9 = vpop.f32.mrb[16].mxu0  ;;  %v643_v10 = vpop.f32.mrb[16].mxu1 }
 0x122   : > { %v1155_v11 = vpack.c.bf16 %v759_v7, %v758_v5  ;;  %v689_v13 = vmul.f32 %v1452_v47, %v579_v9  ;;  %v705_v14 = vmul.f32 %v1452_v47, %v643_v10  ;;  %v581_v15 = vpop.f32.mrb[17].mxu0  ;;  %v645_v16 = vpop.f32.mrb[17].mxu1 }
 0x123   : > { %v1195_v12 = vpack.c.bf16 %v775_v8, %v774_v6  ;;  %v582_v17 = vpop.f32.mrb[18].mxu0  ;;  %v646_v18 = vpop.f32.mrb[18].mxu1 }
 0x124   : > { %1219 = vst [vmem:[%s1471_s25 + $0x18] sm:$0xff] %v1155_v11   ;;  %v728_v19 = vadd.f32 %v1457_v49, %v689_v13  ;;  %v744_v20 = vadd.f32 %v1457_v49, %v705_v14  ;;  %v690_v21 = vmul.f32 %v1452_v47, %v582_v17  ;;  %v706_v22 = vmul.f32 %v1452_v47, %v646_v18  ;;  %v584_v23 = vpop.f32.mrb[19].mxu0  ;;  %v648_v24 = vpop.f32.mrb[19].mxu1 }
 0x125   : > { %1227 = vst [vmem:[%s1471_s25 + $0x58] sm:$0xff] %v1195_v12  }
 0x126   : > { %v729_v25 = vadd.f32 %v1457_v49, %v690_v21  ;;  %v745_v26 = vadd.f32 %v1457_v49, %v706_v22  ;;  %v760_v27 = vmax.f32 %v728_v19, 0.0  ;;  %v776_v28 = vmax.f32 %v744_v20, 0.0 }
 0x128   : > { %v761_v29 = vmax.f32 %v729_v25, 0.0  ;;  %v777_v30 = vmax.f32 %v745_v26, 0.0 }
 0x129   : > { %v587_v31 = vpop.f32.mrb[20].mxu0  ;;  %v651_v32 = vpop.f32.mrb[20].mxu1 }
 0x12a   : > { %v1160_v33 = vpack.c.bf16 %v761_v29, %v760_v27  ;;  %v1200_v34 = vpack.c.bf16 %v777_v30, %v776_v28  ;;  %v691_v35 = vmul.f32 %v1452_v47, %v587_v31  ;;  %v707_v36 = vmul.f32 %v1452_v47, %v651_v32  ;;  %v589_v37 = vpop.f32.mrb[21].mxu0  ;;  %v653_v38 = vpop.f32.mrb[21].mxu1 }
 0x12b   : > { %v590_v39 = vpop.f32.mrb[22].mxu0  ;;  %v654_v40 = vpop.f32.mrb[22].mxu1 }
 0x12c   : > { %1220 = vst [vmem:[%s1471_s25 + $0x20] sm:$0xff] %v1160_v33   ;;  %1228 = vst [vmem:[%s1471_s25 + $0x60] sm:$0xff] %v1200_v34   ;;  %v730_v41 = vadd.f32 %v1457_v49, %v691_v35  ;;  %v746_v42 = vadd.f32 %v1457_v49, %v707_v36  ;;  %v692_v43 = vmul.f32 %v1452_v47, %v590_v39  ;;  %v592_v45 = vpop.f32.mrb[23].mxu0  ;;  %v656_v46 = vpop.f32.mrb[23].mxu1 }
 0x12d   : > { %v708_v44 = vmul.f32 %v1452_v47, %v654_v40 }
 0x12e   : > { %v731_v48 = vadd.f32 %v1457_v49, %v692_v43  ;;  %v762_v51 = vmax.f32 %v730_v41, 0.0  ;;  %v778_v52 = vmax.f32 %v746_v42, 0.0 }
 0x12f   : > { %v747_v50 = vadd.f32 %v1457_v49, %v708_v44 }
 0x130   : > { %v763_v53 = vmax.f32 %v731_v48, 0.0 }
 0x131   : > { %v779_v54 = vmax.f32 %v747_v50, 0.0  ;;  %v595_v55 = vpop.f32.mrb[24].mxu0  ;;  %v659_v56 = vpop.f32.mrb[24].mxu1 }
 0x132   : > { %v1165_v57 = vpack.c.bf16 %v763_v53, %v762_v51  ;;  %v693_v59 = vmul.f32 %v1452_v47, %v595_v55  ;;  %v709_v60 = vmul.f32 %v1452_v47, %v659_v56  ;;  %v597_v61 = vpop.f32.mrb[25].mxu0  ;;  %v661_v62 = vpop.f32.mrb[25].mxu1 }
 0x133   : > { %v1205_v58 = vpack.c.bf16 %v779_v54, %v778_v52  ;;  %v598_v63 = vpop.f32.mrb[26].mxu0  ;;  %v662_v0 = vpop.f32.mrb[26].mxu1 }
 0x134   : > { %1221 = vst [vmem:[%s1471_s25 + $0x28] sm:$0xff] %v1165_v57   ;;  %v732_v1 = vadd.f32 %v1457_v49, %v693_v59  ;;  %v748_v2 = vadd.f32 %v1457_v49, %v709_v60  ;;  %v694_v3 = vmul.f32 %v1452_v47, %v598_v63  ;;  %v710_v4 = vmul.f32 %v1452_v47, %v662_v0  ;;  %v600_v5 = vpop.f32.mrb[27].mxu0  ;;  %v664_v6 = vpop.f32.mrb[27].mxu1 }
 0x135   : > { %1229 = vst [vmem:[%s1471_s25 + $0x68] sm:$0xff] %v1205_v58  }
 0x136   : > { %v733_v7 = vadd.f32 %v1457_v49, %v694_v3  ;;  %v749_v8 = vadd.f32 %v1457_v49, %v710_v4  ;;  %v764_v9 = vmax.f32 %v732_v1, 0.0  ;;  %v780_v10 = vmax.f32 %v748_v2, 0.0 }
 0x138   : > { %v765_v11 = vmax.f32 %v733_v7, 0.0  ;;  %v781_v12 = vmax.f32 %v749_v8, 0.0 }
 0x139   : > { %v603_v13 = vpop.f32.mrb[28].mxu0  ;;  %v667_v14 = vpop.f32.mrb[28].mxu1 }
 0x13a   : > { %v1170_v15 = vpack.c.bf16 %v765_v11, %v764_v9  ;;  %v1210_v16 = vpack.c.bf16 %v781_v12, %v780_v10  ;;  %v695_v17 = vmul.f32 %v1452_v47, %v603_v13  ;;  %v711_v18 = vmul.f32 %v1452_v47, %v667_v14  ;;  %v605_v19 = vpop.f32.mrb[29].mxu0  ;;  %v669_v20 = vpop.f32.mrb[29].mxu1 }
 0x13b   : > { %v606_v21 = vpop.f32.mrb[30].mxu0  ;;  %v670_v22 = vpop.f32.mrb[30].mxu1 }
 0x13c   : > { %1222 = vst [vmem:[%s1471_s25 + $0x30] sm:$0xff] %v1170_v15   ;;  %1230 = vst [vmem:[%s1471_s25 + $0x70] sm:$0xff] %v1210_v16   ;;  %v734_v23 = vadd.f32 %v1457_v49, %v695_v17  ;;  %v750_v24 = vadd.f32 %v1457_v49, %v711_v18  ;;  %v696_v25 = vmul.f32 %v1452_v47, %v606_v21  ;;  %v608_v27 = vpop.f32.mrb[31].mxu0  ;;  %v672_v28 = vpop.f32.mrb[31].mxu1 }
 0x13d   : > { %v712_v26 = vmul.f32 %v1452_v47, %v670_v22 }
 0x13e   : > { %v735_v29 = vadd.f32 %v1457_v49, %v696_v25  ;;  %v766_v31 = vmax.f32 %v734_v23, 0.0  ;;  %v782_v32 = vmax.f32 %v750_v24, 0.0 }
 0x13f   : > { %v751_v30 = vadd.f32 %v1457_v49, %v712_v26 }
 0x140   : > { %v767_v33 = vmax.f32 %v735_v29, 0.0 }
 0x141   : > { %v783_v34 = vmax.f32 %v751_v30, 0.0 }
 0x142   : > { %v1175_v35 = vpack.c.bf16 %v767_v33, %v766_v31 }
 0x143   : > { %v1215_v36 = vpack.c.bf16 %v783_v34, %v782_v32 }
 0x144   : > { %1223 = vst [vmem:[%s1471_s25 + $0x38] sm:$0xff] %v1175_v35  }
 0x145   : > { %1231 = vst [vmem:[%s1471_s25 + $0x78] sm:$0xff] %v1215_v36  }
 0x146 PF: > { %s14_s15 = sadd.s32 1, %s1326_s15  }
 0x147   : > { %p11_p4 = scmp.ge.s32.totalorder %s14_s15, 4  }
 0x149   :  { %13 = sbr.rel (!%p11_p4) target bundleno = 1 (0x1), region = 66 }

// kernel: _lambda_.18
= control target key start
LH: loop header
LB: loop body
LE: loop exit
PB: predicated region body
PF: predicated region fallthrough
CT: control target
= control target key end

     0   :  { %s848_s1 = inlined_call_operand.vmem [shape: bf16[128,128], index: 1, kind: input, shape index: {}]   ;;  %s849_s0 = inlined_call_operand.vmem [shape: bf16[128,128], index: 0, kind: input, shape index: {}]   ;;  %s850_s4 = inlined_call_operand.vmem [shape: bf16[128,128], index: 4, kind: input, shape index: {}]   ;;  %s851_s2 = inlined_call_operand.vmem [shape: f32[1,128], index: 2, kind: input, shape index: {}]   ;;  %s852_s3 = inlined_call_operand.vmem [shape: f32[1,128], index: 3, kind: input, shape index: {}]   ;;  %s853_s5 = inlined_call_operand.vmem [shape: bf16[128,128], index: 5, kind: output, shape index: {}]  }
   0x1   :  { %v640_v0 = vld [vmem:[%s848_s1] sm:$0xff]   ;;  %v641_v1 = vld [vmem:[%s848_s1 + $0x8] sm:$0xff]   ;;  %v642_v2 = vld [vmem:[%s848_s1 + $0x10] sm:$0xff]  }
   0x2   :  { %592 = vmatprep.subr.bf16.mxu0 %v640_v0  ;;  %624 = vmatprep.subr.bf16.mxu1 %v640_v0  ;;  %v643_v3 = vld [vmem:[%s848_s1 + $0x18] sm:$0xff]   ;;  %v648_v4 = vld [vmem:[%s849_s0] sm:$0xff]   ;;  %v645_v7 = vld [vmem:[%s848_s1 + $0x28] sm:$0xff]  }
   0x3   :  { %593 = vmatpush3.bf16.msra.mxu0 %v640_v0  ;;  %632 = vmatpush3.bf16.msra.mxu1 %v640_v0  ;;  %v649_v5 = vld [vmem:[%s849_s0 + $0x20] sm:$0xff]   ;;  %v646_v8 = vld [vmem:[%s848_s1 + $0x30] sm:$0xff]   ;;  %v647_v9 = vld [vmem:[%s848_s1 + $0x38] sm:$0xff]  }
   0x4   :  { %594 = vmatprep.subr.bf16.mxu0 %v641_v1  ;;  %625 = vmatprep.subr.bf16.mxu1 %v641_v1  ;;  %v644_v6 = vld [vmem:[%s848_s1 + $0x20] sm:$0xff]   ;;  %v650_v10 = vld [vmem:[%s849_s0 + $0x8] sm:$0xff]   ;;  %v652_v12 = vld [vmem:[%s849_s0 + $0x10] sm:$0xff]  }
   0x5   :  { %608 = vmatprep.mubr.bf16.mxu0 %v648_v4  ;;  %616 = vmatprep.mubr.bf16.mxu1 %v649_v5  ;;  %v651_v11 = vld [vmem:[%s849_s0 + $0x28] sm:$0xff]   ;;  %v653_v13 = vld [vmem:[%s849_s0 + $0x30] sm:$0xff]   ;;  %v654_v14 = vld [vmem:[%s849_s0 + $0x18] sm:$0xff]  }
   0x6   :  { %v655_v15 = vld [vmem:[%s849_s0 + $0x38] sm:$0xff]   ;;  %v562_v16 = vld [vmem:[%s850_s4 + $0x8] sm:$0xff]   ;;  %v491_v18 = vld [vmem:[%s850_s4] sm:$0xff]  }
   0x7   :  { %595 = vmatpush3.bf16.msra.mxu0 %v641_v1  ;;  %633 = vmatpush3.bf16.msra.mxu1 %v641_v1  ;;  %v566_v17 = vld [vmem:[%s850_s4 + $0x28] sm:$0xff]   ;;  %v565_v19 = vld [vmem:[%s850_s4 + $0x20] sm:$0xff]   ;;  %v754_v21 = vld [vmem:[%s850_s4 + $0x18] sm:$0xff]   ;;  %v496_v23 = vunpack.c.l.bf16 %v562_v16  ;;  %v492_v25 = vunpack.c.l.bf16 %v491_v18  ;;  %v497_v32 = vunpack.c.h.bf16 %v562_v16  ;;  %v493_v34 = vunpack.c.h.bf16 %v491_v18 }
   0x8   :  { %596 = vmatprep.subr.bf16.mxu0 %v642_v2  ;;  %626 = vmatprep.subr.bf16.mxu1 %v642_v2  ;;  %v749_v20 = vld [vmem:[%s851_s2] ss:$0 sm:$0xff]  ;;  %v759_v22 = vld [vmem:[%s850_s4 + $0x38] sm:$0xff]   ;;  %v512_v24 = vunpack.c.l.bf16 %v566_v17  ;;  %v508_v26 = vunpack.c.l.bf16 %v565_v19  ;;  %v764_v27 = vld [vmem:[%s850_s4 + $0x10] sm:$0xff]   ;;  %v513_v33 = vunpack.c.h.bf16 %v566_v17  ;;  %v509_v35 = vunpack.c.h.bf16 %v565_v19 }
   0x9   :  { %v769_v28 = vld [vmem:[%s850_s4 + $0x30] sm:$0xff]   ;;  %v774_v30 = vld [vmem:[%s852_s3] ss:$0 sm:$0xff]  ;;  %v504_v40 = vunpack.c.l.bf16 %v754_v21  ;;  %v520_v41 = vunpack.c.l.bf16 %v759_v22  ;;  %v500_v46 = vunpack.c.l.bf16 %v764_v27 }
   0xa   :  { %v516_v47 = vunpack.c.l.bf16 %v769_v28 }
   0xb   :  { %597 = vmatpush3.bf16.msra.mxu0 %v642_v2  ;;  %634 = vmatpush3.bf16.msra.mxu1 %v642_v2 }
   0xc   :  { %598 = vmatprep.subr.bf16.mxu0 %v643_v3  ;;  %627 = vmatprep.subr.bf16.mxu1 %v643_v3 }
   0xf   :  { %599 = vmatpush3.bf16.msra.mxu0 %v643_v3  ;;  %635 = vmatpush3.bf16.msra.mxu1 %v643_v3 }
  0x10   :  { %600 = vmatprep.subr.bf16.mxu0 %v644_v6  ;;  %628 = vmatprep.subr.bf16.mxu1 %v644_v6 }
  0x13   :  { %601 = vmatpush3.bf16.msra.mxu0 %v644_v6  ;;  %636 = vmatpush3.bf16.msra.mxu1 %v644_v6 }
  0x14   :  { %602 = vmatprep.subr.bf16.mxu0 %v645_v7  ;;  %629 = vmatprep.subr.bf16.mxu1 %v645_v7 }
  0x17   :  { %603 = vmatpush3.bf16.msra.mxu0 %v645_v7  ;;  %637 = vmatpush3.bf16.msra.mxu1 %v645_v7 }
  0x18   :  { %604 = vmatprep.subr.bf16.mxu0 %v646_v8  ;;  %630 = vmatprep.subr.bf16.mxu1 %v646_v8 }
  0x1b   :  { %605 = vmatpush3.bf16.msra.mxu0 %v646_v8  ;;  %638 = vmatpush3.bf16.msra.mxu1 %v646_v8 }
  0x1c   :  { %606 = vmatprep.subr.bf16.mxu0 %v647_v9  ;;  %631 = vmatprep.subr.bf16.mxu1 %v647_v9 }
  0x1f   :  { %607 = vmatpush3.bf16.msra.mxu0 %v647_v9  ;;  %639 = vmatpush3.bf16.msra.mxu1 %v647_v9 }
  0x22   :  { %609 = vmatmul.mubr.bf16.vlgmr.msra.gmra.mrb[0].mxu0 %v650_v10  ;;  %617 = vmatmul.mubr.bf16.vlgmr.msra.gmra.mrb[0].mxu1 %v651_v11 }
  0x23   :  { %612 = vmatprep.mubr.bf16.mxu0 %v652_v12  ;;  %620 = vmatprep.mubr.bf16.mxu1 %v653_v13 }
  0x2a   :  { %613 = vmatmul.mubr.bf16.gmra.mrb[4].mxu0 %v654_v14  ;;  %621 = vmatmul.mubr.bf16.gmra.mrb[4].mxu1 %v655_v15 }
  0xf5   :  { %v610_v29 = vpop.f32.mrb[0].mxu0  ;;  %v618_v31 = vpop.f32.mrb[0].mxu1 }
  0xf6   :  { %v255_v36 = vmul.f32 %v610_v29, %v749_v20  ;;  %v263_v37 = vmul.f32 %v618_v31, %v749_v20  ;;  %v183_v38 = vpop.f32.mrb[1].mxu0  ;;  %v215_v39 = vpop.f32.mrb[1].mxu1 }
  0xf7   :  { %v253_v42 = vmul.f32 %v749_v20, %v183_v38  ;;  %v261_v43 = vmul.f32 %v749_v20, %v215_v39  ;;  %v611_v44 = vpop.f32.mrb[2].mxu0  ;;  %v619_v45 = vpop.f32.mrb[2].mxu1 }
  0xf8   :  { %v278_v48 = vadd.f32 %v774_v30, %v255_v36  ;;  %v286_v49 = vadd.f32 %v774_v30, %v263_v37  ;;  %v256_v50 = vmul.f32 %v611_v44, %v749_v20  ;;  %v264_v51 = vmul.f32 %v619_v45, %v749_v20  ;;  %v186_v52 = vpop.f32.mrb[3].mxu0  ;;  %v218_v53 = vpop.f32.mrb[3].mxu1 }
  0xf9   :  { %v276_v54 = vadd.f32 %v774_v30, %v253_v42  ;;  %v284_v55 = vadd.f32 %v774_v30, %v261_v43  ;;  %v254_v56 = vmul.f32 %v749_v20, %v186_v52  ;;  %v262_v57 = vmul.f32 %v749_v20, %v218_v53 }
  0xfa   :  { %v326_v58 = vadd.f32 %v496_v23, %v278_v48  ;;  %v334_v59 = vadd.f32 %v512_v24, %v286_v49  ;;  %v279_v60 = vadd.f32 %v774_v30, %v256_v50  ;;  %v287_v61 = vadd.f32 %v774_v30, %v264_v51 }
  0xfb   :  { %v324_v62 = vadd.f32 %v492_v25, %v276_v54  ;;  %v332_v63 = vadd.f32 %v508_v26, %v284_v55  ;;  %v277_v0 = vadd.f32 %v774_v30, %v254_v56  ;;  %v285_v1 = vadd.f32 %v774_v30, %v262_v57 }
  0xfc   :  { %v342_v2 = vmax.f32 %v326_v58, 0.0  ;;  %v350_v3 = vmax.f32 %v334_v59, 0.0  ;;  %v327_v4 = vadd.f32 %v497_v32, %v279_v60  ;;  %v335_v5 = vadd.f32 %v513_v33, %v287_v61 }
  0xfd   :  { %v340_v6 = vmax.f32 %v324_v62, 0.0  ;;  %v348_v7 = vmax.f32 %v332_v63, 0.0  ;;  %v325_v8 = vadd.f32 %v493_v34, %v277_v0  ;;  %v333_v9 = vadd.f32 %v509_v35, %v285_v1  ;;  %v614_v10 = vpop.f32.mrb[4].mxu0  ;;  %v622_v11 = vpop.f32.mrb[4].mxu1 }
  0xfe   :  { %v343_v12 = vmax.f32 %v327_v4, 0.0  ;;  %v351_v13 = vmax.f32 %v335_v5, 0.0  ;;  %v259_v14 = vmul.f32 %v614_v10, %v749_v20  ;;  %v267_v15 = vmul.f32 %v622_v11, %v749_v20  ;;  %v199_v16 = vpop.f32.mrb[5].mxu0  ;;  %v231_v17 = vpop.f32.mrb[5].mxu1 }
  0xff   :  { %v341_v18 = vmax.f32 %v325_v8, 0.0  ;;  %v349_v19 = vmax.f32 %v333_v9, 0.0  ;;  %v257_v23 = vmul.f32 %v749_v20, %v199_v16  ;;  %v265_v24 = vmul.f32 %v749_v20, %v231_v17  ;;  %v615_v25 = vpop.f32.mrb[6].mxu0  ;;  %v623_v26 = vpop.f32.mrb[6].mxu1 }
 0x100   :  { %v530_v29 = vpack.c.bf16 %v343_v12, %v342_v2  ;;  %v550_v31 = vpack.c.bf16 %v351_v13, %v350_v3  ;;  %v282_v32 = vadd.f32 %v774_v30, %v259_v14  ;;  %v290_v33 = vadd.f32 %v774_v30, %v267_v15  ;;  %v202_v34 = vpop.f32.mrb[7].mxu0  ;;  %v234_v35 = vpop.f32.mrb[7].mxu1 }
 0x101   :  { %v525_v36 = vpack.c.bf16 %v341_v18, %v340_v6  ;;  %v545_v37 = vpack.c.bf16 %v349_v19, %v348_v7  ;;  %v280_v38 = vadd.f32 %v774_v30, %v257_v23  ;;  %v288_v39 = vadd.f32 %v774_v30, %v265_v24 }
 0x102   :  { %569 = vst [vmem:[%s853_s5 + $0x8] sm:$0xff] %v530_v29   ;;  %573 = vst [vmem:[%s853_s5 + $0x28] sm:$0xff] %v550_v31   ;;  %v260_v42 = vmul.f32 %v615_v25, %v749_v20  ;;  %v505_v43 = vunpack.c.h.bf16 %v754_v21  ;;  %v268_v44 = vmul.f32 %v623_v26, %v749_v20  ;;  %v521_v45 = vunpack.c.h.bf16 %v759_v22 }
 0x103   :  { %526 = vst [vmem:[%s853_s5] sm:$0xff] %v525_v36   ;;  %572 = vst [vmem:[%s853_s5 + $0x20] sm:$0xff] %v545_v37   ;;  %v258_v48 = vmul.f32 %v749_v20, %v202_v34  ;;  %v501_v49 = vunpack.c.h.bf16 %v764_v27  ;;  %v266_v50 = vmul.f32 %v749_v20, %v234_v35  ;;  %v517_v51 = vunpack.c.h.bf16 %v769_v28 }
 0x104   :  { %v330_v52 = vadd.f32 %v504_v40, %v282_v32  ;;  %v338_v53 = vadd.f32 %v520_v41, %v290_v33  ;;  %v283_v54 = vadd.f32 %v774_v30, %v260_v42  ;;  %v291_v55 = vadd.f32 %v774_v30, %v268_v44 }
 0x105   :  { %v328_v56 = vadd.f32 %v500_v46, %v280_v38  ;;  %v336_v57 = vadd.f32 %v516_v47, %v288_v39  ;;  %v281_v20 = vadd.f32 %v774_v30, %v258_v48  ;;  %v289_v58 = vadd.f32 %v774_v30, %v266_v50 }
 0x106   :  { %v331_v59 = vadd.f32 %v505_v43, %v283_v54  ;;  %v339_v21 = vadd.f32 %v521_v45, %v291_v55  ;;  %v346_v22 = vmax.f32 %v330_v52, 0.0  ;;  %v354_v41 = vmax.f32 %v338_v53, 0.0 }
 0x107   :  { %v329_v40 = vadd.f32 %v501_v49, %v281_v20  ;;  %v337_v60 = vadd.f32 %v517_v51, %v289_v58  ;;  %v344_v63 = vmax.f32 %v328_v56, 0.0  ;;  %v352_v0 = vmax.f32 %v336_v57, 0.0 }
 0x108   :  { %v347_v61 = vmax.f32 %v331_v59, 0.0  ;;  %v355_v62 = vmax.f32 %v339_v21, 0.0 }
 0x109   :  { %v345_v1 = vmax.f32 %v329_v40, 0.0  ;;  %v353_v27 = vmax.f32 %v337_v60, 0.0 }
 0x10a   :  { %v540_v46 = vpack.c.bf16 %v347_v61, %v346_v22  ;;  %v560_v2 = vpack.c.bf16 %v355_v62, %v354_v41 }
 0x10b   :  { %v535_v28 = vpack.c.bf16 %v345_v1, %v344_v63  ;;  %v555_v47 = vpack.c.bf16 %v353_v27, %v352_v0 }
 0x10c   :  { %571 = vst [vmem:[%s853_s5 + $0x18] sm:$0xff] %v540_v46   ;;  %575 = vst [vmem:[%s853_s5 + $0x38] sm:$0xff] %v560_v2  }
 0x10d   :  { %570 = vst [vmem:[%s853_s5 + $0x10] sm:$0xff] %v535_v28   ;;  %574 = vst [vmem:[%s853_s5 + $0x30] sm:$0xff] %v555_v47  }

// kernel: _lambda_.21
= control target key start
LH: loop header
LB: loop body
LE: loop exit
PB: predicated region body
PF: predicated region fallthrough
CT: control target
= control target key end

     0   :  { %s370_s1 = inlined_call_operand.vmem [shape: bf16[128,128], index: 1, kind: input, shape index: {}]   ;;  %s371_s0 = inlined_call_operand.vmem [shape: bf16[32,128], index: 0, kind: input, shape index: {}]   ;;  %s372_s2 = inlined_call_operand.vmem [shape: f32[1,128], index: 2, kind: input, shape index: {}]   ;;  %s373_s4 = inlined_call_operand.vmem [shape: bf16[32,128], index: 4, kind: input, shape index: {}]   ;;  %s374_s3 = inlined_call_operand.vmem [shape: f32[1,128], index: 3, kind: input, shape index: {}]   ;;  %s375_s5 = inlined_call_operand.vmem [shape: bf16[32,128], index: 5, kind: output, shape index: {}]  }
   0x1   :  { %v282_v0 = vld [vmem:[%s370_s1] sm:$0xff]   ;;  %v283_v1 = vld [vmem:[%s370_s1 + $0x8] sm:$0xff]   ;;  %v284_v2 = vld [vmem:[%s370_s1 + $0x10] sm:$0xff]  }
   0x2   :  { %262 = vmatprep.subr.bf16.mxu0 %v282_v0  ;;  %v285_v3 = vld [vmem:[%s370_s1 + $0x18] sm:$0xff]   ;;  %v290_v4 = vld [vmem:[%s371_s0] sm:$0xff]   ;;  %v287_v6 = vld [vmem:[%s370_s1 + $0x28] sm:$0xff]  }
   0x3   :  { %263 = vmatpush3.bf16.msra.mxu0 %v282_v0  ;;  %278 = vmatprep.mubr.bf16.mxu0 %v290_v4  ;;  %v286_v5 = vld [vmem:[%s370_s1 + $0x20] sm:$0xff]   ;;  %v288_v7 = vld [vmem:[%s370_s1 + $0x30] sm:$0xff]   ;;  %v289_v8 = vld [vmem:[%s370_s1 + $0x38] sm:$0xff]  }
   0x4   :  { %264 = vmatprep.subr.bf16.mxu0 %v283_v1  ;;  %v291_v9 = vld [vmem:[%s371_s0 + $0x8] sm:$0xff]   ;;  %v222_v10 = vld [vmem:[%s372_s2] ss:$0 sm:$0xff] }
   0x5   :  { %v250_v11 = vld [vmem:[%s373_s4 + $0x8] sm:$0xff]   ;;  %v233_v12 = vld [vmem:[%s373_s4] sm:$0xff]  }
   0x6   :  { %v223_v14 = vld [vmem:[%s374_s3] ss:$0 sm:$0xff]  ;;  %v238_v16 = vunpack.c.l.bf16 %v250_v11  ;;  %v234_v19 = vunpack.c.l.bf16 %v233_v12  ;;  %v239_v23 = vunpack.c.h.bf16 %v250_v11  ;;  %v235_v27 = vunpack.c.h.bf16 %v233_v12 }
   0x7   :  { %265 = vmatpush3.bf16.msra.mxu0 %v283_v1 }
   0x8   :  { %266 = vmatprep.subr.bf16.mxu0 %v284_v2 }
   0xb   :  { %267 = vmatpush3.bf16.msra.mxu0 %v284_v2 }
   0xc   :  { %268 = vmatprep.subr.bf16.mxu0 %v285_v3 }
   0xf   :  { %269 = vmatpush3.bf16.msra.mxu0 %v285_v3 }
  0x10   :  { %270 = vmatprep.subr.bf16.mxu0 %v286_v5 }
  0x13   :  { %271 = vmatpush3.bf16.msra.mxu0 %v286_v5 }
  0x14   :  { %272 = vmatprep.subr.bf16.mxu0 %v287_v6 }
  0x17   :  { %273 = vmatpush3.bf16.msra.mxu0 %v287_v6 }
  0x18   :  { %274 = vmatprep.subr.bf16.mxu0 %v288_v7 }
  0x1b   :  { %275 = vmatpush3.bf16.msra.mxu0 %v288_v7 }
  0x1c   :  { %276 = vmatprep.subr.bf16.mxu0 %v289_v8 }
  0x1f   :  { %277 = vmatpush3.bf16.msra.mxu0 %v289_v8 }
  0x22   :  { %279 = vmatmul.mubr.bf16.vlgmr.msra.gmra.mrb[0].mxu0 %v291_v9 }
  0xf5   :  { %v280_v13 = vpop.f32.mrb[0].mxu0 }
  0xf6   :  { %v159_v15 = vmul.f32 %v280_v13, %v222_v10  ;;  %v135_v17 = vpop.f32.mrb[1].mxu0 }
  0xf7   :  { %v157_v18 = vmul.f32 %v222_v10, %v135_v17  ;;  %v281_v20 = vpop.f32.mrb[2].mxu0 }
  0xf8   :  { %v170_v21 = vadd.f32 %v223_v14, %v159_v15  ;;  %v160_v22 = vmul.f32 %v281_v20, %v222_v10  ;;  %v138_v24 = vpop.f32.mrb[3].mxu0 }
  0xf9   :  { %v168_v25 = vadd.f32 %v223_v14, %v157_v18  ;;  %v158_v26 = vmul.f32 %v222_v10, %v138_v24 }
  0xfa   :  { %v182_v28 = vadd.f32 %v238_v16, %v170_v21  ;;  %v171_v29 = vadd.f32 %v223_v14, %v160_v22 }
  0xfb   :  { %v180_v30 = vadd.f32 %v234_v19, %v168_v25  ;;  %v169_v31 = vadd.f32 %v223_v14, %v158_v26 }
  0xfc   :  { %v183_v32 = vadd.f32 %v239_v23, %v171_v29  ;;  %v186_v34 = vmax.f32 %v182_v28, 0.0 }
  0xfd   :  { %v181_v33 = vadd.f32 %v235_v27, %v169_v31  ;;  %v184_v36 = vmax.f32 %v180_v30, 0.0 }
  0xfe   :  { %v187_v35 = vmax.f32 %v183_v32, 0.0 }
  0xff   :  { %v185_v37 = vmax.f32 %v181_v33, 0.0 }
 0x100   :  { %v248_v38 = vpack.c.bf16 %v187_v35, %v186_v34 }
 0x101   :  { %v243_v39 = vpack.c.bf16 %v185_v37, %v184_v36 }
 0x102   :  { %251 = vst [vmem:[%s375_s5 + $0x8] sm:$0xff] %v248_v38  }
 0x103   :  { %244 = vst [vmem:[%s375_s5] sm:$0xff] %v243_v39  }

// kernel: _lambda_.17
= control target key start
LH: loop header
LB: loop body
LE: loop exit
PB: predicated region body
PF: predicated region fallthrough
CT: control target
= control target key end

     0   :  { %s6827_s15 = smov 0   ;;  %s8729_s0 = inlined_call_operand.vmem [shape: bf16[2,10,10,128], index: 0, kind: input, shape index: {}]   ;;  %s8730_s1 = inlined_call_operand.vmem [shape: bf16[9,128,128], index: 1, kind: input, shape index: {}]   ;;  %s8731_s2 = inlined_call_operand.vmem [shape: f32[1,128], index: 2, kind: input, shape index: {}]   ;;  %s8732_s3 = inlined_call_operand.vmem [shape: f32[1,128], index: 3, kind: input, shape index: {}]   ;;  %s8733_s4 = inlined_call_operand.vmem [shape: bf16[2,8,8,128], index: 4, kind: output, shape index: {}]  }
   0x1 LB: > { %s4063_s16 = sadd.s32 4294967295, %s6798_s15   ;;  %p4067_p0 = scmp.ge.s32.totalorder %s6798_s15, 1  ;;  %s6798_s15 = sphi %s6827_s15, %s14_s15  }
   0x2   : > { %p162_p1 = scmp.lt.s32.totalorder %s6798_s15, 3 }
   0x4   : > { %p163_p2 = pnand %p4067_p0, %p162_p1 }
   0x5   : > { %v6838_v0 = vld [vmem:[%s8730_s1 + $0x40] sm:$0xff] (!%p163_p2)   ;;  %v6800_v1 = vmov (!%p163_p2), 0.0   ;;  %v6847_v2 = vld [vmem:[%s8730_s1 + $0x48] sm:$0xff] (!%p163_p2)   ;;  %p188_p3 = scmp.lt.s32.totalorder (!%p163_p2), %s4063_s16, 1  ;;  %vm6801_vm0 = vmmov (!%p163_p2), 0   ;;  %v6862_v3 = vld [vmem:[%s8730_s1 + $0x50] sm:$0xff] (!%p163_p2)  }
   0x6   : > { %166 = sbr.rel (%p163_p2) target bundleno = 1379 (0x563), region = 36  ;;  %4987 = vmatprep.subr.bf16.mxu0 (!%p163_p2), %v6800_v1  ;;  %5027 = vmatprep.subr.bf16.mxu1 (!%p163_p2), %v6800_v1  ;;  %v6877_v4 = vld [vmem:[%s8730_s1 + $0x58] sm:$0xff] (!%p163_p2)   ;;  %v6884_v5 = vld [vmem:[%s8730_s1 + $0x60] sm:$0xff] (!%p163_p2)   ;;  %v6908_v12 = vld [vmem:[%s8730_s1 + $0x68] sm:$0xff] (!%p163_p2)  }
   0x7   : > { %4988 = vmatpush3.bf16.msra.mxu0 (!%p163_p2), %v6838_v0  ;;  %5028 = vmatpush3.bf16.msra.mxu1 (!%p163_p2), %v6838_v0  ;;  %v6917_v15 = vld [vmem:[%s8730_s1 + $0x70] sm:$0xff] (!%p163_p2)   ;;  %v6926_v20 = vld [vmem:[%s8730_s1 + $0x78] sm:$0xff] (!%p163_p2)   ;;  %v6937_v23 = vld [vmem:[%s8730_s1] sm:$0xff] (!%p163_p2)  }
   0x8   : > { %4989 = vmatprep.subr.bf16.mxu0 (!%p163_p2), %v6800_v1  ;;  %5029 = vmatprep.subr.bf16.mxu1 (!%p163_p2), %v6800_v1  ;;  %v6944_v24 = vld [vmem:[%s8730_s1 + $0x8] sm:$0xff] (!%p163_p2)   ;;  %v6954_v25 = vld [vmem:[%s8730_s1 + $0x10] sm:$0xff] (!%p163_p2)   ;;  %v6967_v26 = vld [vmem:[%s8730_s1 + $0x18] sm:$0xff] (!%p163_p2)  }
   0x9   : > { %5003 = vmatprep.mubr.msk.bf16.mxu0 (!%p163_p2), %vm6801_vm0, %v6800_v1  ;;  %5043 = vmatprep.mubr.msk.bf16.mxu1 (!%p163_p2), %vm6801_vm0, %v6800_v1  ;;  %v6976_v27 = vld [vmem:[%s8730_s1 + $0x20] sm:$0xff] (!%p163_p2)   ;;  %v6985_v28 = vld [vmem:[%s8730_s1 + $0x28] sm:$0xff] (!%p163_p2)   ;;  %v6994_v29 = vld [vmem:[%s8730_s1 + $0x30] sm:$0xff] (!%p163_p2)  }
   0xa   : > { %v7003_v30 = vld [vmem:[%s8730_s1 + $0x38] sm:$0xff] (!%p163_p2)  }
   0xb   : > { %4990 = vmatpush3.bf16.msra.mxu0 (!%p163_p2), %v6847_v2  ;;  %5030 = vmatpush3.bf16.msra.mxu1 (!%p163_p2), %v6847_v2 }
   0xc   : > { %4991 = vmatprep.subr.bf16.mxu0 (!%p163_p2), %v6800_v1  ;;  %5031 = vmatprep.subr.bf16.mxu1 (!%p163_p2), %v6800_v1 }
   0xd   : > { %s8735_s16 = smov (!%p188_p3, %s4063_s16), 1 }
   0xe   : > { %s6683_s23 = smul.u32 80, %s8735_s16  ;;  %s4338_s30 = sshll.u32 %s8735_s16, 5 }
   0xf   : > { %4992 = vmatpush3.bf16.msra.mxu0 %v6862_v3  ;;  %5032 = vmatpush3.bf16.msra.mxu1 %v6862_v3  ;;  %s8710_s7 = scalar_lea.vmem %s8733_s4, %s4338_s30 }
  0x10   : > { %s6870_s26 = scalar_lea.vmem %s8729_s0, %s6683_s23  ;;  %4993 = vmatprep.subr.bf16.mxu0 %v6800_v1  ;;  %5033 = vmatprep.subr.bf16.mxu1 %v6800_v1 }
  0x11   : > { %v6887_v6 = vld [vmem:[%s6870_s26] sm:$0xf]  ;;  %v6890_v7 = vld [vmem:[%s6870_s26 + $0x4] sm:$0x1]  ;;  %v4111_v8 = vld [vmem:[%s6870_s26 + $0x8] sm:$0xf] }
  0x12   : > { %v6896_v9 = vld [vmem:[%s6870_s26 + $0xc] sm:$0x1]  ;;  %v4094_v10 = vcombine.low %v6887_v6, %v6890_v7  ;;  %v7012_v31 = vld [vmem:[%s6870_s26 + $0x8] sm:$0xf]  ;;  %v4114_v32 = vld [vmem:[%s6870_s26 + $0x10] sm:$0xf] }
  0x13   : > { %4994 = vmatpush3.bf16.msra.mxu0 %v6877_v4  ;;  %5034 = vmatpush3.bf16.msra.mxu1 %v6877_v4  ;;  %v4113_v11 = vcombine.low %v4111_v8, %v6896_v9  ;;  %v7038_v33 = vld [vmem:[%s6870_s26 + $0x14] sm:$0x1]  ;;  %v4117_v34 = vld [vmem:[%s6870_s26 + $0x18] sm:$0xf]  ;;  %v7042_v35 = vld [vmem:[%s6870_s26 + $0x1c] sm:$0x1] }
  0x14   : > { %4995 = vmatprep.subr.bf16.mxu0 %v6800_v1  ;;  %5035 = vmatprep.subr.bf16.mxu1 %v6800_v1  ;;  %v256_v13 = vshll.u32 %v4094_v10, 16  ;;  %v254_v16 = vshrl.u32 %v4094_v10, 16  ;;  %v4116_v36 = vcombine.low %v4114_v32, %v7038_v33  ;;  %v4119_v37 = vcombine.low %v4117_v34, %v7042_v35  ;;  %v7105_v46 = vld [vmem:[%s6870_s26 + $0x10] sm:$0xf]  ;;  %v7108_v47 = vld [vmem:[%s6870_s26 + $0x18] sm:$0xf] }
  0x15   : > { %v447_v14 = vshll.u32 %v4113_v11, 16  ;;  %v445_v18 = vshrl.u32 %v4113_v11, 16  ;;  %v4120_v48 = vld [vmem:[%s6870_s26 + $0x20] sm:$0xf]  ;;  %v7134_v49 = vld [vmem:[%s6870_s26 + $0x24] sm:$0x1] }
  0x16   : > { %v258_v17 = vrot.slane %v256_v13, 1  ;;  %v542_v38 = vshll.u32 %v4116_v36, 16  ;;  %v637_v39 = vshll.u32 %v4119_v37, 16  ;;  %v540_v40 = vshrl.u32 %v4116_v36, 16  ;;  %v4123_v50 = vld [vmem:[%s6870_s26 + $0x28] sm:$0xf] }
  0x17   : > { %4996 = vmatpush3.bf16.msra.mxu0 %v6884_v5  ;;  %5036 = vmatpush3.bf16.msra.mxu1 %v6884_v5  ;;  %v449_v19 = vrot.slane %v447_v14, 1  ;;  %v635_v42 = vshrl.u32 %v4119_v37, 16  ;;  %v7138_v51 = vld [vmem:[%s6870_s26 + $0x2c] sm:$0x1]  ;;  %v4122_v52 = vcombine.low %v4120_v48, %v7134_v49  ;;  %v7201_v62 = vld [vmem:[%s6870_s26 + $0x20] sm:$0xf] }
  0x18   : > { %4997 = vmatprep.subr.bf16.mxu0 %v6800_v1  ;;  %5037 = vmatprep.subr.bf16.mxu1 %v6800_v1  ;;  %v259_v21 = vor.u32 %v258_v17, %v254_v16  ;;  %v544_v41 = vrot.slane %v542_v38, 1  ;;  %v639_v43 = vrot.slane %v637_v39, 1  ;;  %v4125_v53 = vcombine.low %v4123_v50, %v7138_v51  ;;  %v7204_v63 = vld [vmem:[%s6870_s26 + $0x28] sm:$0xf]  ;;  %v7234_v8 = vld [vmem:[%s6870_s26 + $0x3c] sm:$0x1] }
  0x19   : > { %v6930_v22 = vor.u32 %v449_v19, %v445_v18  ;;  %v732_v54 = vshll.u32 %v4122_v52, 16  ;;  %v730_v56 = vshrl.u32 %v4122_v52, 16  ;;  %v7305_v19 = vld [vmem:[%s8730_s1 + $0x80] sm:$0xff]   ;;  %v7378_v32 = vld [vmem:[%s8730_s1 + $0xb8] sm:$0xff]  }
  0x1a   : > { %v7060_v44 = vor.u32 %v544_v41, %v540_v40  ;;  %v7062_v45 = vor.u32 %v639_v43, %v635_v42  ;;  %v827_v55 = vshll.u32 %v4125_v53, 16  ;;  %v825_v58 = vshrl.u32 %v4125_v53, 16  ;;  %v4169_v50 = vld [vmem:[%s6870_s26 + $0x38] sm:$0xe] }
  0x1b   : > { %4998 = vmatpush3.bf16.msra.mxu0 %v6908_v12  ;;  %5038 = vmatpush3.bf16.msra.mxu1 %v6908_v12  ;;  %v734_v57 = vrot.slane %v732_v54, 1  ;;  %v4170_v52 = vcombine.low %v4169_v50, %v7234_v8  ;;  %v6791_v50 = vld [vmem:[%s6870_s26 + $0x38] sm:$0xf] }
  0x1c   : > { %4999 = vmatprep.subr.bf16.mxu0 %v6800_v1  ;;  %5039 = vmatprep.subr.bf16.mxu1 %v6800_v1  ;;  %v829_v59 = vrot.slane %v827_v55, 1  ;;  %v7526_v55 = vld [vmem:[%s8730_s1 + $0xc0] sm:$0xff]  }
  0x1d   : > { %v7156_v60 = vor.u32 %v734_v57, %v730_v56  ;;  %v7519_v54 = vrot.slane %v4170_v52, 1  ;;  %v7537_v56 = vld [vmem:[%s8730_s1 + $0xc8] sm:$0xff]   ;;  %v7550_v57 = vld [vmem:[%s8730_s1 + $0xd0] sm:$0xff]   ;;  %v8309_v52 = vld [vmem:[%s8730_s1 + $0x1c0] sm:$0xff]  }
  0x1e   : > { %v7158_v61 = vor.u32 %v829_v59, %v825_v58  ;;  %v7559_v58 = vld [vmem:[%s8730_s1 + $0xd8] sm:$0xff]   ;;  %v7568_v59 = vld [vmem:[%s8730_s1 + $0xe0] sm:$0xff]  }
  0x1f   : > { %5000 = vmatpush3.bf16.msra.mxu0 %v6917_v15  ;;  %5040 = vmatpush3.bf16.msra.mxu1 %v6917_v15 }
  0x20   : > { %5001 = vmatprep.subr.bf16.mxu0 %v6800_v1  ;;  %5041 = vmatprep.subr.bf16.mxu1 %v6800_v1 }
  0x23   : > { %5002 = vmatpush3.bf16.msra.mxu0 %v6926_v20  ;;  %5042 = vmatpush3.bf16.msra.mxu1 %v6926_v20 }
  0x24   : > { %5007 = vmatprep.subr.bf16.mxu0 %v6800_v1  ;;  %5047 = vmatprep.subr.bf16.mxu1 %v6800_v1 }
  0x26   : > { %5004 = vmatmul.mubr.bf16.vlgmr.msra.gmra.mrb[0].mxu0 %v259_v21  ;;  %5044 = vmatmul.mubr.bf16.vlgmr.msra.gmra.mrb[0].mxu1 %v6930_v22  ;;  %v7329_v21 = vld [vmem:[%s8730_s1 + $0x90] sm:$0xff]  }
  0x27   : > { %5008 = vmatpush3.bf16.msra.mxu0 %v6937_v23  ;;  %5048 = vmatpush3.bf16.msra.mxu1 %v6937_v23 }
  0x28   : > { %5009 = vmatprep.subr.bf16.mxu0 %v6800_v1  ;;  %5049 = vmatprep.subr.bf16.mxu1 %v6800_v1 }
  0x29   : > { %5023 = vmatprep.mubr.msk.bf16.mxu0 %vm6801_vm0, %v6800_v1  ;;  %5063 = vmatprep.mubr.msk.bf16.mxu1 %vm6801_vm0, %v6800_v1 }
  0x2b   : > { %5010 = vmatpush3.bf16.msra.mxu0 %v6944_v24  ;;  %5050 = vmatpush3.bf16.msra.mxu1 %v6944_v24 }
  0x2c   : > { %5011 = vmatprep.subr.bf16.mxu0 %v6800_v1  ;;  %5051 = vmatprep.subr.bf16.mxu1 %v6800_v1 }
  0x2f   : > { %5012 = vmatpush3.bf16.msra.mxu0 %v6954_v25  ;;  %5052 = vmatpush3.bf16.msra.mxu1 %v6954_v25 }
  0x30   : > { %5013 = vmatprep.subr.bf16.mxu0 %v6800_v1  ;;  %5053 = vmatprep.subr.bf16.mxu1 %v6800_v1 }
  0x33   : > { %5014 = vmatpush3.bf16.msra.mxu0 %v6967_v26  ;;  %5054 = vmatpush3.bf16.msra.mxu1 %v6967_v26 }
  0x34   : > { %5015 = vmatprep.subr.bf16.mxu0 %v6800_v1  ;;  %5055 = vmatprep.subr.bf16.mxu1 %v6800_v1 }
  0x37   : > { %5016 = vmatpush3.bf16.msra.mxu0 %v6976_v27  ;;  %5056 = vmatpush3.bf16.msra.mxu1 %v6976_v27 }
  0x38   : > { %5017 = vmatprep.subr.bf16.mxu0 %v6800_v1  ;;  %5057 = vmatprep.subr.bf16.mxu1 %v6800_v1 }
  0x3b   : > { %5018 = vmatpush3.bf16.msra.mxu0 %v6985_v28  ;;  %5058 = vmatpush3.bf16.msra.mxu1 %v6985_v28 }
  0x3c   : > { %5019 = vmatprep.subr.bf16.mxu0 %v6800_v1  ;;  %5059 = vmatprep.subr.bf16.mxu1 %v6800_v1 }
  0x3f   : > { %5020 = vmatpush3.bf16.msra.mxu0 %v6994_v29  ;;  %5060 = vmatpush3.bf16.msra.mxu1 %v6994_v29 }
  0x40   : > { %5021 = vmatprep.subr.bf16.mxu0 %v6800_v1  ;;  %5061 = vmatprep.subr.bf16.mxu1 %v6800_v1 }
  0x43   : > { %5022 = vmatpush3.bf16.msra.mxu0 %v7003_v30  ;;  %5062 = vmatpush3.bf16.msra.mxu1 %v7003_v30 }
  0x44   : > { %5067 = vmatprep.subr.bf16.mxu0 %v6800_v1  ;;  %5107 = vmatprep.subr.bf16.mxu1 %v6800_v1 }
  0x46   : > { %5024 = vmatmul.mubr.bf16.vlgmr.msra.gmra.mrb[0].mxu0 %v6887_v6  ;;  %5064 = vmatmul.mubr.bf16.vlgmr.msra.gmra.mrb[0].mxu1 %v7012_v31  ;;  %v7230_v6 = vld [vmem:[%s6870_s26 + $0x34] sm:$0x1] }
  0x47   : > { %5068 = vmatpush3.bf16.msra.mxu0 %v6838_v0  ;;  %5108 = vmatpush3.bf16.msra.mxu1 %v6838_v0 }
  0x48   : > { %5069 = vmatprep.subr.bf16.mxu0 %v6800_v1  ;;  %5109 = vmatprep.subr.bf16.mxu1 %v6800_v1 }
  0x49   : > { %5083 = vmatprep.mubr.msk.bf16.mxu0 %vm6801_vm0, %v6800_v1  ;;  %5123 = vmatprep.mubr.msk.bf16.mxu1 %vm6801_vm0, %v6800_v1 }
  0x4b   : > { %5070 = vmatpush3.bf16.msra.mxu0 %v6847_v2  ;;  %5110 = vmatpush3.bf16.msra.mxu1 %v6847_v2 }
  0x4c   : > { %5071 = vmatprep.subr.bf16.mxu0 %v6800_v1  ;;  %5111 = vmatprep.subr.bf16.mxu1 %v6800_v1 }
  0x4f   : > { %5072 = vmatpush3.bf16.msra.mxu0 %v6862_v3  ;;  %5112 = vmatpush3.bf16.msra.mxu1 %v6862_v3 }
  0x50   : > { %5073 = vmatprep.subr.bf16.mxu0 %v6800_v1  ;;  %5113 = vmatprep.subr.bf16.mxu1 %v6800_v1 }
  0x53   : > { %5074 = vmatpush3.bf16.msra.mxu0 %v6877_v4  ;;  %5114 = vmatpush3.bf16.msra.mxu1 %v6877_v4 }
  0x54   : > { %5075 = vmatprep.subr.bf16.mxu0 %v6800_v1  ;;  %5115 = vmatprep.subr.bf16.mxu1 %v6800_v1 }
  0x57   : > { %5076 = vmatpush3.bf16.msra.mxu0 %v6884_v5  ;;  %5116 = vmatpush3.bf16.msra.mxu1 %v6884_v5 }
  0x58   : > { %5077 = vmatprep.subr.bf16.mxu0 %v6800_v1  ;;  %5117 = vmatprep.subr.bf16.mxu1 %v6800_v1 }
  0x5b   : > { %5078 = vmatpush3.bf16.msra.mxu0 %v6908_v12  ;;  %5118 = vmatpush3.bf16.msra.mxu1 %v6908_v12 }
  0x5c   : > { %5079 = vmatprep.subr.bf16.mxu0 %v6800_v1  ;;  %5119 = vmatprep.subr.bf16.mxu1 %v6800_v1 }
  0x5f   : > { %5080 = vmatpush3.bf16.msra.mxu0 %v6917_v15  ;;  %5120 = vmatpush3.bf16.msra.mxu1 %v6917_v15 }
  0x60   : > { %5081 = vmatprep.subr.bf16.mxu0 %v6800_v1  ;;  %5121 = vmatprep.subr.bf16.mxu1 %v6800_v1 }
  0x63   : > { %5082 = vmatpush3.bf16.msra.mxu0 %v6926_v20  ;;  %5122 = vmatpush3.bf16.msra.mxu1 %v6926_v20 }
  0x64   : > { %5087 = vmatprep.subr.bf16.mxu0 %v6800_v1  ;;  %5127 = vmatprep.subr.bf16.mxu1 %v6800_v1 }
  0x66   : > { %5084 = vmatmul.mubr.bf16.vlgmr.msra.gmra.mrb[4].mxu0 %v7060_v44  ;;  %5124 = vmatmul.mubr.bf16.vlgmr.msra.gmra.mrb[4].mxu1 %v7062_v45 }
  0x67   : > { %5088 = vmatpush3.bf16.msra.mxu0 %v6937_v23  ;;  %5128 = vmatpush3.bf16.msra.mxu1 %v6937_v23 }
  0x68   : > { %5089 = vmatprep.subr.bf16.mxu0 %v6800_v1  ;;  %5129 = vmatprep.subr.bf16.mxu1 %v6800_v1 }
  0x69   : > { %5103 = vmatprep.mubr.msk.bf16.mxu0 %vm6801_vm0, %v6800_v1  ;;  %5143 = vmatprep.mubr.msk.bf16.mxu1 %vm6801_vm0, %v6800_v1 }
  0x6b   : > { %5090 = vmatpush3.bf16.msra.mxu0 %v6944_v24  ;;  %5130 = vmatpush3.bf16.msra.mxu1 %v6944_v24 }
  0x6c   : > { %5091 = vmatprep.subr.bf16.mxu0 %v6800_v1  ;;  %5131 = vmatprep.subr.bf16.mxu1 %v6800_v1 }
  0x6f   : > { %5092 = vmatpush3.bf16.msra.mxu0 %v6954_v25  ;;  %5132 = vmatpush3.bf16.msra.mxu1 %v6954_v25 }
  0x70   : > { %5093 = vmatprep.subr.bf16.mxu0 %v6800_v1  ;;  %5133 = vmatprep.subr.bf16.mxu1 %v6800_v1 }
  0x73   : > { %5094 = vmatpush3.bf16.msra.mxu0 %v6967_v26  ;;  %5134 = vmatpush3.bf16.msra.mxu1 %v6967_v26 }
  0x74   : > { %5095 = vmatprep.subr.bf16.mxu0 %v6800_v1  ;;  %5135 = vmatprep.subr.bf16.mxu1 %v6800_v1 }
  0x77   : > { %5096 = vmatpush3.bf16.msra.mxu0 %v6976_v27  ;;  %5136 = vmatpush3.bf16.msra.mxu1 %v6976_v27 }
  0x78   : > { %5097 = vmatprep.subr.bf16.mxu0 %v6800_v1  ;;  %5137 = vmatprep.subr.bf16.mxu1 %v6800_v1 }
  0x7b   : > { %5098 = vmatpush3.bf16.msra.mxu0 %v6985_v28  ;;  %5138 = vmatpush3.bf16.msra.mxu1 %v6985_v28 }
  0x7c   : > { %5099 = vmatprep.subr.bf16.mxu0 %v6800_v1  ;;  %5139 = vmatprep.subr.bf16.mxu1 %v6800_v1 }
  0x7f   : > { %5100 = vmatpush3.bf16.msra.mxu0 %v6994_v29  ;;  %5140 = vmatpush3.bf16.msra.mxu1 %v6994_v29 }
  0x80   : > { %5101 = vmatprep.subr.bf16.mxu0 %v6800_v1  ;;  %5141 = vmatprep.subr.bf16.mxu1 %v6800_v1 }
  0x83   : > { %5102 = vmatpush3.bf16.msra.mxu0 %v7003_v30  ;;  %5142 = vmatpush3.bf16.msra.mxu1 %v7003_v30 }
  0x84   : > { %5147 = vmatprep.subr.bf16.mxu0 %v6800_v1  ;;  %5187 = vmatprep.subr.bf16.mxu1 %v6800_v1 }
  0x86   : > { %5104 = vmatmul.mubr.bf16.vlgmr.msra.gmra.mrb[4].mxu0 %v7105_v46  ;;  %5144 = vmatmul.mubr.bf16.vlgmr.msra.gmra.mrb[4].mxu1 %v7108_v47 }
  0x87   : > { %5148 = vmatpush3.bf16.msra.mxu0 %v6838_v0  ;;  %5188 = vmatpush3.bf16.msra.mxu1 %v6838_v0 }
  0x88   : > { %5149 = vmatprep.subr.bf16.mxu0 %v6800_v1  ;;  %5189 = vmatprep.subr.bf16.mxu1 %v6800_v1 }
  0x89   : > { %5163 = vmatprep.mubr.msk.bf16.mxu0 %vm6801_vm0, %v6800_v1  ;;  %5203 = vmatprep.mubr.msk.bf16.mxu1 %vm6801_vm0, %v6800_v1 }
  0x8b   : > { %5150 = vmatpush3.bf16.msra.mxu0 %v6847_v2  ;;  %5190 = vmatpush3.bf16.msra.mxu1 %v6847_v2 }
  0x8c   : > { %5151 = vmatprep.subr.bf16.mxu0 %v6800_v1  ;;  %5191 = vmatprep.subr.bf16.mxu1 %v6800_v1 }
  0x8f   : > { %5152 = vmatpush3.bf16.msra.mxu0 %v6862_v3  ;;  %5192 = vmatpush3.bf16.msra.mxu1 %v6862_v3 }
  0x90   : > { %5153 = vmatprep.subr.bf16.mxu0 %v6800_v1  ;;  %5193 = vmatprep.subr.bf16.mxu1 %v6800_v1 }
  0x93   : > { %5154 = vmatpush3.bf16.msra.mxu0 %v6877_v4  ;;  %5194 = vmatpush3.bf16.msra.mxu1 %v6877_v4 }
  0x94   : > { %5155 = vmatprep.subr.bf16.mxu0 %v6800_v1  ;;  %5195 = vmatprep.subr.bf16.mxu1 %v6800_v1 }
  0x97   : > { %5156 = vmatpush3.bf16.msra.mxu0 %v6884_v5  ;;  %5196 = vmatpush3.bf16.msra.mxu1 %v6884_v5 }
  0x98   : > { %5157 = vmatprep.subr.bf16.mxu0 %v6800_v1  ;;  %5197 = vmatprep.subr.bf16.mxu1 %v6800_v1 }
  0x9b   : > { %5158 = vmatpush3.bf16.msra.mxu0 %v6908_v12  ;;  %5198 = vmatpush3.bf16.msra.mxu1 %v6908_v12 }
  0x9c   : > { %5159 = vmatprep.subr.bf16.mxu0 %v6800_v1  ;;  %5199 = vmatprep.subr.bf16.mxu1 %v6800_v1 }
  0x9f   : > { %5160 = vmatpush3.bf16.msra.mxu0 %v6917_v15  ;;  %5200 = vmatpush3.bf16.msra.mxu1 %v6917_v15 }
  0xa0   : > { %5161 = vmatprep.subr.bf16.mxu0 %v6800_v1  ;;  %5201 = vmatprep.subr.bf16.mxu1 %v6800_v1 }
  0xa3   : > { %5162 = vmatpush3.bf16.msra.mxu0 %v6926_v20  ;;  %5202 = vmatpush3.bf16.msra.mxu1 %v6926_v20 }
  0xa4   : > { %5167 = vmatprep.subr.bf16.mxu0 %v6800_v1  ;;  %5207 = vmatprep.subr.bf16.mxu1 %v6800_v1 }
  0xa6   : > { %5164 = vmatmul.mubr.bf16.vlgmr.msra.gmra.mrb[8].mxu0 %v7156_v60  ;;  %5204 = vmatmul.mubr.bf16.vlgmr.msra.gmra.mrb[8].mxu1 %v7158_v61 }
  0xa7   : > { %5168 = vmatpush3.bf16.msra.mxu0 %v6937_v23  ;;  %5208 = vmatpush3.bf16.msra.mxu1 %v6937_v23 }
  0xa8   : > { %5169 = vmatprep.subr.bf16.mxu0 %v6800_v1  ;;  %5209 = vmatprep.subr.bf16.mxu1 %v6800_v1 }
  0xa9   : > { %5183 = vmatprep.mubr.msk.bf16.mxu0 %vm6801_vm0, %v6800_v1  ;;  %5223 = vmatprep.mubr.msk.bf16.mxu1 %vm6801_vm0, %v6800_v1 }
  0xab   : > { %5170 = vmatpush3.bf16.msra.mxu0 %v6944_v24  ;;  %5210 = vmatpush3.bf16.msra.mxu1 %v6944_v24 }
  0xac   : > { %5171 = vmatprep.subr.bf16.mxu0 %v6800_v1  ;;  %5211 = vmatprep.subr.bf16.mxu1 %v6800_v1 }
  0xaf   : > { %5172 = vmatpush3.bf16.msra.mxu0 %v6954_v25  ;;  %5212 = vmatpush3.bf16.msra.mxu1 %v6954_v25 }
  0xb0   : > { %5173 = vmatprep.subr.bf16.mxu0 %v6800_v1  ;;  %5213 = vmatprep.subr.bf16.mxu1 %v6800_v1 }
  0xb3   : > { %5174 = vmatpush3.bf16.msra.mxu0 %v6967_v26  ;;  %5214 = vmatpush3.bf16.msra.mxu1 %v6967_v26 }
  0xb4   : > { %5175 = vmatprep.subr.bf16.mxu0 %v6800_v1  ;;  %5215 = vmatprep.subr.bf16.mxu1 %v6800_v1 }
  0xb7   : > { %5176 = vmatpush3.bf16.msra.mxu0 %v6976_v27  ;;  %5216 = vmatpush3.bf16.msra.mxu1 %v6976_v27 }
  0xb8   : > { %5177 = vmatprep.subr.bf16.mxu0 %v6800_v1  ;;  %5217 = vmatprep.subr.bf16.mxu1 %v6800_v1 }
  0xbb   : > { %5178 = vmatpush3.bf16.msra.mxu0 %v6985_v28  ;;  %5218 = vmatpush3.bf16.msra.mxu1 %v6985_v28 }
  0xbc   : > { %5179 = vmatprep.subr.bf16.mxu0 %v6800_v1  ;;  %5219 = vmatprep.subr.bf16.mxu1 %v6800_v1 }
  0xbf   : > { %5180 = vmatpush3.bf16.msra.mxu0 %v6994_v29  ;;  %5220 = vmatpush3.bf16.msra.mxu1 %v6994_v29 }
  0xc0   : > { %5181 = vmatprep.subr.bf16.mxu0 %v6800_v1  ;;  %5221 = vmatprep.subr.bf16.mxu1 %v6800_v1 }
  0xc3   : > { %5182 = vmatpush3.bf16.msra.mxu0 %v7003_v30  ;;  %5222 = vmatpush3.bf16.msra.mxu1 %v7003_v30 }
  0xc4   : > { %5227 = vmatprep.subr.bf16.mxu0 %v6800_v1  ;;  %5267 = vmatprep.subr.bf16.mxu1 %v6800_v1 }
  0xc6   : > { %5184 = vmatmul.mubr.bf16.vlgmr.msra.gmra.mrb[8].mxu0 %v7201_v62  ;;  %5224 = vmatmul.mubr.bf16.vlgmr.msra.gmra.mrb[8].mxu1 %v7204_v63 }
  0xc7   : > { %5228 = vmatpush3.bf16.msra.mxu0 %v6838_v0  ;;  %5268 = vmatpush3.bf16.msra.mxu1 %v6838_v0  ;;  %v4126_v0 = vld [vmem:[%s6870_s26 + $0x30] sm:$0xf] }
  0xc8   : > { %5229 = vmatprep.subr.bf16.mxu0 %v6800_v1  ;;  %5269 = vmatprep.subr.bf16.mxu1 %v6800_v1 }
  0xc9   : > { %5243 = vmatprep.mubr.msk.bf16.mxu0 %vm6801_vm0, %v6800_v1  ;;  %5283 = vmatprep.mubr.msk.bf16.mxu1 %vm6801_vm0, %v6800_v1 }
  0xcb   : > { %5230 = vmatpush3.bf16.msra.mxu0 %v6847_v2  ;;  %5270 = vmatpush3.bf16.msra.mxu1 %v6847_v2  ;;  %v4129_v2 = vld [vmem:[%s6870_s26 + $0x38] sm:$0xf] }
  0xcc   : > { %5231 = vmatprep.subr.bf16.mxu0 %v6800_v1  ;;  %5271 = vmatprep.subr.bf16.mxu1 %v6800_v1  ;;  %v4131_v10 = vcombine.low %v4129_v2, %v7234_v8  ;;  %v7595_v2 = vld [vmem:[%s8730_s1 + $0xf8] sm:$0xff]   ;;  %v7763_v8 = vld [vmem:[%s8730_s1 + $0x120] sm:$0xff]  }
  0xce   : > { %v1017_v11 = vshll.u32 %v4131_v10, 16  ;;  %v1015_v16 = vshrl.u32 %v4131_v10, 16  ;;  %v7781_v10 = vld [vmem:[%s8730_s1 + $0x130] sm:$0xff]  }
  0xcf   : > { %5232 = vmatpush3.bf16.msra.mxu0 %v6862_v3  ;;  %5272 = vmatpush3.bf16.msra.mxu1 %v6862_v3  ;;  %v4128_v3 = vcombine.low %v4126_v0, %v7230_v6  ;;  %v7577_v0 = vld [vmem:[%s8730_s1 + $0xe8] sm:$0xff]  }
  0xd0   : > { %5233 = vmatprep.subr.bf16.mxu0 %v6800_v1  ;;  %5273 = vmatprep.subr.bf16.mxu1 %v6800_v1  ;;  %v1019_v17 = vrot.slane %v1017_v11, 1  ;;  %v7896_v11 = vld [vmem:[%s6870_s26 + $0x44] sm:$0x1] }
  0xd1   : > { %v920_v13 = vshrl.u32 %v4128_v3, 16 }
  0xd2   : > { %v7254_v18 = vor.u32 %v1019_v17, %v1015_v16 }
  0xd3   : > { %5234 = vmatpush3.bf16.msra.mxu0 %v6877_v4  ;;  %5274 = vmatpush3.bf16.msra.mxu1 %v6877_v4  ;;  %v922_v4 = vshll.u32 %v4128_v3, 16  ;;  %v7772_v3 = vld [vmem:[%s8730_s1 + $0x128] sm:$0xff]  }
  0xd4   : > { %5235 = vmatprep.subr.bf16.mxu0 %v6800_v1  ;;  %5275 = vmatprep.subr.bf16.mxu1 %v6800_v1 }
  0xd5   : > { %v924_v14 = vrot.slane %v922_v4, 1  ;;  %v7790_v4 = vld [vmem:[%s8730_s1 + $0x138] sm:$0xff]  }
  0xd7   : > { %5236 = vmatpush3.bf16.msra.mxu0 %v6884_v5  ;;  %5276 = vmatpush3.bf16.msra.mxu1 %v6884_v5  ;;  %v7252_v5 = vor.u32 %v924_v14, %v920_v13 }
  0xd8   : > { %5237 = vmatprep.subr.bf16.mxu0 %v6800_v1  ;;  %5277 = vmatprep.subr.bf16.mxu1 %v6800_v1 }
  0xdb   : > { %5238 = vmatpush3.bf16.msra.mxu0 %v6908_v12  ;;  %5278 = vmatpush3.bf16.msra.mxu1 %v6908_v12  ;;  %v7297_v12 = vld [vmem:[%s6870_s26 + $0x30] sm:$0xf] }
  0xdc   : > { %5239 = vmatprep.subr.bf16.mxu0 %v6800_v1  ;;  %5279 = vmatprep.subr.bf16.mxu1 %v6800_v1 }
  0xdf   : > { %5240 = vmatpush3.bf16.msra.mxu0 %v6917_v15  ;;  %5280 = vmatpush3.bf16.msra.mxu1 %v6917_v15  ;;  %v7300_v15 = vld [vmem:[%s6870_s26 + $0x38] sm:$0xf] }
  0xe0   : > { %5241 = vmatprep.subr.bf16.mxu0 %v6800_v1  ;;  %5281 = vmatprep.subr.bf16.mxu1 %v6800_v1 }
  0xe3   : > { %5242 = vmatpush3.bf16.msra.mxu0 %v6926_v20  ;;  %5282 = vmatpush3.bf16.msra.mxu1 %v6926_v20  ;;  %v7316_v20 = vld [vmem:[%s8730_s1 + $0x88] sm:$0xff]  }
  0xe4   : > { %5247 = vmatprep.subr.bf16.mxu0 %v6800_v1  ;;  %5287 = vmatprep.subr.bf16.mxu1 %v6800_v1 }
  0xe6   : > { %5244 = vmatmul.mubr.bf16.vlgmr.msra.gmra.mrb[12].mxu0 %v7252_v5  ;;  %5284 = vmatmul.mubr.bf16.vlgmr.msra.gmra.mrb[12].mxu1 %v7254_v18 }
  0xe7   : > { %5248 = vmatpush3.bf16.msra.mxu0 %v6937_v23  ;;  %5288 = vmatpush3.bf16.msra.mxu1 %v6937_v23  ;;  %v7338_v23 = vld [vmem:[%s8730_s1 + $0x98] sm:$0xff]  }
  0xe8   : > { %5249 = vmatprep.subr.bf16.mxu0 %v6800_v1  ;;  %5289 = vmatprep.subr.bf16.mxu1 %v6800_v1 }
  0xe9   : > { %5263 = vmatprep.mubr.msk.bf16.mxu0 %vm6801_vm0, %v6800_v1  ;;  %5303 = vmatprep.mubr.msk.bf16.mxu1 %vm6801_vm0, %v6800_v1 }
  0xeb   : > { %5250 = vmatpush3.bf16.msra.mxu0 %v6944_v24  ;;  %5290 = vmatpush3.bf16.msra.mxu1 %v6944_v24  ;;  %v7347_v24 = vld [vmem:[%s8730_s1 + $0xa0] sm:$0xff]  }
  0xec   : > { %5251 = vmatprep.subr.bf16.mxu0 %v6800_v1  ;;  %5291 = vmatprep.subr.bf16.mxu1 %v6800_v1 }
  0xef   : > { %5252 = vmatpush3.bf16.msra.mxu0 %v6954_v25  ;;  %5292 = vmatpush3.bf16.msra.mxu1 %v6954_v25  ;;  %v7356_v25 = vld [vmem:[%s8730_s1 + $0xa8] sm:$0xff]  }
  0xf0   : > { %5253 = vmatprep.subr.bf16.mxu0 %v6800_v1  ;;  %5293 = vmatprep.subr.bf16.mxu1 %v6800_v1 }
  0xf3   : > { %5254 = vmatpush3.bf16.msra.mxu0 %v6967_v26  ;;  %5294 = vmatpush3.bf16.msra.mxu1 %v6967_v26  ;;  %v7365_v26 = vld [vmem:[%s8730_s1 + $0xb0] sm:$0xff]  }
  0xf4   : > { %5255 = vmatprep.subr.bf16.mxu0 %v6800_v1  ;;  %5295 = vmatprep.subr.bf16.mxu1 %v6800_v1 }
  0xf7   : > { %5256 = vmatpush3.bf16.msra.mxu0 %v6976_v27  ;;  %5296 = vmatpush3.bf16.msra.mxu1 %v6976_v27  ;;  %v1119_v27 = vld [vmem:[%s6870_s26] sm:$0xe] }
  0xf8   : > { %5257 = vmatprep.subr.bf16.mxu0 %v6800_v1  ;;  %5297 = vmatprep.subr.bf16.mxu1 %v6800_v1 }
  0xfb   : > { %5258 = vmatpush3.bf16.msra.mxu0 %v6985_v28  ;;  %5298 = vmatpush3.bf16.msra.mxu1 %v6985_v28  ;;  %v4157_v28 = vld [vmem:[%s6870_s26 + $0x8] sm:$0xe] }
  0xfc   : > { %5259 = vmatprep.subr.bf16.mxu0 %v6800_v1  ;;  %5299 = vmatprep.subr.bf16.mxu1 %v6800_v1 }
  0xff   : > { %5260 = vmatpush3.bf16.msra.mxu0 %v6994_v29  ;;  %5300 = vmatpush3.bf16.msra.mxu1 %v6994_v29  ;;  %v4148_v29 = vcombine.low %v1119_v27, %v6890_v7  ;;  %v4159_v7 = vld [vmem:[%s6870_s26 + $0x10] sm:$0xe]  ;;  %v4247_v27 = vld [vmem:[%s6870_s26 + $0x40] sm:$0xe] }
 0x100   : > { %5261 = vmatprep.subr.bf16.mxu0 %v6800_v1  ;;  %5301 = vmatprep.subr.bf16.mxu1 %v6800_v1  ;;  %v4160_v37 = vcombine.low %v4159_v7, %v7038_v33  ;;  %v4163_v33 = vld [vmem:[%s6870_s26 + $0x20] sm:$0xe] }
 0x101   : > { %v1123_v34 = vrot.slane %v4148_v29, 1  ;;  %v4164_v41 = vcombine.low %v4163_v33, %v7134_v49  ;;  %v4167_v49 = vld [vmem:[%s6870_s26 + $0x30] sm:$0xe]  ;;  %v8158_v7 = vld [vmem:[%s8730_s1 + $0x1a0] sm:$0xff]  }
 0x102   : > { %v7425_v39 = vrot.slane %v4160_v37, 1  ;;  %v8176_v37 = vld [vmem:[%s8730_s1 + $0x1b0] sm:$0xff]  }
 0x103   : > { %5262 = vmatpush3.bf16.msra.mxu0 %v7003_v30  ;;  %5302 = vmatpush3.bf16.msra.mxu1 %v7003_v30  ;;  %v4158_v30 = vcombine.low %v4157_v28, %v6896_v9  ;;  %v4161_v9 = vld [vmem:[%s6870_s26 + $0x18] sm:$0xe]  ;;  %v7471_v43 = vrot.slane %v4164_v41, 1  ;;  %v4248_v28 = vcombine.low %v4247_v27, %v7896_v11  ;;  %v6786_v33 = vld [vmem:[%s6870_s26 + $0x10] sm:$0xf] }
 0x104   : > { %5307 = vmatprep.subr.bf16.mxu0 %v6800_v1  ;;  %5327 = vmatprep.subr.bf16.mxu1 %v6800_v1  ;;  %v4162_v38 = vcombine.low %v4161_v9, %v7042_v35  ;;  %v4165_v35 = vld [vmem:[%s6870_s26 + $0x28] sm:$0xe]  ;;  %v6788_v41 = vld [vmem:[%s6870_s26 + $0x20] sm:$0xf] }
 0x105   : > { %v7382_v36 = vrot.slane %v4158_v30, 1  ;;  %v4166_v42 = vcombine.low %v4165_v35, %v7138_v51  ;;  %v4168_v51 = vcombine.low %v4167_v49, %v7230_v6  ;;  %v7586_v6 = vld [vmem:[%s8730_s1 + $0xf0] sm:$0xff]   ;;  %v8109_v29 = vrot.slane %v4248_v28, 1  ;;  %v8116_v30 = vld [vmem:[%s8730_s1 + $0x180] sm:$0xff]   ;;  %v8167_v9 = vld [vmem:[%s8730_s1 + $0x1a8] sm:$0xff]  }
 0x106   : > { %5264 = vmatmul.mubr.bf16.vlgmr.msra.gmra.mrb[12].mxu0 %v7297_v12  ;;  %5304 = vmatmul.mubr.bf16.vlgmr.msra.gmra.mrb[12].mxu1 %v7300_v15  ;;  %v7427_v40 = vrot.slane %v4162_v38, 1  ;;  %v8185_v38 = vld [vmem:[%s8730_s1 + $0x1b8] sm:$0xff]   ;;  %v6790_v49 = vld [vmem:[%s6870_s26 + $0x30] sm:$0xf] }
 0x107   : > { %5308 = vmatpush3.bf16.msra.mxu0 %v7305_v19  ;;  %5328 = vmatpush3.bf16.msra.mxu1 %v7305_v19  ;;  %v7473_v48 = vrot.slane %v4166_v42, 1  ;;  %v7517_v53 = vrot.slane %v4168_v51, 1  ;;  %v6787_v35 = vld [vmem:[%s6870_s26 + $0x18] sm:$0xf]  ;;  %v6789_v42 = vld [vmem:[%s6870_s26 + $0x28] sm:$0xf] }
 0x108   : > { %5309 = vmatprep.subr.bf16.mxu0 %v6800_v1  ;;  %5329 = vmatprep.subr.bf16.mxu1 %v6800_v1  ;;  %v4273_v51 = vld [vmem:[%s6870_s26 + $0x48] sm:$0xf] }
 0x109   : > { %5323 = vmatprep.mubr.msk.bf16.mxu0 %vm6801_vm0, %v6800_v1  ;;  %5343 = vmatprep.mubr.msk.bf16.mxu1 %vm6801_vm0, %v6800_v1 }
 0x10b   : > { %5310 = vmatpush3.bf16.msra.mxu0 %v7316_v20  ;;  %5330 = vmatpush3.bf16.msra.mxu1 %v7316_v20 }
 0x10c   : > { %5311 = vmatprep.subr.bf16.mxu0 %v6800_v1  ;;  %5331 = vmatprep.subr.bf16.mxu1 %v6800_v1 }
 0x10f   : > { %5312 = vmatpush3.bf16.msra.mxu0 %v7329_v21  ;;  %5332 = vmatpush3.bf16.msra.mxu1 %v7329_v21 }
 0x110   : > { %5313 = vmatprep.subr.bf16.mxu0 %v6800_v1  ;;  %5333 = vmatprep.subr.bf16.mxu1 %v6800_v1 }
 0x113   : > { %5314 = vmatpush3.bf16.msra.mxu0 %v7338_v23  ;;  %5334 = vmatpush3.bf16.msra.mxu1 %v7338_v23 }
 0x114   : > { %5315 = vmatprep.subr.bf16.mxu0 %v6800_v1  ;;  %5335 = vmatprep.subr.bf16.mxu1 %v6800_v1 }
 0x117   : > { %5316 = vmatpush3.bf16.msra.mxu0 %v7347_v24  ;;  %5336 = vmatpush3.bf16.msra.mxu1 %v7347_v24 }
 0x118   : > { %5317 = vmatprep.subr.bf16.mxu0 %v6800_v1  ;;  %5337 = vmatprep.subr.bf16.mxu1 %v6800_v1 }
 0x11b   : > { %5318 = vmatpush3.bf16.msra.mxu0 %v7356_v25  ;;  %5338 = vmatpush3.bf16.msra.mxu1 %v7356_v25 }
 0x11c   : > { %5319 = vmatprep.subr.bf16.mxu0 %v6800_v1  ;;  %5339 = vmatprep.subr.bf16.mxu1 %v6800_v1 }
 0x11f   : > { %5320 = vmatpush3.bf16.msra.mxu0 %v7365_v26  ;;  %5340 = vmatpush3.bf16.msra.mxu1 %v7365_v26 }
 0x120   : > { %5321 = vmatprep.subr.bf16.mxu0 %v6800_v1  ;;  %5341 = vmatprep.subr.bf16.mxu1 %v6800_v1 }
 0x123   : > { %5322 = vmatpush3.bf16.msra.mxu0 %v7378_v32  ;;  %5342 = vmatpush3.bf16.msra.mxu1 %v7378_v32 }
 0x124   : > { %5347 = vmatprep.subr.bf16.mxu0 %v6800_v1  ;;  %5367 = vmatprep.subr.bf16.mxu1 %v6800_v1 }
 0x126   : > { %5324 = vmatmul.mubr.bf16.vlgmr.msra.gmra.mrb[0].mxu0 %v1123_v34  ;;  %5344 = vmatmul.mubr.bf16.vlgmr.msra.gmra.mrb[0].mxu1 %v7382_v36  ;;  %v8140_v34 = vld [vmem:[%s8730_s1 + $0x190] sm:$0xff]  }
 0x127   : > { %5348 = vmatpush3.bf16.msra.mxu0 %v7305_v19  ;;  %5368 = vmatpush3.bf16.msra.mxu1 %v7305_v19 }
 0x128   : > { %5349 = vmatprep.subr.bf16.mxu0 %v6800_v1  ;;  %5369 = vmatprep.subr.bf16.mxu1 %v6800_v1 }
 0x129   : > { %5363 = vmatprep.mubr.msk.bf16.mxu0 %vm6801_vm0, %v6800_v1  ;;  %5383 = vmatprep.mubr.msk.bf16.mxu1 %vm6801_vm0, %v6800_v1 }
 0x12b   : > { %5350 = vmatpush3.bf16.msra.mxu0 %v7316_v20  ;;  %5370 = vmatpush3.bf16.msra.mxu1 %v7316_v20 }
 0x12c   : > { %5351 = vmatprep.subr.bf16.mxu0 %v6800_v1  ;;  %5371 = vmatprep.subr.bf16.mxu1 %v6800_v1 }
 0x12f   : > { %5352 = vmatpush3.bf16.msra.mxu0 %v7329_v21  ;;  %5372 = vmatpush3.bf16.msra.mxu1 %v7329_v21 }
 0x130   : > { %5353 = vmatprep.subr.bf16.mxu0 %v6800_v1  ;;  %5373 = vmatprep.subr.bf16.mxu1 %v6800_v1 }
 0x133   : > { %5354 = vmatpush3.bf16.msra.mxu0 %v7338_v23  ;;  %5374 = vmatpush3.bf16.msra.mxu1 %v7338_v23 }
 0x134   : > { %5355 = vmatprep.subr.bf16.mxu0 %v6800_v1  ;;  %5375 = vmatprep.subr.bf16.mxu1 %v6800_v1 }
 0x137   : > { %5356 = vmatpush3.bf16.msra.mxu0 %v7347_v24  ;;  %5376 = vmatpush3.bf16.msra.mxu1 %v7347_v24 }
 0x138   : > { %5357 = vmatprep.subr.bf16.mxu0 %v6800_v1  ;;  %5377 = vmatprep.subr.bf16.mxu1 %v6800_v1 }
 0x13b   : > { %5358 = vmatpush3.bf16.msra.mxu0 %v7356_v25  ;;  %5378 = vmatpush3.bf16.msra.mxu1 %v7356_v25 }
 0x13c   : > { %5359 = vmatprep.subr.bf16.mxu0 %v6800_v1  ;;  %5379 = vmatprep.subr.bf16.mxu1 %v6800_v1 }
 0x13f   : > { %5360 = vmatpush3.bf16.msra.mxu0 %v7365_v26  ;;  %5380 = vmatpush3.bf16.msra.mxu1 %v7365_v26 }
 0x140   : > { %5361 = vmatprep.subr.bf16.mxu0 %v6800_v1  ;;  %5381 = vmatprep.subr.bf16.mxu1 %v6800_v1 }
 0x143   : > { %5362 = vmatpush3.bf16.msra.mxu0 %v7378_v32  ;;  %5382 = vmatpush3.bf16.msra.mxu1 %v7378_v32 }
 0x144   : > { %5387 = vmatprep.subr.bf16.mxu0 %v6800_v1  ;;  %5407 = vmatprep.subr.bf16.mxu1 %v6800_v1 }
 0x146   : > { %5364 = vmatmul.mubr.bf16.vlgmr.msra.gmra.mrb[4].mxu0 %v7425_v39  ;;  %5384 = vmatmul.mubr.bf16.vlgmr.msra.gmra.mrb[4].mxu1 %v7427_v40 }
 0x147   : > { %5388 = vmatpush3.bf16.msra.mxu0 %v7305_v19  ;;  %5408 = vmatpush3.bf16.msra.mxu1 %v7305_v19 }
 0x148   : > { %5389 = vmatprep.subr.bf16.mxu0 %v6800_v1  ;;  %5409 = vmatprep.subr.bf16.mxu1 %v6800_v1 }
 0x149   : > { %5403 = vmatprep.mubr.msk.bf16.mxu0 %vm6801_vm0, %v6800_v1  ;;  %5423 = vmatprep.mubr.msk.bf16.mxu1 %vm6801_vm0, %v6800_v1 }
 0x14b   : > { %5390 = vmatpush3.bf16.msra.mxu0 %v7316_v20  ;;  %5410 = vmatpush3.bf16.msra.mxu1 %v7316_v20 }
 0x14c   : > { %5391 = vmatprep.subr.bf16.mxu0 %v6800_v1  ;;  %5411 = vmatprep.subr.bf16.mxu1 %v6800_v1 }
 0x14f   : > { %5392 = vmatpush3.bf16.msra.mxu0 %v7329_v21  ;;  %5412 = vmatpush3.bf16.msra.mxu1 %v7329_v21 }
 0x150   : > { %5393 = vmatprep.subr.bf16.mxu0 %v6800_v1  ;;  %5413 = vmatprep.subr.bf16.mxu1 %v6800_v1 }
 0x153   : > { %5394 = vmatpush3.bf16.msra.mxu0 %v7338_v23  ;;  %5414 = vmatpush3.bf16.msra.mxu1 %v7338_v23 }
 0x154   : > { %5395 = vmatprep.subr.bf16.mxu0 %v6800_v1  ;;  %5415 = vmatprep.subr.bf16.mxu1 %v6800_v1 }
 0x157   : > { %5396 = vmatpush3.bf16.msra.mxu0 %v7347_v24  ;;  %5416 = vmatpush3.bf16.msra.mxu1 %v7347_v24 }
 0x158   : > { %5397 = vmatprep.subr.bf16.mxu0 %v6800_v1  ;;  %5417 = vmatprep.subr.bf16.mxu1 %v6800_v1 }
 0x15b   : > { %5398 = vmatpush3.bf16.msra.mxu0 %v7356_v25  ;;  %5418 = vmatpush3.bf16.msra.mxu1 %v7356_v25 }
 0x15c   : > { %5399 = vmatprep.subr.bf16.mxu0 %v6800_v1  ;;  %5419 = vmatprep.subr.bf16.mxu1 %v6800_v1 }
 0x15f   : > { %5400 = vmatpush3.bf16.msra.mxu0 %v7365_v26  ;;  %5420 = vmatpush3.bf16.msra.mxu1 %v7365_v26 }
 0x160   : > { %5401 = vmatprep.subr.bf16.mxu0 %v6800_v1  ;;  %5421 = vmatprep.subr.bf16.mxu1 %v6800_v1 }
 0x163   : > { %5402 = vmatpush3.bf16.msra.mxu0 %v7378_v32  ;;  %5422 = vmatpush3.bf16.msra.mxu1 %v7378_v32 }
 0x164   : > { %5427 = vmatprep.subr.bf16.mxu0 %v6800_v1  ;;  %5447 = vmatprep.subr.bf16.mxu1 %v6800_v1 }
 0x166   : > { %5404 = vmatmul.mubr.bf16.vlgmr.msra.gmra.mrb[8].mxu0 %v7471_v43  ;;  %5424 = vmatmul.mubr.bf16.vlgmr.msra.gmra.mrb[8].mxu1 %v7473_v48 }
 0x167   : > { %5428 = vmatpush3.bf16.msra.mxu0 %v7305_v19  ;;  %5448 = vmatpush3.bf16.msra.mxu1 %v7305_v19  ;;  %v7931_v19 = vld [vmem:[%s8730_s1 + $0x148] sm:$0xff]  }
 0x168   : > { %5429 = vmatprep.subr.bf16.mxu0 %v6800_v1  ;;  %5449 = vmatprep.subr.bf16.mxu1 %v6800_v1 }
 0x169   : > { %5443 = vmatprep.mubr.msk.bf16.mxu0 %vm6801_vm0, %v6800_v1  ;;  %5463 = vmatprep.mubr.msk.bf16.mxu1 %vm6801_vm0, %v6800_v1 }
 0x16b   : > { %5430 = vmatpush3.bf16.msra.mxu0 %v7316_v20  ;;  %5450 = vmatpush3.bf16.msra.mxu1 %v7316_v20  ;;  %v7944_v20 = vld [vmem:[%s8730_s1 + $0x150] sm:$0xff]  }
 0x16c   : > { %5431 = vmatprep.subr.bf16.mxu0 %v6800_v1  ;;  %5451 = vmatprep.subr.bf16.mxu1 %v6800_v1 }
 0x16f   : > { %5432 = vmatpush3.bf16.msra.mxu0 %v7329_v21  ;;  %5452 = vmatpush3.bf16.msra.mxu1 %v7329_v21  ;;  %v7953_v21 = vld [vmem:[%s8730_s1 + $0x158] sm:$0xff]  }
 0x170   : > { %5433 = vmatprep.subr.bf16.mxu0 %v6800_v1  ;;  %5453 = vmatprep.subr.bf16.mxu1 %v6800_v1 }
 0x173   : > { %5434 = vmatpush3.bf16.msra.mxu0 %v7338_v23  ;;  %5454 = vmatpush3.bf16.msra.mxu1 %v7338_v23  ;;  %v7962_v23 = vld [vmem:[%s8730_s1 + $0x160] sm:$0xff]  }
 0x174   : > { %5435 = vmatprep.subr.bf16.mxu0 %v6800_v1  ;;  %5455 = vmatprep.subr.bf16.mxu1 %v6800_v1 }
 0x177   : > { %5436 = vmatpush3.bf16.msra.mxu0 %v7347_v24  ;;  %5456 = vmatpush3.bf16.msra.mxu1 %v7347_v24  ;;  %v7971_v24 = vld [vmem:[%s8730_s1 + $0x168] sm:$0xff]  }
 0x178   : > { %5437 = vmatprep.subr.bf16.mxu0 %v6800_v1  ;;  %5457 = vmatprep.subr.bf16.mxu1 %v6800_v1 }
 0x17b   : > { %5438 = vmatpush3.bf16.msra.mxu0 %v7356_v25  ;;  %5458 = vmatpush3.bf16.msra.mxu1 %v7356_v25  ;;  %v7980_v25 = vld [vmem:[%s8730_s1 + $0x170] sm:$0xff]  }
 0x17c   : > { %5439 = vmatprep.subr.bf16.mxu0 %v6800_v1  ;;  %5459 = vmatprep.subr.bf16.mxu1 %v6800_v1 }
 0x17f   : > { %5440 = vmatpush3.bf16.msra.mxu0 %v7365_v26  ;;  %5460 = vmatpush3.bf16.msra.mxu1 %v7365_v26  ;;  %v7989_v26 = vld [vmem:[%s8730_s1 + $0x178] sm:$0xff]  }
 0x180   : > { %5441 = vmatprep.subr.bf16.mxu0 %v6800_v1  ;;  %5461 = vmatprep.subr.bf16.mxu1 %v6800_v1 }
 0x183   : > { %5442 = vmatpush3.bf16.msra.mxu0 %v7378_v32  ;;  %5462 = vmatpush3.bf16.msra.mxu1 %v7378_v32  ;;  %v8127_v32 = vld [vmem:[%s8730_s1 + $0x188] sm:$0xff]  }
 0x184   : > { %5467 = vmatprep.subr.bf16.mxu0 %v6800_v1  ;;  %5487 = vmatprep.subr.bf16.mxu1 %v6800_v1 }
 0x186   : > { %5444 = vmatmul.mubr.bf16.vlgmr.msra.gmra.mrb[12].mxu0 %v7517_v53  ;;  %5464 = vmatmul.mubr.bf16.vlgmr.msra.gmra.mrb[12].mxu1 %v7519_v54 }
 0x187   : > { %5468 = vmatpush3.bf16.msra.mxu0 %v7526_v55  ;;  %5488 = vmatpush3.bf16.msra.mxu1 %v7526_v55 }
 0x188   : > { %5469 = vmatprep.subr.bf16.mxu0 %v6800_v1  ;;  %5489 = vmatprep.subr.bf16.mxu1 %v6800_v1 }
 0x189   : > { %5483 = vmatprep.mubr.msk.bf16.mxu0 %vm6801_vm0, %v6800_v1  ;;  %5503 = vmatprep.mubr.msk.bf16.mxu1 %vm6801_vm0, %v6800_v1 }
 0x18b   : > { %5470 = vmatpush3.bf16.msra.mxu0 %v7537_v56  ;;  %5490 = vmatpush3.bf16.msra.mxu1 %v7537_v56 }
 0x18c   : > { %5471 = vmatprep.subr.bf16.mxu0 %v6800_v1  ;;  %5491 = vmatprep.subr.bf16.mxu1 %v6800_v1 }
 0x18f   : > { %5472 = vmatpush3.bf16.msra.mxu0 %v7550_v57  ;;  %5492 = vmatpush3.bf16.msra.mxu1 %v7550_v57 }
 0x190   : > { %5473 = vmatprep.subr.bf16.mxu0 %v6800_v1  ;;  %5493 = vmatprep.subr.bf16.mxu1 %v6800_v1 }
 0x193   : > { %5474 = vmatpush3.bf16.msra.mxu0 %v7559_v58  ;;  %5494 = vmatpush3.bf16.msra.mxu1 %v7559_v58 }
 0x194   : > { %5475 = vmatprep.subr.bf16.mxu0 %v6800_v1  ;;  %5495 = vmatprep.subr.bf16.mxu1 %v6800_v1 }
 0x197   : > { %5476 = vmatpush3.bf16.msra.mxu0 %v7568_v59  ;;  %5496 = vmatpush3.bf16.msra.mxu1 %v7568_v59 }
 0x198   : > { %5477 = vmatprep.subr.bf16.mxu0 %v6800_v1  ;;  %5497 = vmatprep.subr.bf16.mxu1 %v6800_v1 }
 0x19b   : > { %5478 = vmatpush3.bf16.msra.mxu0 %v7577_v0  ;;  %5498 = vmatpush3.bf16.msra.mxu1 %v7577_v0 }
 0x19c   : > { %5479 = vmatprep.subr.bf16.mxu0 %v6800_v1  ;;  %5499 = vmatprep.subr.bf16.mxu1 %v6800_v1 }
 0x19f   : > { %5480 = vmatpush3.bf16.msra.mxu0 %v7586_v6  ;;  %5500 = vmatpush3.bf16.msra.mxu1 %v7586_v6 }
 0x1a0   : > { %5481 = vmatprep.subr.bf16.mxu0 %v6800_v1  ;;  %5501 = vmatprep.subr.bf16.mxu1 %v6800_v1 }
 0x1a3   : > { %5482 = vmatpush3.bf16.msra.mxu0 %v7595_v2  ;;  %5502 = vmatpush3.bf16.msra.mxu1 %v7595_v2 }
 0x1a4   : > { %5507 = vmatprep.subr.bf16.mxu0 %v6800_v1  ;;  %5527 = vmatprep.subr.bf16.mxu1 %v6800_v1 }
 0x1a6   : > { %5484 = vmatmul.mubr.bf16.vlgmr.msra.gmra.mrb[0].mxu0 %v7012_v31  ;;  %5504 = vmatmul.mubr.bf16.vlgmr.msra.gmra.mrb[0].mxu1 %v7105_v46  ;;  %v7716_v31 = vld [vmem:[%s6870_s26 + $0x40] sm:$0xf] }
 0x1a7   : > { %5508 = vmatpush3.bf16.msra.mxu0 %v7526_v55  ;;  %5528 = vmatpush3.bf16.msra.mxu1 %v7526_v55  ;;  %v7721_v46 = vld [vmem:[%s8730_s1 + $0x100] sm:$0xff]  }
 0x1a8   : > { %5509 = vmatprep.subr.bf16.mxu0 %v6800_v1  ;;  %5529 = vmatprep.subr.bf16.mxu1 %v6800_v1 }
 0x1a9   : > { %5523 = vmatprep.mubr.msk.bf16.mxu0 %vm6801_vm0, %v6800_v1  ;;  %5543 = vmatprep.mubr.msk.bf16.mxu1 %vm6801_vm0, %v6800_v1 }
 0x1ab   : > { %5510 = vmatpush3.bf16.msra.mxu0 %v7537_v56  ;;  %5530 = vmatpush3.bf16.msra.mxu1 %v7537_v56 }
 0x1ac   : > { %5511 = vmatprep.subr.bf16.mxu0 %v6800_v1  ;;  %5531 = vmatprep.subr.bf16.mxu1 %v6800_v1 }
 0x1af   : > { %5512 = vmatpush3.bf16.msra.mxu0 %v7550_v57  ;;  %5532 = vmatpush3.bf16.msra.mxu1 %v7550_v57 }
 0x1b0   : > { %5513 = vmatprep.subr.bf16.mxu0 %v6800_v1  ;;  %5533 = vmatprep.subr.bf16.mxu1 %v6800_v1 }
 0x1b3   : > { %5514 = vmatpush3.bf16.msra.mxu0 %v7559_v58  ;;  %5534 = vmatpush3.bf16.msra.mxu1 %v7559_v58 }
 0x1b4   : > { %5515 = vmatprep.subr.bf16.mxu0 %v6800_v1  ;;  %5535 = vmatprep.subr.bf16.mxu1 %v6800_v1 }
 0x1b7   : > { %5516 = vmatpush3.bf16.msra.mxu0 %v7568_v59  ;;  %5536 = vmatpush3.bf16.msra.mxu1 %v7568_v59 }
 0x1b8   : > { %5517 = vmatprep.subr.bf16.mxu0 %v6800_v1  ;;  %5537 = vmatprep.subr.bf16.mxu1 %v6800_v1 }
 0x1bb   : > { %5518 = vmatpush3.bf16.msra.mxu0 %v7577_v0  ;;  %5538 = vmatpush3.bf16.msra.mxu1 %v7577_v0 }
 0x1bc   : > { %5519 = vmatprep.subr.bf16.mxu0 %v6800_v1  ;;  %5539 = vmatprep.subr.bf16.mxu1 %v6800_v1 }
 0x1bf   : > { %5520 = vmatpush3.bf16.msra.mxu0 %v7586_v6  ;;  %5540 = vmatpush3.bf16.msra.mxu1 %v7586_v6 }
 0x1c0   : > { %5521 = vmatprep.subr.bf16.mxu0 %v6800_v1  ;;  %5541 = vmatprep.subr.bf16.mxu1 %v6800_v1 }
 0x1c3   : > { %5522 = vmatpush3.bf16.msra.mxu0 %v7595_v2  ;;  %5542 = vmatpush3.bf16.msra.mxu1 %v7595_v2 }
 0x1c4   : > { %5547 = vmatprep.subr.bf16.mxu0 %v6800_v1  ;;  %5567 = vmatprep.subr.bf16.mxu1 %v6800_v1 }
 0x1c6   : > { %5524 = vmatmul.mubr.bf16.vlgmr.msra.gmra.mrb[4].mxu0 %v7108_v47  ;;  %5544 = vmatmul.mubr.bf16.vlgmr.msra.gmra.mrb[4].mxu1 %v7201_v62  ;;  %v7732_v47 = vld [vmem:[%s8730_s1 + $0x108] sm:$0xff]   ;;  %v7745_v62 = vld [vmem:[%s8730_s1 + $0x110] sm:$0xff]  }
 0x1c7   : > { %5548 = vmatpush3.bf16.msra.mxu0 %v7526_v55  ;;  %5568 = vmatpush3.bf16.msra.mxu1 %v7526_v55 }
 0x1c8   : > { %5549 = vmatprep.subr.bf16.mxu0 %v6800_v1  ;;  %5569 = vmatprep.subr.bf16.mxu1 %v6800_v1 }
 0x1c9   : > { %5563 = vmatprep.mubr.msk.bf16.mxu0 %vm6801_vm0, %v6800_v1  ;;  %5583 = vmatprep.mubr.msk.bf16.mxu1 %vm6801_vm0, %v6800_v1 }
 0x1cb   : > { %5550 = vmatpush3.bf16.msra.mxu0 %v7537_v56  ;;  %5570 = vmatpush3.bf16.msra.mxu1 %v7537_v56 }
 0x1cc   : > { %5551 = vmatprep.subr.bf16.mxu0 %v6800_v1  ;;  %5571 = vmatprep.subr.bf16.mxu1 %v6800_v1 }
 0x1cf   : > { %5552 = vmatpush3.bf16.msra.mxu0 %v7550_v57  ;;  %5572 = vmatpush3.bf16.msra.mxu1 %v7550_v57 }
 0x1d0   : > { %5553 = vmatprep.subr.bf16.mxu0 %v6800_v1  ;;  %5573 = vmatprep.subr.bf16.mxu1 %v6800_v1 }
 0x1d3   : > { %5554 = vmatpush3.bf16.msra.mxu0 %v7559_v58  ;;  %5574 = vmatpush3.bf16.msra.mxu1 %v7559_v58 }
 0x1d4   : > { %5555 = vmatprep.subr.bf16.mxu0 %v6800_v1  ;;  %5575 = vmatprep.subr.bf16.mxu1 %v6800_v1 }
 0x1d7   : > { %5556 = vmatpush3.bf16.msra.mxu0 %v7568_v59  ;;  %5576 = vmatpush3.bf16.msra.mxu1 %v7568_v59 }
 0x1d8   : > { %5557 = vmatprep.subr.bf16.mxu0 %v6800_v1  ;;  %5577 = vmatprep.subr.bf16.mxu1 %v6800_v1 }
 0x1db   : > { %5558 = vmatpush3.bf16.msra.mxu0 %v7577_v0  ;;  %5578 = vmatpush3.bf16.msra.mxu1 %v7577_v0 }
 0x1dc   : > { %5559 = vmatprep.subr.bf16.mxu0 %v6800_v1  ;;  %5579 = vmatprep.subr.bf16.mxu1 %v6800_v1 }
 0x1df   : > { %5560 = vmatpush3.bf16.msra.mxu0 %v7586_v6  ;;  %5580 = vmatpush3.bf16.msra.mxu1 %v7586_v6 }
 0x1e0   : > { %5561 = vmatprep.subr.bf16.mxu0 %v6800_v1  ;;  %5581 = vmatprep.subr.bf16.mxu1 %v6800_v1 }
 0x1e3   : > { %5562 = vmatpush3.bf16.msra.mxu0 %v7595_v2  ;;  %5582 = vmatpush3.bf16.msra.mxu1 %v7595_v2 }
 0x1e4   : > { %5587 = vmatprep.subr.bf16.mxu0 %v6800_v1  ;;  %5607 = vmatprep.subr.bf16.mxu1 %v6800_v1 }
 0x1e6   : > { %5564 = vmatmul.mubr.bf16.vlgmr.msra.gmra.mrb[8].mxu0 %v7204_v63  ;;  %5584 = vmatmul.mubr.bf16.vlgmr.msra.gmra.mrb[8].mxu1 %v7297_v12  ;;  %v7754_v63 = vld [vmem:[%s8730_s1 + $0x118] sm:$0xff]  }
 0x1e7   : > { %5588 = vmatpush3.bf16.msra.mxu0 %v7526_v55  ;;  %5608 = vmatpush3.bf16.msra.mxu1 %v7526_v55  ;;  %v8319_v55 = vld [vmem:[%s8730_s1 + $0x1c8] sm:$0xff]  }
 0x1e8   : > { %5589 = vmatprep.subr.bf16.mxu0 %v6800_v1  ;;  %5609 = vmatprep.subr.bf16.mxu1 %v6800_v1 }
 0x1e9   : > { %5603 = vmatprep.mubr.msk.bf16.mxu0 %vm6801_vm0, %v6800_v1  ;;  %5623 = vmatprep.mubr.msk.bf16.mxu1 %vm6801_vm0, %v6800_v1 }
 0x1eb   : > { %5590 = vmatpush3.bf16.msra.mxu0 %v7537_v56  ;;  %5610 = vmatpush3.bf16.msra.mxu1 %v7537_v56  ;;  %v8332_v56 = vld [vmem:[%s8730_s1 + $0x1d0] sm:$0xff]  }
 0x1ec   : > { %5591 = vmatprep.subr.bf16.mxu0 %v6800_v1  ;;  %5611 = vmatprep.subr.bf16.mxu1 %v6800_v1 }
 0x1ef   : > { %5592 = vmatpush3.bf16.msra.mxu0 %v7550_v57  ;;  %5612 = vmatpush3.bf16.msra.mxu1 %v7550_v57  ;;  %v8341_v57 = vld [vmem:[%s8730_s1 + $0x1d8] sm:$0xff]  }
 0x1f0   : > { %5593 = vmatprep.subr.bf16.mxu0 %v6800_v1  ;;  %5613 = vmatprep.subr.bf16.mxu1 %v6800_v1 }
 0x1f3   : > { %5594 = vmatpush3.bf16.msra.mxu0 %v7559_v58  ;;  %5614 = vmatpush3.bf16.msra.mxu1 %v7559_v58  ;;  %v8350_v58 = vld [vmem:[%s8730_s1 + $0x1e0] sm:$0xff]  }
 0x1f4   : > { %5595 = vmatprep.subr.bf16.mxu0 %v6800_v1  ;;  %5615 = vmatprep.subr.bf16.mxu1 %v6800_v1 }
 0x1f7   : > { %5596 = vmatpush3.bf16.msra.mxu0 %v7568_v59  ;;  %5616 = vmatpush3.bf16.msra.mxu1 %v7568_v59  ;;  %v8359_v59 = vld [vmem:[%s8730_s1 + $0x1e8] sm:$0xff]  }
 0x1f8   : > { %5597 = vmatprep.subr.bf16.mxu0 %v6800_v1  ;;  %5617 = vmatprep.subr.bf16.mxu1 %v6800_v1 }
 0x1fb   : > { %5598 = vmatpush3.bf16.msra.mxu0 %v7577_v0  ;;  %5618 = vmatpush3.bf16.msra.mxu1 %v7577_v0  ;;  %v8368_v0 = vld [vmem:[%s8730_s1 + $0x1f0] sm:$0xff]  }
 0x1fc   : > { %5599 = vmatprep.subr.bf16.mxu0 %v6800_v1  ;;  %5619 = vmatprep.subr.bf16.mxu1 %v6800_v1 }
 0x1ff   : > { %5600 = vmatpush3.bf16.msra.mxu0 %v7586_v6  ;;  %5620 = vmatpush3.bf16.msra.mxu1 %v7586_v6  ;;  %v8377_v6 = vld [vmem:[%s8730_s1 + $0x1f8] sm:$0xff]  }
 0x200   : > { %5601 = vmatprep.subr.bf16.mxu0 %v6800_v1  ;;  %5621 = vmatprep.subr.bf16.mxu1 %v6800_v1 }
 0x203   : > { %5602 = vmatpush3.bf16.msra.mxu0 %v7595_v2  ;;  %5622 = vmatpush3.bf16.msra.mxu1 %v7595_v2 }
 0x204   : > { %5627 = vmatprep.subr.bf16.mxu0 %v6800_v1  ;;  %5647 = vmatprep.subr.bf16.mxu1 %v6800_v1 }
 0x206   : > { %5604 = vmatmul.mubr.bf16.vlgmr.msra.gmra.mrb[12].mxu0 %v7300_v15  ;;  %5624 = vmatmul.mubr.bf16.vlgmr.msra.gmra.mrb[12].mxu1 %v7716_v31  ;;  %v7920_v15 = vld [vmem:[%s8730_s1 + $0x140] sm:$0xff]  }
 0x207   : > { %5628 = vmatpush3.bf16.msra.mxu0 %v7721_v46  ;;  %5648 = vmatpush3.bf16.msra.mxu1 %v7721_v46 }
 0x208   : > { %5629 = vmatprep.subr.bf16.mxu0 %v6800_v1  ;;  %5649 = vmatprep.subr.bf16.mxu1 %v6800_v1 }
 0x209   : > { %5643 = vmatprep.mubr.msk.bf16.mxu0 %vm6801_vm0, %v6800_v1  ;;  %5663 = vmatprep.mubr.msk.bf16.mxu1 %vm6801_vm0, %v6800_v1 }
 0x20b   : > { %5630 = vmatpush3.bf16.msra.mxu0 %v7732_v47  ;;  %5650 = vmatpush3.bf16.msra.mxu1 %v7732_v47 }
 0x20c   : > { %5631 = vmatprep.subr.bf16.mxu0 %v6800_v1  ;;  %5651 = vmatprep.subr.bf16.mxu1 %v6800_v1 }
 0x20f   : > { %5632 = vmatpush3.bf16.msra.mxu0 %v7745_v62  ;;  %5652 = vmatpush3.bf16.msra.mxu1 %v7745_v62 }
 0x210   : > { %5633 = vmatprep.subr.bf16.mxu0 %v6800_v1  ;;  %5653 = vmatprep.subr.bf16.mxu1 %v6800_v1 }
 0x213   : > { %5634 = vmatpush3.bf16.msra.mxu0 %v7754_v63  ;;  %5654 = vmatpush3.bf16.msra.mxu1 %v7754_v63 }
 0x214   : > { %5635 = vmatprep.subr.bf16.mxu0 %v6800_v1  ;;  %5655 = vmatprep.subr.bf16.mxu1 %v6800_v1 }
 0x217   : > { %5636 = vmatpush3.bf16.msra.mxu0 %v7763_v8  ;;  %5656 = vmatpush3.bf16.msra.mxu1 %v7763_v8 }
 0x218   : > { %5637 = vmatprep.subr.bf16.mxu0 %v6800_v1  ;;  %5657 = vmatprep.subr.bf16.mxu1 %v6800_v1 }
 0x21b   : > { %5638 = vmatpush3.bf16.msra.mxu0 %v7772_v3  ;;  %5658 = vmatpush3.bf16.msra.mxu1 %v7772_v3 }
 0x21c   : > { %5639 = vmatprep.subr.bf16.mxu0 %v6800_v1  ;;  %5659 = vmatprep.subr.bf16.mxu1 %v6800_v1 }
 0x21f   : > { %5640 = vmatpush3.bf16.msra.mxu0 %v7781_v10  ;;  %5660 = vmatpush3.bf16.msra.mxu1 %v7781_v10 }
 0x220   : > { %5641 = vmatprep.subr.bf16.mxu0 %v6800_v1  ;;  %5661 = vmatprep.subr.bf16.mxu1 %v6800_v1 }
 0x223   : > { %5642 = vmatpush3.bf16.msra.mxu0 %v7790_v4  ;;  %5662 = vmatpush3.bf16.msra.mxu1 %v7790_v4 }
 0x224   : > { %5667 = vmatprep.subr.bf16.mxu0 %v6800_v1  ;;  %5687 = vmatprep.subr.bf16.mxu1 %v6800_v1 }
 0x226   : > { %5644 = vmatmul.mubr.bf16.vlgmr.msra.gmra.mrb[0].mxu0 %v6930_v22  ;;  %5664 = vmatmul.mubr.bf16.vlgmr.msra.gmra.mrb[0].mxu1 %v7060_v44  ;;  %v4220_v22 = vld [vmem:[%s6870_s26 + $0x40] sm:$0xf] }
 0x227   : > { %5668 = vmatpush3.bf16.msra.mxu0 %v7721_v46  ;;  %5688 = vmatpush3.bf16.msra.mxu1 %v7721_v46  ;;  %v4222_v13 = vcombine.low %v4220_v22, %v7896_v11 }
 0x228   : > { %5669 = vmatprep.subr.bf16.mxu0 %v6800_v1  ;;  %5689 = vmatprep.subr.bf16.mxu1 %v6800_v1 }
 0x229   : > { %5683 = vmatprep.mubr.msk.bf16.mxu0 %vm6801_vm0, %v6800_v1  ;;  %5703 = vmatprep.mubr.msk.bf16.mxu1 %vm6801_vm0, %v6800_v1  ;;  %v2300_v14 = vshll.u32 %v4222_v13, 16  ;;  %v2298_v16 = vshrl.u32 %v4222_v13, 16 }
 0x22b   : > { %5670 = vmatpush3.bf16.msra.mxu0 %v7732_v47  ;;  %5690 = vmatpush3.bf16.msra.mxu1 %v7732_v47  ;;  %v2302_v17 = vrot.slane %v2300_v14, 1 }
 0x22c   : > { %5671 = vmatprep.subr.bf16.mxu0 %v6800_v1  ;;  %5691 = vmatprep.subr.bf16.mxu1 %v6800_v1 }
 0x22d   : > { %v7913_v12 = vor.u32 %v2302_v17, %v2298_v16 }
 0x22f   : > { %5672 = vmatpush3.bf16.msra.mxu0 %v7745_v62  ;;  %5692 = vmatpush3.bf16.msra.mxu1 %v7745_v62 }
 0x230   : > { %5673 = vmatprep.subr.bf16.mxu0 %v6800_v1  ;;  %5693 = vmatprep.subr.bf16.mxu1 %v6800_v1 }
 0x233   : > { %5674 = vmatpush3.bf16.msra.mxu0 %v7754_v63  ;;  %5694 = vmatpush3.bf16.msra.mxu1 %v7754_v63 }
 0x234   : > { %5675 = vmatprep.subr.bf16.mxu0 %v6800_v1  ;;  %5695 = vmatprep.subr.bf16.mxu1 %v6800_v1 }
 0x237   : > { %5676 = vmatpush3.bf16.msra.mxu0 %v7763_v8  ;;  %5696 = vmatpush3.bf16.msra.mxu1 %v7763_v8 }
 0x238   : > { %5677 = vmatprep.subr.bf16.mxu0 %v6800_v1  ;;  %5697 = vmatprep.subr.bf16.mxu1 %v6800_v1 }
 0x23b   : > { %5678 = vmatpush3.bf16.msra.mxu0 %v7772_v3  ;;  %5698 = vmatpush3.bf16.msra.mxu1 %v7772_v3 }
 0x23c   : > { %5679 = vmatprep.subr.bf16.mxu0 %v6800_v1  ;;  %5699 = vmatprep.subr.bf16.mxu1 %v6800_v1 }
 0x23f   : > { %5680 = vmatpush3.bf16.msra.mxu0 %v7781_v10  ;;  %5700 = vmatpush3.bf16.msra.mxu1 %v7781_v10 }
 0x240   : > { %5681 = vmatprep.subr.bf16.mxu0 %v6800_v1  ;;  %5701 = vmatprep.subr.bf16.mxu1 %v6800_v1 }
 0x243   : > { %5682 = vmatpush3.bf16.msra.mxu0 %v7790_v4  ;;  %5702 = vmatpush3.bf16.msra.mxu1 %v7790_v4 }
 0x244   : > { %5707 = vmatprep.subr.bf16.mxu0 %v6800_v1  ;;  %5727 = vmatprep.subr.bf16.mxu1 %v6800_v1 }
 0x246   : > { %5684 = vmatmul.mubr.bf16.vlgmr.msra.gmra.mrb[4].mxu0 %v7062_v45  ;;  %5704 = vmatmul.mubr.bf16.vlgmr.msra.gmra.mrb[4].mxu1 %v7156_v60 }
 0x247   : > { %5708 = vmatpush3.bf16.msra.mxu0 %v7721_v46  ;;  %5728 = vmatpush3.bf16.msra.mxu1 %v7721_v46 }
 0x248   : > { %5709 = vmatprep.subr.bf16.mxu0 %v6800_v1  ;;  %5729 = vmatprep.subr.bf16.mxu1 %v6800_v1 }
 0x249   : > { %5723 = vmatprep.mubr.msk.bf16.mxu0 %vm6801_vm0, %v6800_v1  ;;  %5743 = vmatprep.mubr.msk.bf16.mxu1 %vm6801_vm0, %v6800_v1 }
 0x24b   : > { %5710 = vmatpush3.bf16.msra.mxu0 %v7732_v47  ;;  %5730 = vmatpush3.bf16.msra.mxu1 %v7732_v47 }
 0x24c   : > { %5711 = vmatprep.subr.bf16.mxu0 %v6800_v1  ;;  %5731 = vmatprep.subr.bf16.mxu1 %v6800_v1 }
 0x24f   : > { %5712 = vmatpush3.bf16.msra.mxu0 %v7745_v62  ;;  %5732 = vmatpush3.bf16.msra.mxu1 %v7745_v62 }
 0x250   : > { %5713 = vmatprep.subr.bf16.mxu0 %v6800_v1  ;;  %5733 = vmatprep.subr.bf16.mxu1 %v6800_v1 }
 0x253   : > { %5714 = vmatpush3.bf16.msra.mxu0 %v7754_v63  ;;  %5734 = vmatpush3.bf16.msra.mxu1 %v7754_v63 }
 0x254   : > { %5715 = vmatprep.subr.bf16.mxu0 %v6800_v1  ;;  %5735 = vmatprep.subr.bf16.mxu1 %v6800_v1 }
 0x257   : > { %5716 = vmatpush3.bf16.msra.mxu0 %v7763_v8  ;;  %5736 = vmatpush3.bf16.msra.mxu1 %v7763_v8 }
 0x258   : > { %5717 = vmatprep.subr.bf16.mxu0 %v6800_v1  ;;  %5737 = vmatprep.subr.bf16.mxu1 %v6800_v1 }
 0x25b   : > { %5718 = vmatpush3.bf16.msra.mxu0 %v7772_v3  ;;  %5738 = vmatpush3.bf16.msra.mxu1 %v7772_v3 }
 0x25c   : > { %5719 = vmatprep.subr.bf16.mxu0 %v6800_v1  ;;  %5739 = vmatprep.subr.bf16.mxu1 %v6800_v1 }
 0x25f   : > { %5720 = vmatpush3.bf16.msra.mxu0 %v7781_v10  ;;  %5740 = vmatpush3.bf16.msra.mxu1 %v7781_v10 }
 0x260   : > { %5721 = vmatprep.subr.bf16.mxu0 %v6800_v1  ;;  %5741 = vmatprep.subr.bf16.mxu1 %v6800_v1 }
 0x263   : > { %5722 = vmatpush3.bf16.msra.mxu0 %v7790_v4  ;;  %5742 = vmatpush3.bf16.msra.mxu1 %v7790_v4 }
 0x264   : > { %5747 = vmatprep.subr.bf16.mxu0 %v6800_v1  ;;  %5767 = vmatprep.subr.bf16.mxu1 %v6800_v1 }
 0x266   : > { %5724 = vmatmul.mubr.bf16.vlgmr.msra.gmra.mrb[8].mxu0 %v7158_v61  ;;  %5744 = vmatmul.mubr.bf16.vlgmr.msra.gmra.mrb[8].mxu1 %v7252_v5 }
 0x267   : > { %5748 = vmatpush3.bf16.msra.mxu0 %v7721_v46  ;;  %5768 = vmatpush3.bf16.msra.mxu1 %v7721_v46  ;;  %v8515_v46 = vld [vmem:[%s8730_s1 + $0x208] sm:$0xff]  }
 0x268   : > { %5749 = vmatprep.subr.bf16.mxu0 %v6800_v1  ;;  %5769 = vmatprep.subr.bf16.mxu1 %v6800_v1 }
 0x269   : > { %5763 = vmatprep.mubr.msk.bf16.mxu0 %vm6801_vm0, %v6800_v1  ;;  %5783 = vmatprep.mubr.msk.bf16.mxu1 %vm6801_vm0, %v6800_v1 }
 0x26b   : > { %5750 = vmatpush3.bf16.msra.mxu0 %v7732_v47  ;;  %5770 = vmatpush3.bf16.msra.mxu1 %v7732_v47  ;;  %v8528_v47 = vld [vmem:[%s8730_s1 + $0x210] sm:$0xff]  }
 0x26c   : > { %5751 = vmatprep.subr.bf16.mxu0 %v6800_v1  ;;  %5771 = vmatprep.subr.bf16.mxu1 %v6800_v1 }
 0x26f   : > { %5752 = vmatpush3.bf16.msra.mxu0 %v7745_v62  ;;  %5772 = vmatpush3.bf16.msra.mxu1 %v7745_v62  ;;  %v8537_v62 = vld [vmem:[%s8730_s1 + $0x218] sm:$0xff]  }
 0x270   : > { %5753 = vmatprep.subr.bf16.mxu0 %v6800_v1  ;;  %5773 = vmatprep.subr.bf16.mxu1 %v6800_v1 }
 0x273   : > { %5754 = vmatpush3.bf16.msra.mxu0 %v7754_v63  ;;  %5774 = vmatpush3.bf16.msra.mxu1 %v7754_v63  ;;  %v8546_v63 = vld [vmem:[%s8730_s1 + $0x220] sm:$0xff]  }
 0x274   : > { %5755 = vmatprep.subr.bf16.mxu0 %v6800_v1  ;;  %5775 = vmatprep.subr.bf16.mxu1 %v6800_v1 }
 0x277   : > { %5756 = vmatpush3.bf16.msra.mxu0 %v7763_v8  ;;  %5776 = vmatpush3.bf16.msra.mxu1 %v7763_v8  ;;  %v8555_v8 = vld [vmem:[%s8730_s1 + $0x228] sm:$0xff]  }
 0x278   : > { %5757 = vmatprep.subr.bf16.mxu0 %v6800_v1  ;;  %5777 = vmatprep.subr.bf16.mxu1 %v6800_v1 }
 0x27b   : > { %5758 = vmatpush3.bf16.msra.mxu0 %v7772_v3  ;;  %5778 = vmatpush3.bf16.msra.mxu1 %v7772_v3  ;;  %v8564_v3 = vld [vmem:[%s8730_s1 + $0x230] sm:$0xff]  }
 0x27c   : > { %5759 = vmatprep.subr.bf16.mxu0 %v6800_v1  ;;  %5779 = vmatprep.subr.bf16.mxu1 %v6800_v1 }
 0x27f   : > { %5760 = vmatpush3.bf16.msra.mxu0 %v7781_v10  ;;  %5780 = vmatpush3.bf16.msra.mxu1 %v7781_v10  ;;  %v8573_v10 = vld [vmem:[%s8730_s1 + $0x238] sm:$0xff]  }
 0x280   : > { %5761 = vmatprep.subr.bf16.mxu0 %v6800_v1  ;;  %5781 = vmatprep.subr.bf16.mxu1 %v6800_v1 }
 0x283   : > { %5762 = vmatpush3.bf16.msra.mxu0 %v7790_v4  ;;  %5782 = vmatpush3.bf16.msra.mxu1 %v7790_v4 }
 0x284   : > { %5787 = vmatprep.subr.bf16.mxu0 %v6800_v1  ;;  %5807 = vmatprep.subr.bf16.mxu1 %v6800_v1 }
 0x286   : > { %5764 = vmatmul.mubr.bf16.vlgmr.msra.gmra.mrb[12].mxu0 %v7254_v18  ;;  %5784 = vmatmul.mubr.bf16.vlgmr.msra.gmra.mrb[12].mxu1 %v7913_v12 }
 0x287   : > { %5788 = vmatpush3.bf16.msra.mxu0 %v7920_v15  ;;  %5808 = vmatpush3.bf16.msra.mxu1 %v7920_v15 }
 0x288   : > { %5789 = vmatprep.subr.bf16.mxu0 %v6800_v1  ;;  %5809 = vmatprep.subr.bf16.mxu1 %v6800_v1 }
 0x289   : > { %5803 = vmatprep.mubr.msk.bf16.mxu0 %vm6801_vm0, %v6800_v1  ;;  %5823 = vmatprep.mubr.msk.bf16.mxu1 %vm6801_vm0, %v6800_v1 }
 0x28b   : > { %5790 = vmatpush3.bf16.msra.mxu0 %v7931_v19  ;;  %5810 = vmatpush3.bf16.msra.mxu1 %v7931_v19 }
 0x28c   : > { %5791 = vmatprep.subr.bf16.mxu0 %v6800_v1  ;;  %5811 = vmatprep.subr.bf16.mxu1 %v6800_v1 }
 0x28f   : > { %5792 = vmatpush3.bf16.msra.mxu0 %v7944_v20  ;;  %5812 = vmatpush3.bf16.msra.mxu1 %v7944_v20 }
 0x290   : > { %5793 = vmatprep.subr.bf16.mxu0 %v6800_v1  ;;  %5813 = vmatprep.subr.bf16.mxu1 %v6800_v1 }
 0x293   : > { %5794 = vmatpush3.bf16.msra.mxu0 %v7953_v21  ;;  %5814 = vmatpush3.bf16.msra.mxu1 %v7953_v21 }
 0x294   : > { %5795 = vmatprep.subr.bf16.mxu0 %v6800_v1  ;;  %5815 = vmatprep.subr.bf16.mxu1 %v6800_v1 }
 0x297   : > { %5796 = vmatpush3.bf16.msra.mxu0 %v7962_v23  ;;  %5816 = vmatpush3.bf16.msra.mxu1 %v7962_v23 }
 0x298   : > { %5797 = vmatprep.subr.bf16.mxu0 %v6800_v1  ;;  %5817 = vmatprep.subr.bf16.mxu1 %v6800_v1 }
 0x29b   : > { %5798 = vmatpush3.bf16.msra.mxu0 %v7971_v24  ;;  %5818 = vmatpush3.bf16.msra.mxu1 %v7971_v24 }
 0x29c   : > { %5799 = vmatprep.subr.bf16.mxu0 %v6800_v1  ;;  %5819 = vmatprep.subr.bf16.mxu1 %v6800_v1 }
 0x29f   : > { %5800 = vmatpush3.bf16.msra.mxu0 %v7980_v25  ;;  %5820 = vmatpush3.bf16.msra.mxu1 %v7980_v25 }
 0x2a0   : > { %5801 = vmatprep.subr.bf16.mxu0 %v6800_v1  ;;  %5821 = vmatprep.subr.bf16.mxu1 %v6800_v1 }
 0x2a3   : > { %5802 = vmatpush3.bf16.msra.mxu0 %v7989_v26  ;;  %5822 = vmatpush3.bf16.msra.mxu1 %v7989_v26 }
 0x2a4   : > { %5827 = vmatprep.subr.bf16.mxu0 %v6800_v1  ;;  %5847 = vmatprep.subr.bf16.mxu1 %v6800_v1 }
 0x2a6   : > { %5804 = vmatmul.mubr.bf16.vlgmr.msra.gmra.mrb[0].mxu0 %v7382_v36  ;;  %5824 = vmatmul.mubr.bf16.vlgmr.msra.gmra.mrb[0].mxu1 %v7425_v39  ;;  %v8149_v36 = vld [vmem:[%s8730_s1 + $0x198] sm:$0xff]  }
 0x2a7   : > { %5828 = vmatpush3.bf16.msra.mxu0 %v7920_v15  ;;  %5848 = vmatpush3.bf16.msra.mxu1 %v7920_v15 }
 0x2a8   : > { %5829 = vmatprep.subr.bf16.mxu0 %v6800_v1  ;;  %5849 = vmatprep.subr.bf16.mxu1 %v6800_v1 }
 0x2a9   : > { %5843 = vmatprep.mubr.msk.bf16.mxu0 %vm6801_vm0, %v6800_v1  ;;  %5863 = vmatprep.mubr.msk.bf16.mxu1 %vm6801_vm0, %v6800_v1 }
 0x2ab   : > { %5830 = vmatpush3.bf16.msra.mxu0 %v7931_v19  ;;  %5850 = vmatpush3.bf16.msra.mxu1 %v7931_v19 }
 0x2ac   : > { %5831 = vmatprep.subr.bf16.mxu0 %v6800_v1  ;;  %5851 = vmatprep.subr.bf16.mxu1 %v6800_v1 }
 0x2af   : > { %5832 = vmatpush3.bf16.msra.mxu0 %v7944_v20  ;;  %5852 = vmatpush3.bf16.msra.mxu1 %v7944_v20 }
 0x2b0   : > { %5833 = vmatprep.subr.bf16.mxu0 %v6800_v1  ;;  %5853 = vmatprep.subr.bf16.mxu1 %v6800_v1 }
 0x2b3   : > { %5834 = vmatpush3.bf16.msra.mxu0 %v7953_v21  ;;  %5854 = vmatpush3.bf16.msra.mxu1 %v7953_v21 }
 0x2b4   : > { %5835 = vmatprep.subr.bf16.mxu0 %v6800_v1  ;;  %5855 = vmatprep.subr.bf16.mxu1 %v6800_v1 }
 0x2b7   : > { %5836 = vmatpush3.bf16.msra.mxu0 %v7962_v23  ;;  %5856 = vmatpush3.bf16.msra.mxu1 %v7962_v23 }
 0x2b8   : > { %5837 = vmatprep.subr.bf16.mxu0 %v6800_v1  ;;  %5857 = vmatprep.subr.bf16.mxu1 %v6800_v1 }
 0x2bb   : > { %5838 = vmatpush3.bf16.msra.mxu0 %v7971_v24  ;;  %5858 = vmatpush3.bf16.msra.mxu1 %v7971_v24 }
 0x2bc   : > { %5839 = vmatprep.subr.bf16.mxu0 %v6800_v1  ;;  %5859 = vmatprep.subr.bf16.mxu1 %v6800_v1 }
 0x2bf   : > { %5840 = vmatpush3.bf16.msra.mxu0 %v7980_v25  ;;  %5860 = vmatpush3.bf16.msra.mxu1 %v7980_v25 }
 0x2c0   : > { %5841 = vmatprep.subr.bf16.mxu0 %v6800_v1  ;;  %5861 = vmatprep.subr.bf16.mxu1 %v6800_v1 }
 0x2c3   : > { %5842 = vmatpush3.bf16.msra.mxu0 %v7989_v26  ;;  %5862 = vmatpush3.bf16.msra.mxu1 %v7989_v26 }
 0x2c4   : > { %5867 = vmatprep.subr.bf16.mxu0 %v6800_v1  ;;  %5887 = vmatprep.subr.bf16.mxu1 %v6800_v1 }
 0x2c6   : > { %5844 = vmatmul.mubr.bf16.vlgmr.msra.gmra.mrb[4].mxu0 %v7427_v40  ;;  %5864 = vmatmul.mubr.bf16.vlgmr.msra.gmra.mrb[4].mxu1 %v7471_v43 }
 0x2c7   : > { %5868 = vmatpush3.bf16.msra.mxu0 %v7920_v15  ;;  %5888 = vmatpush3.bf16.msra.mxu1 %v7920_v15 }
 0x2c8   : > { %5869 = vmatprep.subr.bf16.mxu0 %v6800_v1  ;;  %5889 = vmatprep.subr.bf16.mxu1 %v6800_v1 }
 0x2c9   : > { %5883 = vmatprep.mubr.msk.bf16.mxu0 %vm6801_vm0, %v6800_v1  ;;  %5903 = vmatprep.mubr.msk.bf16.mxu1 %vm6801_vm0, %v6800_v1 }
 0x2cb   : > { %5870 = vmatpush3.bf16.msra.mxu0 %v7931_v19  ;;  %5890 = vmatpush3.bf16.msra.mxu1 %v7931_v19 }
 0x2cc   : > { %5871 = vmatprep.subr.bf16.mxu0 %v6800_v1  ;;  %5891 = vmatprep.subr.bf16.mxu1 %v6800_v1 }
 0x2cf   : > { %5872 = vmatpush3.bf16.msra.mxu0 %v7944_v20  ;;  %5892 = vmatpush3.bf16.msra.mxu1 %v7944_v20 }
 0x2d0   : > { %5873 = vmatprep.subr.bf16.mxu0 %v6800_v1  ;;  %5893 = vmatprep.subr.bf16.mxu1 %v6800_v1 }
 0x2d3   : > { %5874 = vmatpush3.bf16.msra.mxu0 %v7953_v21  ;;  %5894 = vmatpush3.bf16.msra.mxu1 %v7953_v21 }
 0x2d4   : > { %5875 = vmatprep.subr.bf16.mxu0 %v6800_v1  ;;  %5895 = vmatprep.subr.bf16.mxu1 %v6800_v1 }
 0x2d7   : > { %5876 = vmatpush3.bf16.msra.mxu0 %v7962_v23  ;;  %5896 = vmatpush3.bf16.msra.mxu1 %v7962_v23 }
 0x2d8   : > { %5877 = vmatprep.subr.bf16.mxu0 %v6800_v1  ;;  %5897 = vmatprep.subr.bf16.mxu1 %v6800_v1 }
 0x2db   : > { %5878 = vmatpush3.bf16.msra.mxu0 %v7971_v24  ;;  %5898 = vmatpush3.bf16.msra.mxu1 %v7971_v24 }
 0x2dc   : > { %5879 = vmatprep.subr.bf16.mxu0 %v6800_v1  ;;  %5899 = vmatprep.subr.bf16.mxu1 %v6800_v1 }
 0x2df   : > { %5880 = vmatpush3.bf16.msra.mxu0 %v7980_v25  ;;  %5900 = vmatpush3.bf16.msra.mxu1 %v7980_v25 }
 0x2e0   : > { %5881 = vmatprep.subr.bf16.mxu0 %v6800_v1  ;;  %5901 = vmatprep.subr.bf16.mxu1 %v6800_v1 }
 0x2e3   : > { %5882 = vmatpush3.bf16.msra.mxu0 %v7989_v26  ;;  %5902 = vmatpush3.bf16.msra.mxu1 %v7989_v26 }
 0x2e4   : > { %5907 = vmatprep.subr.bf16.mxu0 %v6800_v1  ;;  %5927 = vmatprep.subr.bf16.mxu1 %v6800_v1 }
 0x2e6   : > { %5884 = vmatmul.mubr.bf16.vlgmr.msra.gmra.mrb[8].mxu0 %v7473_v48  ;;  %5904 = vmatmul.mubr.bf16.vlgmr.msra.gmra.mrb[8].mxu1 %v7517_v53 }
 0x2e7   : > { %5908 = vmatpush3.bf16.msra.mxu0 %v7920_v15  ;;  %5928 = vmatpush3.bf16.msra.mxu1 %v7920_v15 }
 0x2e8   : > { %5909 = vmatprep.subr.bf16.mxu0 %v6800_v1  ;;  %5929 = vmatprep.subr.bf16.mxu1 %v6800_v1 }
 0x2e9   : > { %5923 = vmatprep.mubr.msk.bf16.mxu0 %vm6801_vm0, %v6800_v1  ;;  %5943 = vmatprep.mubr.msk.bf16.mxu1 %vm6801_vm0, %v6800_v1 }
 0x2eb   : > { %5910 = vmatpush3.bf16.msra.mxu0 %v7931_v19  ;;  %5930 = vmatpush3.bf16.msra.mxu1 %v7931_v19 }
 0x2ec   : > { %5911 = vmatprep.subr.bf16.mxu0 %v6800_v1  ;;  %5931 = vmatprep.subr.bf16.mxu1 %v6800_v1 }
 0x2ef   : > { %5912 = vmatpush3.bf16.msra.mxu0 %v7944_v20  ;;  %5932 = vmatpush3.bf16.msra.mxu1 %v7944_v20 }
 0x2f0   : > { %5913 = vmatprep.subr.bf16.mxu0 %v6800_v1  ;;  %5933 = vmatprep.subr.bf16.mxu1 %v6800_v1 }
 0x2f3   : > { %5914 = vmatpush3.bf16.msra.mxu0 %v7953_v21  ;;  %5934 = vmatpush3.bf16.msra.mxu1 %v7953_v21 }
 0x2f4   : > { %5915 = vmatprep.subr.bf16.mxu0 %v6800_v1  ;;  %5935 = vmatprep.subr.bf16.mxu1 %v6800_v1 }
 0x2f7   : > { %5916 = vmatpush3.bf16.msra.mxu0 %v7962_v23  ;;  %5936 = vmatpush3.bf16.msra.mxu1 %v7962_v23 }
 0x2f8   : > { %5917 = vmatprep.subr.bf16.mxu0 %v6800_v1  ;;  %5937 = vmatprep.subr.bf16.mxu1 %v6800_v1 }
 0x2fb   : > { %5918 = vmatpush3.bf16.msra.mxu0 %v7971_v24  ;;  %5938 = vmatpush3.bf16.msra.mxu1 %v7971_v24 }
 0x2fc   : > { %5919 = vmatprep.subr.bf16.mxu0 %v6800_v1  ;;  %5939 = vmatprep.subr.bf16.mxu1 %v6800_v1 }
 0x2ff   : > { %5920 = vmatpush3.bf16.msra.mxu0 %v7980_v25  ;;  %5940 = vmatpush3.bf16.msra.mxu1 %v7980_v25 }
 0x300   : > { %5921 = vmatprep.subr.bf16.mxu0 %v6800_v1  ;;  %5941 = vmatprep.subr.bf16.mxu1 %v6800_v1 }
 0x303   : > { %5922 = vmatpush3.bf16.msra.mxu0 %v7989_v26  ;;  %5942 = vmatpush3.bf16.msra.mxu1 %v7989_v26 }
 0x304   : > { %5947 = vmatprep.subr.bf16.mxu0 %v6800_v1  ;;  %5967 = vmatprep.subr.bf16.mxu1 %v6800_v1 }
 0x306   : > { %5924 = vmatmul.mubr.bf16.vlgmr.msra.gmra.mrb[12].mxu0 %v7519_v54  ;;  %5944 = vmatmul.mubr.bf16.vlgmr.msra.gmra.mrb[12].mxu1 %v8109_v29 }
 0x307   : > { %5948 = vmatpush3.bf16.msra.mxu0 %v8116_v30  ;;  %5968 = vmatpush3.bf16.msra.mxu1 %v8116_v30 }
 0x308   : > { %5949 = vmatprep.subr.bf16.mxu0 %v6800_v1  ;;  %5969 = vmatprep.subr.bf16.mxu1 %v6800_v1 }
 0x309   : > { %5963 = vmatprep.mubr.msk.bf16.mxu0 %vm6801_vm0, %v6800_v1  ;;  %5983 = vmatprep.mubr.msk.bf16.mxu1 %vm6801_vm0, %v6800_v1 }
 0x30b   : > { %5950 = vmatpush3.bf16.msra.mxu0 %v8127_v32  ;;  %5970 = vmatpush3.bf16.msra.mxu1 %v8127_v32 }
 0x30c   : > { %5951 = vmatprep.subr.bf16.mxu0 %v6800_v1  ;;  %5971 = vmatprep.subr.bf16.mxu1 %v6800_v1 }
 0x30f   : > { %5952 = vmatpush3.bf16.msra.mxu0 %v8140_v34  ;;  %5972 = vmatpush3.bf16.msra.mxu1 %v8140_v34 }
 0x310   : > { %5953 = vmatprep.subr.bf16.mxu0 %v6800_v1  ;;  %5973 = vmatprep.subr.bf16.mxu1 %v6800_v1 }
 0x313   : > { %5954 = vmatpush3.bf16.msra.mxu0 %v8149_v36  ;;  %5974 = vmatpush3.bf16.msra.mxu1 %v8149_v36 }
 0x314   : > { %5955 = vmatprep.subr.bf16.mxu0 %v6800_v1  ;;  %5975 = vmatprep.subr.bf16.mxu1 %v6800_v1 }
 0x317   : > { %5956 = vmatpush3.bf16.msra.mxu0 %v8158_v7  ;;  %5976 = vmatpush3.bf16.msra.mxu1 %v8158_v7 }
 0x318   : > { %5957 = vmatprep.subr.bf16.mxu0 %v6800_v1  ;;  %5977 = vmatprep.subr.bf16.mxu1 %v6800_v1 }
 0x31b   : > { %5958 = vmatpush3.bf16.msra.mxu0 %v8167_v9  ;;  %5978 = vmatpush3.bf16.msra.mxu1 %v8167_v9 }
 0x31c   : > { %5959 = vmatprep.subr.bf16.mxu0 %v6800_v1  ;;  %5979 = vmatprep.subr.bf16.mxu1 %v6800_v1 }
 0x31f   : > { %5960 = vmatpush3.bf16.msra.mxu0 %v8176_v37  ;;  %5980 = vmatpush3.bf16.msra.mxu1 %v8176_v37 }
 0x320   : > { %5961 = vmatprep.subr.bf16.mxu0 %v6800_v1  ;;  %5981 = vmatprep.subr.bf16.mxu1 %v6800_v1 }
 0x323   : > { %5962 = vmatpush3.bf16.msra.mxu0 %v8185_v38  ;;  %5982 = vmatpush3.bf16.msra.mxu1 %v8185_v38 }
 0x324   : > { %5987 = vmatprep.subr.bf16.mxu0 %v6800_v1  ;;  %6007 = vmatprep.subr.bf16.mxu1 %v6800_v1 }
 0x326   : > { %5964 = vmatmul.mubr.bf16.vlgmr.msra.gmra.mrb[0].mxu0 %v6786_v33  ;;  %5984 = vmatmul.mubr.bf16.vlgmr.msra.gmra.mrb[0].mxu1 %v6787_v35 }
 0x327   : > { %5988 = vmatpush3.bf16.msra.mxu0 %v8116_v30  ;;  %6008 = vmatpush3.bf16.msra.mxu1 %v8116_v30 }
 0x328   : > { %5989 = vmatprep.subr.bf16.mxu0 %v6800_v1  ;;  %6009 = vmatprep.subr.bf16.mxu1 %v6800_v1 }
 0x329   : > { %6003 = vmatprep.mubr.msk.bf16.mxu0 %vm6801_vm0, %v6800_v1  ;;  %6023 = vmatprep.mubr.msk.bf16.mxu1 %vm6801_vm0, %v6800_v1 }
 0x32b   : > { %5990 = vmatpush3.bf16.msra.mxu0 %v8127_v32  ;;  %6010 = vmatpush3.bf16.msra.mxu1 %v8127_v32 }
 0x32c   : > { %5991 = vmatprep.subr.bf16.mxu0 %v6800_v1  ;;  %6011 = vmatprep.subr.bf16.mxu1 %v6800_v1 }
 0x32f   : > { %5992 = vmatpush3.bf16.msra.mxu0 %v8140_v34  ;;  %6012 = vmatpush3.bf16.msra.mxu1 %v8140_v34 }
 0x330   : > { %5993 = vmatprep.subr.bf16.mxu0 %v6800_v1  ;;  %6013 = vmatprep.subr.bf16.mxu1 %v6800_v1 }
 0x333   : > { %5994 = vmatpush3.bf16.msra.mxu0 %v8149_v36  ;;  %6014 = vmatpush3.bf16.msra.mxu1 %v8149_v36 }
 0x334   : > { %5995 = vmatprep.subr.bf16.mxu0 %v6800_v1  ;;  %6015 = vmatprep.subr.bf16.mxu1 %v6800_v1 }
 0x337   : > { %5996 = vmatpush3.bf16.msra.mxu0 %v8158_v7  ;;  %6016 = vmatpush3.bf16.msra.mxu1 %v8158_v7 }
 0x338   : > { %5997 = vmatprep.subr.bf16.mxu0 %v6800_v1  ;;  %6017 = vmatprep.subr.bf16.mxu1 %v6800_v1 }
 0x33b   : > { %5998 = vmatpush3.bf16.msra.mxu0 %v8167_v9  ;;  %6018 = vmatpush3.bf16.msra.mxu1 %v8167_v9 }
 0x33c   : > { %5999 = vmatprep.subr.bf16.mxu0 %v6800_v1  ;;  %6019 = vmatprep.subr.bf16.mxu1 %v6800_v1 }
 0x33f   : > { %6000 = vmatpush3.bf16.msra.mxu0 %v8176_v37  ;;  %6020 = vmatpush3.bf16.msra.mxu1 %v8176_v37 }
 0x340   : > { %6001 = vmatprep.subr.bf16.mxu0 %v6800_v1  ;;  %6021 = vmatprep.subr.bf16.mxu1 %v6800_v1 }
 0x343   : > { %6002 = vmatpush3.bf16.msra.mxu0 %v8185_v38  ;;  %6022 = vmatpush3.bf16.msra.mxu1 %v8185_v38 }
 0x344   : > { %6027 = vmatprep.subr.bf16.mxu0 %v6800_v1  ;;  %6047 = vmatprep.subr.bf16.mxu1 %v6800_v1 }
 0x346   : > { %6004 = vmatmul.mubr.bf16.vlgmr.msra.gmra.mrb[4].mxu0 %v6788_v41  ;;  %6024 = vmatmul.mubr.bf16.vlgmr.msra.gmra.mrb[4].mxu1 %v6789_v42 }
 0x347   : > { %6028 = vmatpush3.bf16.msra.mxu0 %v8116_v30  ;;  %6048 = vmatpush3.bf16.msra.mxu1 %v8116_v30 }
 0x348   : > { %6029 = vmatprep.subr.bf16.mxu0 %v6800_v1  ;;  %6049 = vmatprep.subr.bf16.mxu1 %v6800_v1 }
 0x349   : > { %6043 = vmatprep.mubr.msk.bf16.mxu0 %vm6801_vm0, %v6800_v1  ;;  %6063 = vmatprep.mubr.msk.bf16.mxu1 %vm6801_vm0, %v6800_v1 }
 0x34b   : > { %6030 = vmatpush3.bf16.msra.mxu0 %v8127_v32  ;;  %6050 = vmatpush3.bf16.msra.mxu1 %v8127_v32 }
 0x34c   : > { %6031 = vmatprep.subr.bf16.mxu0 %v6800_v1  ;;  %6051 = vmatprep.subr.bf16.mxu1 %v6800_v1 }
 0x34f   : > { %6032 = vmatpush3.bf16.msra.mxu0 %v8140_v34  ;;  %6052 = vmatpush3.bf16.msra.mxu1 %v8140_v34 }
 0x350   : > { %6033 = vmatprep.subr.bf16.mxu0 %v6800_v1  ;;  %6053 = vmatprep.subr.bf16.mxu1 %v6800_v1 }
 0x353   : > { %6034 = vmatpush3.bf16.msra.mxu0 %v8149_v36  ;;  %6054 = vmatpush3.bf16.msra.mxu1 %v8149_v36 }
 0x354   : > { %6035 = vmatprep.subr.bf16.mxu0 %v6800_v1  ;;  %6055 = vmatprep.subr.bf16.mxu1 %v6800_v1 }
 0x357   : > { %6036 = vmatpush3.bf16.msra.mxu0 %v8158_v7  ;;  %6056 = vmatpush3.bf16.msra.mxu1 %v8158_v7 }
 0x358   : > { %6037 = vmatprep.subr.bf16.mxu0 %v6800_v1  ;;  %6057 = vmatprep.subr.bf16.mxu1 %v6800_v1 }
 0x35b   : > { %6038 = vmatpush3.bf16.msra.mxu0 %v8167_v9  ;;  %6058 = vmatpush3.bf16.msra.mxu1 %v8167_v9 }
 0x35c   : > { %6039 = vmatprep.subr.bf16.mxu0 %v6800_v1  ;;  %6059 = vmatprep.subr.bf16.mxu1 %v6800_v1 }
 0x35f   : > { %6040 = vmatpush3.bf16.msra.mxu0 %v8176_v37  ;;  %6060 = vmatpush3.bf16.msra.mxu1 %v8176_v37 }
 0x360   : > { %6041 = vmatprep.subr.bf16.mxu0 %v6800_v1  ;;  %6061 = vmatprep.subr.bf16.mxu1 %v6800_v1 }
 0x363   : > { %6042 = vmatpush3.bf16.msra.mxu0 %v8185_v38  ;;  %6062 = vmatpush3.bf16.msra.mxu1 %v8185_v38 }
 0x364   : > { %6067 = vmatprep.subr.bf16.mxu0 %v6800_v1  ;;  %6087 = vmatprep.subr.bf16.mxu1 %v6800_v1 }
 0x366   : > { %6044 = vmatmul.mubr.bf16.vlgmr.msra.gmra.mrb[8].mxu0 %v6790_v49  ;;  %6064 = vmatmul.mubr.bf16.vlgmr.msra.gmra.mrb[8].mxu1 %v6791_v50 }
 0x367   : > { %6068 = vmatpush3.bf16.msra.mxu0 %v8116_v30  ;;  %6088 = vmatpush3.bf16.msra.mxu1 %v8116_v30 }
 0x368   : > { %6069 = vmatprep.subr.bf16.mxu0 %v6800_v1  ;;  %6089 = vmatprep.subr.bf16.mxu1 %v6800_v1 }
 0x369   : > { %6083 = vmatprep.mubr.msk.bf16.mxu0 %vm6801_vm0, %v6800_v1  ;;  %6103 = vmatprep.mubr.msk.bf16.mxu1 %vm6801_vm0, %v6800_v1 }
 0x36b   : > { %6070 = vmatpush3.bf16.msra.mxu0 %v8127_v32  ;;  %6090 = vmatpush3.bf16.msra.mxu1 %v8127_v32 }
 0x36c   : > { %6071 = vmatprep.subr.bf16.mxu0 %v6800_v1  ;;  %6091 = vmatprep.subr.bf16.mxu1 %v6800_v1 }
 0x36f   : > { %6072 = vmatpush3.bf16.msra.mxu0 %v8140_v34  ;;  %6092 = vmatpush3.bf16.msra.mxu1 %v8140_v34 }
 0x370   : > { %6073 = vmatprep.subr.bf16.mxu0 %v6800_v1  ;;  %6093 = vmatprep.subr.bf16.mxu1 %v6800_v1 }
 0x373   : > { %6074 = vmatpush3.bf16.msra.mxu0 %v8149_v36  ;;  %6094 = vmatpush3.bf16.msra.mxu1 %v8149_v36 }
 0x374   : > { %6075 = vmatprep.subr.bf16.mxu0 %v6800_v1  ;;  %6095 = vmatprep.subr.bf16.mxu1 %v6800_v1 }
 0x377   : > { %6076 = vmatpush3.bf16.msra.mxu0 %v8158_v7  ;;  %6096 = vmatpush3.bf16.msra.mxu1 %v8158_v7 }
 0x378   : > { %6077 = vmatprep.subr.bf16.mxu0 %v6800_v1  ;;  %6097 = vmatprep.subr.bf16.mxu1 %v6800_v1 }
 0x37b   : > { %6078 = vmatpush3.bf16.msra.mxu0 %v8167_v9  ;;  %6098 = vmatpush3.bf16.msra.mxu1 %v8167_v9 }
 0x37c   : > { %6079 = vmatprep.subr.bf16.mxu0 %v6800_v1  ;;  %6099 = vmatprep.subr.bf16.mxu1 %v6800_v1 }
 0x37f   : > { %6080 = vmatpush3.bf16.msra.mxu0 %v8176_v37  ;;  %6100 = vmatpush3.bf16.msra.mxu1 %v8176_v37 }
 0x380   : > { %6081 = vmatprep.subr.bf16.mxu0 %v6800_v1  ;;  %6101 = vmatprep.subr.bf16.mxu1 %v6800_v1 }
 0x383   : > { %6082 = vmatpush3.bf16.msra.mxu0 %v8185_v38  ;;  %6102 = vmatpush3.bf16.msra.mxu1 %v8185_v38 }
 0x384   : > { %6107 = vmatprep.subr.bf16.mxu0 %v6800_v1  ;;  %6127 = vmatprep.subr.bf16.mxu1 %v6800_v1 }
 0x386   : > { %6084 = vmatmul.mubr.bf16.vlgmr.msra.gmra.mrb[12].mxu0 %v7716_v31  ;;  %6104 = vmatmul.mubr.bf16.vlgmr.msra.gmra.mrb[12].mxu1 %v4273_v51  ;;  %v8505_v31 = vld [vmem:[%s8730_s1 + $0x200] sm:$0xff]  }
 0x387   : > { %6108 = vmatpush3.bf16.msra.mxu0 %v8309_v52  ;;  %6128 = vmatpush3.bf16.msra.mxu1 %v8309_v52 }
 0x388   : > { %6109 = vmatprep.subr.bf16.mxu0 %v6800_v1  ;;  %6129 = vmatprep.subr.bf16.mxu1 %v6800_v1 }
 0x389   : > { %6123 = vmatprep.mubr.msk.bf16.mxu0 %vm6801_vm0, %v6800_v1  ;;  %6143 = vmatprep.mubr.msk.bf16.mxu1 %vm6801_vm0, %v6800_v1 }
 0x38b   : > { %6110 = vmatpush3.bf16.msra.mxu0 %v8319_v55  ;;  %6130 = vmatpush3.bf16.msra.mxu1 %v8319_v55 }
 0x38c   : > { %6111 = vmatprep.subr.bf16.mxu0 %v6800_v1  ;;  %6131 = vmatprep.subr.bf16.mxu1 %v6800_v1 }
 0x38f   : > { %6112 = vmatpush3.bf16.msra.mxu0 %v8332_v56  ;;  %6132 = vmatpush3.bf16.msra.mxu1 %v8332_v56 }
 0x390   : > { %6113 = vmatprep.subr.bf16.mxu0 %v6800_v1  ;;  %6133 = vmatprep.subr.bf16.mxu1 %v6800_v1 }
 0x393   : > { %6114 = vmatpush3.bf16.msra.mxu0 %v8341_v57  ;;  %6134 = vmatpush3.bf16.msra.mxu1 %v8341_v57 }
 0x394   : > { %6115 = vmatprep.subr.bf16.mxu0 %v6800_v1  ;;  %6135 = vmatprep.subr.bf16.mxu1 %v6800_v1 }
 0x397   : > { %6116 = vmatpush3.bf16.msra.mxu0 %v8350_v58  ;;  %6136 = vmatpush3.bf16.msra.mxu1 %v8350_v58 }
 0x398   : > { %6117 = vmatprep.subr.bf16.mxu0 %v6800_v1  ;;  %6137 = vmatprep.subr.bf16.mxu1 %v6800_v1 }
 0x39b   : > { %6118 = vmatpush3.bf16.msra.mxu0 %v8359_v59  ;;  %6138 = vmatpush3.bf16.msra.mxu1 %v8359_v59 }
 0x39c   : > { %6119 = vmatprep.subr.bf16.mxu0 %v6800_v1  ;;  %6139 = vmatprep.subr.bf16.mxu1 %v6800_v1 }
 0x39f   : > { %6120 = vmatpush3.bf16.msra.mxu0 %v8368_v0  ;;  %6140 = vmatpush3.bf16.msra.mxu1 %v8368_v0 }
 0x3a0   : > { %6121 = vmatprep.subr.bf16.mxu0 %v6800_v1  ;;  %6141 = vmatprep.subr.bf16.mxu1 %v6800_v1 }
 0x3a3   : > { %6122 = vmatpush3.bf16.msra.mxu0 %v8377_v6  ;;  %6142 = vmatpush3.bf16.msra.mxu1 %v8377_v6 }
 0x3a4   : > { %6147 = vmatprep.subr.bf16.mxu0 %v6800_v1  ;;  %6167 = vmatprep.subr.bf16.mxu1 %v6800_v1 }
 0x3a6   : > { %6124 = vmatmul.mubr.bf16.vlgmr.msra.gmra.mrb[0].mxu0 %v7060_v44  ;;  %6144 = vmatmul.mubr.bf16.vlgmr.msra.gmra.mrb[0].mxu1 %v7062_v45  ;;  %v4298_v44 = vld [vmem:[%s6870_s26 + $0x48] sm:$0xf]  ;;  %v8483_v45 = vld [vmem:[%s6870_s26 + $0x4c] sm:$0x1] }
 0x3a7   : > { %6148 = vmatpush3.bf16.msra.mxu0 %v8309_v52  ;;  %6168 = vmatpush3.bf16.msra.mxu1 %v8309_v52 }
 0x3a8   : > { %6149 = vmatprep.subr.bf16.mxu0 %v6800_v1  ;;  %6169 = vmatprep.subr.bf16.mxu1 %v6800_v1 }
 0x3a9   : > { %6163 = vmatprep.mubr.msk.bf16.mxu0 %vm6801_vm0, %v6800_v1  ;;  %6183 = vmatprep.mubr.msk.bf16.mxu1 %vm6801_vm0, %v6800_v1 }
 0x3ab   : > { %6150 = vmatpush3.bf16.msra.mxu0 %v8319_v55  ;;  %6170 = vmatpush3.bf16.msra.mxu1 %v8319_v55 }
 0x3ac   : > { %6151 = vmatprep.subr.bf16.mxu0 %v6800_v1  ;;  %6171 = vmatprep.subr.bf16.mxu1 %v6800_v1 }
 0x3af   : > { %6152 = vmatpush3.bf16.msra.mxu0 %v8332_v56  ;;  %6172 = vmatpush3.bf16.msra.mxu1 %v8332_v56 }
 0x3b0   : > { %6153 = vmatprep.subr.bf16.mxu0 %v6800_v1  ;;  %6173 = vmatprep.subr.bf16.mxu1 %v6800_v1 }
 0x3b3   : > { %6154 = vmatpush3.bf16.msra.mxu0 %v8341_v57  ;;  %6174 = vmatpush3.bf16.msra.mxu1 %v8341_v57 }
 0x3b4   : > { %6155 = vmatprep.subr.bf16.mxu0 %v6800_v1  ;;  %6175 = vmatprep.subr.bf16.mxu1 %v6800_v1 }
 0x3b7   : > { %6156 = vmatpush3.bf16.msra.mxu0 %v8350_v58  ;;  %6176 = vmatpush3.bf16.msra.mxu1 %v8350_v58 }
 0x3b8   : > { %6157 = vmatprep.subr.bf16.mxu0 %v6800_v1  ;;  %6177 = vmatprep.subr.bf16.mxu1 %v6800_v1 }
 0x3bb   : > { %6158 = vmatpush3.bf16.msra.mxu0 %v8359_v59  ;;  %6178 = vmatpush3.bf16.msra.mxu1 %v8359_v59 }
 0x3bc   : > { %6159 = vmatprep.subr.bf16.mxu0 %v6800_v1  ;;  %6179 = vmatprep.subr.bf16.mxu1 %v6800_v1 }
 0x3bf   : > { %6160 = vmatpush3.bf16.msra.mxu0 %v8368_v0  ;;  %6180 = vmatpush3.bf16.msra.mxu1 %v8368_v0 }
 0x3c0   : > { %6161 = vmatprep.subr.bf16.mxu0 %v6800_v1  ;;  %6181 = vmatprep.subr.bf16.mxu1 %v6800_v1 }
 0x3c3   : > { %6162 = vmatpush3.bf16.msra.mxu0 %v8377_v6  ;;  %6182 = vmatpush3.bf16.msra.mxu1 %v8377_v6 }
 0x3c4   : > { %6187 = vmatprep.subr.bf16.mxu0 %v6800_v1  ;;  %6207 = vmatprep.subr.bf16.mxu1 %v6800_v1 }
 0x3c6   : > { %6164 = vmatmul.mubr.bf16.vlgmr.msra.gmra.mrb[4].mxu0 %v7156_v60  ;;  %6184 = vmatmul.mubr.bf16.vlgmr.msra.gmra.mrb[4].mxu1 %v7158_v61  ;;  %v4300_v60 = vcombine.low %v4298_v44, %v8483_v45 }
 0x3c7   : > { %6188 = vmatpush3.bf16.msra.mxu0 %v8309_v52  ;;  %6208 = vmatpush3.bf16.msra.mxu1 %v8309_v52 }
 0x3c8   : > { %6189 = vmatprep.subr.bf16.mxu0 %v6800_v1  ;;  %6209 = vmatprep.subr.bf16.mxu1 %v6800_v1  ;;  %v3502_v61 = vshll.u32 %v4300_v60, 16 }
 0x3c9   : > { %6203 = vmatprep.mubr.msk.bf16.mxu0 %vm6801_vm0, %v6800_v1  ;;  %6223 = vmatprep.mubr.msk.bf16.mxu1 %vm6801_vm0, %v6800_v1 }
 0x3cb   : > { %6190 = vmatpush3.bf16.msra.mxu0 %v8319_v55  ;;  %6210 = vmatpush3.bf16.msra.mxu1 %v8319_v55 }
 0x3cc   : > { %6191 = vmatprep.subr.bf16.mxu0 %v6800_v1  ;;  %6211 = vmatprep.subr.bf16.mxu1 %v6800_v1 }
 0x3cf   : > { %6192 = vmatpush3.bf16.msra.mxu0 %v8332_v56  ;;  %6212 = vmatpush3.bf16.msra.mxu1 %v8332_v56 }
 0x3d0   : > { %6193 = vmatprep.subr.bf16.mxu0 %v6800_v1  ;;  %6213 = vmatprep.subr.bf16.mxu1 %v6800_v1 }
 0x3d3   : > { %6194 = vmatpush3.bf16.msra.mxu0 %v8341_v57  ;;  %6214 = vmatpush3.bf16.msra.mxu1 %v8341_v57 }
 0x3d4   : > { %6195 = vmatprep.subr.bf16.mxu0 %v6800_v1  ;;  %6215 = vmatprep.subr.bf16.mxu1 %v6800_v1 }
 0x3d7   : > { %6196 = vmatpush3.bf16.msra.mxu0 %v8350_v58  ;;  %6216 = vmatpush3.bf16.msra.mxu1 %v8350_v58 }
 0x3d8   : > { %6197 = vmatprep.subr.bf16.mxu0 %v6800_v1  ;;  %6217 = vmatprep.subr.bf16.mxu1 %v6800_v1 }
 0x3db   : > { %6198 = vmatpush3.bf16.msra.mxu0 %v8359_v59  ;;  %6218 = vmatpush3.bf16.msra.mxu1 %v8359_v59 }
 0x3dc   : > { %6199 = vmatprep.subr.bf16.mxu0 %v6800_v1  ;;  %6219 = vmatprep.subr.bf16.mxu1 %v6800_v1 }
 0x3df   : > { %6200 = vmatpush3.bf16.msra.mxu0 %v8368_v0  ;;  %6220 = vmatpush3.bf16.msra.mxu1 %v8368_v0 }
 0x3e0   : > { %6201 = vmatprep.subr.bf16.mxu0 %v6800_v1  ;;  %6221 = vmatprep.subr.bf16.mxu1 %v6800_v1 }
 0x3e3   : > { %6202 = vmatpush3.bf16.msra.mxu0 %v8377_v6  ;;  %6222 = vmatpush3.bf16.msra.mxu1 %v8377_v6 }
 0x3e4   : > { %6227 = vmatprep.subr.bf16.mxu0 %v6800_v1  ;;  %6247 = vmatprep.subr.bf16.mxu1 %v6800_v1 }
 0x3e6   : > { %6204 = vmatmul.mubr.bf16.vlgmr.msra.gmra.mrb[8].mxu0 %v7252_v5  ;;  %6224 = vmatmul.mubr.bf16.vlgmr.msra.gmra.mrb[8].mxu1 %v7254_v18  ;;  %v3500_v5 = vshrl.u32 %v4300_v60, 16  ;;  %v3504_v18 = vrot.slane %v3502_v61, 1 }
 0x3e7   : > { %6228 = vmatpush3.bf16.msra.mxu0 %v8309_v52  ;;  %6248 = vmatpush3.bf16.msra.mxu1 %v8309_v52 }
 0x3e8   : > { %6229 = vmatprep.subr.bf16.mxu0 %v6800_v1  ;;  %6249 = vmatprep.subr.bf16.mxu1 %v6800_v1  ;;  %v3505_v2 = vor.u32 %v3504_v18, %v3500_v5 }
 0x3e9   : > { %6243 = vmatprep.mubr.msk.bf16.mxu0 %vm6801_vm0, %v6800_v1  ;;  %6263 = vmatprep.mubr.msk.bf16.mxu1 %vm6801_vm0, %v6800_v1 }
 0x3eb   : > { %6230 = vmatpush3.bf16.msra.mxu0 %v8319_v55  ;;  %6250 = vmatpush3.bf16.msra.mxu1 %v8319_v55 }
 0x3ec   : > { %6231 = vmatprep.subr.bf16.mxu0 %v6800_v1  ;;  %6251 = vmatprep.subr.bf16.mxu1 %v6800_v1 }
 0x3ef   : > { %6232 = vmatpush3.bf16.msra.mxu0 %v8332_v56  ;;  %6252 = vmatpush3.bf16.msra.mxu1 %v8332_v56 }
 0x3f0   : > { %6233 = vmatprep.subr.bf16.mxu0 %v6800_v1  ;;  %6253 = vmatprep.subr.bf16.mxu1 %v6800_v1 }
 0x3f3   : > { %6234 = vmatpush3.bf16.msra.mxu0 %v8341_v57  ;;  %6254 = vmatpush3.bf16.msra.mxu1 %v8341_v57 }
 0x3f4   : > { %6235 = vmatprep.subr.bf16.mxu0 %v6800_v1  ;;  %6255 = vmatprep.subr.bf16.mxu1 %v6800_v1 }
 0x3f7   : > { %6236 = vmatpush3.bf16.msra.mxu0 %v8350_v58  ;;  %6256 = vmatpush3.bf16.msra.mxu1 %v8350_v58 }
 0x3f8   : > { %6237 = vmatprep.subr.bf16.mxu0 %v6800_v1  ;;  %6257 = vmatprep.subr.bf16.mxu1 %v6800_v1 }
 0x3fb   : > { %6238 = vmatpush3.bf16.msra.mxu0 %v8359_v59  ;;  %6258 = vmatpush3.bf16.msra.mxu1 %v8359_v59 }
 0x3fc   : > { %6239 = vmatprep.subr.bf16.mxu0 %v6800_v1  ;;  %6259 = vmatprep.subr.bf16.mxu1 %v6800_v1 }
 0x3ff   : > { %6240 = vmatpush3.bf16.msra.mxu0 %v8368_v0  ;;  %6260 = vmatpush3.bf16.msra.mxu1 %v8368_v0 }
 0x400   : > { %6241 = vmatprep.subr.bf16.mxu0 %v6800_v1  ;;  %6261 = vmatprep.subr.bf16.mxu1 %v6800_v1 }
 0x403   : > { %6242 = vmatpush3.bf16.msra.mxu0 %v8377_v6  ;;  %6262 = vmatpush3.bf16.msra.mxu1 %v8377_v6 }
 0x404   : > { %6267 = vmatprep.subr.bf16.mxu0 %v6800_v1  ;;  %6287 = vmatprep.subr.bf16.mxu1 %v6800_v1 }
 0x406   : > { %6244 = vmatmul.mubr.bf16.vlgmr.msra.gmra.mrb[12].mxu0 %v7913_v12  ;;  %6264 = vmatmul.mubr.bf16.vlgmr.msra.gmra.mrb[12].mxu1 %v3505_v2 }
 0x407   : > { %6268 = vmatpush3.bf16.msra.mxu0 %v8505_v31  ;;  %6288 = vmatpush3.bf16.msra.mxu1 %v8505_v31 }
 0x408   : > { %6269 = vmatprep.subr.bf16.mxu0 %v6800_v1  ;;  %6289 = vmatprep.subr.bf16.mxu1 %v6800_v1 }
 0x409   : > { %6283 = vmatprep.mubr.msk.bf16.mxu0 %vm6801_vm0, %v6800_v1  ;;  %6303 = vmatprep.mubr.msk.bf16.mxu1 %vm6801_vm0, %v6800_v1 }
 0x40b   : > { %6270 = vmatpush3.bf16.msra.mxu0 %v8515_v46  ;;  %6290 = vmatpush3.bf16.msra.mxu1 %v8515_v46 }
 0x40c   : > { %6271 = vmatprep.subr.bf16.mxu0 %v6800_v1  ;;  %6291 = vmatprep.subr.bf16.mxu1 %v6800_v1 }
 0x40f   : > { %6272 = vmatpush3.bf16.msra.mxu0 %v8528_v47  ;;  %6292 = vmatpush3.bf16.msra.mxu1 %v8528_v47 }
 0x410   : > { %6273 = vmatprep.subr.bf16.mxu0 %v6800_v1  ;;  %6293 = vmatprep.subr.bf16.mxu1 %v6800_v1 }
 0x413   : > { %6274 = vmatpush3.bf16.msra.mxu0 %v8537_v62  ;;  %6294 = vmatpush3.bf16.msra.mxu1 %v8537_v62 }
 0x414   : > { %6275 = vmatprep.subr.bf16.mxu0 %v6800_v1  ;;  %6295 = vmatprep.subr.bf16.mxu1 %v6800_v1 }
 0x417   : > { %6276 = vmatpush3.bf16.msra.mxu0 %v8546_v63  ;;  %6296 = vmatpush3.bf16.msra.mxu1 %v8546_v63 }
 0x418   : > { %6277 = vmatprep.subr.bf16.mxu0 %v6800_v1  ;;  %6297 = vmatprep.subr.bf16.mxu1 %v6800_v1 }
 0x41b   : > { %6278 = vmatpush3.bf16.msra.mxu0 %v8555_v8  ;;  %6298 = vmatpush3.bf16.msra.mxu1 %v8555_v8 }
 0x41c   : > { %6279 = vmatprep.subr.bf16.mxu0 %v6800_v1  ;;  %6299 = vmatprep.subr.bf16.mxu1 %v6800_v1 }
 0x41f   : > { %6280 = vmatpush3.bf16.msra.mxu0 %v8564_v3  ;;  %6300 = vmatpush3.bf16.msra.mxu1 %v8564_v3 }
 0x420   : > { %6281 = vmatprep.subr.bf16.mxu0 %v6800_v1  ;;  %6301 = vmatprep.subr.bf16.mxu1 %v6800_v1 }
 0x423   : > { %6282 = vmatpush3.bf16.msra.mxu0 %v8573_v10  ;;  %6302 = vmatpush3.bf16.msra.mxu1 %v8573_v10 }
 0x424   : > { %6307 = vmatprep.subr.bf16.mxu0 %v6800_v1  ;;  %6327 = vmatprep.subr.bf16.mxu1 %v6800_v1 }
 0x426   : > { %6284 = vmatmul.mubr.bf16.vlgmr.msra.gmra.mrb[0].mxu0 %v7425_v39  ;;  %6304 = vmatmul.mubr.bf16.vlgmr.msra.gmra.mrb[0].mxu1 %v7427_v40  ;;  %v4325_v39 = vld [vmem:[%s6870_s26 + $0x48] sm:$0xe] }
 0x427   : > { %6308 = vmatpush3.bf16.msra.mxu0 %v8505_v31  ;;  %6328 = vmatpush3.bf16.msra.mxu1 %v8505_v31  ;;  %v4326_v40 = vcombine.low %v4325_v39, %v8483_v45 }
 0x428   : > { %6309 = vmatprep.subr.bf16.mxu0 %v6800_v1  ;;  %6329 = vmatprep.subr.bf16.mxu1 %v6800_v1 }
 0x429   : > { %6323 = vmatprep.mubr.msk.bf16.mxu0 %vm6801_vm0, %v6800_v1  ;;  %6343 = vmatprep.mubr.msk.bf16.mxu1 %vm6801_vm0, %v6800_v1 }
 0x42b   : > { %6310 = vmatpush3.bf16.msra.mxu0 %v8515_v46  ;;  %6330 = vmatpush3.bf16.msra.mxu1 %v8515_v46 }
 0x42c   : > { %6311 = vmatprep.subr.bf16.mxu0 %v6800_v1  ;;  %6331 = vmatprep.subr.bf16.mxu1 %v6800_v1 }
 0x42f   : > { %6312 = vmatpush3.bf16.msra.mxu0 %v8528_v47  ;;  %6332 = vmatpush3.bf16.msra.mxu1 %v8528_v47 }
 0x430   : > { %6313 = vmatprep.subr.bf16.mxu0 %v6800_v1  ;;  %6333 = vmatprep.subr.bf16.mxu1 %v6800_v1 }
 0x433   : > { %6314 = vmatpush3.bf16.msra.mxu0 %v8537_v62  ;;  %6334 = vmatpush3.bf16.msra.mxu1 %v8537_v62 }
 0x434   : > { %6315 = vmatprep.subr.bf16.mxu0 %v6800_v1  ;;  %6335 = vmatprep.subr.bf16.mxu1 %v6800_v1 }
 0x437   : > { %6316 = vmatpush3.bf16.msra.mxu0 %v8546_v63  ;;  %6336 = vmatpush3.bf16.msra.mxu1 %v8546_v63 }
 0x438   : > { %6317 = vmatprep.subr.bf16.mxu0 %v6800_v1  ;;  %6337 = vmatprep.subr.bf16.mxu1 %v6800_v1 }
 0x43b   : > { %6318 = vmatpush3.bf16.msra.mxu0 %v8555_v8  ;;  %6338 = vmatpush3.bf16.msra.mxu1 %v8555_v8 }
 0x43c   : > { %6319 = vmatprep.subr.bf16.mxu0 %v6800_v1  ;;  %6339 = vmatprep.subr.bf16.mxu1 %v6800_v1 }
 0x43f   : > { %6320 = vmatpush3.bf16.msra.mxu0 %v8564_v3  ;;  %6340 = vmatpush3.bf16.msra.mxu1 %v8564_v3 }
 0x440   : > { %6321 = vmatprep.subr.bf16.mxu0 %v6800_v1  ;;  %6341 = vmatprep.subr.bf16.mxu1 %v6800_v1 }
 0x443   : > { %6322 = vmatpush3.bf16.msra.mxu0 %v8573_v10  ;;  %6342 = vmatpush3.bf16.msra.mxu1 %v8573_v10 }
 0x444   : > { %6347 = vmatprep.subr.bf16.mxu0 %v6800_v1  ;;  %6367 = vmatprep.subr.bf16.mxu1 %v6800_v1 }
 0x446   : > { %6324 = vmatmul.mubr.bf16.vlgmr.msra.gmra.mrb[4].mxu0 %v7471_v43  ;;  %6344 = vmatmul.mubr.bf16.vlgmr.msra.gmra.mrb[4].mxu1 %v7473_v48  ;;  %v3904_v43 = vrot.slane %v4326_v40, 1  ;;  %v4327_v48 = vld [vmem:[%s8731_s2] ss:$0 sm:$0xff] }
 0x447   : > { %6348 = vmatpush3.bf16.msra.mxu0 %v8505_v31  ;;  %6368 = vmatpush3.bf16.msra.mxu1 %v8505_v31 }
 0x448   : > { %6349 = vmatprep.subr.bf16.mxu0 %v6800_v1  ;;  %6369 = vmatprep.subr.bf16.mxu1 %v6800_v1 }
 0x449   : > { %6363 = vmatprep.mubr.msk.bf16.mxu0 %vm6801_vm0, %v6800_v1  ;;  %6383 = vmatprep.mubr.msk.bf16.mxu1 %vm6801_vm0, %v6800_v1 }
 0x44b   : > { %6350 = vmatpush3.bf16.msra.mxu0 %v8515_v46  ;;  %6370 = vmatpush3.bf16.msra.mxu1 %v8515_v46 }
 0x44c   : > { %6351 = vmatprep.subr.bf16.mxu0 %v6800_v1  ;;  %6371 = vmatprep.subr.bf16.mxu1 %v6800_v1 }
 0x44f   : > { %6352 = vmatpush3.bf16.msra.mxu0 %v8528_v47  ;;  %6372 = vmatpush3.bf16.msra.mxu1 %v8528_v47 }
 0x450   : > { %6353 = vmatprep.subr.bf16.mxu0 %v6800_v1  ;;  %6373 = vmatprep.subr.bf16.mxu1 %v6800_v1 }
 0x453   : > { %6354 = vmatpush3.bf16.msra.mxu0 %v8537_v62  ;;  %6374 = vmatpush3.bf16.msra.mxu1 %v8537_v62 }
 0x454   : > { %6355 = vmatprep.subr.bf16.mxu0 %v6800_v1  ;;  %6375 = vmatprep.subr.bf16.mxu1 %v6800_v1 }
 0x457   : > { %6356 = vmatpush3.bf16.msra.mxu0 %v8546_v63  ;;  %6376 = vmatpush3.bf16.msra.mxu1 %v8546_v63 }
 0x458   : > { %6357 = vmatprep.subr.bf16.mxu0 %v6800_v1  ;;  %6377 = vmatprep.subr.bf16.mxu1 %v6800_v1 }
 0x45b   : > { %6358 = vmatpush3.bf16.msra.mxu0 %v8555_v8  ;;  %6378 = vmatpush3.bf16.msra.mxu1 %v8555_v8 }
 0x45c   : > { %6359 = vmatprep.subr.bf16.mxu0 %v6800_v1  ;;  %6379 = vmatprep.subr.bf16.mxu1 %v6800_v1 }
 0x45f   : > { %6360 = vmatpush3.bf16.msra.mxu0 %v8564_v3  ;;  %6380 = vmatpush3.bf16.msra.mxu1 %v8564_v3 }
 0x460   : > { %6361 = vmatprep.subr.bf16.mxu0 %v6800_v1  ;;  %6381 = vmatprep.subr.bf16.mxu1 %v6800_v1 }
 0x463   : > { %6362 = vmatpush3.bf16.msra.mxu0 %v8573_v10  ;;  %6382 = vmatpush3.bf16.msra.mxu1 %v8573_v10 }
 0x464   : > { %6387 = vmatprep.subr.bf16.mxu0 %v6800_v1  ;;  %6407 = vmatprep.subr.bf16.mxu1 %v6800_v1 }
 0x466   : > { %6364 = vmatmul.mubr.bf16.vlgmr.msra.gmra.mrb[8].mxu0 %v7517_v53  ;;  %6384 = vmatmul.mubr.bf16.vlgmr.msra.gmra.mrb[8].mxu1 %v7519_v54  ;;  %v8702_v54 = vld [vmem:[%s8732_s3] ss:$0 sm:$0xff] }
 0x467   : > { %6388 = vmatpush3.bf16.msra.mxu0 %v8505_v31  ;;  %6408 = vmatpush3.bf16.msra.mxu1 %v8505_v31 }
 0x468   : > { %6389 = vmatprep.subr.bf16.mxu0 %v6800_v1  ;;  %6409 = vmatprep.subr.bf16.mxu1 %v6800_v1 }
 0x469   : > { %6403 = vmatprep.mubr.msk.bf16.mxu0 %vm6801_vm0, %v6800_v1  ;;  %6423 = vmatprep.mubr.msk.bf16.mxu1 %vm6801_vm0, %v6800_v1 }
 0x46b   : > { %6390 = vmatpush3.bf16.msra.mxu0 %v8515_v46  ;;  %6410 = vmatpush3.bf16.msra.mxu1 %v8515_v46 }
 0x46c   : > { %6391 = vmatprep.subr.bf16.mxu0 %v6800_v1  ;;  %6411 = vmatprep.subr.bf16.mxu1 %v6800_v1 }
 0x46f   : > { %6392 = vmatpush3.bf16.msra.mxu0 %v8528_v47  ;;  %6412 = vmatpush3.bf16.msra.mxu1 %v8528_v47 }
 0x470   : > { %6393 = vmatprep.subr.bf16.mxu0 %v6800_v1  ;;  %6413 = vmatprep.subr.bf16.mxu1 %v6800_v1 }
 0x473   : > { %6394 = vmatpush3.bf16.msra.mxu0 %v8537_v62  ;;  %6414 = vmatpush3.bf16.msra.mxu1 %v8537_v62 }
 0x474   : > { %6395 = vmatprep.subr.bf16.mxu0 %v6800_v1  ;;  %6415 = vmatprep.subr.bf16.mxu1 %v6800_v1 }
 0x477   : > { %6396 = vmatpush3.bf16.msra.mxu0 %v8546_v63  ;;  %6416 = vmatpush3.bf16.msra.mxu1 %v8546_v63 }
 0x478   : > { %6397 = vmatprep.subr.bf16.mxu0 %v6800_v1  ;;  %6417 = vmatprep.subr.bf16.mxu1 %v6800_v1 }
 0x47b   : > { %6398 = vmatpush3.bf16.msra.mxu0 %v8555_v8  ;;  %6418 = vmatpush3.bf16.msra.mxu1 %v8555_v8 }
 0x47c   : > { %6399 = vmatprep.subr.bf16.mxu0 %v6800_v1  ;;  %6419 = vmatprep.subr.bf16.mxu1 %v6800_v1 }
 0x47f   : > { %6400 = vmatpush3.bf16.msra.mxu0 %v8564_v3  ;;  %6420 = vmatpush3.bf16.msra.mxu1 %v8564_v3 }
 0x480   : > { %6401 = vmatprep.subr.bf16.mxu0 %v6800_v1  ;;  %6421 = vmatprep.subr.bf16.mxu1 %v6800_v1 }
 0x483   : > { %6402 = vmatpush3.bf16.msra.mxu0 %v8573_v10  ;;  %6422 = vmatpush3.bf16.msra.mxu1 %v8573_v10 }
 0x486   : > { %6404 = vmatmul.mubr.bf16.vlgmr.msra.gmra.mrb[12].mxu0 %v8109_v29  ;;  %6424 = vmatmul.mubr.bf16.vlgmr.msra.gmra.mrb[12].mxu1 %v3904_v43 }
 0x4f9   : > { %v3647_v53 = vpop.f32.mrb[0].mxu0  ;;  %v3688_v1 = vpop.f32.mrb[0].mxu1 }
 0x4fa   : > { %v3955_v4 = vmul.f32 %v4327_v48, %v3647_v53  ;;  %v3966_v22 = vmul.f32 %v4327_v48, %v3688_v1  ;;  %v6285_v11 = vpop.f32.mrb[1].mxu0  ;;  %v6305_v13 = vpop.f32.mrb[1].mxu1 }
 0x4fb   : > { %v3650_v14 = vpop.f32.mrb[2].mxu0  ;;  %v3691_v16 = vpop.f32.mrb[2].mxu1 }
 0x4fc   : > { %v3962_v17 = vadd.f32 %v8702_v54, %v3955_v4  ;;  %v3967_v12 = vadd.f32 %v8702_v54, %v3966_v22  ;;  %v6286_v15 = vpop.f32.mrb[3].mxu0  ;;  %v6306_v19 = vpop.f32.mrb[3].mxu1 }
 0x4fe   : > { %v3963_v20 = vmax.f32 %v3962_v17, 0.0  ;;  %v3968_v21 = vmax.f32 %v3967_v12, 0.0 }
 0x500   : > { %v3964_v23 = vpack.c.bf16 %v3963_v20, %v3963_v20  ;;  %v3969_v24 = vpack.c.bf16 %v3968_v21, %v3968_v21 }
 0x502   : > { %3965 = vst [vmem:[%s8710_s7] sm:$0xf] %v3964_v23  ;;  %4329 = vst [vmem:[%s8710_s7 + $0x4] sm:$0xf] %v3969_v24 }
 0x519   : > { %v3729_v25 = vpop.f32.mrb[4].mxu0  ;;  %v3770_v26 = vpop.f32.mrb[4].mxu1 }
 0x51a   : > { %v3972_v27 = vmul.f32 %v4327_v48, %v3729_v25  ;;  %v3978_v28 = vmul.f32 %v4327_v48, %v3770_v26  ;;  %v6325_v29 = vpop.f32.mrb[5].mxu0  ;;  %v6345_v30 = vpop.f32.mrb[5].mxu1 }
 0x51b   : > { %v3732_v32 = vpop.f32.mrb[6].mxu0  ;;  %v3773_v34 = vpop.f32.mrb[6].mxu1 }
 0x51c   : > { %v3973_v36 = vadd.f32 %v8702_v54, %v3972_v27  ;;  %v3979_v7 = vadd.f32 %v8702_v54, %v3978_v28  ;;  %v6326_v9 = vpop.f32.mrb[7].mxu0  ;;  %v6346_v37 = vpop.f32.mrb[7].mxu1 }
 0x51e   : > { %v3974_v38 = vmax.f32 %v3973_v36, 0.0  ;;  %v3980_v33 = vmax.f32 %v3979_v7, 0.0 }
 0x520   : > { %v3975_v35 = vpack.c.bf16 %v3974_v38, %v3974_v38  ;;  %v3981_v41 = vpack.c.bf16 %v3980_v33, %v3980_v33 }
 0x522   : > { %4330 = vst [vmem:[%s8710_s7 + $0x8] sm:$0xf] %v3975_v35  ;;  %4331 = vst [vmem:[%s8710_s7 + $0xc] sm:$0xf] %v3981_v41 }
 0x539   : > { %v3811_v42 = vpop.f32.mrb[8].mxu0  ;;  %v3852_v49 = vpop.f32.mrb[8].mxu1 }
 0x53a   : > { %v3984_v50 = vmul.f32 %v4327_v48, %v3811_v42  ;;  %v3990_v51 = vmul.f32 %v4327_v48, %v3852_v49  ;;  %v6365_v52 = vpop.f32.mrb[9].mxu0  ;;  %v6385_v55 = vpop.f32.mrb[9].mxu1 }
 0x53b   : > { %v3814_v56 = vpop.f32.mrb[10].mxu0  ;;  %v3855_v57 = vpop.f32.mrb[10].mxu1 }
 0x53c   : > { %v3985_v58 = vadd.f32 %v8702_v54, %v3984_v50  ;;  %v3991_v59 = vadd.f32 %v8702_v54, %v3990_v51  ;;  %v6366_v0 = vpop.f32.mrb[11].mxu0  ;;  %v6386_v6 = vpop.f32.mrb[11].mxu1 }
 0x53e   : > { %v3986_v44 = vmax.f32 %v3985_v58, 0.0  ;;  %v3992_v45 = vmax.f32 %v3991_v59, 0.0 }
 0x540   : > { %v3987_v60 = vpack.c.bf16 %v3986_v44, %v3986_v44  ;;  %v3993_v61 = vpack.c.bf16 %v3992_v45, %v3992_v45 }
 0x542   : > { %4332 = vst [vmem:[%s8710_s7 + $0x10] sm:$0xf] %v3987_v60  ;;  %4333 = vst [vmem:[%s8710_s7 + $0x14] sm:$0xf] %v3993_v61 }
 0x559   : > { %v3893_v5 = vpop.f32.mrb[12].mxu0  ;;  %v3940_v18 = vpop.f32.mrb[12].mxu1 }
 0x55a   : > { %v3996_v2 = vmul.f32 %v4327_v48, %v3893_v5  ;;  %v4002_v31 = vmul.f32 %v4327_v48, %v3940_v18  ;;  %v6405_v46 = vpop.f32.mrb[13].mxu0  ;;  %v6425_v47 = vpop.f32.mrb[13].mxu1 }
 0x55b   : > { %v3896_v62 = vpop.f32.mrb[14].mxu0  ;;  %v3943_v63 = vpop.f32.mrb[14].mxu1 }
 0x55c   : > { %v3997_v8 = vadd.f32 %v8702_v54, %v3996_v2  ;;  %v4003_v3 = vadd.f32 %v8702_v54, %v4002_v31  ;;  %v6406_v10 = vpop.f32.mrb[15].mxu0  ;;  %v6426_v39 = vpop.f32.mrb[15].mxu1 }
 0x55e   : > { %v3998_v40 = vmax.f32 %v3997_v8, 0.0  ;;  %v4004_v43 = vmax.f32 %v4003_v3, 0.0 }
 0x560   : > { %v3999_v53 = vpack.c.bf16 %v3998_v40, %v3998_v40  ;;  %v4005_v1 = vpack.c.bf16 %v4004_v43, %v4004_v43 }
 0x562   : > { %4334 = vst [vmem:[%s8710_s7 + $0x18] sm:$0xf] %v3999_v53  ;;  %4335 = vst [vmem:[%s8710_s7 + $0x1c] sm:$0xf] %v4005_v1 }
 0x563 PF: > { %s14_s15 = sadd.s32 1, %s6798_s15  }
 0x564   : > { %p11_p4 = scmp.ge.s32.totalorder %s14_s15, 4  }
 0x566   :  { %13 = sbr.rel (!%p11_p4) target bundleno = 1 (0x1), region = 90 }

// kernel: _lambda_.22
= control target key start
LH: loop header
LB: loop body
LE: loop exit
PB: predicated region body
PF: predicated region fallthrough
CT: control target
= control target key end

     0   :  { %s335_s1 = inlined_call_operand.vmem [shape: bf16[128,128], index: 1, kind: input, shape index: {}]   ;;  %s336_s0 = inlined_call_operand.vmem [shape: bf16[32,128], index: 0, kind: input, shape index: {}]   ;;  %s337_s2 = inlined_call_operand.vmem [shape: f32[1,128], index: 2, kind: input, shape index: {}]   ;;  %s338_s3 = inlined_call_operand.vmem [shape: f32[1,128], index: 3, kind: input, shape index: {}]   ;;  %s339_s4 = inlined_call_operand.vmem [shape: bf16[32,128], index: 4, kind: output, shape index: {}]  }
   0x1   :  { %v258_v0 = vld [vmem:[%s335_s1] sm:$0xff]   ;;  %v259_v1 = vld [vmem:[%s335_s1 + $0x8] sm:$0xff]   ;;  %v260_v2 = vld [vmem:[%s335_s1 + $0x10] sm:$0xff]  }
   0x2   :  { %238 = vmatprep.subr.bf16.mxu0 %v258_v0  ;;  %v261_v3 = vld [vmem:[%s335_s1 + $0x18] sm:$0xff]   ;;  %v266_v4 = vld [vmem:[%s336_s0] sm:$0xff]   ;;  %v263_v6 = vld [vmem:[%s335_s1 + $0x28] sm:$0xff]  }
   0x3   :  { %239 = vmatpush3.bf16.msra.mxu0 %v258_v0  ;;  %254 = vmatprep.mubr.bf16.mxu0 %v266_v4  ;;  %v262_v5 = vld [vmem:[%s335_s1 + $0x20] sm:$0xff]   ;;  %v264_v7 = vld [vmem:[%s335_s1 + $0x30] sm:$0xff]   ;;  %v265_v8 = vld [vmem:[%s335_s1 + $0x38] sm:$0xff]  }
   0x4   :  { %240 = vmatprep.subr.bf16.mxu0 %v259_v1  ;;  %v267_v9 = vld [vmem:[%s336_s0 + $0x8] sm:$0xff]   ;;  %v207_v10 = vld [vmem:[%s337_s2] ss:$0 sm:$0xff] }
   0x5   :  { %v208_v12 = vld [vmem:[%s338_s3] ss:$0 sm:$0xff] }
   0x7   :  { %241 = vmatpush3.bf16.msra.mxu0 %v259_v1 }
   0x8   :  { %242 = vmatprep.subr.bf16.mxu0 %v260_v2 }
   0xb   :  { %243 = vmatpush3.bf16.msra.mxu0 %v260_v2 }
   0xc   :  { %244 = vmatprep.subr.bf16.mxu0 %v261_v3 }
   0xf   :  { %245 = vmatpush3.bf16.msra.mxu0 %v261_v3 }
  0x10   :  { %246 = vmatprep.subr.bf16.mxu0 %v262_v5 }
  0x13   :  { %247 = vmatpush3.bf16.msra.mxu0 %v262_v5 }
  0x14   :  { %248 = vmatprep.subr.bf16.mxu0 %v263_v6 }
  0x17   :  { %249 = vmatpush3.bf16.msra.mxu0 %v263_v6 }
  0x18   :  { %250 = vmatprep.subr.bf16.mxu0 %v264_v7 }
  0x1b   :  { %251 = vmatpush3.bf16.msra.mxu0 %v264_v7 }
  0x1c   :  { %252 = vmatprep.subr.bf16.mxu0 %v265_v8 }
  0x1f   :  { %253 = vmatpush3.bf16.msra.mxu0 %v265_v8 }
  0x22   :  { %255 = vmatmul.mubr.bf16.vlgmr.msra.gmra.mrb[0].mxu0 %v267_v9 }
  0xf5   :  { %v256_v11 = vpop.f32.mrb[0].mxu0 }
  0xf6   :  { %v156_v13 = vmul.f32 %v256_v11, %v207_v10  ;;  %v132_v14 = vpop.f32.mrb[1].mxu0 }
  0xf7   :  { %v154_v15 = vmul.f32 %v207_v10, %v132_v14  ;;  %v257_v16 = vpop.f32.mrb[2].mxu0 }
  0xf8   :  { %v167_v17 = vadd.f32 %v208_v12, %v156_v13  ;;  %v157_v18 = vmul.f32 %v257_v16, %v207_v10  ;;  %v135_v19 = vpop.f32.mrb[3].mxu0 }
  0xf9   :  { %v165_v20 = vadd.f32 %v208_v12, %v154_v15  ;;  %v155_v21 = vmul.f32 %v207_v10, %v135_v19 }
  0xfa   :  { %v168_v22 = vadd.f32 %v208_v12, %v157_v18  ;;  %v171_v24 = vmax.f32 %v167_v17, 0.0 }
  0xfb   :  { %v166_v23 = vadd.f32 %v208_v12, %v155_v21  ;;  %v169_v26 = vmax.f32 %v165_v20, 0.0 }
  0xfc   :  { %v172_v25 = vmax.f32 %v168_v22, 0.0 }
  0xfd   :  { %v170_v27 = vmax.f32 %v166_v23, 0.0 }
  0xfe   :  { %v225_v28 = vpack.c.bf16 %v172_v25, %v171_v24 }
  0xff   :  { %v220_v29 = vpack.c.bf16 %v170_v27, %v169_v26 }
 0x100   :  { %227 = vst [vmem:[%s339_s4 + $0x8] sm:$0xff] %v225_v28  }
 0x101   :  { %221 = vst [vmem:[%s339_s4] sm:$0xff] %v220_v29  }

// kernel: _lambda_.20
= control target key start
LH: loop header
LB: loop body
LE: loop exit
PB: predicated region body
PF: predicated region fallthrough
CT: control target
= control target key end

     0   :  { %s4226_s24 = smov 0   ;;  %s5006_s0 = inlined_call_operand.vmem [shape: bf16[2,5,5,128], index: 0, kind: input, shape index: {}]   ;;  %s5007_s1 = inlined_call_operand.vmem [shape: bf16[2,5,5,128], index: 1, kind: input, shape index: {}]   ;;  %s5008_s2 = inlined_call_operand.vmem [shape: bf16[2,5,5,128], index: 2, kind: input, shape index: {}]   ;;  %s5009_s3 = inlined_call_operand.vmem [shape: bf16[2,5,5,128], index: 3, kind: input, shape index: {}]   ;;  %s5010_s4 = inlined_call_operand.vmem [shape: bf16[9,128,128], index: 4, kind: input, shape index: {}]   ;;  %s5011_s5 = inlined_call_operand.vmem [shape: f32[1,128], index: 5, kind: input, shape index: {}]   ;;  %s5012_s6 = inlined_call_operand.vmem [shape: f32[1,128], index: 6, kind: input, shape index: {}]   ;;  %s5013_s7 = inlined_call_operand.vmem [shape: bf16[2,4,4,128], index: 7, kind: output, shape index: {}]  }
   0x1 LB: > { %s2660_s25 = sadd.s32 4294967295, %s4182_s24   ;;  %p2664_p0 = scmp.ge.s32.totalorder %s4182_s24, 1  ;;  %s4182_s24 = sphi %s4226_s24, %s17_s24  }
   0x2   : > { %p267_p1 = scmp.lt.s32.totalorder %s4182_s24, 3 }
   0x4   : > { %p268_p2 = pnand %p2664_p0, %p267_p1 }
   0x5   : > { %v4237_v0 = vld [vmem:[%s5010_s4 + $0x40] sm:$0xff] (!%p268_p2)   ;;  %v4184_v1 = vmov (!%p268_p2), 0.0   ;;  %v4246_v2 = vld [vmem:[%s5010_s4 + $0x48] sm:$0xff] (!%p268_p2)   ;;  %vm4185_vm0 = vmmov (!%p268_p2), 0   ;;  %v4259_v3 = vld [vmem:[%s5010_s4 + $0x50] sm:$0xff] (!%p268_p2)   ;;  %p314_p3 = scmp.lt.s32.totalorder (!%p268_p2), %s2660_s25, 1 }
   0x6   : > { %271 = sbr.rel (%p268_p2) target bundleno = 803 (0x323), region = 48  ;;  %3233 = vmatprep.subr.bf16.mxu0 (!%p268_p2), %v4184_v1  ;;  %3273 = vmatprep.subr.bf16.mxu1 (!%p268_p2), %v4184_v1  ;;  %v4268_v4 = vld [vmem:[%s5010_s4 + $0x58] sm:$0xff] (!%p268_p2)   ;;  %v4277_v5 = vld [vmem:[%s5010_s4 + $0x60] sm:$0xff] (!%p268_p2)   ;;  %v4288_v6 = vld [vmem:[%s5010_s4 + $0x68] sm:$0xff] (!%p268_p2)  }
   0x7   : > { %3234 = vmatpush3.bf16.msra.mxu0 (!%p268_p2), %v4237_v0  ;;  %3274 = vmatpush3.bf16.msra.mxu1 (!%p268_p2), %v4237_v0  ;;  %v4301_v7 = vld [vmem:[%s5010_s4 + $0x70] sm:$0xff] (!%p268_p2)   ;;  %v4311_v8 = vld [vmem:[%s5010_s4 + $0x78] sm:$0xff] (!%p268_p2)   ;;  %v4332_v9 = vld [vmem:[%s5010_s4] sm:$0xff] (!%p268_p2)  }
   0x8   : > { %3235 = vmatprep.subr.bf16.mxu0 (!%p268_p2), %v4184_v1  ;;  %3275 = vmatprep.subr.bf16.mxu1 (!%p268_p2), %v4184_v1  ;;  %v4343_v12 = vld [vmem:[%s5010_s4 + $0x8] sm:$0xff] (!%p268_p2)   ;;  %v4352_v13 = vld [vmem:[%s5010_s4 + $0x10] sm:$0xff] (!%p268_p2)   ;;  %v4365_v14 = vld [vmem:[%s5010_s4 + $0x18] sm:$0xff] (!%p268_p2)  }
   0x9   : > { %3249 = vmatprep.mubr.msk.bf16.mxu0 (!%p268_p2), %vm4185_vm0, %v4184_v1  ;;  %3289 = vmatprep.mubr.msk.bf16.mxu1 (!%p268_p2), %vm4185_vm0, %v4184_v1  ;;  %v4374_v15 = vld [vmem:[%s5010_s4 + $0x20] sm:$0xff] (!%p268_p2)   ;;  %v4383_v16 = vld [vmem:[%s5010_s4 + $0x28] sm:$0xff] (!%p268_p2)   ;;  %v4392_v17 = vld [vmem:[%s5010_s4 + $0x30] sm:$0xff] (!%p268_p2)  }
   0xa   : > { %v4403_v18 = vld [vmem:[%s5010_s4 + $0x38] sm:$0xff] (!%p268_p2)   ;;  %v4108_v25 = vld [vmem:[%s5010_s4 + $0x80] sm:$0xff] (!%p268_p2)   ;;  %v4109_v26 = vld [vmem:[%s5010_s4 + $0x88] sm:$0xff] (!%p268_p2)  }
   0xb   : > { %3236 = vmatpush3.bf16.msra.mxu0 (!%p268_p2), %v4246_v2  ;;  %3276 = vmatpush3.bf16.msra.mxu1 (!%p268_p2), %v4246_v2  ;;  %v4110_v27 = vld [vmem:[%s5010_s4 + $0x90] sm:$0xff] (!%p268_p2)   ;;  %v4111_v28 = vld [vmem:[%s5010_s4 + $0x98] sm:$0xff] (!%p268_p2)   ;;  %v4112_v29 = vld [vmem:[%s5010_s4 + $0xa0] sm:$0xff] (!%p268_p2)  }
   0xc   : > { %3237 = vmatprep.subr.bf16.mxu0 (!%p268_p2), %v4184_v1  ;;  %3277 = vmatprep.subr.bf16.mxu1 (!%p268_p2), %v4184_v1  ;;  %v4113_v32 = vld [vmem:[%s5010_s4 + $0xa8] sm:$0xff] (!%p268_p2)   ;;  %v4114_v35 = vld [vmem:[%s5010_s4 + $0xb0] sm:$0xff] (!%p268_p2)   ;;  %v4115_v40 = vld [vmem:[%s5010_s4 + $0xb8] sm:$0xff] (!%p268_p2)  }
   0xd   : > { %s5015_s25 = smov (!%p314_p3, %s2660_s25), 1  ;;  %v4120_v53 = vld [vmem:[%s5010_s4 + $0xc0] sm:$0xff]   ;;  %v4121_v54 = vld [vmem:[%s5010_s4 + $0xc8] sm:$0xff]   ;;  %v4122_v55 = vld [vmem:[%s5010_s4 + $0xd0] sm:$0xff]  }
   0xe   : > { %s4306_s17 = smul.u32 20, %s5015_s25  ;;  %v4123_v56 = vld [vmem:[%s5010_s4 + $0xd8] sm:$0xff]   ;;  %v4124_v57 = vld [vmem:[%s5010_s4 + $0xe0] sm:$0xff]   ;;  %v4125_v58 = vld [vmem:[%s5010_s4 + $0xe8] sm:$0xff]   ;;  %s2908_s14 = sshll.u32 %s5015_s25, 3 }
   0xf   : > { %3238 = vmatpush3.bf16.msra.mxu0 %v4259_v3  ;;  %3278 = vmatpush3.bf16.msra.mxu1 %v4259_v3  ;;  %v4126_v59 = vld [vmem:[%s5010_s4 + $0xf0] sm:$0xff]   ;;  %v4127_v60 = vld [vmem:[%s5010_s4 + $0xf8] sm:$0xff]   ;;  %s338_s18 = scalar_lea.vmem %s5013_s7, %s2908_s14 }
  0x10   : > { %3239 = vmatprep.subr.bf16.mxu0 %v4184_v1  ;;  %3279 = vmatprep.subr.bf16.mxu1 %v4184_v1  ;;  %s4317_s22 = scalar_lea.vmem %s5006_s0, %s4306_s17  ;;  %s4327_s27 = scalar_lea.vmem %s5007_s1, %s4306_s17 }
  0x11   : > { %v380_v10 = vld [vmem:[%s4327_s27] sm:$0x3]  ;;  %v2706_v11 = vld [vmem:[%s4327_s27 + $0x4] sm:$0x3]  ;;  %v2707_v21 = vld [vmem:[%s4327_s27 + $0x8] sm:$0x3]  ;;  %s4458_s28 = scalar_lea.vmem %s5008_s2, %s4306_s17  ;;  %s4695_s26 = scalar_lea.vmem %s5009_s3, %s4306_s17 }
  0x12   : > { %v356_v19 = vld [vmem:[%s4317_s22] sm:$0x3]  ;;  %v4411_v20 = vld [vmem:[%s4317_s22 + $0x4] sm:$0x3]  ;;  %v2708_v22 = vld [vmem:[%s4327_s27 + $0xc] sm:$0x3] }
  0x13   : > { %3240 = vmatpush3.bf16.msra.mxu0 %v4268_v4  ;;  %3280 = vmatpush3.bf16.msra.mxu1 %v4268_v4  ;;  %v4495_v23 = vld [vmem:[%s4317_s22 + $0x8] sm:$0x3]  ;;  %v4498_v24 = vld [vmem:[%s4317_s22 + $0xc] sm:$0x3]  ;;  %v1097_v61 = vld [vmem:[%s4458_s28] sm:$0x3] }
  0x14   : > { %3241 = vmatprep.subr.bf16.mxu0 %v4184_v1  ;;  %3281 = vmatprep.subr.bf16.mxu1 %v4184_v1  ;;  %v4116_v30 = vld [vmem:[%s4317_s22] ss:$0 sps:$4 sm:$0x77]   ;;  %v4117_v31 = vld [vmem:[%s4317_s22 + $0x4] ss:$0 sps:$4 sm:$0x77]  }
  0x15   : > { %v827_v33 = vshll.u32 %v4116_v30, 16  ;;  %v928_v34 = vshll.u32 %v4117_v31, 16  ;;  %v825_v36 = vshrl.u32 %v4116_v30, 16  ;;  %v926_v38 = vshrl.u32 %v4117_v31, 16  ;;  %v2764_v62 = vld [vmem:[%s4458_s28 + $0x4] sm:$0x3] }
  0x16   : > { %v4118_v43 = vld [vmem:[%s4317_s22 + $0x8] ss:$0 sps:$4 sm:$0x77]   ;;  %v4119_v44 = vld [vmem:[%s4317_s22 + $0xc] ss:$0 sps:$4 sm:$0x77]  }
  0x17   : > { %3242 = vmatpush3.bf16.msra.mxu0 %v4277_v5  ;;  %3282 = vmatpush3.bf16.msra.mxu1 %v4277_v5  ;;  %v829_v37 = vrot.slane %v827_v33, 1  ;;  %v930_v39 = vrot.slane %v928_v34, 1  ;;  %v981_v45 = vshll.u32 %v4118_v43, 16  ;;  %v1034_v46 = vshll.u32 %v4119_v44, 16  ;;  %v2765_v63 = vld [vmem:[%s4458_s28 + $0x8] sm:$0x3] }
  0x18   : > { %3243 = vmatprep.subr.bf16.mxu0 %v4184_v1  ;;  %3283 = vmatprep.subr.bf16.mxu1 %v4184_v1  ;;  %v979_v47 = vshrl.u32 %v4118_v43, 16  ;;  %v1032_v49 = vshrl.u32 %v4119_v44, 16 }
  0x19   : > { %v830_v41 = vor.u32 %v829_v37, %v825_v36  ;;  %v4548_v42 = vor.u32 %v930_v39, %v926_v38  ;;  %v983_v48 = vrot.slane %v981_v45, 1  ;;  %v1036_v50 = vrot.slane %v1034_v46, 1  ;;  %v4147_v36 = vld [vmem:[%s4458_s28 + $0xc] ss:$0 sps:$4 sm:$0x77]   ;;  %v4148_v46 = vld [vmem:[%s5010_s4 + $0x180] sm:$0xff]  }
  0x1a   : > { %v1783_v38 = vshll.u32 %v4147_v36, 16 }
  0x1b   : > { %3244 = vmatpush3.bf16.msra.mxu0 %v4288_v6  ;;  %3284 = vmatpush3.bf16.msra.mxu1 %v4288_v6  ;;  %v4573_v51 = vor.u32 %v983_v48, %v979_v47  ;;  %v4575_v52 = vor.u32 %v1036_v50, %v1032_v49  ;;  %v4149_v47 = vld [vmem:[%s5010_s4 + $0x188] sm:$0xff]   ;;  %v4150_v48 = vld [vmem:[%s5010_s4 + $0x190] sm:$0xff]   ;;  %v4151_v49 = vld [vmem:[%s5010_s4 + $0x198] sm:$0xff]  }
  0x1c   : > { %3245 = vmatprep.subr.bf16.mxu0 %v4184_v1  ;;  %3285 = vmatprep.subr.bf16.mxu1 %v4184_v1  ;;  %v1785_v43 = vrot.slane %v1783_v38, 1  ;;  %v4152_v50 = vld [vmem:[%s5010_s4 + $0x1a0] sm:$0xff]  }
  0x1f   : > { %3246 = vmatpush3.bf16.msra.mxu0 %v4301_v7  ;;  %3286 = vmatpush3.bf16.msra.mxu1 %v4301_v7 }
  0x20   : > { %3247 = vmatprep.subr.bf16.mxu0 %v4184_v1  ;;  %3287 = vmatprep.subr.bf16.mxu1 %v4184_v1 }
  0x23   : > { %3248 = vmatpush3.bf16.msra.mxu0 %v4311_v8  ;;  %3288 = vmatpush3.bf16.msra.mxu1 %v4311_v8 }
  0x24   : > { %3253 = vmatprep.subr.bf16.mxu0 %v4184_v1  ;;  %3293 = vmatprep.subr.bf16.mxu1 %v4184_v1 }
  0x26   : > { %3250 = vmatmul.mubr.bf16.vlgmr.msra.gmra.mrb[0].mxu0 %v380_v10  ;;  %3290 = vmatmul.mubr.bf16.vlgmr.msra.gmra.mrb[0].mxu1 %v2706_v11  ;;  %v1333_v10 = vld [vmem:[%s4695_s26] sm:$0x3]  ;;  %v2791_v11 = vld [vmem:[%s4695_s26 + $0x4] sm:$0x3] }
  0x27   : > { %3254 = vmatpush3.bf16.msra.mxu0 %v4332_v9  ;;  %3294 = vmatpush3.bf16.msra.mxu1 %v4332_v9 }
  0x28   : > { %3255 = vmatprep.subr.bf16.mxu0 %v4184_v1  ;;  %3295 = vmatprep.subr.bf16.mxu1 %v4184_v1 }
  0x29   : > { %3269 = vmatprep.mubr.msk.bf16.mxu0 %vm4185_vm0, %v4184_v1  ;;  %3309 = vmatprep.mubr.msk.bf16.mxu1 %vm4185_vm0, %v4184_v1 }
  0x2b   : > { %3256 = vmatpush3.bf16.msra.mxu0 %v4343_v12  ;;  %3296 = vmatpush3.bf16.msra.mxu1 %v4343_v12 }
  0x2c   : > { %3257 = vmatprep.subr.bf16.mxu0 %v4184_v1  ;;  %3297 = vmatprep.subr.bf16.mxu1 %v4184_v1 }
  0x2f   : > { %3258 = vmatpush3.bf16.msra.mxu0 %v4352_v13  ;;  %3298 = vmatpush3.bf16.msra.mxu1 %v4352_v13 }
  0x30   : > { %3259 = vmatprep.subr.bf16.mxu0 %v4184_v1  ;;  %3299 = vmatprep.subr.bf16.mxu1 %v4184_v1 }
  0x33   : > { %3260 = vmatpush3.bf16.msra.mxu0 %v4365_v14  ;;  %3300 = vmatpush3.bf16.msra.mxu1 %v4365_v14 }
  0x34   : > { %3261 = vmatprep.subr.bf16.mxu0 %v4184_v1  ;;  %3301 = vmatprep.subr.bf16.mxu1 %v4184_v1 }
  0x37   : > { %3262 = vmatpush3.bf16.msra.mxu0 %v4374_v15  ;;  %3302 = vmatpush3.bf16.msra.mxu1 %v4374_v15 }
  0x38   : > { %3263 = vmatprep.subr.bf16.mxu0 %v4184_v1  ;;  %3303 = vmatprep.subr.bf16.mxu1 %v4184_v1 }
  0x3b   : > { %3264 = vmatpush3.bf16.msra.mxu0 %v4383_v16  ;;  %3304 = vmatpush3.bf16.msra.mxu1 %v4383_v16 }
  0x3c   : > { %3265 = vmatprep.subr.bf16.mxu0 %v4184_v1  ;;  %3305 = vmatprep.subr.bf16.mxu1 %v4184_v1 }
  0x3f   : > { %3266 = vmatpush3.bf16.msra.mxu0 %v4392_v17  ;;  %3306 = vmatpush3.bf16.msra.mxu1 %v4392_v17 }
  0x40   : > { %3267 = vmatprep.subr.bf16.mxu0 %v4184_v1  ;;  %3307 = vmatprep.subr.bf16.mxu1 %v4184_v1 }
  0x43   : > { %3268 = vmatpush3.bf16.msra.mxu0 %v4403_v18  ;;  %3308 = vmatpush3.bf16.msra.mxu1 %v4403_v18 }
  0x44   : > { %3313 = vmatprep.subr.bf16.mxu0 %v4184_v1  ;;  %3353 = vmatprep.subr.bf16.mxu1 %v4184_v1 }
  0x46   : > { %3270 = vmatmul.mubr.bf16.vlgmr.msra.gmra.mrb[0].mxu0 %v356_v19  ;;  %3310 = vmatmul.mubr.bf16.vlgmr.msra.gmra.mrb[0].mxu1 %v4411_v20  ;;  %v4144_v19 = vld [vmem:[%s4458_s28] ss:$0 sps:$4 sm:$0x77]  }
  0x47   : > { %3314 = vmatpush3.bf16.msra.mxu0 %v4237_v0  ;;  %3354 = vmatpush3.bf16.msra.mxu1 %v4237_v0  ;;  %v2766_v0 = vld [vmem:[%s4458_s28 + $0xc] sm:$0x3] }
  0x48   : > { %3315 = vmatprep.subr.bf16.mxu0 %v4184_v1  ;;  %3355 = vmatprep.subr.bf16.mxu1 %v4184_v1 }
  0x49   : > { %3329 = vmatprep.mubr.msk.bf16.mxu0 %vm4185_vm0, %v4184_v1  ;;  %3369 = vmatprep.mubr.msk.bf16.mxu1 %vm4185_vm0, %v4184_v1 }
  0x4b   : > { %3316 = vmatpush3.bf16.msra.mxu0 %v4246_v2  ;;  %3356 = vmatpush3.bf16.msra.mxu1 %v4246_v2  ;;  %v4128_v2 = vld [vmem:[%s5010_s4 + $0x100] sm:$0xff]  }
  0x4c   : > { %3317 = vmatprep.subr.bf16.mxu0 %v4184_v1  ;;  %3357 = vmatprep.subr.bf16.mxu1 %v4184_v1 }
  0x4f   : > { %3318 = vmatpush3.bf16.msra.mxu0 %v4259_v3  ;;  %3358 = vmatpush3.bf16.msra.mxu1 %v4259_v3  ;;  %v4129_v3 = vld [vmem:[%s5010_s4 + $0x108] sm:$0xff]  }
  0x50   : > { %3319 = vmatprep.subr.bf16.mxu0 %v4184_v1  ;;  %3359 = vmatprep.subr.bf16.mxu1 %v4184_v1 }
  0x53   : > { %3320 = vmatpush3.bf16.msra.mxu0 %v4268_v4  ;;  %3360 = vmatpush3.bf16.msra.mxu1 %v4268_v4  ;;  %v4130_v4 = vld [vmem:[%s5010_s4 + $0x110] sm:$0xff]  }
  0x54   : > { %3321 = vmatprep.subr.bf16.mxu0 %v4184_v1  ;;  %3361 = vmatprep.subr.bf16.mxu1 %v4184_v1 }
  0x57   : > { %3322 = vmatpush3.bf16.msra.mxu0 %v4277_v5  ;;  %3362 = vmatpush3.bf16.msra.mxu1 %v4277_v5  ;;  %v4131_v5 = vld [vmem:[%s5010_s4 + $0x118] sm:$0xff]  }
  0x58   : > { %3323 = vmatprep.subr.bf16.mxu0 %v4184_v1  ;;  %3363 = vmatprep.subr.bf16.mxu1 %v4184_v1 }
  0x5b   : > { %3324 = vmatpush3.bf16.msra.mxu0 %v4288_v6  ;;  %3364 = vmatpush3.bf16.msra.mxu1 %v4288_v6  ;;  %v4132_v6 = vld [vmem:[%s5010_s4 + $0x120] sm:$0xff]  }
  0x5c   : > { %3325 = vmatprep.subr.bf16.mxu0 %v4184_v1  ;;  %3365 = vmatprep.subr.bf16.mxu1 %v4184_v1 }
  0x5f   : > { %3326 = vmatpush3.bf16.msra.mxu0 %v4301_v7  ;;  %3366 = vmatpush3.bf16.msra.mxu1 %v4301_v7  ;;  %v4133_v7 = vld [vmem:[%s5010_s4 + $0x128] sm:$0xff]  }
  0x60   : > { %3327 = vmatprep.subr.bf16.mxu0 %v4184_v1  ;;  %3367 = vmatprep.subr.bf16.mxu1 %v4184_v1 }
  0x63   : > { %3328 = vmatpush3.bf16.msra.mxu0 %v4311_v8  ;;  %3368 = vmatpush3.bf16.msra.mxu1 %v4311_v8  ;;  %v4134_v8 = vld [vmem:[%s5010_s4 + $0x130] sm:$0xff]  }
  0x64   : > { %3333 = vmatprep.subr.bf16.mxu0 %v4184_v1  ;;  %3373 = vmatprep.subr.bf16.mxu1 %v4184_v1 }
  0x66   : > { %3330 = vmatmul.mubr.bf16.vlgmr.msra.gmra.mrb[4].mxu0 %v2707_v21  ;;  %3370 = vmatmul.mubr.bf16.vlgmr.msra.gmra.mrb[4].mxu1 %v2708_v22  ;;  %v4145_v21 = vld [vmem:[%s4458_s28 + $0x4] ss:$0 sps:$4 sm:$0x77]   ;;  %v4141_v22 = vld [vmem:[%s5010_s4 + $0x168] sm:$0xff]  }
  0x67   : > { %3334 = vmatpush3.bf16.msra.mxu0 %v4332_v9  ;;  %3374 = vmatpush3.bf16.msra.mxu1 %v4332_v9  ;;  %v4135_v9 = vld [vmem:[%s5010_s4 + $0x138] sm:$0xff]   ;;  %v1675_v30 = vshrl.u32 %v4145_v21, 16 }
  0x68   : > { %3335 = vmatprep.subr.bf16.mxu0 %v4184_v1  ;;  %3375 = vmatprep.subr.bf16.mxu1 %v4184_v1 }
  0x69   : > { %3349 = vmatprep.mubr.msk.bf16.mxu0 %vm4185_vm0, %v4184_v1  ;;  %3389 = vmatprep.mubr.msk.bf16.mxu1 %vm4185_vm0, %v4184_v1 }
  0x6b   : > { %3336 = vmatpush3.bf16.msra.mxu0 %v4343_v12  ;;  %3376 = vmatpush3.bf16.msra.mxu1 %v4343_v12  ;;  %v2792_v12 = vld [vmem:[%s4695_s26 + $0x8] sm:$0x3] }
  0x6c   : > { %3337 = vmatprep.subr.bf16.mxu0 %v4184_v1  ;;  %3377 = vmatprep.subr.bf16.mxu1 %v4184_v1 }
  0x6f   : > { %3338 = vmatpush3.bf16.msra.mxu0 %v4352_v13  ;;  %3378 = vmatpush3.bf16.msra.mxu1 %v4352_v13  ;;  %v2793_v13 = vld [vmem:[%s4695_s26 + $0xc] sm:$0x3] }
  0x70   : > { %3339 = vmatprep.subr.bf16.mxu0 %v4184_v1  ;;  %3379 = vmatprep.subr.bf16.mxu1 %v4184_v1 }
  0x73   : > { %3340 = vmatpush3.bf16.msra.mxu0 %v4365_v14  ;;  %3380 = vmatpush3.bf16.msra.mxu1 %v4365_v14  ;;  %v4136_v14 = vld [vmem:[%s5010_s4 + $0x140] sm:$0xff]  }
  0x74   : > { %3341 = vmatprep.subr.bf16.mxu0 %v4184_v1  ;;  %3381 = vmatprep.subr.bf16.mxu1 %v4184_v1 }
  0x77   : > { %3342 = vmatpush3.bf16.msra.mxu0 %v4374_v15  ;;  %3382 = vmatpush3.bf16.msra.mxu1 %v4374_v15  ;;  %v4137_v15 = vld [vmem:[%s5010_s4 + $0x148] sm:$0xff]  }
  0x78   : > { %3343 = vmatprep.subr.bf16.mxu0 %v4184_v1  ;;  %3383 = vmatprep.subr.bf16.mxu1 %v4184_v1 }
  0x7b   : > { %3344 = vmatpush3.bf16.msra.mxu0 %v4383_v16  ;;  %3384 = vmatpush3.bf16.msra.mxu1 %v4383_v16  ;;  %v4138_v16 = vld [vmem:[%s5010_s4 + $0x150] sm:$0xff]  }
  0x7c   : > { %3345 = vmatprep.subr.bf16.mxu0 %v4184_v1  ;;  %3385 = vmatprep.subr.bf16.mxu1 %v4184_v1 }
  0x7f   : > { %3346 = vmatpush3.bf16.msra.mxu0 %v4392_v17  ;;  %3386 = vmatpush3.bf16.msra.mxu1 %v4392_v17  ;;  %v4139_v17 = vld [vmem:[%s5010_s4 + $0x158] sm:$0xff]  }
  0x80   : > { %3347 = vmatprep.subr.bf16.mxu0 %v4184_v1  ;;  %3387 = vmatprep.subr.bf16.mxu1 %v4184_v1 }
  0x83   : > { %3348 = vmatpush3.bf16.msra.mxu0 %v4403_v18  ;;  %3388 = vmatpush3.bf16.msra.mxu1 %v4403_v18  ;;  %v4140_v18 = vld [vmem:[%s5010_s4 + $0x160] sm:$0xff]  }
  0x84   : > { %3393 = vmatprep.subr.bf16.mxu0 %v4184_v1  ;;  %3413 = vmatprep.subr.bf16.mxu1 %v4184_v1 }
  0x86   : > { %3350 = vmatmul.mubr.bf16.vlgmr.msra.gmra.mrb[4].mxu0 %v4495_v23  ;;  %3390 = vmatmul.mubr.bf16.vlgmr.msra.gmra.mrb[4].mxu1 %v4498_v24 }
  0x87   : > { %3394 = vmatpush3.bf16.msra.mxu0 %v4108_v25  ;;  %3414 = vmatpush3.bf16.msra.mxu1 %v4108_v25 }
  0x88   : > { %3395 = vmatprep.subr.bf16.mxu0 %v4184_v1  ;;  %3415 = vmatprep.subr.bf16.mxu1 %v4184_v1 }
  0x89   : > { %3409 = vmatprep.mubr.msk.bf16.mxu0 %vm4185_vm0, %v4184_v1  ;;  %3429 = vmatprep.mubr.msk.bf16.mxu1 %vm4185_vm0, %v4184_v1 }
  0x8b   : > { %3396 = vmatpush3.bf16.msra.mxu0 %v4109_v26  ;;  %3416 = vmatpush3.bf16.msra.mxu1 %v4109_v26 }
  0x8c   : > { %3397 = vmatprep.subr.bf16.mxu0 %v4184_v1  ;;  %3417 = vmatprep.subr.bf16.mxu1 %v4184_v1 }
  0x8f   : > { %3398 = vmatpush3.bf16.msra.mxu0 %v4110_v27  ;;  %3418 = vmatpush3.bf16.msra.mxu1 %v4110_v27 }
  0x90   : > { %3399 = vmatprep.subr.bf16.mxu0 %v4184_v1  ;;  %3419 = vmatprep.subr.bf16.mxu1 %v4184_v1 }
  0x93   : > { %3400 = vmatpush3.bf16.msra.mxu0 %v4111_v28  ;;  %3420 = vmatpush3.bf16.msra.mxu1 %v4111_v28 }
  0x94   : > { %3401 = vmatprep.subr.bf16.mxu0 %v4184_v1  ;;  %3421 = vmatprep.subr.bf16.mxu1 %v4184_v1 }
  0x97   : > { %3402 = vmatpush3.bf16.msra.mxu0 %v4112_v29  ;;  %3422 = vmatpush3.bf16.msra.mxu1 %v4112_v29 }
  0x98   : > { %3403 = vmatprep.subr.bf16.mxu0 %v4184_v1  ;;  %3423 = vmatprep.subr.bf16.mxu1 %v4184_v1 }
  0x9b   : > { %3404 = vmatpush3.bf16.msra.mxu0 %v4113_v32  ;;  %3424 = vmatpush3.bf16.msra.mxu1 %v4113_v32 }
  0x9c   : > { %3405 = vmatprep.subr.bf16.mxu0 %v4184_v1  ;;  %3425 = vmatprep.subr.bf16.mxu1 %v4184_v1 }
  0x9f   : > { %3406 = vmatpush3.bf16.msra.mxu0 %v4114_v35  ;;  %3426 = vmatpush3.bf16.msra.mxu1 %v4114_v35 }
  0xa0   : > { %3407 = vmatprep.subr.bf16.mxu0 %v4184_v1  ;;  %3427 = vmatprep.subr.bf16.mxu1 %v4184_v1 }
  0xa3   : > { %3408 = vmatpush3.bf16.msra.mxu0 %v4115_v40  ;;  %3428 = vmatpush3.bf16.msra.mxu1 %v4115_v40 }
  0xa4   : > { %3433 = vmatprep.subr.bf16.mxu0 %v4184_v1  ;;  %3453 = vmatprep.subr.bf16.mxu1 %v4184_v1 }
  0xa6   : > { %3410 = vmatmul.mubr.bf16.vlgmr.msra.gmra.mrb[0].mxu0 %v830_v41  ;;  %3430 = vmatmul.mubr.bf16.vlgmr.msra.gmra.mrb[0].mxu1 %v4548_v42  ;;  %v1781_v41 = vshrl.u32 %v4147_v36, 16 }
  0xa7   : > { %3434 = vmatpush3.bf16.msra.mxu0 %v4108_v25  ;;  %3454 = vmatpush3.bf16.msra.mxu1 %v4108_v25  ;;  %v1576_v25 = vshll.u32 %v4144_v19, 16 }
  0xa8   : > { %3435 = vmatprep.subr.bf16.mxu0 %v4184_v1  ;;  %3455 = vmatprep.subr.bf16.mxu1 %v4184_v1  ;;  %v1786_v45 = vor.u32 %v1785_v43, %v1781_v41 }
  0xa9   : > { %3449 = vmatprep.mubr.msk.bf16.mxu0 %vm4185_vm0, %v4184_v1  ;;  %3469 = vmatprep.mubr.msk.bf16.mxu1 %vm4185_vm0, %v4184_v1 }
  0xab   : > { %3436 = vmatpush3.bf16.msra.mxu0 %v4109_v26  ;;  %3456 = vmatpush3.bf16.msra.mxu1 %v4109_v26  ;;  %v1677_v26 = vshll.u32 %v4145_v21, 16 }
  0xac   : > { %3437 = vmatprep.subr.bf16.mxu0 %v4184_v1  ;;  %3457 = vmatprep.subr.bf16.mxu1 %v4184_v1 }
  0xad   : > { %v1679_v31 = vrot.slane %v1677_v26, 1 }
  0xaf   : > { %3438 = vmatpush3.bf16.msra.mxu0 %v4110_v27  ;;  %3458 = vmatpush3.bf16.msra.mxu1 %v4110_v27  ;;  %v4142_v27 = vld [vmem:[%s5010_s4 + $0x170] sm:$0xff]   ;;  %v1680_v34 = vor.u32 %v1679_v31, %v1675_v30 }
  0xb0   : > { %3439 = vmatprep.subr.bf16.mxu0 %v4184_v1  ;;  %3459 = vmatprep.subr.bf16.mxu1 %v4184_v1 }
  0xb3   : > { %3440 = vmatpush3.bf16.msra.mxu0 %v4111_v28  ;;  %3460 = vmatpush3.bf16.msra.mxu1 %v4111_v28  ;;  %v1574_v28 = vshrl.u32 %v4144_v19, 16 }
  0xb4   : > { %3441 = vmatprep.subr.bf16.mxu0 %v4184_v1  ;;  %3461 = vmatprep.subr.bf16.mxu1 %v4184_v1 }
  0xb7   : > { %3442 = vmatpush3.bf16.msra.mxu0 %v4112_v29  ;;  %3462 = vmatpush3.bf16.msra.mxu1 %v4112_v29  ;;  %v1578_v29 = vrot.slane %v1576_v25, 1 }
  0xb8   : > { %3443 = vmatprep.subr.bf16.mxu0 %v4184_v1  ;;  %3463 = vmatprep.subr.bf16.mxu1 %v4184_v1 }
  0xb9   : > { %v1579_v33 = vor.u32 %v1578_v29, %v1574_v28 }
  0xbb   : > { %3444 = vmatpush3.bf16.msra.mxu0 %v4113_v32  ;;  %3464 = vmatpush3.bf16.msra.mxu1 %v4113_v32  ;;  %v4143_v32 = vld [vmem:[%s5010_s4 + $0x178] sm:$0xff]  }
  0xbc   : > { %3445 = vmatprep.subr.bf16.mxu0 %v4184_v1  ;;  %3465 = vmatprep.subr.bf16.mxu1 %v4184_v1 }
  0xbf   : > { %3446 = vmatpush3.bf16.msra.mxu0 %v4114_v35  ;;  %3466 = vmatpush3.bf16.msra.mxu1 %v4114_v35  ;;  %v4146_v35 = vld [vmem:[%s4458_s28 + $0x8] ss:$0 sps:$4 sm:$0x77]  }
  0xc0   : > { %3447 = vmatprep.subr.bf16.mxu0 %v4184_v1  ;;  %3467 = vmatprep.subr.bf16.mxu1 %v4184_v1  ;;  %v1730_v37 = vshll.u32 %v4146_v35, 16  ;;  %v1728_v39 = vshrl.u32 %v4146_v35, 16 }
  0xc3   : > { %3448 = vmatpush3.bf16.msra.mxu0 %v4115_v40  ;;  %3468 = vmatpush3.bf16.msra.mxu1 %v4115_v40  ;;  %v1732_v40 = vrot.slane %v1730_v37, 1 }
  0xc4   : > { %3473 = vmatprep.subr.bf16.mxu0 %v4184_v1  ;;  %3493 = vmatprep.subr.bf16.mxu1 %v4184_v1 }
  0xc5   : > { %v1733_v44 = vor.u32 %v1732_v40, %v1728_v39 }
  0xc6   : > { %3450 = vmatmul.mubr.bf16.vlgmr.msra.gmra.mrb[4].mxu0 %v4573_v51  ;;  %3470 = vmatmul.mubr.bf16.vlgmr.msra.gmra.mrb[4].mxu1 %v4575_v52 }
  0xc7   : > { %3474 = vmatpush3.bf16.msra.mxu0 %v4120_v53  ;;  %3494 = vmatpush3.bf16.msra.mxu1 %v4120_v53 }
  0xc8   : > { %3475 = vmatprep.subr.bf16.mxu0 %v4184_v1  ;;  %3495 = vmatprep.subr.bf16.mxu1 %v4184_v1 }
  0xc9   : > { %3489 = vmatprep.mubr.msk.bf16.mxu0 %vm4185_vm0, %v4184_v1  ;;  %3509 = vmatprep.mubr.msk.bf16.mxu1 %vm4185_vm0, %v4184_v1 }
  0xcb   : > { %3476 = vmatpush3.bf16.msra.mxu0 %v4121_v54  ;;  %3496 = vmatpush3.bf16.msra.mxu1 %v4121_v54 }
  0xcc   : > { %3477 = vmatprep.subr.bf16.mxu0 %v4184_v1  ;;  %3497 = vmatprep.subr.bf16.mxu1 %v4184_v1 }
  0xcf   : > { %3478 = vmatpush3.bf16.msra.mxu0 %v4122_v55  ;;  %3498 = vmatpush3.bf16.msra.mxu1 %v4122_v55 }
  0xd0   : > { %3479 = vmatprep.subr.bf16.mxu0 %v4184_v1  ;;  %3499 = vmatprep.subr.bf16.mxu1 %v4184_v1 }
  0xd3   : > { %3480 = vmatpush3.bf16.msra.mxu0 %v4123_v56  ;;  %3500 = vmatpush3.bf16.msra.mxu1 %v4123_v56 }
  0xd4   : > { %3481 = vmatprep.subr.bf16.mxu0 %v4184_v1  ;;  %3501 = vmatprep.subr.bf16.mxu1 %v4184_v1 }
  0xd7   : > { %3482 = vmatpush3.bf16.msra.mxu0 %v4124_v57  ;;  %3502 = vmatpush3.bf16.msra.mxu1 %v4124_v57 }
  0xd8   : > { %3483 = vmatprep.subr.bf16.mxu0 %v4184_v1  ;;  %3503 = vmatprep.subr.bf16.mxu1 %v4184_v1 }
  0xdb   : > { %3484 = vmatpush3.bf16.msra.mxu0 %v4125_v58  ;;  %3504 = vmatpush3.bf16.msra.mxu1 %v4125_v58 }
  0xdc   : > { %3485 = vmatprep.subr.bf16.mxu0 %v4184_v1  ;;  %3505 = vmatprep.subr.bf16.mxu1 %v4184_v1 }
  0xdf   : > { %3486 = vmatpush3.bf16.msra.mxu0 %v4126_v59  ;;  %3506 = vmatpush3.bf16.msra.mxu1 %v4126_v59 }
  0xe0   : > { %3487 = vmatprep.subr.bf16.mxu0 %v4184_v1  ;;  %3507 = vmatprep.subr.bf16.mxu1 %v4184_v1 }
  0xe3   : > { %3488 = vmatpush3.bf16.msra.mxu0 %v4127_v60  ;;  %3508 = vmatpush3.bf16.msra.mxu1 %v4127_v60 }
  0xe4   : > { %3513 = vmatprep.subr.bf16.mxu0 %v4184_v1  ;;  %3533 = vmatprep.subr.bf16.mxu1 %v4184_v1 }
  0xe6   : > { %3490 = vmatmul.mubr.bf16.vlgmr.msra.gmra.mrb[0].mxu0 %v1097_v61  ;;  %3510 = vmatmul.mubr.bf16.vlgmr.msra.gmra.mrb[0].mxu1 %v2764_v62  ;;  %v4163_v61 = vld [vmem:[%s5010_s4 + $0x1f8] sm:$0xff]   ;;  %v4173_v62 = vld [vmem:[%s4327_s27 + $0x4] sm:$0x3] }
  0xe7   : > { %3514 = vmatpush3.bf16.msra.mxu0 %v4120_v53  ;;  %3534 = vmatpush3.bf16.msra.mxu1 %v4120_v53  ;;  %v4153_v53 = vld [vmem:[%s5010_s4 + $0x1a8] sm:$0xff]  }
  0xe8   : > { %3515 = vmatprep.subr.bf16.mxu0 %v4184_v1  ;;  %3535 = vmatprep.subr.bf16.mxu1 %v4184_v1 }
  0xe9   : > { %3529 = vmatprep.mubr.msk.bf16.mxu0 %vm4185_vm0, %v4184_v1  ;;  %3549 = vmatprep.mubr.msk.bf16.mxu1 %vm4185_vm0, %v4184_v1 }
  0xeb   : > { %3516 = vmatpush3.bf16.msra.mxu0 %v4121_v54  ;;  %3536 = vmatpush3.bf16.msra.mxu1 %v4121_v54  ;;  %v4154_v54 = vld [vmem:[%s5010_s4 + $0x1b0] sm:$0xff]  }
  0xec   : > { %3517 = vmatprep.subr.bf16.mxu0 %v4184_v1  ;;  %3537 = vmatprep.subr.bf16.mxu1 %v4184_v1 }
  0xef   : > { %3518 = vmatpush3.bf16.msra.mxu0 %v4122_v55  ;;  %3538 = vmatpush3.bf16.msra.mxu1 %v4122_v55  ;;  %v4155_v55 = vld [vmem:[%s5010_s4 + $0x1b8] sm:$0xff]  }
  0xf0   : > { %3519 = vmatprep.subr.bf16.mxu0 %v4184_v1  ;;  %3539 = vmatprep.subr.bf16.mxu1 %v4184_v1 }
  0xf3   : > { %3520 = vmatpush3.bf16.msra.mxu0 %v4123_v56  ;;  %3540 = vmatpush3.bf16.msra.mxu1 %v4123_v56  ;;  %v4157_v56 = vld [vmem:[%s5010_s4 + $0x1c8] sm:$0xff]  }
  0xf4   : > { %3521 = vmatprep.subr.bf16.mxu0 %v4184_v1  ;;  %3541 = vmatprep.subr.bf16.mxu1 %v4184_v1 }
  0xf7   : > { %3522 = vmatpush3.bf16.msra.mxu0 %v4124_v57  ;;  %3542 = vmatpush3.bf16.msra.mxu1 %v4124_v57  ;;  %v4159_v57 = vld [vmem:[%s5010_s4 + $0x1d8] sm:$0xff]  }
  0xf8   : > { %3523 = vmatprep.subr.bf16.mxu0 %v4184_v1  ;;  %3543 = vmatprep.subr.bf16.mxu1 %v4184_v1 }
  0xfb   : > { %3524 = vmatpush3.bf16.msra.mxu0 %v4125_v58  ;;  %3544 = vmatpush3.bf16.msra.mxu1 %v4125_v58  ;;  %v4160_v58 = vld [vmem:[%s5010_s4 + $0x1e0] sm:$0xff]  }
  0xfc   : > { %3525 = vmatprep.subr.bf16.mxu0 %v4184_v1  ;;  %3545 = vmatprep.subr.bf16.mxu1 %v4184_v1 }
  0xff   : > { %3526 = vmatpush3.bf16.msra.mxu0 %v4126_v59  ;;  %3546 = vmatpush3.bf16.msra.mxu1 %v4126_v59  ;;  %v4161_v59 = vld [vmem:[%s5010_s4 + $0x1e8] sm:$0xff]  }
 0x100   : > { %3527 = vmatprep.subr.bf16.mxu0 %v4184_v1  ;;  %3547 = vmatprep.subr.bf16.mxu1 %v4184_v1 }
 0x103   : > { %3528 = vmatpush3.bf16.msra.mxu0 %v4127_v60  ;;  %3548 = vmatpush3.bf16.msra.mxu1 %v4127_v60  ;;  %v4162_v60 = vld [vmem:[%s5010_s4 + $0x1f0] sm:$0xff]  }
 0x104   : > { %3553 = vmatprep.subr.bf16.mxu0 %v4184_v1  ;;  %3573 = vmatprep.subr.bf16.mxu1 %v4184_v1 }
 0x106   : > { %3530 = vmatmul.mubr.bf16.vlgmr.msra.gmra.mrb[4].mxu0 %v2765_v63  ;;  %3550 = vmatmul.mubr.bf16.vlgmr.msra.gmra.mrb[4].mxu1 %v2766_v0  ;;  %v4174_v63 = vld [vmem:[%s4327_s27 + $0x8] sm:$0x3]  ;;  %v2874_v0 = vld [vmem:[%s4327_s27 + $0x10] sm:$0x3] }
 0x107   : > { %3554 = vmatpush3.bf16.msra.mxu0 %v4128_v2  ;;  %3574 = vmatpush3.bf16.msra.mxu1 %v4128_v2 }
 0x108   : > { %3555 = vmatprep.subr.bf16.mxu0 %v4184_v1  ;;  %3575 = vmatprep.subr.bf16.mxu1 %v4184_v1 }
 0x109   : > { %3569 = vmatprep.mubr.msk.bf16.mxu0 %vm4185_vm0, %v4184_v1  ;;  %3589 = vmatprep.mubr.msk.bf16.mxu1 %vm4185_vm0, %v4184_v1 }
 0x10b   : > { %3556 = vmatpush3.bf16.msra.mxu0 %v4129_v3  ;;  %3576 = vmatpush3.bf16.msra.mxu1 %v4129_v3 }
 0x10c   : > { %3557 = vmatprep.subr.bf16.mxu0 %v4184_v1  ;;  %3577 = vmatprep.subr.bf16.mxu1 %v4184_v1 }
 0x10f   : > { %3558 = vmatpush3.bf16.msra.mxu0 %v4130_v4  ;;  %3578 = vmatpush3.bf16.msra.mxu1 %v4130_v4 }
 0x110   : > { %3559 = vmatprep.subr.bf16.mxu0 %v4184_v1  ;;  %3579 = vmatprep.subr.bf16.mxu1 %v4184_v1 }
 0x113   : > { %3560 = vmatpush3.bf16.msra.mxu0 %v4131_v5  ;;  %3580 = vmatpush3.bf16.msra.mxu1 %v4131_v5 }
 0x114   : > { %3561 = vmatprep.subr.bf16.mxu0 %v4184_v1  ;;  %3581 = vmatprep.subr.bf16.mxu1 %v4184_v1 }
 0x117   : > { %3562 = vmatpush3.bf16.msra.mxu0 %v4132_v6  ;;  %3582 = vmatpush3.bf16.msra.mxu1 %v4132_v6 }
 0x118   : > { %3563 = vmatprep.subr.bf16.mxu0 %v4184_v1  ;;  %3583 = vmatprep.subr.bf16.mxu1 %v4184_v1 }
 0x11b   : > { %3564 = vmatpush3.bf16.msra.mxu0 %v4133_v7  ;;  %3584 = vmatpush3.bf16.msra.mxu1 %v4133_v7 }
 0x11c   : > { %3565 = vmatprep.subr.bf16.mxu0 %v4184_v1  ;;  %3585 = vmatprep.subr.bf16.mxu1 %v4184_v1 }
 0x11f   : > { %3566 = vmatpush3.bf16.msra.mxu0 %v4134_v8  ;;  %3586 = vmatpush3.bf16.msra.mxu1 %v4134_v8 }
 0x120   : > { %3567 = vmatprep.subr.bf16.mxu0 %v4184_v1  ;;  %3587 = vmatprep.subr.bf16.mxu1 %v4184_v1 }
 0x123   : > { %3568 = vmatpush3.bf16.msra.mxu0 %v4135_v9  ;;  %3588 = vmatpush3.bf16.msra.mxu1 %v4135_v9 }
 0x124   : > { %3593 = vmatprep.subr.bf16.mxu0 %v4184_v1  ;;  %3613 = vmatprep.subr.bf16.mxu1 %v4184_v1 }
 0x126   : > { %3570 = vmatmul.mubr.bf16.vlgmr.msra.gmra.mrb[0].mxu0 %v1333_v10  ;;  %3590 = vmatmul.mubr.bf16.vlgmr.msra.gmra.mrb[0].mxu1 %v2791_v11  ;;  %v4171_v10 = vld [vmem:[%s5010_s4 + $0x238] sm:$0xff]  }
 0x127   : > { %3594 = vmatpush3.bf16.msra.mxu0 %v4128_v2  ;;  %3614 = vmatpush3.bf16.msra.mxu1 %v4128_v2  ;;  %v4164_v2 = vld [vmem:[%s5010_s4 + $0x200] sm:$0xff]  }
 0x128   : > { %3595 = vmatprep.subr.bf16.mxu0 %v4184_v1  ;;  %3615 = vmatprep.subr.bf16.mxu1 %v4184_v1 }
 0x129   : > { %3609 = vmatprep.mubr.msk.bf16.mxu0 %vm4185_vm0, %v4184_v1  ;;  %3629 = vmatprep.mubr.msk.bf16.mxu1 %vm4185_vm0, %v4184_v1 }
 0x12b   : > { %3596 = vmatpush3.bf16.msra.mxu0 %v4129_v3  ;;  %3616 = vmatpush3.bf16.msra.mxu1 %v4129_v3  ;;  %v4175_v3 = vld [vmem:[%s4327_s27 + $0xc] sm:$0x3] }
 0x12c   : > { %3597 = vmatprep.subr.bf16.mxu0 %v4184_v1  ;;  %3617 = vmatprep.subr.bf16.mxu1 %v4184_v1 }
 0x12f   : > { %3598 = vmatpush3.bf16.msra.mxu0 %v4130_v4  ;;  %3618 = vmatpush3.bf16.msra.mxu1 %v4130_v4  ;;  %v4165_v4 = vld [vmem:[%s5010_s4 + $0x208] sm:$0xff]  }
 0x130   : > { %3599 = vmatprep.subr.bf16.mxu0 %v4184_v1  ;;  %3619 = vmatprep.subr.bf16.mxu1 %v4184_v1 }
 0x133   : > { %3600 = vmatpush3.bf16.msra.mxu0 %v4131_v5  ;;  %3620 = vmatpush3.bf16.msra.mxu1 %v4131_v5  ;;  %v4166_v5 = vld [vmem:[%s5010_s4 + $0x210] sm:$0xff]  }
 0x134   : > { %3601 = vmatprep.subr.bf16.mxu0 %v4184_v1  ;;  %3621 = vmatprep.subr.bf16.mxu1 %v4184_v1 }
 0x137   : > { %3602 = vmatpush3.bf16.msra.mxu0 %v4132_v6  ;;  %3622 = vmatpush3.bf16.msra.mxu1 %v4132_v6  ;;  %v4167_v6 = vld [vmem:[%s5010_s4 + $0x218] sm:$0xff]  }
 0x138   : > { %3603 = vmatprep.subr.bf16.mxu0 %v4184_v1  ;;  %3623 = vmatprep.subr.bf16.mxu1 %v4184_v1 }
 0x13b   : > { %3604 = vmatpush3.bf16.msra.mxu0 %v4133_v7  ;;  %3624 = vmatpush3.bf16.msra.mxu1 %v4133_v7  ;;  %v4168_v7 = vld [vmem:[%s5010_s4 + $0x220] sm:$0xff]  }
 0x13c   : > { %3605 = vmatprep.subr.bf16.mxu0 %v4184_v1  ;;  %3625 = vmatprep.subr.bf16.mxu1 %v4184_v1 }
 0x13f   : > { %3606 = vmatpush3.bf16.msra.mxu0 %v4134_v8  ;;  %3626 = vmatpush3.bf16.msra.mxu1 %v4134_v8  ;;  %v4169_v8 = vld [vmem:[%s5010_s4 + $0x228] sm:$0xff]  }
 0x140   : > { %3607 = vmatprep.subr.bf16.mxu0 %v4184_v1  ;;  %3627 = vmatprep.subr.bf16.mxu1 %v4184_v1 }
 0x143   : > { %3608 = vmatpush3.bf16.msra.mxu0 %v4135_v9  ;;  %3628 = vmatpush3.bf16.msra.mxu1 %v4135_v9  ;;  %v4170_v9 = vld [vmem:[%s5010_s4 + $0x230] sm:$0xff]  }
 0x144   : > { %3633 = vmatprep.subr.bf16.mxu0 %v4184_v1  ;;  %3653 = vmatprep.subr.bf16.mxu1 %v4184_v1 }
 0x146   : > { %3610 = vmatmul.mubr.bf16.vlgmr.msra.gmra.mrb[4].mxu0 %v2792_v12  ;;  %3630 = vmatmul.mubr.bf16.vlgmr.msra.gmra.mrb[4].mxu1 %v2793_v13 }
 0x147   : > { %3634 = vmatpush3.bf16.msra.mxu0 %v4136_v14  ;;  %3654 = vmatpush3.bf16.msra.mxu1 %v4136_v14 }
 0x148   : > { %3635 = vmatprep.subr.bf16.mxu0 %v4184_v1  ;;  %3655 = vmatprep.subr.bf16.mxu1 %v4184_v1 }
 0x149   : > { %3649 = vmatprep.mubr.msk.bf16.mxu0 %vm4185_vm0, %v4184_v1  ;;  %3669 = vmatprep.mubr.msk.bf16.mxu1 %vm4185_vm0, %v4184_v1 }
 0x14b   : > { %3636 = vmatpush3.bf16.msra.mxu0 %v4137_v15  ;;  %3656 = vmatpush3.bf16.msra.mxu1 %v4137_v15 }
 0x14c   : > { %3637 = vmatprep.subr.bf16.mxu0 %v4184_v1  ;;  %3657 = vmatprep.subr.bf16.mxu1 %v4184_v1 }
 0x14f   : > { %3638 = vmatpush3.bf16.msra.mxu0 %v4138_v16  ;;  %3658 = vmatpush3.bf16.msra.mxu1 %v4138_v16 }
 0x150   : > { %3639 = vmatprep.subr.bf16.mxu0 %v4184_v1  ;;  %3659 = vmatprep.subr.bf16.mxu1 %v4184_v1 }
 0x153   : > { %3640 = vmatpush3.bf16.msra.mxu0 %v4139_v17  ;;  %3660 = vmatpush3.bf16.msra.mxu1 %v4139_v17 }
 0x154   : > { %3641 = vmatprep.subr.bf16.mxu0 %v4184_v1  ;;  %3661 = vmatprep.subr.bf16.mxu1 %v4184_v1 }
 0x157   : > { %3642 = vmatpush3.bf16.msra.mxu0 %v4140_v18  ;;  %3662 = vmatpush3.bf16.msra.mxu1 %v4140_v18 }
 0x158   : > { %3643 = vmatprep.subr.bf16.mxu0 %v4184_v1  ;;  %3663 = vmatprep.subr.bf16.mxu1 %v4184_v1 }
 0x15b   : > { %3644 = vmatpush3.bf16.msra.mxu0 %v4141_v22  ;;  %3664 = vmatpush3.bf16.msra.mxu1 %v4141_v22 }
 0x15c   : > { %3645 = vmatprep.subr.bf16.mxu0 %v4184_v1  ;;  %3665 = vmatprep.subr.bf16.mxu1 %v4184_v1 }
 0x15f   : > { %3646 = vmatpush3.bf16.msra.mxu0 %v4142_v27  ;;  %3666 = vmatpush3.bf16.msra.mxu1 %v4142_v27 }
 0x160   : > { %3647 = vmatprep.subr.bf16.mxu0 %v4184_v1  ;;  %3667 = vmatprep.subr.bf16.mxu1 %v4184_v1 }
 0x163   : > { %3648 = vmatpush3.bf16.msra.mxu0 %v4143_v32  ;;  %3668 = vmatpush3.bf16.msra.mxu1 %v4143_v32 }
 0x164   : > { %3673 = vmatprep.subr.bf16.mxu0 %v4184_v1  ;;  %3693 = vmatprep.subr.bf16.mxu1 %v4184_v1 }
 0x166   : > { %3650 = vmatmul.mubr.bf16.vlgmr.msra.gmra.mrb[0].mxu0 %v1579_v33  ;;  %3670 = vmatmul.mubr.bf16.vlgmr.msra.gmra.mrb[0].mxu1 %v1680_v34 }
 0x167   : > { %3674 = vmatpush3.bf16.msra.mxu0 %v4136_v14  ;;  %3694 = vmatpush3.bf16.msra.mxu1 %v4136_v14  ;;  %v2901_v14 = vld [vmem:[%s5011_s5] ss:$0 sm:$0xff] }
 0x168   : > { %3675 = vmatprep.subr.bf16.mxu0 %v4184_v1  ;;  %3695 = vmatprep.subr.bf16.mxu1 %v4184_v1 }
 0x169   : > { %3689 = vmatprep.mubr.msk.bf16.mxu0 %vm4185_vm0, %v4184_v1  ;;  %3709 = vmatprep.mubr.msk.bf16.mxu1 %vm4185_vm0, %v4184_v1 }
 0x16b   : > { %3676 = vmatpush3.bf16.msra.mxu0 %v4137_v15  ;;  %3696 = vmatpush3.bf16.msra.mxu1 %v4137_v15 }
 0x16c   : > { %3677 = vmatprep.subr.bf16.mxu0 %v4184_v1  ;;  %3697 = vmatprep.subr.bf16.mxu1 %v4184_v1 }
 0x16f   : > { %3678 = vmatpush3.bf16.msra.mxu0 %v4138_v16  ;;  %3698 = vmatpush3.bf16.msra.mxu1 %v4138_v16  ;;  %v2902_v16 = vld [vmem:[%s5012_s6] ss:$0 sm:$0xff] }
 0x170   : > { %3679 = vmatprep.subr.bf16.mxu0 %v4184_v1  ;;  %3699 = vmatprep.subr.bf16.mxu1 %v4184_v1 }
 0x173   : > { %3680 = vmatpush3.bf16.msra.mxu0 %v4139_v17  ;;  %3700 = vmatpush3.bf16.msra.mxu1 %v4139_v17 }
 0x174   : > { %3681 = vmatprep.subr.bf16.mxu0 %v4184_v1  ;;  %3701 = vmatprep.subr.bf16.mxu1 %v4184_v1 }
 0x177   : > { %3682 = vmatpush3.bf16.msra.mxu0 %v4140_v18  ;;  %3702 = vmatpush3.bf16.msra.mxu1 %v4140_v18 }
 0x178   : > { %3683 = vmatprep.subr.bf16.mxu0 %v4184_v1  ;;  %3703 = vmatprep.subr.bf16.mxu1 %v4184_v1 }
 0x17b   : > { %3684 = vmatpush3.bf16.msra.mxu0 %v4141_v22  ;;  %3704 = vmatpush3.bf16.msra.mxu1 %v4141_v22 }
 0x17c   : > { %3685 = vmatprep.subr.bf16.mxu0 %v4184_v1  ;;  %3705 = vmatprep.subr.bf16.mxu1 %v4184_v1 }
 0x17f   : > { %3686 = vmatpush3.bf16.msra.mxu0 %v4142_v27  ;;  %3706 = vmatpush3.bf16.msra.mxu1 %v4142_v27 }
 0x180   : > { %3687 = vmatprep.subr.bf16.mxu0 %v4184_v1  ;;  %3707 = vmatprep.subr.bf16.mxu1 %v4184_v1 }
 0x183   : > { %3688 = vmatpush3.bf16.msra.mxu0 %v4143_v32  ;;  %3708 = vmatpush3.bf16.msra.mxu1 %v4143_v32 }
 0x184   : > { %3713 = vmatprep.subr.bf16.mxu0 %v4184_v1  ;;  %3733 = vmatprep.subr.bf16.mxu1 %v4184_v1 }
 0x186   : > { %3690 = vmatmul.mubr.bf16.vlgmr.msra.gmra.mrb[4].mxu0 %v1733_v44  ;;  %3710 = vmatmul.mubr.bf16.vlgmr.msra.gmra.mrb[4].mxu1 %v1786_v45 }
 0x187   : > { %3714 = vmatpush3.bf16.msra.mxu0 %v4148_v46  ;;  %3734 = vmatpush3.bf16.msra.mxu1 %v4148_v46 }
 0x188   : > { %3715 = vmatprep.subr.bf16.mxu0 %v4184_v1  ;;  %3735 = vmatprep.subr.bf16.mxu1 %v4184_v1 }
 0x189   : > { %3729 = vmatprep.mubr.msk.bf16.mxu0 %vm4185_vm0, %v4184_v1  ;;  %3749 = vmatprep.mubr.msk.bf16.mxu1 %vm4185_vm0, %v4184_v1 }
 0x18b   : > { %3716 = vmatpush3.bf16.msra.mxu0 %v4149_v47  ;;  %3736 = vmatpush3.bf16.msra.mxu1 %v4149_v47 }
 0x18c   : > { %3717 = vmatprep.subr.bf16.mxu0 %v4184_v1  ;;  %3737 = vmatprep.subr.bf16.mxu1 %v4184_v1 }
 0x18f   : > { %3718 = vmatpush3.bf16.msra.mxu0 %v4150_v48  ;;  %3738 = vmatpush3.bf16.msra.mxu1 %v4150_v48 }
 0x190   : > { %3719 = vmatprep.subr.bf16.mxu0 %v4184_v1  ;;  %3739 = vmatprep.subr.bf16.mxu1 %v4184_v1 }
 0x193   : > { %3720 = vmatpush3.bf16.msra.mxu0 %v4151_v49  ;;  %3740 = vmatpush3.bf16.msra.mxu1 %v4151_v49 }
 0x194   : > { %3721 = vmatprep.subr.bf16.mxu0 %v4184_v1  ;;  %3741 = vmatprep.subr.bf16.mxu1 %v4184_v1 }
 0x197   : > { %3722 = vmatpush3.bf16.msra.mxu0 %v4152_v50  ;;  %3742 = vmatpush3.bf16.msra.mxu1 %v4152_v50 }
 0x198   : > { %3723 = vmatprep.subr.bf16.mxu0 %v4184_v1  ;;  %3743 = vmatprep.subr.bf16.mxu1 %v4184_v1 }
 0x19b   : > { %3724 = vmatpush3.bf16.msra.mxu0 %v4153_v53  ;;  %3744 = vmatpush3.bf16.msra.mxu1 %v4153_v53 }
 0x19c   : > { %3725 = vmatprep.subr.bf16.mxu0 %v4184_v1  ;;  %3745 = vmatprep.subr.bf16.mxu1 %v4184_v1 }
 0x19f   : > { %3726 = vmatpush3.bf16.msra.mxu0 %v4154_v54  ;;  %3746 = vmatpush3.bf16.msra.mxu1 %v4154_v54 }
 0x1a0   : > { %3727 = vmatprep.subr.bf16.mxu0 %v4184_v1  ;;  %3747 = vmatprep.subr.bf16.mxu1 %v4184_v1 }
 0x1a3   : > { %3728 = vmatpush3.bf16.msra.mxu0 %v4155_v55  ;;  %3748 = vmatpush3.bf16.msra.mxu1 %v4155_v55 }
 0x1a4   : > { %3753 = vmatprep.subr.bf16.mxu0 %v4184_v1  ;;  %3773 = vmatprep.subr.bf16.mxu1 %v4184_v1 }
 0x1a6   : > { %3730 = vmatmul.mubr.bf16.vlgmr.msra.gmra.mrb[0].mxu0 %v4411_v20  ;;  %3750 = vmatmul.mubr.bf16.vlgmr.msra.gmra.mrb[0].mxu1 %v4495_v23  ;;  %v2849_v20 = vld [vmem:[%s4317_s22 + $0x10] sm:$0x3]  ;;  %v4156_v23 = vld [vmem:[%s5010_s4 + $0x1c0] sm:$0xff]  }
 0x1a7   : > { %3754 = vmatpush3.bf16.msra.mxu0 %v4148_v46  ;;  %3774 = vmatpush3.bf16.msra.mxu1 %v4148_v46 }
 0x1a8   : > { %3755 = vmatprep.subr.bf16.mxu0 %v4184_v1  ;;  %3775 = vmatprep.subr.bf16.mxu1 %v4184_v1 }
 0x1a9   : > { %3769 = vmatprep.mubr.msk.bf16.mxu0 %vm4185_vm0, %v4184_v1  ;;  %3789 = vmatprep.mubr.msk.bf16.mxu1 %vm4185_vm0, %v4184_v1 }
 0x1ab   : > { %3756 = vmatpush3.bf16.msra.mxu0 %v4149_v47  ;;  %3776 = vmatpush3.bf16.msra.mxu1 %v4149_v47 }
 0x1ac   : > { %3757 = vmatprep.subr.bf16.mxu0 %v4184_v1  ;;  %3777 = vmatprep.subr.bf16.mxu1 %v4184_v1 }
 0x1af   : > { %3758 = vmatpush3.bf16.msra.mxu0 %v4150_v48  ;;  %3778 = vmatpush3.bf16.msra.mxu1 %v4150_v48 }
 0x1b0   : > { %3759 = vmatprep.subr.bf16.mxu0 %v4184_v1  ;;  %3779 = vmatprep.subr.bf16.mxu1 %v4184_v1 }
 0x1b3   : > { %3760 = vmatpush3.bf16.msra.mxu0 %v4151_v49  ;;  %3780 = vmatpush3.bf16.msra.mxu1 %v4151_v49 }
 0x1b4   : > { %3761 = vmatprep.subr.bf16.mxu0 %v4184_v1  ;;  %3781 = vmatprep.subr.bf16.mxu1 %v4184_v1 }
 0x1b7   : > { %3762 = vmatpush3.bf16.msra.mxu0 %v4152_v50  ;;  %3782 = vmatpush3.bf16.msra.mxu1 %v4152_v50 }
 0x1b8   : > { %3763 = vmatprep.subr.bf16.mxu0 %v4184_v1  ;;  %3783 = vmatprep.subr.bf16.mxu1 %v4184_v1 }
 0x1bb   : > { %3764 = vmatpush3.bf16.msra.mxu0 %v4153_v53  ;;  %3784 = vmatpush3.bf16.msra.mxu1 %v4153_v53 }
 0x1bc   : > { %3765 = vmatprep.subr.bf16.mxu0 %v4184_v1  ;;  %3785 = vmatprep.subr.bf16.mxu1 %v4184_v1 }
 0x1bf   : > { %3766 = vmatpush3.bf16.msra.mxu0 %v4154_v54  ;;  %3786 = vmatpush3.bf16.msra.mxu1 %v4154_v54 }
 0x1c0   : > { %3767 = vmatprep.subr.bf16.mxu0 %v4184_v1  ;;  %3787 = vmatprep.subr.bf16.mxu1 %v4184_v1 }
 0x1c3   : > { %3768 = vmatpush3.bf16.msra.mxu0 %v4155_v55  ;;  %3788 = vmatpush3.bf16.msra.mxu1 %v4155_v55 }
 0x1c4   : > { %3793 = vmatprep.subr.bf16.mxu0 %v4184_v1  ;;  %3813 = vmatprep.subr.bf16.mxu1 %v4184_v1 }
 0x1c6   : > { %3770 = vmatmul.mubr.bf16.vlgmr.msra.gmra.mrb[4].mxu0 %v4498_v24  ;;  %3790 = vmatmul.mubr.bf16.vlgmr.msra.gmra.mrb[4].mxu1 %v2849_v20  ;;  %v4158_v24 = vld [vmem:[%s5010_s4 + $0x1d0] sm:$0xff]  }
 0x1c7   : > { %3794 = vmatpush3.bf16.msra.mxu0 %v4156_v23  ;;  %3814 = vmatpush3.bf16.msra.mxu1 %v4156_v23 }
 0x1c8   : > { %3795 = vmatprep.subr.bf16.mxu0 %v4184_v1  ;;  %3815 = vmatprep.subr.bf16.mxu1 %v4184_v1 }
 0x1c9   : > { %3809 = vmatprep.mubr.msk.bf16.mxu0 %vm4185_vm0, %v4184_v1  ;;  %3829 = vmatprep.mubr.msk.bf16.mxu1 %vm4185_vm0, %v4184_v1 }
 0x1cb   : > { %3796 = vmatpush3.bf16.msra.mxu0 %v4157_v56  ;;  %3816 = vmatpush3.bf16.msra.mxu1 %v4157_v56 }
 0x1cc   : > { %3797 = vmatprep.subr.bf16.mxu0 %v4184_v1  ;;  %3817 = vmatprep.subr.bf16.mxu1 %v4184_v1 }
 0x1cf   : > { %3798 = vmatpush3.bf16.msra.mxu0 %v4158_v24  ;;  %3818 = vmatpush3.bf16.msra.mxu1 %v4158_v24 }
 0x1d0   : > { %3799 = vmatprep.subr.bf16.mxu0 %v4184_v1  ;;  %3819 = vmatprep.subr.bf16.mxu1 %v4184_v1 }
 0x1d3   : > { %3800 = vmatpush3.bf16.msra.mxu0 %v4159_v57  ;;  %3820 = vmatpush3.bf16.msra.mxu1 %v4159_v57 }
 0x1d4   : > { %3801 = vmatprep.subr.bf16.mxu0 %v4184_v1  ;;  %3821 = vmatprep.subr.bf16.mxu1 %v4184_v1 }
 0x1d7   : > { %3802 = vmatpush3.bf16.msra.mxu0 %v4160_v58  ;;  %3822 = vmatpush3.bf16.msra.mxu1 %v4160_v58 }
 0x1d8   : > { %3803 = vmatprep.subr.bf16.mxu0 %v4184_v1  ;;  %3823 = vmatprep.subr.bf16.mxu1 %v4184_v1 }
 0x1db   : > { %3804 = vmatpush3.bf16.msra.mxu0 %v4161_v59  ;;  %3824 = vmatpush3.bf16.msra.mxu1 %v4161_v59 }
 0x1dc   : > { %3805 = vmatprep.subr.bf16.mxu0 %v4184_v1  ;;  %3825 = vmatprep.subr.bf16.mxu1 %v4184_v1 }
 0x1df   : > { %3806 = vmatpush3.bf16.msra.mxu0 %v4162_v60  ;;  %3826 = vmatpush3.bf16.msra.mxu1 %v4162_v60 }
 0x1e0   : > { %3807 = vmatprep.subr.bf16.mxu0 %v4184_v1  ;;  %3827 = vmatprep.subr.bf16.mxu1 %v4184_v1 }
 0x1e3   : > { %3808 = vmatpush3.bf16.msra.mxu0 %v4163_v61  ;;  %3828 = vmatpush3.bf16.msra.mxu1 %v4163_v61 }
 0x1e4   : > { %3833 = vmatprep.subr.bf16.mxu0 %v4184_v1  ;;  %3853 = vmatprep.subr.bf16.mxu1 %v4184_v1 }
 0x1e6   : > { %3810 = vmatmul.mubr.bf16.vlgmr.msra.gmra.mrb[0].mxu0 %v4173_v62  ;;  %3830 = vmatmul.mubr.bf16.vlgmr.msra.gmra.mrb[0].mxu1 %v4174_v63 }
 0x1e7   : > { %3834 = vmatpush3.bf16.msra.mxu0 %v4156_v23  ;;  %3854 = vmatpush3.bf16.msra.mxu1 %v4156_v23 }
 0x1e8   : > { %3835 = vmatprep.subr.bf16.mxu0 %v4184_v1  ;;  %3855 = vmatprep.subr.bf16.mxu1 %v4184_v1 }
 0x1e9   : > { %3849 = vmatprep.mubr.msk.bf16.mxu0 %vm4185_vm0, %v4184_v1  ;;  %3869 = vmatprep.mubr.msk.bf16.mxu1 %vm4185_vm0, %v4184_v1 }
 0x1eb   : > { %3836 = vmatpush3.bf16.msra.mxu0 %v4157_v56  ;;  %3856 = vmatpush3.bf16.msra.mxu1 %v4157_v56 }
 0x1ec   : > { %3837 = vmatprep.subr.bf16.mxu0 %v4184_v1  ;;  %3857 = vmatprep.subr.bf16.mxu1 %v4184_v1 }
 0x1ef   : > { %3838 = vmatpush3.bf16.msra.mxu0 %v4158_v24  ;;  %3858 = vmatpush3.bf16.msra.mxu1 %v4158_v24 }
 0x1f0   : > { %3839 = vmatprep.subr.bf16.mxu0 %v4184_v1  ;;  %3859 = vmatprep.subr.bf16.mxu1 %v4184_v1 }
 0x1f3   : > { %3840 = vmatpush3.bf16.msra.mxu0 %v4159_v57  ;;  %3860 = vmatpush3.bf16.msra.mxu1 %v4159_v57 }
 0x1f4   : > { %3841 = vmatprep.subr.bf16.mxu0 %v4184_v1  ;;  %3861 = vmatprep.subr.bf16.mxu1 %v4184_v1 }
 0x1f7   : > { %3842 = vmatpush3.bf16.msra.mxu0 %v4160_v58  ;;  %3862 = vmatpush3.bf16.msra.mxu1 %v4160_v58 }
 0x1f8   : > { %3843 = vmatprep.subr.bf16.mxu0 %v4184_v1  ;;  %3863 = vmatprep.subr.bf16.mxu1 %v4184_v1 }
 0x1fb   : > { %3844 = vmatpush3.bf16.msra.mxu0 %v4161_v59  ;;  %3864 = vmatpush3.bf16.msra.mxu1 %v4161_v59 }
 0x1fc   : > { %3845 = vmatprep.subr.bf16.mxu0 %v4184_v1  ;;  %3865 = vmatprep.subr.bf16.mxu1 %v4184_v1 }
 0x1ff   : > { %3846 = vmatpush3.bf16.msra.mxu0 %v4162_v60  ;;  %3866 = vmatpush3.bf16.msra.mxu1 %v4162_v60 }
 0x200   : > { %3847 = vmatprep.subr.bf16.mxu0 %v4184_v1  ;;  %3867 = vmatprep.subr.bf16.mxu1 %v4184_v1 }
 0x203   : > { %3848 = vmatpush3.bf16.msra.mxu0 %v4163_v61  ;;  %3868 = vmatpush3.bf16.msra.mxu1 %v4163_v61 }
 0x204   : > { %3873 = vmatprep.subr.bf16.mxu0 %v4184_v1  ;;  %3893 = vmatprep.subr.bf16.mxu1 %v4184_v1 }
 0x206   : > { %3850 = vmatmul.mubr.bf16.vlgmr.msra.gmra.mrb[4].mxu0 %v4175_v3  ;;  %3870 = vmatmul.mubr.bf16.vlgmr.msra.gmra.mrb[4].mxu1 %v2874_v0 }
 0x207   : > { %3874 = vmatpush3.bf16.msra.mxu0 %v4164_v2  ;;  %3894 = vmatpush3.bf16.msra.mxu1 %v4164_v2 }
 0x208   : > { %3875 = vmatprep.subr.bf16.mxu0 %v4184_v1  ;;  %3895 = vmatprep.subr.bf16.mxu1 %v4184_v1 }
 0x209   : > { %3889 = vmatprep.mubr.msk.bf16.mxu0 %vm4185_vm0, %v4184_v1  ;;  %3909 = vmatprep.mubr.msk.bf16.mxu1 %vm4185_vm0, %v4184_v1 }
 0x20b   : > { %3876 = vmatpush3.bf16.msra.mxu0 %v4165_v4  ;;  %3896 = vmatpush3.bf16.msra.mxu1 %v4165_v4 }
 0x20c   : > { %3877 = vmatprep.subr.bf16.mxu0 %v4184_v1  ;;  %3897 = vmatprep.subr.bf16.mxu1 %v4184_v1 }
 0x20f   : > { %3878 = vmatpush3.bf16.msra.mxu0 %v4166_v5  ;;  %3898 = vmatpush3.bf16.msra.mxu1 %v4166_v5 }
 0x210   : > { %3879 = vmatprep.subr.bf16.mxu0 %v4184_v1  ;;  %3899 = vmatprep.subr.bf16.mxu1 %v4184_v1 }
 0x213   : > { %3880 = vmatpush3.bf16.msra.mxu0 %v4167_v6  ;;  %3900 = vmatpush3.bf16.msra.mxu1 %v4167_v6 }
 0x214   : > { %3881 = vmatprep.subr.bf16.mxu0 %v4184_v1  ;;  %3901 = vmatprep.subr.bf16.mxu1 %v4184_v1 }
 0x217   : > { %3882 = vmatpush3.bf16.msra.mxu0 %v4168_v7  ;;  %3902 = vmatpush3.bf16.msra.mxu1 %v4168_v7 }
 0x218   : > { %3883 = vmatprep.subr.bf16.mxu0 %v4184_v1  ;;  %3903 = vmatprep.subr.bf16.mxu1 %v4184_v1 }
 0x21b   : > { %3884 = vmatpush3.bf16.msra.mxu0 %v4169_v8  ;;  %3904 = vmatpush3.bf16.msra.mxu1 %v4169_v8 }
 0x21c   : > { %3885 = vmatprep.subr.bf16.mxu0 %v4184_v1  ;;  %3905 = vmatprep.subr.bf16.mxu1 %v4184_v1 }
 0x21f   : > { %3886 = vmatpush3.bf16.msra.mxu0 %v4170_v9  ;;  %3906 = vmatpush3.bf16.msra.mxu1 %v4170_v9 }
 0x220   : > { %3887 = vmatprep.subr.bf16.mxu0 %v4184_v1  ;;  %3907 = vmatprep.subr.bf16.mxu1 %v4184_v1 }
 0x223   : > { %3888 = vmatpush3.bf16.msra.mxu0 %v4171_v10  ;;  %3908 = vmatpush3.bf16.msra.mxu1 %v4171_v10 }
 0x224   : > { %3913 = vmatprep.subr.bf16.mxu0 %v4184_v1  ;;  %3933 = vmatprep.subr.bf16.mxu1 %v4184_v1 }
 0x226   : > { %3890 = vmatmul.mubr.bf16.vlgmr.msra.gmra.mrb[0].mxu0 %v4548_v42  ;;  %3910 = vmatmul.mubr.bf16.vlgmr.msra.gmra.mrb[0].mxu1 %v4573_v51  ;;  %v4172_v42 = vld [vmem:[%s4317_s22 + $0x10] ss:$0 sps:$4 sm:$0x77]  }
 0x227   : > { %3914 = vmatpush3.bf16.msra.mxu0 %v4164_v2  ;;  %3934 = vmatpush3.bf16.msra.mxu1 %v4164_v2  ;;  %v2486_v51 = vshll.u32 %v4172_v42, 16  ;;  %v2484_v11 = vshrl.u32 %v4172_v42, 16 }
 0x228   : > { %3915 = vmatprep.subr.bf16.mxu0 %v4184_v1  ;;  %3935 = vmatprep.subr.bf16.mxu1 %v4184_v1 }
 0x229   : > { %3929 = vmatprep.mubr.msk.bf16.mxu0 %vm4185_vm0, %v4184_v1  ;;  %3949 = vmatprep.mubr.msk.bf16.mxu1 %vm4185_vm0, %v4184_v1  ;;  %v2488_v12 = vrot.slane %v2486_v51, 1 }
 0x22b   : > { %3916 = vmatpush3.bf16.msra.mxu0 %v4165_v4  ;;  %3936 = vmatpush3.bf16.msra.mxu1 %v4165_v4  ;;  %v2489_v13 = vor.u32 %v2488_v12, %v2484_v11 }
 0x22c   : > { %3917 = vmatprep.subr.bf16.mxu0 %v4184_v1  ;;  %3937 = vmatprep.subr.bf16.mxu1 %v4184_v1 }
 0x22f   : > { %3918 = vmatpush3.bf16.msra.mxu0 %v4166_v5  ;;  %3938 = vmatpush3.bf16.msra.mxu1 %v4166_v5 }
 0x230   : > { %3919 = vmatprep.subr.bf16.mxu0 %v4184_v1  ;;  %3939 = vmatprep.subr.bf16.mxu1 %v4184_v1 }
 0x233   : > { %3920 = vmatpush3.bf16.msra.mxu0 %v4167_v6  ;;  %3940 = vmatpush3.bf16.msra.mxu1 %v4167_v6 }
 0x234   : > { %3921 = vmatprep.subr.bf16.mxu0 %v4184_v1  ;;  %3941 = vmatprep.subr.bf16.mxu1 %v4184_v1 }
 0x237   : > { %3922 = vmatpush3.bf16.msra.mxu0 %v4168_v7  ;;  %3942 = vmatpush3.bf16.msra.mxu1 %v4168_v7 }
 0x238   : > { %3923 = vmatprep.subr.bf16.mxu0 %v4184_v1  ;;  %3943 = vmatprep.subr.bf16.mxu1 %v4184_v1 }
 0x23b   : > { %3924 = vmatpush3.bf16.msra.mxu0 %v4169_v8  ;;  %3944 = vmatpush3.bf16.msra.mxu1 %v4169_v8 }
 0x23c   : > { %3925 = vmatprep.subr.bf16.mxu0 %v4184_v1  ;;  %3945 = vmatprep.subr.bf16.mxu1 %v4184_v1 }
 0x23f   : > { %3926 = vmatpush3.bf16.msra.mxu0 %v4170_v9  ;;  %3946 = vmatpush3.bf16.msra.mxu1 %v4170_v9 }
 0x240   : > { %3927 = vmatprep.subr.bf16.mxu0 %v4184_v1  ;;  %3947 = vmatprep.subr.bf16.mxu1 %v4184_v1 }
 0x243   : > { %3928 = vmatpush3.bf16.msra.mxu0 %v4171_v10  ;;  %3948 = vmatpush3.bf16.msra.mxu1 %v4171_v10 }
 0x246   : > { %3930 = vmatmul.mubr.bf16.vlgmr.msra.gmra.mrb[4].mxu0 %v4575_v52  ;;  %3950 = vmatmul.mubr.bf16.vlgmr.msra.gmra.mrb[4].mxu1 %v2489_v13 }
 0x2f9   : > { %v2390_v15 = vpop.f32.mrb[0].mxu0  ;;  %v2431_v17 = vpop.f32.mrb[0].mxu1 }
 0x2fa   : > { %v2540_v18 = vmul.f32 %v2901_v14, %v2390_v15  ;;  %v2551_v19 = vmul.f32 %v2901_v14, %v2431_v17  ;;  %v3891_v1 = vpop.f32.mrb[1].mxu0  ;;  %v3911_v21 = vpop.f32.mrb[1].mxu1 }
 0x2fb   : > { %v2393_v22 = vpop.f32.mrb[2].mxu0  ;;  %v2434_v25 = vpop.f32.mrb[2].mxu1 }
 0x2fc   : > { %v2547_v26 = vadd.f32 %v2902_v16, %v2540_v18  ;;  %v2552_v52 = vadd.f32 %v2902_v16, %v2551_v19  ;;  %v3892_v27 = vpop.f32.mrb[3].mxu0  ;;  %v3912_v28 = vpop.f32.mrb[3].mxu1 }
 0x2fe   : > { %v2548_v29 = vmax.f32 %v2547_v26, 0.0  ;;  %v2553_v30 = vmax.f32 %v2552_v52, 0.0 }
 0x300   : > { %v2549_v31 = vpack.c.bf16 %v2548_v29, %v2548_v29  ;;  %v2554_v32 = vpack.c.bf16 %v2553_v30, %v2553_v30 }
 0x302   : > { %2550 = vst [vmem:[%s338_s18] sm:$0x3] %v2549_v31  ;;  %2903 = vst [vmem:[%s338_s18 + $0x2] sm:$0x3] %v2554_v32 }
 0x319   : > { %v2472_v33 = vpop.f32.mrb[4].mxu0  ;;  %v2525_v34 = vpop.f32.mrb[4].mxu1 }
 0x31a   : > { %v2557_v35 = vmul.f32 %v2901_v14, %v2472_v33  ;;  %v2563_v36 = vmul.f32 %v2901_v14, %v2525_v34  ;;  %v3931_v37 = vpop.f32.mrb[5].mxu0  ;;  %v3951_v38 = vpop.f32.mrb[5].mxu1 }
 0x31b   : > { %v2475_v39 = vpop.f32.mrb[6].mxu0  ;;  %v2528_v40 = vpop.f32.mrb[6].mxu1 }
 0x31c   : > { %v2558_v41 = vadd.f32 %v2902_v16, %v2557_v35  ;;  %v2564_v43 = vadd.f32 %v2902_v16, %v2563_v36  ;;  %v3932_v44 = vpop.f32.mrb[7].mxu0  ;;  %v3952_v45 = vpop.f32.mrb[7].mxu1 }
 0x31e   : > { %v2559_v46 = vmax.f32 %v2558_v41, 0.0  ;;  %v2565_v47 = vmax.f32 %v2564_v43, 0.0 }
 0x320   : > { %v2560_v48 = vpack.c.bf16 %v2559_v46, %v2559_v46  ;;  %v2566_v49 = vpack.c.bf16 %v2565_v47, %v2565_v47 }
 0x322   : > { %2904 = vst [vmem:[%s338_s18 + $0x4] sm:$0x3] %v2560_v48  ;;  %2905 = vst [vmem:[%s338_s18 + $0x6] sm:$0x3] %v2566_v49 }
 0x323 PF: > { %s17_s24 = sadd.s32 1, %s4182_s24  }
 0x324   : > { %p14_p4 = scmp.ge.s32.totalorder %s17_s24, 4  }
 0x326   :  { %16 = sbr.rel (!%p14_p4) target bundleno = 1 (0x1), region = 112 }

// kernel: _lambda_.24
= control target key start
LH: loop header
LB: loop body
LE: loop exit
PB: predicated region body
PF: predicated region fallthrough
CT: control target
= control target key end

     0   :  { %v201_v0 = vmov 0.0   ;;  %vm202_vm0 = vmmov 0   ;;  %s272_s1 = inlined_call_operand.vmem [shape: bf16[128,128], index: 1, kind: input, shape index: {}]   ;;  %s273_s0 = inlined_call_operand.vmem [shape: bf16[8,128], index: 0, kind: input, shape index: {}]   ;;  %s274_s2 = inlined_call_operand.vmem [shape: f32[1,128], index: 2, kind: input, shape index: {}]   ;;  %s275_s4 = inlined_call_operand.vmem [shape: bf16[8,128], index: 4, kind: input, shape index: {}]   ;;  %s276_s3 = inlined_call_operand.vmem [shape: f32[1,128], index: 3, kind: input, shape index: {}]   ;;  %s277_s5 = inlined_call_operand.vmem [shape: bf16[8,128], index: 5, kind: output, shape index: {}]  }
   0x1   :  { %171 = vmatprep.subr.bf16.mxu0 %v201_v0  ;;  %v193_v1 = vld [vmem:[%s272_s1] sm:$0xff]   ;;  %187 = vmatprep.mubr.msk.bf16.mxu0 %vm202_vm0, %v201_v0  ;;  %v194_v2 = vld [vmem:[%s272_s1 + $0x8] sm:$0xff]   ;;  %v195_v3 = vld [vmem:[%s272_s1 + $0x10] sm:$0xff]  }
   0x2   :  { %172 = vmatpush3.bf16.msra.mxu0 %v193_v1  ;;  %v196_v4 = vld [vmem:[%s272_s1 + $0x18] sm:$0xff]   ;;  %v197_v5 = vld [vmem:[%s272_s1 + $0x20] sm:$0xff]   ;;  %v198_v6 = vld [vmem:[%s272_s1 + $0x28] sm:$0xff]  }
   0x3   :  { %173 = vmatprep.subr.bf16.mxu0 %v201_v0  ;;  %v199_v7 = vld [vmem:[%s272_s1 + $0x30] sm:$0xff]   ;;  %v200_v8 = vld [vmem:[%s272_s1 + $0x38] sm:$0xff]   ;;  %v21_v9 = vld [vmem:[%s273_s0] sm:$0xf] }
   0x4   :  { %v160_v10 = vld [vmem:[%s274_s2] ss:$0 sm:$0xff] }
   0x5   :  { %v142_v11 = vld [vmem:[%s275_s4] sm:$0xf] }
   0x6   :  { %174 = vmatpush3.bf16.msra.mxu0 %v194_v2  ;;  %v161_v13 = vld [vmem:[%s276_s3] ss:$0 sm:$0xff]  ;;  %v143_v15 = vunpack.c.l.bf16 %v142_v11 }
   0x7   :  { %175 = vmatprep.subr.bf16.mxu0 %v201_v0 }
   0xa   :  { %176 = vmatpush3.bf16.msra.mxu0 %v195_v3 }
   0xb   :  { %177 = vmatprep.subr.bf16.mxu0 %v201_v0 }
   0xe   :  { %178 = vmatpush3.bf16.msra.mxu0 %v196_v4 }
   0xf   :  { %179 = vmatprep.subr.bf16.mxu0 %v201_v0 }
  0x12   :  { %180 = vmatpush3.bf16.msra.mxu0 %v197_v5 }
  0x13   :  { %181 = vmatprep.subr.bf16.mxu0 %v201_v0 }
  0x16   :  { %182 = vmatpush3.bf16.msra.mxu0 %v198_v6 }
  0x17   :  { %183 = vmatprep.subr.bf16.mxu0 %v201_v0 }
  0x1a   :  { %184 = vmatpush3.bf16.msra.mxu0 %v199_v7 }
  0x1b   :  { %185 = vmatprep.subr.bf16.mxu0 %v201_v0 }
  0x1e   :  { %186 = vmatpush3.bf16.msra.mxu0 %v200_v8 }
  0x21   :  { %188 = vmatmul.mubr.bf16.vlgmr.msra.gmra.mrb[0].mxu0 %v21_v9 }
  0xf4   :  { %v120_v12 = vpop.f32.mrb[0].mxu0 }
  0xf5   :  { %v133_v14 = vmul.f32 %v160_v10, %v120_v12  ;;  %v189_v16 = vpop.f32.mrb[1].mxu0 }
  0xf6   :  { %v123_v17 = vpop.f32.mrb[2].mxu0 }
  0xf7   :  { %v141_v18 = vadd.f32 %v161_v13, %v133_v14  ;;  %v190_v19 = vpop.f32.mrb[3].mxu0 }
  0xf9   :  { %v144_v20 = vadd.f32 %v143_v15, %v141_v18 }
  0xfb   :  { %v145_v21 = vmax.f32 %v144_v20, 0.0 }
  0xfd   :  { %v146_v22 = vpack.c.bf16 %v145_v21, %v145_v21 }
  0xff   :  { %147 = vst [vmem:[%s277_s5] sm:$0xf] %v146_v22 }

// kernel: _lambda_.23
= control target key start
LH: loop header
LB: loop body
LE: loop exit
PB: predicated region body
PF: predicated region fallthrough
CT: control target
= control target key end

     0   :  { %s2819_s24 = smov 0   ;;  %s3292_s0 = inlined_call_operand.vmem [shape: bf16[2,3,3,128], index: 0, kind: input, shape index: {}]   ;;  %s3293_s1 = inlined_call_operand.vmem [shape: bf16[2,3,3,128], index: 1, kind: input, shape index: {}]   ;;  %s3294_s2 = inlined_call_operand.vmem [shape: bf16[2,3,3,128], index: 2, kind: input, shape index: {}]   ;;  %s3295_s3 = inlined_call_operand.vmem [shape: bf16[2,3,3,128], index: 3, kind: input, shape index: {}]   ;;  %s3296_s4 = inlined_call_operand.vmem [shape: bf16[9,128,128], index: 4, kind: input, shape index: {}]   ;;  %s3297_s5 = inlined_call_operand.vmem [shape: f32[1,128], index: 5, kind: input, shape index: {}]   ;;  %s3298_s6 = inlined_call_operand.vmem [shape: f32[1,128], index: 6, kind: input, shape index: {}]   ;;  %s3299_s7 = inlined_call_operand.vmem [shape: bf16[2,2,2,128], index: 7, kind: output, shape index: {}]  }
   0x1 LB: > { %s1871_s25 = sadd.s32 4294967295, %s2775_s24   ;;  %p1875_p0 = scmp.ge.s32.totalorder %s2775_s24, 1  ;;  %s2775_s24 = sphi %s2819_s24, %s17_s24  }
   0x2   : > { %p267_p1 = scmp.lt.s32.totalorder %s2775_s24, 3 }
   0x4   : > { %p268_p2 = pnand %p1875_p0, %p267_p1 }
   0x5   : > { %v2697_v0 = vld [vmem:[%s3296_s4 + $0x40] sm:$0xff] (!%p268_p2)   ;;  %v2777_v1 = vmov (!%p268_p2), 0.0   ;;  %v2698_v2 = vld [vmem:[%s3296_s4 + $0x48] sm:$0xff] (!%p268_p2)   ;;  %vm2778_vm0 = vmmov (!%p268_p2), 0   ;;  %v2699_v3 = vld [vmem:[%s3296_s4 + $0x50] sm:$0xff] (!%p268_p2)   ;;  %p313_p3 = scmp.lt.s32.totalorder (!%p268_p2), %s1871_s25, 1 }
   0x6   : > { %271 = sbr.rel (%p268_p2) target bundleno = 515 (0x203), region = 48  ;;  %2262 = vmatprep.subr.bf16.mxu0 (!%p268_p2), %v2777_v1  ;;  %2302 = vmatprep.subr.bf16.mxu1 (!%p268_p2), %v2777_v1  ;;  %v2700_v4 = vld [vmem:[%s3296_s4 + $0x58] sm:$0xff] (!%p268_p2)   ;;  %v2701_v5 = vld [vmem:[%s3296_s4 + $0x60] sm:$0xff] (!%p268_p2)   ;;  %v2702_v6 = vld [vmem:[%s3296_s4 + $0x68] sm:$0xff] (!%p268_p2)  }
   0x7   : > { %2263 = vmatpush3.bf16.msra.mxu0 (!%p268_p2), %v2697_v0  ;;  %2303 = vmatpush3.bf16.msra.mxu1 (!%p268_p2), %v2697_v0  ;;  %v2703_v7 = vld [vmem:[%s3296_s4 + $0x70] sm:$0xff] (!%p268_p2)   ;;  %v2704_v8 = vld [vmem:[%s3296_s4 + $0x78] sm:$0xff] (!%p268_p2)   ;;  %v2705_v9 = vld [vmem:[%s3296_s4] sm:$0xff] (!%p268_p2)  }
   0x8   : > { %2264 = vmatprep.subr.bf16.mxu0 (!%p268_p2), %v2777_v1  ;;  %2304 = vmatprep.subr.bf16.mxu1 (!%p268_p2), %v2777_v1  ;;  %v2706_v12 = vld [vmem:[%s3296_s4 + $0x8] sm:$0xff] (!%p268_p2)   ;;  %v2707_v13 = vld [vmem:[%s3296_s4 + $0x10] sm:$0xff] (!%p268_p2)   ;;  %v2708_v14 = vld [vmem:[%s3296_s4 + $0x18] sm:$0xff] (!%p268_p2)  }
   0x9   : > { %2278 = vmatprep.mubr.msk.bf16.mxu0 (!%p268_p2), %vm2778_vm0, %v2777_v1  ;;  %2318 = vmatprep.mubr.msk.bf16.mxu1 (!%p268_p2), %vm2778_vm0, %v2777_v1  ;;  %v2709_v15 = vld [vmem:[%s3296_s4 + $0x20] sm:$0xff] (!%p268_p2)   ;;  %v2710_v16 = vld [vmem:[%s3296_s4 + $0x28] sm:$0xff] (!%p268_p2)   ;;  %v2711_v17 = vld [vmem:[%s3296_s4 + $0x30] sm:$0xff] (!%p268_p2)  }
   0xa   : > { %v2712_v18 = vld [vmem:[%s3296_s4 + $0x38] sm:$0xff] (!%p268_p2)   ;;  %v2713_v21 = vld [vmem:[%s3296_s4 + $0x80] sm:$0xff] (!%p268_p2)   ;;  %v2714_v22 = vld [vmem:[%s3296_s4 + $0x88] sm:$0xff] (!%p268_p2)  }
   0xb   : > { %2265 = vmatpush3.bf16.msra.mxu0 (!%p268_p2), %v2698_v2  ;;  %2305 = vmatpush3.bf16.msra.mxu1 (!%p268_p2), %v2698_v2  ;;  %v2715_v23 = vld [vmem:[%s3296_s4 + $0x90] sm:$0xff] (!%p268_p2)   ;;  %v2716_v24 = vld [vmem:[%s3296_s4 + $0x98] sm:$0xff] (!%p268_p2)   ;;  %v2717_v25 = vld [vmem:[%s3296_s4 + $0xa0] sm:$0xff] (!%p268_p2)  }
   0xc   : > { %2266 = vmatprep.subr.bf16.mxu0 (!%p268_p2), %v2777_v1  ;;  %2306 = vmatprep.subr.bf16.mxu1 (!%p268_p2), %v2777_v1  ;;  %v2718_v27 = vld [vmem:[%s3296_s4 + $0xa8] sm:$0xff] (!%p268_p2)   ;;  %v2719_v31 = vld [vmem:[%s3296_s4 + $0xb0] sm:$0xff] (!%p268_p2)   ;;  %v2720_v36 = vld [vmem:[%s3296_s4 + $0xb8] sm:$0xff] (!%p268_p2)  }
   0xd   : > { %s3301_s25 = smov (!%p313_p3, %s1871_s25), 1  ;;  %v2721_v39 = vld [vmem:[%s3296_s4 + $0xc0] sm:$0xff]   ;;  %v2722_v40 = vld [vmem:[%s3296_s4 + $0xc8] sm:$0xff]   ;;  %v2723_v41 = vld [vmem:[%s3296_s4 + $0xd0] sm:$0xff]  }
   0xe   : > { %s2871_s17 = smul.u32 6, %s3301_s25  ;;  %v2724_v42 = vld [vmem:[%s3296_s4 + $0xd8] sm:$0xff]   ;;  %v2725_v43 = vld [vmem:[%s3296_s4 + $0xe0] sm:$0xff]   ;;  %v2726_v44 = vld [vmem:[%s3296_s4 + $0xe8] sm:$0xff]   ;;  %s1880_s11 = sshll.u32 %s3301_s25, 1 }
   0xf   : > { %2267 = vmatpush3.bf16.msra.mxu0 %v2699_v3  ;;  %2307 = vmatpush3.bf16.msra.mxu1 %v2699_v3  ;;  %v2727_v45 = vld [vmem:[%s3296_s4 + $0xf0] sm:$0xff]   ;;  %v2728_v46 = vld [vmem:[%s3296_s4 + $0xf8] sm:$0xff]   ;;  %v2729_v49 = vld [vmem:[%s3296_s4 + $0x100] sm:$0xff]   ;;  %s336_s14 = scalar_lea.vmem %s3299_s7, %s1880_s11 }
  0x10   : > { %2268 = vmatprep.subr.bf16.mxu0 %v2777_v1  ;;  %2308 = vmatprep.subr.bf16.mxu1 %v2777_v1  ;;  %s2882_s22 = scalar_lea.vmem %s3293_s1, %s2871_s17  ;;  %s2937_s21 = scalar_lea.vmem %s3292_s0, %s2871_s17  ;;  %v2730_v50 = vld [vmem:[%s3296_s4 + $0x108] sm:$0xff]   ;;  %v2731_v51 = vld [vmem:[%s3296_s4 + $0x110] sm:$0xff]   ;;  %v2732_v52 = vld [vmem:[%s3296_s4 + $0x118] sm:$0xff]  }
  0x11   : > { %v374_v10 = vld [vmem:[%s2882_s22] sm:$0x1]  ;;  %v2891_v11 = vld [vmem:[%s2882_s22 + $0x2] sm:$0x1]  ;;  %s3043_s19 = scalar_lea.vmem %s3294_s2, %s2871_s17  ;;  %v2734_v54 = vld [vmem:[%s3296_s4 + $0x128] sm:$0xff]   ;;  %s332_s23 = scalar_lea.vmem %s3295_s3, %s2871_s17 }
  0x12   : > { %v354_v19 = vld [vmem:[%s2937_s21] sm:$0x1]  ;;  %v2943_v20 = vld [vmem:[%s2937_s21 + $0x2] sm:$0x1]  ;;  %v2735_v55 = vld [vmem:[%s3296_s4 + $0x130] sm:$0xff]  }
  0x13   : > { %2269 = vmatpush3.bf16.msra.mxu0 %v2700_v4  ;;  %2309 = vmatpush3.bf16.msra.mxu1 %v2700_v4  ;;  %v1931_v26 = vld.sshfl [vmem:[%s2937_s21] sm:$0x3 pattern:$0x76325410]  ;;  %v1966_v48 = vld [vmem:[%s3043_s19 + $0x2] sm:$0x1] }
  0x14   : > { %2270 = vmatprep.subr.bf16.mxu0 %v2777_v1  ;;  %2310 = vmatprep.subr.bf16.mxu1 %v2777_v1  ;;  %v1941_v28 = vld.sshfl [vmem:[%s2937_s21 + $0x2] sm:$0x3 pattern:$0x76325410]  ;;  %v662_v29 = vshll.u32 %v1931_v26, 16  ;;  %v660_v32 = vshrl.u32 %v1931_v26, 16 }
  0x15   : > { %v768_v30 = vshll.u32 %v1941_v28, 16  ;;  %v766_v34 = vshrl.u32 %v1941_v28, 16  ;;  %v831_v47 = vld [vmem:[%s3043_s19] sm:$0x1]  ;;  %v2736_v56 = vld [vmem:[%s3296_s4 + $0x138] sm:$0xff]   ;;  %v2738_v60 = vld [vmem:[%s3296_s4 + $0x148] sm:$0xff]  }
  0x16   : > { %v664_v33 = vrot.slane %v662_v29, 1  ;;  %v2733_v53 = vld [vmem:[%s3296_s4 + $0x120] sm:$0xff]   ;;  %v2739_v61 = vld [vmem:[%s3296_s4 + $0x150] sm:$0xff]   ;;  %v2740_v62 = vld [vmem:[%s3296_s4 + $0x158] sm:$0xff]  }
  0x17   : > { %2271 = vmatpush3.bf16.msra.mxu0 %v2701_v5  ;;  %2311 = vmatpush3.bf16.msra.mxu1 %v2701_v5  ;;  %v770_v35 = vrot.slane %v768_v30, 1  ;;  %v981_v57 = vld [vmem:[%s332_s23] sm:$0x1]  ;;  %v1991_v58 = vld [vmem:[%s332_s23 + $0x2] sm:$0x1]  ;;  %v2742_v2 = vld [vmem:[%s3296_s4 + $0x168] sm:$0xff]  }
  0x18   : > { %2272 = vmatprep.subr.bf16.mxu0 %v2777_v1  ;;  %2312 = vmatprep.subr.bf16.mxu1 %v2777_v1  ;;  %v665_v37 = vor.u32 %v664_v33, %v660_v32  ;;  %v2737_v59 = vld [vmem:[%s3296_s4 + $0x140] sm:$0xff]   ;;  %v2754_v26 = vld [vmem:[%s3296_s4 + $0x1c8] sm:$0xff]   ;;  %v2759_v30 = vld [vmem:[%s3296_s4 + $0x1f0] sm:$0xff]  }
  0x19   : > { %v2992_v38 = vor.u32 %v770_v35, %v766_v34  ;;  %v2741_v63 = vld [vmem:[%s3296_s4 + $0x160] sm:$0xff]   ;;  %v2758_v29 = vld [vmem:[%s3296_s4 + $0x1e8] sm:$0xff]   ;;  %v2764_v35 = vld [vmem:[%s3296_s4 + $0x218] sm:$0xff]  }
  0x1a   : > { %v2008_v0 = vld.sshfl [vmem:[%s3043_s19] sm:$0x3 pattern:$0x76325410]  ;;  %v2068_v32 = vld [vmem:[%s2882_s22 + $0x4] sm:$0x1] }
  0x1b   : > { %2273 = vmatpush3.bf16.msra.mxu0 %v2702_v6  ;;  %2313 = vmatpush3.bf16.msra.mxu1 %v2702_v6  ;;  %v2018_v3 = vld.sshfl [vmem:[%s3043_s19 + $0x2] sm:$0x3 pattern:$0x76325410]  ;;  %v1143_v4 = vshll.u32 %v2008_v0, 16  ;;  %v2743_v6 = vld [vmem:[%s3296_s4 + $0x170] sm:$0xff]  }
  0x1c   : > { %2274 = vmatprep.subr.bf16.mxu0 %v2777_v1  ;;  %2314 = vmatprep.subr.bf16.mxu1 %v2777_v1  ;;  %v1249_v5 = vshll.u32 %v2018_v3, 16  ;;  %v2757_v28 = vld [vmem:[%s3296_s4 + $0x1e0] sm:$0xff]   ;;  %v2762_v34 = vld [vmem:[%s3296_s4 + $0x208] sm:$0xff]  }
  0x1d   : > { %v2761_v33 = vld [vmem:[%s3296_s4 + $0x200] sm:$0xff]  }
  0x1f   : > { %2275 = vmatpush3.bf16.msra.mxu0 %v2703_v7  ;;  %2315 = vmatpush3.bf16.msra.mxu1 %v2703_v7  ;;  %v1141_v7 = vshrl.u32 %v2008_v0, 16 }
  0x20   : > { %2276 = vmatprep.subr.bf16.mxu0 %v2777_v1  ;;  %2316 = vmatprep.subr.bf16.mxu1 %v2777_v1 }
  0x23   : > { %2277 = vmatpush3.bf16.msra.mxu0 %v2704_v8  ;;  %2317 = vmatpush3.bf16.msra.mxu1 %v2704_v8  ;;  %v1145_v8 = vrot.slane %v1143_v4, 1 }
  0x24   : > { %2282 = vmatprep.subr.bf16.mxu0 %v2777_v1  ;;  %2322 = vmatprep.subr.bf16.mxu1 %v2777_v1 }
  0x26   : > { %2279 = vmatmul.mubr.bf16.vlgmr.msra.gmra.mrb[0].mxu0 %v374_v10  ;;  %2319 = vmatmul.mubr.bf16.vlgmr.msra.gmra.mrb[0].mxu1 %v2891_v11  ;;  %v1251_v10 = vrot.slane %v1249_v5, 1 }
  0x27   : > { %2283 = vmatpush3.bf16.msra.mxu0 %v2705_v9  ;;  %2323 = vmatpush3.bf16.msra.mxu1 %v2705_v9  ;;  %v1247_v9 = vshrl.u32 %v2018_v3, 16 }
  0x28   : > { %2284 = vmatprep.subr.bf16.mxu0 %v2777_v1  ;;  %2324 = vmatprep.subr.bf16.mxu1 %v2777_v1 }
  0x29   : > { %2298 = vmatprep.mubr.msk.bf16.mxu0 %vm2778_vm0, %v2777_v1  ;;  %2338 = vmatprep.mubr.msk.bf16.mxu1 %vm2778_vm0, %v2777_v1 }
  0x2b   : > { %2285 = vmatpush3.bf16.msra.mxu0 %v2706_v12  ;;  %2325 = vmatpush3.bf16.msra.mxu1 %v2706_v12  ;;  %v2744_v12 = vld [vmem:[%s3296_s4 + $0x178] sm:$0xff]  }
  0x2c   : > { %2286 = vmatprep.subr.bf16.mxu0 %v2777_v1  ;;  %2326 = vmatprep.subr.bf16.mxu1 %v2777_v1 }
  0x2f   : > { %2287 = vmatpush3.bf16.msra.mxu0 %v2707_v13  ;;  %2327 = vmatpush3.bf16.msra.mxu1 %v2707_v13  ;;  %v1146_v13 = vor.u32 %v1145_v8, %v1141_v7 }
  0x30   : > { %2288 = vmatprep.subr.bf16.mxu0 %v2777_v1  ;;  %2328 = vmatprep.subr.bf16.mxu1 %v2777_v1 }
  0x33   : > { %2289 = vmatpush3.bf16.msra.mxu0 %v2708_v14  ;;  %2329 = vmatpush3.bf16.msra.mxu1 %v2708_v14  ;;  %v1252_v14 = vor.u32 %v1251_v10, %v1247_v9 }
  0x34   : > { %2290 = vmatprep.subr.bf16.mxu0 %v2777_v1  ;;  %2330 = vmatprep.subr.bf16.mxu1 %v2777_v1 }
  0x37   : > { %2291 = vmatpush3.bf16.msra.mxu0 %v2709_v15  ;;  %2331 = vmatpush3.bf16.msra.mxu1 %v2709_v15  ;;  %v2745_v15 = vld [vmem:[%s3296_s4 + $0x180] sm:$0xff]  }
  0x38   : > { %2292 = vmatprep.subr.bf16.mxu0 %v2777_v1  ;;  %2332 = vmatprep.subr.bf16.mxu1 %v2777_v1 }
  0x3b   : > { %2293 = vmatpush3.bf16.msra.mxu0 %v2710_v16  ;;  %2333 = vmatpush3.bf16.msra.mxu1 %v2710_v16  ;;  %v2746_v16 = vld [vmem:[%s3296_s4 + $0x188] sm:$0xff]  }
  0x3c   : > { %2294 = vmatprep.subr.bf16.mxu0 %v2777_v1  ;;  %2334 = vmatprep.subr.bf16.mxu1 %v2777_v1 }
  0x3f   : > { %2295 = vmatpush3.bf16.msra.mxu0 %v2711_v17  ;;  %2335 = vmatpush3.bf16.msra.mxu1 %v2711_v17  ;;  %v2747_v17 = vld [vmem:[%s3296_s4 + $0x190] sm:$0xff]  }
  0x40   : > { %2296 = vmatprep.subr.bf16.mxu0 %v2777_v1  ;;  %2336 = vmatprep.subr.bf16.mxu1 %v2777_v1 }
  0x43   : > { %2297 = vmatpush3.bf16.msra.mxu0 %v2712_v18  ;;  %2337 = vmatpush3.bf16.msra.mxu1 %v2712_v18  ;;  %v2748_v18 = vld [vmem:[%s3296_s4 + $0x198] sm:$0xff]  }
  0x44   : > { %2342 = vmatprep.subr.bf16.mxu0 %v2777_v1  ;;  %2362 = vmatprep.subr.bf16.mxu1 %v2777_v1 }
  0x46   : > { %2299 = vmatmul.mubr.bf16.vlgmr.msra.gmra.mrb[0].mxu0 %v354_v19  ;;  %2339 = vmatmul.mubr.bf16.vlgmr.msra.gmra.mrb[0].mxu1 %v2943_v20  ;;  %v2749_v19 = vld [vmem:[%s3296_s4 + $0x1a0] sm:$0xff]  }
  0x47   : > { %2343 = vmatpush3.bf16.msra.mxu0 %v2713_v21  ;;  %2363 = vmatpush3.bf16.msra.mxu1 %v2713_v21  ;;  %v2750_v21 = vld [vmem:[%s3296_s4 + $0x1a8] sm:$0xff]  }
  0x48   : > { %2344 = vmatprep.subr.bf16.mxu0 %v2777_v1  ;;  %2364 = vmatprep.subr.bf16.mxu1 %v2777_v1 }
  0x49   : > { %2358 = vmatprep.mubr.msk.bf16.mxu0 %vm2778_vm0, %v2777_v1  ;;  %2378 = vmatprep.mubr.msk.bf16.mxu1 %vm2778_vm0, %v2777_v1 }
  0x4b   : > { %2345 = vmatpush3.bf16.msra.mxu0 %v2714_v22  ;;  %2365 = vmatpush3.bf16.msra.mxu1 %v2714_v22  ;;  %v2751_v22 = vld [vmem:[%s3296_s4 + $0x1b0] sm:$0xff]  }
  0x4c   : > { %2346 = vmatprep.subr.bf16.mxu0 %v2777_v1  ;;  %2366 = vmatprep.subr.bf16.mxu1 %v2777_v1 }
  0x4f   : > { %2347 = vmatpush3.bf16.msra.mxu0 %v2715_v23  ;;  %2367 = vmatpush3.bf16.msra.mxu1 %v2715_v23  ;;  %v2752_v23 = vld [vmem:[%s3296_s4 + $0x1b8] sm:$0xff]  }
  0x50   : > { %2348 = vmatprep.subr.bf16.mxu0 %v2777_v1  ;;  %2368 = vmatprep.subr.bf16.mxu1 %v2777_v1 }
  0x53   : > { %2349 = vmatpush3.bf16.msra.mxu0 %v2716_v24  ;;  %2369 = vmatpush3.bf16.msra.mxu1 %v2716_v24  ;;  %v2043_v24 = vld [vmem:[%s2937_s21 + $0x4] sm:$0x1] }
  0x54   : > { %2350 = vmatprep.subr.bf16.mxu0 %v2777_v1  ;;  %2370 = vmatprep.subr.bf16.mxu1 %v2777_v1 }
  0x57   : > { %2351 = vmatpush3.bf16.msra.mxu0 %v2717_v25  ;;  %2371 = vmatpush3.bf16.msra.mxu1 %v2717_v25  ;;  %v2753_v25 = vld [vmem:[%s3296_s4 + $0x1c0] sm:$0xff]  }
  0x58   : > { %2352 = vmatprep.subr.bf16.mxu0 %v2777_v1  ;;  %2372 = vmatprep.subr.bf16.mxu1 %v2777_v1 }
  0x5b   : > { %2353 = vmatpush3.bf16.msra.mxu0 %v2718_v27  ;;  %2373 = vmatpush3.bf16.msra.mxu1 %v2718_v27  ;;  %v2756_v27 = vld [vmem:[%s3296_s4 + $0x1d8] sm:$0xff]  }
  0x5c   : > { %2354 = vmatprep.subr.bf16.mxu0 %v2777_v1  ;;  %2374 = vmatprep.subr.bf16.mxu1 %v2777_v1 }
  0x5f   : > { %2355 = vmatpush3.bf16.msra.mxu0 %v2719_v31  ;;  %2375 = vmatpush3.bf16.msra.mxu1 %v2719_v31  ;;  %v2760_v31 = vld [vmem:[%s3296_s4 + $0x1f8] sm:$0xff]  }
  0x60   : > { %2356 = vmatprep.subr.bf16.mxu0 %v2777_v1  ;;  %2376 = vmatprep.subr.bf16.mxu1 %v2777_v1 }
  0x63   : > { %2357 = vmatpush3.bf16.msra.mxu0 %v2720_v36  ;;  %2377 = vmatpush3.bf16.msra.mxu1 %v2720_v36  ;;  %v2765_v36 = vld [vmem:[%s3296_s4 + $0x220] sm:$0xff]  }
  0x64   : > { %2382 = vmatprep.subr.bf16.mxu0 %v2777_v1  ;;  %2402 = vmatprep.subr.bf16.mxu1 %v2777_v1 }
  0x66   : > { %2359 = vmatmul.mubr.bf16.vlgmr.msra.gmra.mrb[0].mxu0 %v665_v37  ;;  %2379 = vmatmul.mubr.bf16.vlgmr.msra.gmra.mrb[0].mxu1 %v2992_v38  ;;  %v2766_v37 = vld [vmem:[%s3296_s4 + $0x228] sm:$0xff]  }
  0x67   : > { %2383 = vmatpush3.bf16.msra.mxu0 %v2721_v39  ;;  %2403 = vmatpush3.bf16.msra.mxu1 %v2721_v39  ;;  %v2094_v39 = vld.sshfl [vmem:[%s2937_s21 + $0x4] sm:$0x3 pattern:$0x76325410] }
  0x68   : > { %2384 = vmatprep.subr.bf16.mxu0 %v2777_v1  ;;  %2404 = vmatprep.subr.bf16.mxu1 %v2777_v1 }
  0x69   : > { %2398 = vmatprep.mubr.msk.bf16.mxu0 %vm2778_vm0, %v2777_v1  ;;  %2418 = vmatprep.mubr.msk.bf16.mxu1 %vm2778_vm0, %v2777_v1 }
  0x6b   : > { %2385 = vmatpush3.bf16.msra.mxu0 %v2722_v40  ;;  %2405 = vmatpush3.bf16.msra.mxu1 %v2722_v40  ;;  %v1711_v40 = vshll.u32 %v2094_v39, 16 }
  0x6c   : > { %2386 = vmatprep.subr.bf16.mxu0 %v2777_v1  ;;  %2406 = vmatprep.subr.bf16.mxu1 %v2777_v1 }
  0x6f   : > { %2387 = vmatpush3.bf16.msra.mxu0 %v2723_v41  ;;  %2407 = vmatpush3.bf16.msra.mxu1 %v2723_v41  ;;  %v2767_v41 = vld [vmem:[%s3296_s4 + $0x230] sm:$0xff]  }
  0x70   : > { %2388 = vmatprep.subr.bf16.mxu0 %v2777_v1  ;;  %2408 = vmatprep.subr.bf16.mxu1 %v2777_v1 }
  0x73   : > { %2389 = vmatpush3.bf16.msra.mxu0 %v2724_v42  ;;  %2409 = vmatpush3.bf16.msra.mxu1 %v2724_v42  ;;  %v1709_v42 = vshrl.u32 %v2094_v39, 16 }
  0x74   : > { %2390 = vmatprep.subr.bf16.mxu0 %v2777_v1  ;;  %2410 = vmatprep.subr.bf16.mxu1 %v2777_v1 }
  0x77   : > { %2391 = vmatpush3.bf16.msra.mxu0 %v2725_v43  ;;  %2411 = vmatpush3.bf16.msra.mxu1 %v2725_v43  ;;  %v1713_v43 = vrot.slane %v1711_v40, 1 }
  0x78   : > { %2392 = vmatprep.subr.bf16.mxu0 %v2777_v1  ;;  %2412 = vmatprep.subr.bf16.mxu1 %v2777_v1 }
  0x7b   : > { %2393 = vmatpush3.bf16.msra.mxu0 %v2726_v44  ;;  %2413 = vmatpush3.bf16.msra.mxu1 %v2726_v44  ;;  %v2768_v44 = vld [vmem:[%s3296_s4 + $0x238] sm:$0xff]  }
  0x7c   : > { %2394 = vmatprep.subr.bf16.mxu0 %v2777_v1  ;;  %2414 = vmatprep.subr.bf16.mxu1 %v2777_v1 }
  0x7f   : > { %2395 = vmatpush3.bf16.msra.mxu0 %v2727_v45  ;;  %2415 = vmatpush3.bf16.msra.mxu1 %v2727_v45  ;;  %v1714_v45 = vor.u32 %v1713_v43, %v1709_v42 }
  0x80   : > { %2396 = vmatprep.subr.bf16.mxu0 %v2777_v1  ;;  %2416 = vmatprep.subr.bf16.mxu1 %v2777_v1 }
  0x83   : > { %2397 = vmatpush3.bf16.msra.mxu0 %v2728_v46  ;;  %2417 = vmatpush3.bf16.msra.mxu1 %v2728_v46  ;;  %v2095_v46 = vld [vmem:[%s3297_s5] ss:$0 sm:$0xff] }
  0x84   : > { %2422 = vmatprep.subr.bf16.mxu0 %v2777_v1  ;;  %2442 = vmatprep.subr.bf16.mxu1 %v2777_v1 }
  0x86   : > { %2399 = vmatmul.mubr.bf16.vlgmr.msra.gmra.mrb[0].mxu0 %v831_v47  ;;  %2419 = vmatmul.mubr.bf16.vlgmr.msra.gmra.mrb[0].mxu1 %v1966_v48  ;;  %v2096_v48 = vld [vmem:[%s3298_s6] ss:$0 sm:$0xff] }
  0x87   : > { %2423 = vmatpush3.bf16.msra.mxu0 %v2729_v49  ;;  %2443 = vmatpush3.bf16.msra.mxu1 %v2729_v49 }
  0x88   : > { %2424 = vmatprep.subr.bf16.mxu0 %v2777_v1  ;;  %2444 = vmatprep.subr.bf16.mxu1 %v2777_v1 }
  0x89   : > { %2438 = vmatprep.mubr.msk.bf16.mxu0 %vm2778_vm0, %v2777_v1  ;;  %2458 = vmatprep.mubr.msk.bf16.mxu1 %vm2778_vm0, %v2777_v1 }
  0x8b   : > { %2425 = vmatpush3.bf16.msra.mxu0 %v2730_v50  ;;  %2445 = vmatpush3.bf16.msra.mxu1 %v2730_v50 }
  0x8c   : > { %2426 = vmatprep.subr.bf16.mxu0 %v2777_v1  ;;  %2446 = vmatprep.subr.bf16.mxu1 %v2777_v1 }
  0x8f   : > { %2427 = vmatpush3.bf16.msra.mxu0 %v2731_v51  ;;  %2447 = vmatpush3.bf16.msra.mxu1 %v2731_v51 }
  0x90   : > { %2428 = vmatprep.subr.bf16.mxu0 %v2777_v1  ;;  %2448 = vmatprep.subr.bf16.mxu1 %v2777_v1 }
  0x93   : > { %2429 = vmatpush3.bf16.msra.mxu0 %v2732_v52  ;;  %2449 = vmatpush3.bf16.msra.mxu1 %v2732_v52 }
  0x94   : > { %2430 = vmatprep.subr.bf16.mxu0 %v2777_v1  ;;  %2450 = vmatprep.subr.bf16.mxu1 %v2777_v1 }
  0x97   : > { %2431 = vmatpush3.bf16.msra.mxu0 %v2733_v53  ;;  %2451 = vmatpush3.bf16.msra.mxu1 %v2733_v53 }
  0x98   : > { %2432 = vmatprep.subr.bf16.mxu0 %v2777_v1  ;;  %2452 = vmatprep.subr.bf16.mxu1 %v2777_v1 }
  0x9b   : > { %2433 = vmatpush3.bf16.msra.mxu0 %v2734_v54  ;;  %2453 = vmatpush3.bf16.msra.mxu1 %v2734_v54 }
  0x9c   : > { %2434 = vmatprep.subr.bf16.mxu0 %v2777_v1  ;;  %2454 = vmatprep.subr.bf16.mxu1 %v2777_v1 }
  0x9f   : > { %2435 = vmatpush3.bf16.msra.mxu0 %v2735_v55  ;;  %2455 = vmatpush3.bf16.msra.mxu1 %v2735_v55 }
  0xa0   : > { %2436 = vmatprep.subr.bf16.mxu0 %v2777_v1  ;;  %2456 = vmatprep.subr.bf16.mxu1 %v2777_v1 }
  0xa3   : > { %2437 = vmatpush3.bf16.msra.mxu0 %v2736_v56  ;;  %2457 = vmatpush3.bf16.msra.mxu1 %v2736_v56 }
  0xa4   : > { %2462 = vmatprep.subr.bf16.mxu0 %v2777_v1  ;;  %2482 = vmatprep.subr.bf16.mxu1 %v2777_v1 }
  0xa6   : > { %2439 = vmatmul.mubr.bf16.vlgmr.msra.gmra.mrb[0].mxu0 %v981_v57  ;;  %2459 = vmatmul.mubr.bf16.vlgmr.msra.gmra.mrb[0].mxu1 %v1991_v58 }
  0xa7   : > { %2463 = vmatpush3.bf16.msra.mxu0 %v2737_v59  ;;  %2483 = vmatpush3.bf16.msra.mxu1 %v2737_v59 }
  0xa8   : > { %2464 = vmatprep.subr.bf16.mxu0 %v2777_v1  ;;  %2484 = vmatprep.subr.bf16.mxu1 %v2777_v1 }
  0xa9   : > { %2478 = vmatprep.mubr.msk.bf16.mxu0 %vm2778_vm0, %v2777_v1  ;;  %2498 = vmatprep.mubr.msk.bf16.mxu1 %vm2778_vm0, %v2777_v1 }
  0xab   : > { %2465 = vmatpush3.bf16.msra.mxu0 %v2738_v60  ;;  %2485 = vmatpush3.bf16.msra.mxu1 %v2738_v60 }
  0xac   : > { %2466 = vmatprep.subr.bf16.mxu0 %v2777_v1  ;;  %2486 = vmatprep.subr.bf16.mxu1 %v2777_v1 }
  0xaf   : > { %2467 = vmatpush3.bf16.msra.mxu0 %v2739_v61  ;;  %2487 = vmatpush3.bf16.msra.mxu1 %v2739_v61 }
  0xb0   : > { %2468 = vmatprep.subr.bf16.mxu0 %v2777_v1  ;;  %2488 = vmatprep.subr.bf16.mxu1 %v2777_v1 }
  0xb3   : > { %2469 = vmatpush3.bf16.msra.mxu0 %v2740_v62  ;;  %2489 = vmatpush3.bf16.msra.mxu1 %v2740_v62 }
  0xb4   : > { %2470 = vmatprep.subr.bf16.mxu0 %v2777_v1  ;;  %2490 = vmatprep.subr.bf16.mxu1 %v2777_v1 }
  0xb7   : > { %2471 = vmatpush3.bf16.msra.mxu0 %v2741_v63  ;;  %2491 = vmatpush3.bf16.msra.mxu1 %v2741_v63 }
  0xb8   : > { %2472 = vmatprep.subr.bf16.mxu0 %v2777_v1  ;;  %2492 = vmatprep.subr.bf16.mxu1 %v2777_v1 }
  0xbb   : > { %2473 = vmatpush3.bf16.msra.mxu0 %v2742_v2  ;;  %2493 = vmatpush3.bf16.msra.mxu1 %v2742_v2 }
  0xbc   : > { %2474 = vmatprep.subr.bf16.mxu0 %v2777_v1  ;;  %2494 = vmatprep.subr.bf16.mxu1 %v2777_v1 }
  0xbf   : > { %2475 = vmatpush3.bf16.msra.mxu0 %v2743_v6  ;;  %2495 = vmatpush3.bf16.msra.mxu1 %v2743_v6 }
  0xc0   : > { %2476 = vmatprep.subr.bf16.mxu0 %v2777_v1  ;;  %2496 = vmatprep.subr.bf16.mxu1 %v2777_v1 }
  0xc3   : > { %2477 = vmatpush3.bf16.msra.mxu0 %v2744_v12  ;;  %2497 = vmatpush3.bf16.msra.mxu1 %v2744_v12 }
  0xc4   : > { %2502 = vmatprep.subr.bf16.mxu0 %v2777_v1  ;;  %2522 = vmatprep.subr.bf16.mxu1 %v2777_v1 }
  0xc6   : > { %2479 = vmatmul.mubr.bf16.vlgmr.msra.gmra.mrb[0].mxu0 %v1146_v13  ;;  %2499 = vmatmul.mubr.bf16.vlgmr.msra.gmra.mrb[0].mxu1 %v1252_v14 }
  0xc7   : > { %2503 = vmatpush3.bf16.msra.mxu0 %v2745_v15  ;;  %2523 = vmatpush3.bf16.msra.mxu1 %v2745_v15 }
  0xc8   : > { %2504 = vmatprep.subr.bf16.mxu0 %v2777_v1  ;;  %2524 = vmatprep.subr.bf16.mxu1 %v2777_v1 }
  0xc9   : > { %2518 = vmatprep.mubr.msk.bf16.mxu0 %vm2778_vm0, %v2777_v1  ;;  %2538 = vmatprep.mubr.msk.bf16.mxu1 %vm2778_vm0, %v2777_v1 }
  0xcb   : > { %2505 = vmatpush3.bf16.msra.mxu0 %v2746_v16  ;;  %2525 = vmatpush3.bf16.msra.mxu1 %v2746_v16 }
  0xcc   : > { %2506 = vmatprep.subr.bf16.mxu0 %v2777_v1  ;;  %2526 = vmatprep.subr.bf16.mxu1 %v2777_v1 }
  0xcf   : > { %2507 = vmatpush3.bf16.msra.mxu0 %v2747_v17  ;;  %2527 = vmatpush3.bf16.msra.mxu1 %v2747_v17 }
  0xd0   : > { %2508 = vmatprep.subr.bf16.mxu0 %v2777_v1  ;;  %2528 = vmatprep.subr.bf16.mxu1 %v2777_v1 }
  0xd3   : > { %2509 = vmatpush3.bf16.msra.mxu0 %v2748_v18  ;;  %2529 = vmatpush3.bf16.msra.mxu1 %v2748_v18 }
  0xd4   : > { %2510 = vmatprep.subr.bf16.mxu0 %v2777_v1  ;;  %2530 = vmatprep.subr.bf16.mxu1 %v2777_v1 }
  0xd7   : > { %2511 = vmatpush3.bf16.msra.mxu0 %v2749_v19  ;;  %2531 = vmatpush3.bf16.msra.mxu1 %v2749_v19 }
  0xd8   : > { %2512 = vmatprep.subr.bf16.mxu0 %v2777_v1  ;;  %2532 = vmatprep.subr.bf16.mxu1 %v2777_v1 }
  0xdb   : > { %2513 = vmatpush3.bf16.msra.mxu0 %v2750_v21  ;;  %2533 = vmatpush3.bf16.msra.mxu1 %v2750_v21 }
  0xdc   : > { %2514 = vmatprep.subr.bf16.mxu0 %v2777_v1  ;;  %2534 = vmatprep.subr.bf16.mxu1 %v2777_v1 }
  0xdf   : > { %2515 = vmatpush3.bf16.msra.mxu0 %v2751_v22  ;;  %2535 = vmatpush3.bf16.msra.mxu1 %v2751_v22 }
  0xe0   : > { %2516 = vmatprep.subr.bf16.mxu0 %v2777_v1  ;;  %2536 = vmatprep.subr.bf16.mxu1 %v2777_v1 }
  0xe3   : > { %2517 = vmatpush3.bf16.msra.mxu0 %v2752_v23  ;;  %2537 = vmatpush3.bf16.msra.mxu1 %v2752_v23 }
  0xe4   : > { %2542 = vmatprep.subr.bf16.mxu0 %v2777_v1  ;;  %2562 = vmatprep.subr.bf16.mxu1 %v2777_v1 }
  0xe6   : > { %2519 = vmatmul.mubr.bf16.vlgmr.msra.gmra.mrb[0].mxu0 %v2943_v20  ;;  %2539 = vmatmul.mubr.bf16.vlgmr.msra.gmra.mrb[0].mxu1 %v2043_v24  ;;  %v2755_v20 = vld [vmem:[%s3296_s4 + $0x1d0] sm:$0xff]  }
  0xe7   : > { %2543 = vmatpush3.bf16.msra.mxu0 %v2753_v25  ;;  %2563 = vmatpush3.bf16.msra.mxu1 %v2753_v25 }
  0xe8   : > { %2544 = vmatprep.subr.bf16.mxu0 %v2777_v1  ;;  %2564 = vmatprep.subr.bf16.mxu1 %v2777_v1 }
  0xe9   : > { %2558 = vmatprep.mubr.msk.bf16.mxu0 %vm2778_vm0, %v2777_v1  ;;  %2578 = vmatprep.mubr.msk.bf16.mxu1 %vm2778_vm0, %v2777_v1 }
  0xeb   : > { %2545 = vmatpush3.bf16.msra.mxu0 %v2754_v26  ;;  %2565 = vmatpush3.bf16.msra.mxu1 %v2754_v26 }
  0xec   : > { %2546 = vmatprep.subr.bf16.mxu0 %v2777_v1  ;;  %2566 = vmatprep.subr.bf16.mxu1 %v2777_v1 }
  0xef   : > { %2547 = vmatpush3.bf16.msra.mxu0 %v2755_v20  ;;  %2567 = vmatpush3.bf16.msra.mxu1 %v2755_v20 }
  0xf0   : > { %2548 = vmatprep.subr.bf16.mxu0 %v2777_v1  ;;  %2568 = vmatprep.subr.bf16.mxu1 %v2777_v1 }
  0xf3   : > { %2549 = vmatpush3.bf16.msra.mxu0 %v2756_v27  ;;  %2569 = vmatpush3.bf16.msra.mxu1 %v2756_v27 }
  0xf4   : > { %2550 = vmatprep.subr.bf16.mxu0 %v2777_v1  ;;  %2570 = vmatprep.subr.bf16.mxu1 %v2777_v1 }
  0xf7   : > { %2551 = vmatpush3.bf16.msra.mxu0 %v2757_v28  ;;  %2571 = vmatpush3.bf16.msra.mxu1 %v2757_v28 }
  0xf8   : > { %2552 = vmatprep.subr.bf16.mxu0 %v2777_v1  ;;  %2572 = vmatprep.subr.bf16.mxu1 %v2777_v1 }
  0xfb   : > { %2553 = vmatpush3.bf16.msra.mxu0 %v2758_v29  ;;  %2573 = vmatpush3.bf16.msra.mxu1 %v2758_v29 }
  0xfc   : > { %2554 = vmatprep.subr.bf16.mxu0 %v2777_v1  ;;  %2574 = vmatprep.subr.bf16.mxu1 %v2777_v1 }
  0xff   : > { %2555 = vmatpush3.bf16.msra.mxu0 %v2759_v30  ;;  %2575 = vmatpush3.bf16.msra.mxu1 %v2759_v30 }
 0x100   : > { %2556 = vmatprep.subr.bf16.mxu0 %v2777_v1  ;;  %2576 = vmatprep.subr.bf16.mxu1 %v2777_v1 }
 0x103   : > { %2557 = vmatpush3.bf16.msra.mxu0 %v2760_v31  ;;  %2577 = vmatpush3.bf16.msra.mxu1 %v2760_v31 }
 0x104   : > { %2582 = vmatprep.subr.bf16.mxu0 %v2777_v1  ;;  %2602 = vmatprep.subr.bf16.mxu1 %v2777_v1 }
 0x106   : > { %2559 = vmatmul.mubr.bf16.vlgmr.msra.gmra.mrb[0].mxu0 %v2891_v11  ;;  %2579 = vmatmul.mubr.bf16.vlgmr.msra.gmra.mrb[0].mxu1 %v2068_v32  ;;  %v2763_v11 = vld [vmem:[%s3296_s4 + $0x210] sm:$0xff]  }
 0x107   : > { %2583 = vmatpush3.bf16.msra.mxu0 %v2761_v33  ;;  %2603 = vmatpush3.bf16.msra.mxu1 %v2761_v33 }
 0x108   : > { %2584 = vmatprep.subr.bf16.mxu0 %v2777_v1  ;;  %2604 = vmatprep.subr.bf16.mxu1 %v2777_v1 }
 0x109   : > { %2598 = vmatprep.mubr.msk.bf16.mxu0 %vm2778_vm0, %v2777_v1  ;;  %2618 = vmatprep.mubr.msk.bf16.mxu1 %vm2778_vm0, %v2777_v1 }
 0x10b   : > { %2585 = vmatpush3.bf16.msra.mxu0 %v2762_v34  ;;  %2605 = vmatpush3.bf16.msra.mxu1 %v2762_v34 }
 0x10c   : > { %2586 = vmatprep.subr.bf16.mxu0 %v2777_v1  ;;  %2606 = vmatprep.subr.bf16.mxu1 %v2777_v1 }
 0x10f   : > { %2587 = vmatpush3.bf16.msra.mxu0 %v2763_v11  ;;  %2607 = vmatpush3.bf16.msra.mxu1 %v2763_v11 }
 0x110   : > { %2588 = vmatprep.subr.bf16.mxu0 %v2777_v1  ;;  %2608 = vmatprep.subr.bf16.mxu1 %v2777_v1 }
 0x113   : > { %2589 = vmatpush3.bf16.msra.mxu0 %v2764_v35  ;;  %2609 = vmatpush3.bf16.msra.mxu1 %v2764_v35 }
 0x114   : > { %2590 = vmatprep.subr.bf16.mxu0 %v2777_v1  ;;  %2610 = vmatprep.subr.bf16.mxu1 %v2777_v1 }
 0x117   : > { %2591 = vmatpush3.bf16.msra.mxu0 %v2765_v36  ;;  %2611 = vmatpush3.bf16.msra.mxu1 %v2765_v36 }
 0x118   : > { %2592 = vmatprep.subr.bf16.mxu0 %v2777_v1  ;;  %2612 = vmatprep.subr.bf16.mxu1 %v2777_v1 }
 0x11b   : > { %2593 = vmatpush3.bf16.msra.mxu0 %v2766_v37  ;;  %2613 = vmatpush3.bf16.msra.mxu1 %v2766_v37 }
 0x11c   : > { %2594 = vmatprep.subr.bf16.mxu0 %v2777_v1  ;;  %2614 = vmatprep.subr.bf16.mxu1 %v2777_v1 }
 0x11f   : > { %2595 = vmatpush3.bf16.msra.mxu0 %v2767_v41  ;;  %2615 = vmatpush3.bf16.msra.mxu1 %v2767_v41 }
 0x120   : > { %2596 = vmatprep.subr.bf16.mxu0 %v2777_v1  ;;  %2616 = vmatprep.subr.bf16.mxu1 %v2777_v1 }
 0x123   : > { %2597 = vmatpush3.bf16.msra.mxu0 %v2768_v44  ;;  %2617 = vmatpush3.bf16.msra.mxu1 %v2768_v44 }
 0x126   : > { %2599 = vmatmul.mubr.bf16.vlgmr.msra.gmra.mrb[0].mxu0 %v2992_v38  ;;  %2619 = vmatmul.mubr.bf16.vlgmr.msra.gmra.mrb[0].mxu1 %v1714_v45 }
 0x1f9   : > { %v1692_v47 = vpop.f32.mrb[0].mxu0  ;;  %v1750_v49 = vpop.f32.mrb[0].mxu1 }
 0x1fa   : > { %v1765_v50 = vmul.f32 %v2095_v46, %v1692_v47  ;;  %v1776_v51 = vmul.f32 %v2095_v46, %v1750_v49  ;;  %v2600_v1 = vpop.f32.mrb[1].mxu0  ;;  %v2620_v52 = vpop.f32.mrb[1].mxu1 }
 0x1fb   : > { %v1695_v53 = vpop.f32.mrb[2].mxu0  ;;  %v1753_v54 = vpop.f32.mrb[2].mxu1 }
 0x1fc   : > { %v1772_v55 = vadd.f32 %v2096_v48, %v1765_v50  ;;  %v1777_v38 = vadd.f32 %v2096_v48, %v1776_v51  ;;  %v2601_v56 = vpop.f32.mrb[3].mxu0  ;;  %v2621_v57 = vpop.f32.mrb[3].mxu1 }
 0x1fe   : > { %v1773_v58 = vmax.f32 %v1772_v55, 0.0  ;;  %v1778_v59 = vmax.f32 %v1777_v38, 0.0 }
 0x200   : > { %v1774_v60 = vpack.c.bf16 %v1773_v58, %v1773_v58  ;;  %v1779_v61 = vpack.c.bf16 %v1778_v59, %v1778_v59 }
 0x202   : > { %1775 = vst [vmem:[%s336_s14] sm:$0x1] %v1774_v60  ;;  %2097 = vst [vmem:[%s336_s14 + $0x1] sm:$0x1] %v1779_v61 }
 0x203 PF: > { %s17_s24 = sadd.s32 1, %s2775_s24  }
 0x204   : > { %p14_p4 = scmp.ge.s32.totalorder %s17_s24, 4  }
 0x206   :  { %16 = sbr.rel (!%p14_p4) target bundleno = 1 (0x1), region = 102 }

// kernel: _lambda_.25
= control target key start
LH: loop header
LB: loop body
LE: loop exit
PB: predicated region body
PF: predicated region fallthrough
CT: control target
= control target key end

     0   :  { %v195_v0 = vmov 0.0   ;;  %vm196_vm0 = vmmov 0   ;;  %s258_s1 = inlined_call_operand.vmem [shape: bf16[128,128], index: 1, kind: input, shape index: {}]   ;;  %s259_s0 = inlined_call_operand.vmem [shape: bf16[8,128], index: 0, kind: input, shape index: {}]   ;;  %s260_s2 = inlined_call_operand.vmem [shape: f32[1,128], index: 2, kind: input, shape index: {}]   ;;  %s261_s3 = inlined_call_operand.vmem [shape: f32[1,128], index: 3, kind: input, shape index: {}]   ;;  %s262_s4 = inlined_call_operand.vmem [shape: bf16[8,128], index: 4, kind: output, shape index: {}]  }
   0x1   :  { %165 = vmatprep.subr.bf16.mxu0 %v195_v0  ;;  %v187_v1 = vld [vmem:[%s258_s1] sm:$0xff]   ;;  %181 = vmatprep.mubr.msk.bf16.mxu0 %vm196_vm0, %v195_v0  ;;  %v188_v2 = vld [vmem:[%s258_s1 + $0x8] sm:$0xff]   ;;  %v189_v3 = vld [vmem:[%s258_s1 + $0x10] sm:$0xff]  }
   0x2   :  { %166 = vmatpush3.bf16.msra.mxu0 %v187_v1  ;;  %v190_v4 = vld [vmem:[%s258_s1 + $0x18] sm:$0xff]   ;;  %v191_v5 = vld [vmem:[%s258_s1 + $0x20] sm:$0xff]   ;;  %v192_v6 = vld [vmem:[%s258_s1 + $0x28] sm:$0xff]  }
   0x3   :  { %167 = vmatprep.subr.bf16.mxu0 %v195_v0  ;;  %v193_v7 = vld [vmem:[%s258_s1 + $0x30] sm:$0xff]   ;;  %v194_v8 = vld [vmem:[%s258_s1 + $0x38] sm:$0xff]   ;;  %v18_v9 = vld [vmem:[%s259_s0] sm:$0xf] }
   0x4   :  { %v154_v10 = vld [vmem:[%s260_s2] ss:$0 sm:$0xff] }
   0x5   :  { %v155_v12 = vld [vmem:[%s261_s3] ss:$0 sm:$0xff] }
   0x6   :  { %168 = vmatpush3.bf16.msra.mxu0 %v188_v2 }
   0x7   :  { %169 = vmatprep.subr.bf16.mxu0 %v195_v0 }
   0xa   :  { %170 = vmatpush3.bf16.msra.mxu0 %v189_v3 }
   0xb   :  { %171 = vmatprep.subr.bf16.mxu0 %v195_v0 }
   0xe   :  { %172 = vmatpush3.bf16.msra.mxu0 %v190_v4 }
   0xf   :  { %173 = vmatprep.subr.bf16.mxu0 %v195_v0 }
  0x12   :  { %174 = vmatpush3.bf16.msra.mxu0 %v191_v5 }
  0x13   :  { %175 = vmatprep.subr.bf16.mxu0 %v195_v0 }
  0x16   :  { %176 = vmatpush3.bf16.msra.mxu0 %v192_v6 }
  0x17   :  { %177 = vmatprep.subr.bf16.mxu0 %v195_v0 }
  0x1a   :  { %178 = vmatpush3.bf16.msra.mxu0 %v193_v7 }
  0x1b   :  { %179 = vmatprep.subr.bf16.mxu0 %v195_v0 }
  0x1e   :  { %180 = vmatpush3.bf16.msra.mxu0 %v194_v8 }
  0x21   :  { %182 = vmatmul.mubr.bf16.vlgmr.msra.gmra.mrb[0].mxu0 %v18_v9 }
  0xf4   :  { %v117_v11 = vpop.f32.mrb[0].mxu0 }
  0xf5   :  { %v130_v13 = vmul.f32 %v154_v10, %v117_v11  ;;  %v183_v14 = vpop.f32.mrb[1].mxu0 }
  0xf6   :  { %v120_v15 = vpop.f32.mrb[2].mxu0 }
  0xf7   :  { %v138_v16 = vadd.f32 %v155_v12, %v130_v13  ;;  %v184_v17 = vpop.f32.mrb[3].mxu0 }
  0xf9   :  { %v139_v18 = vmax.f32 %v138_v16, 0.0 }
  0xfb   :  { %v140_v19 = vpack.c.bf16 %v139_v18, %v139_v18 }
  0xfd   :  { %141 = vst [vmem:[%s262_s4] sm:$0xf] %v140_v19 }

// kernel: _lambda_.26
= control target key start
LH: loop header
LB: loop body
LE: loop exit
PB: predicated region body
PF: predicated region fallthrough
CT: control target
= control target key end

     0   :  { %s2072_s24 = smov 0   ;;  %s2448_s0 = inlined_call_operand.vmem [shape: bf16[2,2,2,128], index: 0, kind: input, shape index: {}]   ;;  %s2449_s1 = inlined_call_operand.vmem [shape: bf16[2,2,2,128], index: 1, kind: input, shape index: {}]   ;;  %s2450_s2 = inlined_call_operand.vmem [shape: bf16[2,2,2,128], index: 2, kind: input, shape index: {}]   ;;  %s2451_s3 = inlined_call_operand.vmem [shape: bf16[2,2,2,128], index: 3, kind: input, shape index: {}]   ;;  %s2452_s4 = inlined_call_operand.vmem [shape: bf16[9,128,128], index: 4, kind: input, shape index: {}]   ;;  %s2453_s5 = inlined_call_operand.vmem [shape: f32[1,128], index: 5, kind: input, shape index: {}]   ;;  %s2454_s6 = inlined_call_operand.vmem [shape: f32[1,128], index: 6, kind: input, shape index: {}]   ;;  %s2455_s7 = inlined_call_operand.vmem [shape: bf16[2,1,1,128], index: 7, kind: output, shape index: {}]  }
   0x1 LB: > { %s1435_s25 = sadd.s32 4294967295, %s2027_s24   ;;  %p1439_p0 = scmp.ge.s32.totalorder %s2027_s24, 1  ;;  %s2027_s24 = sphi %s2072_s24, %s17_s24  }
   0x2   : > { %p263_p1 = scmp.lt.s32.totalorder %s2027_s24, 3 }
   0x4   : > { %p264_p2 = pnand %p1439_p0, %p263_p1 }
   0x5   : > { %v1949_v0 = vld [vmem:[%s2452_s4 + $0x40] sm:$0xff] (!%p264_p2)   ;;  %v2029_v1 = vmov (!%p264_p2), 0.0   ;;  %v1951_v3 = vld [vmem:[%s2452_s4 + $0x48] sm:$0xff] (!%p264_p2)   ;;  %vm2030_vm0 = vmmov (!%p264_p2), 0   ;;  %v1953_v5 = vld [vmem:[%s2452_s4 + $0x50] sm:$0xff] (!%p264_p2)   ;;  %p304_p3 = scmp.lt.s32.totalorder (!%p264_p2), %s1435_s25, 1  ;;  %v556_v28 = vlaneseq (!%p264_p2) }
   0x6   : > { %267 = sbr.rel (%p264_p2) target bundleno = 391 (0x187), region = 48  ;;  %1729 = vmatprep.subr.bf16.mxu1 (!%p264_p2), %v2029_v1  ;;  %1809 = vmatprep.subr.bf16.mxu0 (!%p264_p2), %v2029_v1  ;;  %v1950_v2 = vld [vmem:[%s2452_s4 + $0x100] sm:$0xff] (!%p264_p2)   ;;  %v1952_v4 = vld [vmem:[%s2452_s4 + $0x108] sm:$0xff] (!%p264_p2)   ;;  %v1954_v6 = vld [vmem:[%s2452_s4 + $0x110] sm:$0xff] (!%p264_p2)   ;;  %v2031_v26 = vmov (!%p264_p2), 1966171168  }
   0x7   : > { %1730 = vmatpush3.bf16.msra.mxu1 (!%p264_p2), %v1949_v0  ;;  %1745 = vmatprep.mubr.msk.bf16.mxu1 (!%p264_p2), %vm2030_vm0, %v2029_v1  ;;  %v1955_v7 = vld [vmem:[%s2452_s4 + $0x58] sm:$0xff] (!%p264_p2)   ;;  %v1957_v9 = vld [vmem:[%s2452_s4 + $0x60] sm:$0xff] (!%p264_p2)   ;;  %v1959_v11 = vld [vmem:[%s2452_s4 + $0x68] sm:$0xff] (!%p264_p2)   ;;  %v554_v27 = vunpack.c.l.s4 (!%p264_p2), %v2031_v26  ;;  %v557_v32 = vshrl.u32 (!%p264_p2), %v556_v28, 7  ;;  %vm1346_vm1 = vcmask (!%p264_p2), 1040384  }
   0x8   : > { %1810 = vmatpush3.bf16.msra.mxu0 (!%p264_p2), %v1950_v2  ;;  %1731 = vmatprep.subr.bf16.mxu1 (!%p264_p2), %v2029_v1  ;;  %v1956_v8 = vld [vmem:[%s2452_s4 + $0x118] sm:$0xff] (!%p264_p2)   ;;  %v1958_v10 = vld [vmem:[%s2452_s4 + $0x120] sm:$0xff] (!%p264_p2)   ;;  %v1960_v12 = vld [vmem:[%s2452_s4 + $0x128] sm:$0xff] (!%p264_p2)   ;;  %vm1347_vm2 = vsmask.f32 (!%p264_p2), 256 }
   0x9   : > { %1811 = vmatprep.subr.bf16.mxu0 (!%p264_p2), %v2029_v1  ;;  %1825 = vmatprep.mubr.msk.bf16.mxu0 (!%p264_p2), %vm2030_vm0, %v2029_v1  ;;  %v1961_v13 = vld [vmem:[%s2452_s4 + $0x70] sm:$0xff] (!%p264_p2)   ;;  %v1963_v15 = vld [vmem:[%s2452_s4 + $0x78] sm:$0xff] (!%p264_p2)   ;;  %v1965_v18 = vld [vmem:[%s2452_s4] sm:$0xff] (!%p264_p2)   ;;  %v555_v31 = vunpack.c.0.s8 (!%p264_p2), %v554_v27 }
   0xa   : > { %v1962_v14 = vld [vmem:[%s2452_s4 + $0x130] sm:$0xff] (!%p264_p2)   ;;  %v1964_v16 = vld [vmem:[%s2452_s4 + $0x138] sm:$0xff] (!%p264_p2)   ;;  %v1966_v20 = vld [vmem:[%s2452_s4 + $0x140] sm:$0xff] (!%p264_p2)  }
   0xb   : > { %1732 = vmatpush3.bf16.msra.mxu1 (!%p264_p2), %v1951_v3  ;;  %v1967_v21 = vld [vmem:[%s2452_s4 + $0x8] sm:$0xff] (!%p264_p2)   ;;  %v1969_v23 = vld [vmem:[%s2452_s4 + $0x10] sm:$0xff] (!%p264_p2)   ;;  %v1971_v25 = vld [vmem:[%s2452_s4 + $0x18] sm:$0xff] (!%p264_p2)   ;;  %v2219_v35 = vsub.s32 (!%p264_p2), %v555_v31, %v557_v32 }
   0xc   : > { %1812 = vmatpush3.bf16.msra.mxu0 (!%p264_p2), %v1952_v4  ;;  %1733 = vmatprep.subr.bf16.mxu1 (!%p264_p2), %v2029_v1  ;;  %v1968_v22 = vld [vmem:[%s2452_s4 + $0x148] sm:$0xff] (!%p264_p2)   ;;  %v1970_v24 = vld [vmem:[%s2452_s4 + $0x150] sm:$0xff] (!%p264_p2)   ;;  %v1972_v29 = vld [vmem:[%s2452_s4 + $0x158] sm:$0xff] (!%p264_p2)  }
   0xd   : > { %1813 = vmatprep.subr.bf16.mxu0 %v2029_v1  ;;  %s2457_s25 = smov (!%p304_p3, %s1435_s25), 1  ;;  %v1973_v30 = vld [vmem:[%s2452_s4 + $0x20] sm:$0xff]   ;;  %v1975_v34 = vld [vmem:[%s2452_s4 + $0x28] sm:$0xff]   ;;  %v1977_v38 = vld [vmem:[%s2452_s4 + $0x30] sm:$0xff]  }
   0xe   : > { %s2142_s8 = sshll.u32 %s2457_s25, 1  ;;  %v1974_v33 = vld [vmem:[%s2452_s4 + $0x160] sm:$0xff]   ;;  %v1976_v36 = vld [vmem:[%s2452_s4 + $0x168] sm:$0xff]   ;;  %v1978_v40 = vld [vmem:[%s2452_s4 + $0x170] sm:$0xff]   ;;  %s322_s28 = scalar_lea.vmem %s2455_s7, %s2457_s25 }
   0xf   : > { %1734 = vmatpush3.bf16.msra.mxu1 %v1953_v5  ;;  %s2153_s13 = scalar_lea.vmem %s2449_s1, %s2142_s8  ;;  %s319_s20 = scalar_lea.vmem %s2451_s3, %s2142_s8  ;;  %v1979_v41 = vld [vmem:[%s2452_s4 + $0x38] sm:$0xff]   ;;  %v1981_v45 = vld [vmem:[%s2452_s4 + $0x80] sm:$0xff]   ;;  %v1983_v48 = vld [vmem:[%s2452_s4 + $0x88] sm:$0xff]  }
  0x10   : > { %1814 = vmatpush3.bf16.msra.mxu0 %v1954_v6  ;;  %1735 = vmatprep.subr.bf16.mxu1 %v2029_v1  ;;  %v358_v17 = vld [vmem:[%s2153_s13] sm:$0x1]  ;;  %s315_s26 = scalar_lea.vmem %s2450_s2, %s2142_s8  ;;  %s2245_s18 = scalar_lea.vmem %s2448_s0, %s2142_s8  ;;  %v1980_v43 = vld [vmem:[%s2452_s4 + $0x178] sm:$0xff]   ;;  %v1984_v49 = vld [vmem:[%s2452_s4 + $0x188] sm:$0xff]  }
  0x11   : > { %1815 = vmatprep.subr.bf16.mxu0 %v2029_v1  ;;  %v784_v19 = vld [vmem:[%s319_s20] sm:$0x1]  ;;  %v1985_v50 = vld [vmem:[%s2452_s4 + $0x90] sm:$0xff]   ;;  %v1987_v52 = vld [vmem:[%s2452_s4 + $0x98] sm:$0xff]  }
  0x12   : > { %v2225_v37 = vld [vmem:[%s315_s26] sm:$0x1]  ;;  %v1986_v51 = vld [vmem:[%s2452_s4 + $0x190] sm:$0xff]   ;;  %v1988_v53 = vld [vmem:[%s2452_s4 + $0x198] sm:$0xff]  }
  0x13   : > { %1736 = vmatpush3.bf16.msra.mxu1 %v1955_v7  ;;  %v898_v39 = vrot.slane %v2225_v37, %v2219_v35  ;;  %v340_v44 = vld [vmem:[%s2245_s18] sm:$0x1]  ;;  %v1991_v56 = vld [vmem:[%s2452_s4 + $0xa8] sm:$0xff]   ;;  %v1993_v59 = vld [vmem:[%s2452_s4 + $0xb0] sm:$0xff]  }
  0x14   : > { %1816 = vmatpush3.bf16.msra.mxu0 %v1956_v8  ;;  %1737 = vmatprep.subr.bf16.mxu1 %v2029_v1  ;;  %v1982_v47 = vld [vmem:[%s2452_s4 + $0x180] sm:$0xff]   ;;  %v1992_v57 = vld [vmem:[%s2452_s4 + $0x1a8] sm:$0xff]   ;;  %v559_v58 = vrot.slane %v340_v44, %v2219_v35  ;;  %v1994_v60 = vld [vmem:[%s2452_s4 + $0x1b0] sm:$0xff]  }
  0x15   : > { %1817 = vmatprep.subr.bf16.mxu0 %v2029_v1  ;;  %v905_v42 = vrot.slane %v898_v39, %v2219_v35  ;;  %v1989_v54 = vld [vmem:[%s2452_s4 + $0xa0] sm:$0xff]   ;;  %v1995_v62 = vld [vmem:[%s2452_s4 + $0xb8] sm:$0xff]   ;;  %v1999_v5 = vld [vmem:[%s2452_s4 + $0xc8] sm:$0xff]  }
  0x16   : > { %v1990_v55 = vld [vmem:[%s2452_s4 + $0x1a0] sm:$0xff]   ;;  %v566_v61 = vrot.slane %v559_v58, %v2219_v35  ;;  %v1996_v63 = vld [vmem:[%s2452_s4 + $0x1b8] sm:$0xff]   ;;  %v2000_v6 = vld [vmem:[%s2452_s4 + $0x1c8] sm:$0xff]  }
  0x17   : > { %1738 = vmatpush3.bf16.msra.mxu1 %v1957_v9  ;;  %v907_v46 = vshrl.u32 %v905_v42, 16  ;;  %v1997_v2 = vld [vmem:[%s2452_s4 + $0xc0] sm:$0xff]   ;;  %v2001_v7 = vld [vmem:[%s2452_s4 + $0xd0] sm:$0xff]   ;;  %v2003_v9 = vld [vmem:[%s2452_s4 + $0xd8] sm:$0xff]  }
  0x18   : > { %1818 = vmatpush3.bf16.msra.mxu0 %v1958_v10  ;;  %1739 = vmatprep.subr.bf16.mxu1 %v2029_v1  ;;  %v568_v0 = vshrl.u32 %v566_v61, 16  ;;  %v2329_v3 = vld [vmem:[%s2245_s18 + $0x1] sm:$0x1]  ;;  %v2002_v8 = vld [vmem:[%s2452_s4 + $0x1d0] sm:$0xff]   ;;  %v2004_v10 = vld [vmem:[%s2452_s4 + $0x1d8] sm:$0xff]  }
  0x19   : > { %1819 = vmatprep.subr.bf16.mxu0 %v2029_v1  ;;  %v1998_v4 = vld [vmem:[%s2452_s4 + $0x1c0] sm:$0xff]   ;;  %v1239_v26 = vrot.slane %v2329_v3, %v2219_v35  ;;  %v2019_v27 = vld [vmem:[%s2452_s4 + $0x230] sm:$0xff]   ;;  %vm1348_vm3 = vmand %vm1346_vm1, %vm1347_vm2 }
  0x1a   : > { %v1341_v39 = vld [vmem:[%s2454_s6] sm:$0x1] }
  0x1b   : > { %1740 = vmatpush3.bf16.msra.mxu1 %v1959_v11  ;;  %v2005_v11 = vld [vmem:[%s2452_s4 + $0xe0] sm:$0xff]   ;;  %v1246_v28 = vrot.slane %v1239_v26, %v2219_v35 }
  0x1c   : > { %1820 = vmatpush3.bf16.msra.mxu0 %v1960_v12  ;;  %1741 = vmatprep.subr.bf16.mxu1 %v2029_v1  ;;  %v2006_v12 = vld [vmem:[%s2452_s4 + $0x1e0] sm:$0xff]  }
  0x1d   : > { %1821 = vmatprep.subr.bf16.mxu0 %v2029_v1  ;;  %v1340_v35 = vld [vmem:[%s2453_s5] sm:$0x1] }
  0x1f   : > { %1742 = vmatpush3.bf16.msra.mxu1 %v1961_v13  ;;  %v2007_v13 = vld [vmem:[%s2452_s4 + $0xe8] sm:$0xff]  }
  0x20   : > { %1822 = vmatpush3.bf16.msra.mxu0 %v1962_v14  ;;  %1743 = vmatprep.subr.bf16.mxu1 %v2029_v1  ;;  %v2008_v14 = vld [vmem:[%s2452_s4 + $0x1e8] sm:$0xff]  }
  0x21   : > { %1823 = vmatprep.subr.bf16.mxu0 %v2029_v1 }
  0x23   : > { %1744 = vmatpush3.bf16.msra.mxu1 %v1963_v15  ;;  %v2009_v15 = vld [vmem:[%s2452_s4 + $0xf0] sm:$0xff]  }
  0x24   : > { %1824 = vmatpush3.bf16.msra.mxu0 %v1964_v16  ;;  %1749 = vmatprep.subr.bf16.mxu1 %v2029_v1  ;;  %v2010_v16 = vld [vmem:[%s2452_s4 + $0x1f0] sm:$0xff]  }
  0x25   : > { %1829 = vmatprep.subr.bf16.mxu0 %v2029_v1 }
  0x26   : > { %1746 = vmatmul.mubr.bf16.vlgmr.msra.gmra.mrb[0].mxu1 %v358_v17  ;;  %v2011_v17 = vld [vmem:[%s2452_s4 + $0xf8] sm:$0xff]  }
  0x27   : > { %1750 = vmatpush3.bf16.msra.mxu1 %v1965_v18  ;;  %1826 = vmatmul.mubr.bf16.vlgmr.msra.gmra.mrb[0].mxu0 %v784_v19  ;;  %v2012_v18 = vld [vmem:[%s2452_s4 + $0x1f8] sm:$0xff]   ;;  %v1613_v19 = vld [vmem:[%s2153_s13 + $0x1] sm:$0x1] }
  0x28   : > { %1830 = vmatpush3.bf16.msra.mxu0 %v1966_v20  ;;  %1751 = vmatprep.subr.bf16.mxu1 %v2029_v1  ;;  %v2013_v20 = vld [vmem:[%s2452_s4 + $0x200] sm:$0xff]  }
  0x29   : > { %1831 = vmatprep.subr.bf16.mxu0 %v2029_v1  ;;  %1765 = vmatprep.mubr.msk.bf16.mxu1 %vm2030_vm0, %v2029_v1 }
  0x2a   : > { %1845 = vmatprep.mubr.msk.bf16.mxu0 %vm2030_vm0, %v2029_v1 }
  0x2b   : > { %1752 = vmatpush3.bf16.msra.mxu1 %v1967_v21  ;;  %v2014_v21 = vld [vmem:[%s2452_s4 + $0x208] sm:$0xff]  }
  0x2c   : > { %1832 = vmatpush3.bf16.msra.mxu0 %v1968_v22  ;;  %1753 = vmatprep.subr.bf16.mxu1 %v2029_v1  ;;  %v2015_v22 = vld [vmem:[%s2452_s4 + $0x210] sm:$0xff]  }
  0x2d   : > { %1833 = vmatprep.subr.bf16.mxu0 %v2029_v1 }
  0x2f   : > { %1754 = vmatpush3.bf16.msra.mxu1 %v1969_v23  ;;  %v2016_v23 = vld [vmem:[%s2452_s4 + $0x218] sm:$0xff]  }
  0x30   : > { %1834 = vmatpush3.bf16.msra.mxu0 %v1970_v24  ;;  %1755 = vmatprep.subr.bf16.mxu1 %v2029_v1  ;;  %v2017_v24 = vld [vmem:[%s2452_s4 + $0x220] sm:$0xff]  }
  0x31   : > { %1835 = vmatprep.subr.bf16.mxu0 %v2029_v1 }
  0x33   : > { %1756 = vmatpush3.bf16.msra.mxu1 %v1971_v25  ;;  %v2018_v25 = vld [vmem:[%s2452_s4 + $0x228] sm:$0xff]  }
  0x34   : > { %1836 = vmatpush3.bf16.msra.mxu0 %v1972_v29  ;;  %1757 = vmatprep.subr.bf16.mxu1 %v2029_v1  ;;  %v2020_v29 = vld [vmem:[%s2452_s4 + $0x238] sm:$0xff]  }
  0x35   : > { %1837 = vmatprep.subr.bf16.mxu0 %v2029_v1 }
  0x37   : > { %1758 = vmatpush3.bf16.msra.mxu1 %v1973_v30  ;;  %v1248_v30 = vshrl.u32 %v1246_v28, 16 }
  0x38   : > { %1838 = vmatpush3.bf16.msra.mxu0 %v1974_v33  ;;  %1759 = vmatprep.subr.bf16.mxu1 %v2029_v1 }
  0x39   : > { %1839 = vmatprep.subr.bf16.mxu0 %v2029_v1 }
  0x3b   : > { %1760 = vmatpush3.bf16.msra.mxu1 %v1975_v34 }
  0x3c   : > { %1840 = vmatpush3.bf16.msra.mxu0 %v1976_v36  ;;  %1761 = vmatprep.subr.bf16.mxu1 %v2029_v1 }
  0x3d   : > { %1841 = vmatprep.subr.bf16.mxu0 %v2029_v1 }
  0x3f   : > { %1762 = vmatpush3.bf16.msra.mxu1 %v1977_v38 }
  0x40   : > { %1842 = vmatpush3.bf16.msra.mxu0 %v1978_v40  ;;  %1763 = vmatprep.subr.bf16.mxu1 %v2029_v1 }
  0x41   : > { %1843 = vmatprep.subr.bf16.mxu0 %v2029_v1 }
  0x43   : > { %1764 = vmatpush3.bf16.msra.mxu1 %v1979_v41 }
  0x44   : > { %1844 = vmatpush3.bf16.msra.mxu0 %v1980_v43  ;;  %1769 = vmatprep.subr.bf16.mxu1 %v2029_v1 }
  0x45   : > { %1849 = vmatprep.subr.bf16.mxu0 %v2029_v1 }
  0x46   : > { %1766 = vmatmul.mubr.bf16.vlgmr.msra.gmra.mrb[0].mxu1 %v340_v44  ;;  %v1349_v44 = vld [vmem:[%s322_s28] sm:$0x1] }
  0x47   : > { %1770 = vmatpush3.bf16.msra.mxu1 %v1981_v45  ;;  %1846 = vmatmul.mubr.bf16.vlgmr.msra.gmra.mrb[0].mxu0 %v907_v46 }
  0x48   : > { %1850 = vmatpush3.bf16.msra.mxu0 %v1982_v47  ;;  %1771 = vmatprep.subr.bf16.mxu1 %v2029_v1 }
  0x49   : > { %1851 = vmatprep.subr.bf16.mxu0 %v2029_v1  ;;  %1785 = vmatprep.mubr.msk.bf16.mxu1 %vm2030_vm0, %v2029_v1 }
  0x4a   : > { %1865 = vmatprep.mubr.msk.bf16.mxu0 %vm2030_vm0, %v2029_v1 }
  0x4b   : > { %1772 = vmatpush3.bf16.msra.mxu1 %v1983_v48 }
  0x4c   : > { %1852 = vmatpush3.bf16.msra.mxu0 %v1984_v49  ;;  %1773 = vmatprep.subr.bf16.mxu1 %v2029_v1 }
  0x4d   : > { %1853 = vmatprep.subr.bf16.mxu0 %v2029_v1 }
  0x4f   : > { %1774 = vmatpush3.bf16.msra.mxu1 %v1985_v50 }
  0x50   : > { %1854 = vmatpush3.bf16.msra.mxu0 %v1986_v51  ;;  %1775 = vmatprep.subr.bf16.mxu1 %v2029_v1 }
  0x51   : > { %1855 = vmatprep.subr.bf16.mxu0 %v2029_v1 }
  0x53   : > { %1776 = vmatpush3.bf16.msra.mxu1 %v1987_v52 }
  0x54   : > { %1856 = vmatpush3.bf16.msra.mxu0 %v1988_v53  ;;  %1777 = vmatprep.subr.bf16.mxu1 %v2029_v1 }
  0x55   : > { %1857 = vmatprep.subr.bf16.mxu0 %v2029_v1 }
  0x57   : > { %1778 = vmatpush3.bf16.msra.mxu1 %v1989_v54 }
  0x58   : > { %1858 = vmatpush3.bf16.msra.mxu0 %v1990_v55  ;;  %1779 = vmatprep.subr.bf16.mxu1 %v2029_v1 }
  0x59   : > { %1859 = vmatprep.subr.bf16.mxu0 %v2029_v1 }
  0x5b   : > { %1780 = vmatpush3.bf16.msra.mxu1 %v1991_v56 }
  0x5c   : > { %1860 = vmatpush3.bf16.msra.mxu0 %v1992_v57  ;;  %1781 = vmatprep.subr.bf16.mxu1 %v2029_v1 }
  0x5d   : > { %1861 = vmatprep.subr.bf16.mxu0 %v2029_v1 }
  0x5f   : > { %1782 = vmatpush3.bf16.msra.mxu1 %v1993_v59 }
  0x60   : > { %1862 = vmatpush3.bf16.msra.mxu0 %v1994_v60  ;;  %1783 = vmatprep.subr.bf16.mxu1 %v2029_v1 }
  0x61   : > { %1863 = vmatprep.subr.bf16.mxu0 %v2029_v1 }
  0x63   : > { %1784 = vmatpush3.bf16.msra.mxu1 %v1995_v62 }
  0x64   : > { %1864 = vmatpush3.bf16.msra.mxu0 %v1996_v63  ;;  %1789 = vmatprep.subr.bf16.mxu1 %v2029_v1 }
  0x65   : > { %1869 = vmatprep.subr.bf16.mxu0 %v2029_v1 }
  0x66   : > { %1786 = vmatmul.mubr.bf16.vlgmr.msra.gmra.mrb[0].mxu1 %v568_v0 }
  0x67   : > { %1790 = vmatpush3.bf16.msra.mxu1 %v1997_v2  ;;  %1866 = vmatmul.mubr.bf16.vlgmr.msra.gmra.mrb[0].mxu0 %v2329_v3 }
  0x68   : > { %1870 = vmatpush3.bf16.msra.mxu0 %v1998_v4  ;;  %1791 = vmatprep.subr.bf16.mxu1 %v2029_v1 }
  0x69   : > { %1871 = vmatprep.subr.bf16.mxu0 %v2029_v1  ;;  %1805 = vmatprep.mubr.msk.bf16.mxu1 %vm2030_vm0, %v2029_v1 }
  0x6a   : > { %1885 = vmatprep.mubr.msk.bf16.mxu0 %vm2030_vm0, %v2029_v1 }
  0x6b   : > { %1792 = vmatpush3.bf16.msra.mxu1 %v1999_v5 }
  0x6c   : > { %1872 = vmatpush3.bf16.msra.mxu0 %v2000_v6  ;;  %1793 = vmatprep.subr.bf16.mxu1 %v2029_v1 }
  0x6d   : > { %1873 = vmatprep.subr.bf16.mxu0 %v2029_v1 }
  0x6f   : > { %1794 = vmatpush3.bf16.msra.mxu1 %v2001_v7 }
  0x70   : > { %1874 = vmatpush3.bf16.msra.mxu0 %v2002_v8  ;;  %1795 = vmatprep.subr.bf16.mxu1 %v2029_v1 }
  0x71   : > { %1875 = vmatprep.subr.bf16.mxu0 %v2029_v1 }
  0x73   : > { %1796 = vmatpush3.bf16.msra.mxu1 %v2003_v9 }
  0x74   : > { %1876 = vmatpush3.bf16.msra.mxu0 %v2004_v10  ;;  %1797 = vmatprep.subr.bf16.mxu1 %v2029_v1 }
  0x75   : > { %1877 = vmatprep.subr.bf16.mxu0 %v2029_v1 }
  0x77   : > { %1798 = vmatpush3.bf16.msra.mxu1 %v2005_v11 }
  0x78   : > { %1878 = vmatpush3.bf16.msra.mxu0 %v2006_v12  ;;  %1799 = vmatprep.subr.bf16.mxu1 %v2029_v1 }
  0x79   : > { %1879 = vmatprep.subr.bf16.mxu0 %v2029_v1 }
  0x7b   : > { %1800 = vmatpush3.bf16.msra.mxu1 %v2007_v13 }
  0x7c   : > { %1880 = vmatpush3.bf16.msra.mxu0 %v2008_v14  ;;  %1801 = vmatprep.subr.bf16.mxu1 %v2029_v1 }
  0x7d   : > { %1881 = vmatprep.subr.bf16.mxu0 %v2029_v1 }
  0x7f   : > { %1802 = vmatpush3.bf16.msra.mxu1 %v2009_v15 }
  0x80   : > { %1882 = vmatpush3.bf16.msra.mxu0 %v2010_v16  ;;  %1803 = vmatprep.subr.bf16.mxu1 %v2029_v1 }
  0x81   : > { %1883 = vmatprep.subr.bf16.mxu0 %v2029_v1 }
  0x83   : > { %1804 = vmatpush3.bf16.msra.mxu1 %v2011_v17 }
  0x84   : > { %1884 = vmatpush3.bf16.msra.mxu0 %v2012_v18 }
  0x85   : > { %1889 = vmatprep.subr.bf16.mxu0 %v2029_v1 }
  0x86   : > { %1806 = vmatmul.mubr.bf16.vlgmr.msra.gmra.mrb[0].mxu1 %v2225_v37 }
  0x87   : > { %1886 = vmatmul.mubr.bf16.vlgmr.msra.gmra.mrb[0].mxu0 %v1613_v19 }
  0x88   : > { %1890 = vmatpush3.bf16.msra.mxu0 %v2013_v20  ;;  %1905 = vmatprep.mubr.msk.bf16.mxu0 %vm2030_vm0, %v2029_v1 }
  0x89   : > { %1891 = vmatprep.subr.bf16.mxu0 %v2029_v1 }
  0x8c   : > { %1892 = vmatpush3.bf16.msra.mxu0 %v2014_v21 }
  0x8d   : > { %1893 = vmatprep.subr.bf16.mxu0 %v2029_v1 }
  0x90   : > { %1894 = vmatpush3.bf16.msra.mxu0 %v2015_v22 }
  0x91   : > { %1895 = vmatprep.subr.bf16.mxu0 %v2029_v1 }
  0x94   : > { %1896 = vmatpush3.bf16.msra.mxu0 %v2016_v23 }
  0x95   : > { %1897 = vmatprep.subr.bf16.mxu0 %v2029_v1 }
  0x98   : > { %1898 = vmatpush3.bf16.msra.mxu0 %v2017_v24 }
  0x99   : > { %1899 = vmatprep.subr.bf16.mxu0 %v2029_v1 }
  0x9c   : > { %1900 = vmatpush3.bf16.msra.mxu0 %v2018_v25 }
  0x9d   : > { %1901 = vmatprep.subr.bf16.mxu0 %v2029_v1 }
  0xa0   : > { %1902 = vmatpush3.bf16.msra.mxu0 %v2019_v27 }
  0xa1   : > { %1903 = vmatprep.subr.bf16.mxu0 %v2029_v1 }
  0xa4   : > { %1904 = vmatpush3.bf16.msra.mxu0 %v2020_v29 }
  0xa7   : > { %1906 = vmatmul.mubr.bf16.vlgmr.msra.gmra.mrb[0].mxu0 %v1248_v30 }
 0x159   : > { %v760_v31 = vpop.f32.mrb[0].mxu1 }
 0x15a   : > { %v1807_v32 = vpop.f32.mrb[1].mxu1 }
 0x15b   : > { %v763_v33 = vpop.f32.mrb[2].mxu1 }
 0x15c   : > { %v1808_v34 = vpop.f32.mrb[3].mxu1 }
 0x17a   : > { %v1333_v36 = vpop.f32.mrb[0].mxu0 }
 0x17b   : > { %v1909_v37 = vadd.f32 %v1333_v36, %v760_v31  ;;  %v1907_v38 = vpop.f32.mrb[1].mxu0 }
 0x17c   : > { %v1336_v1 = vpop.f32.mrb[2].mxu0 }
 0x17d   : > { %v1342_v40 = vmul.f32 %v1909_v37, %v1340_v35  ;;  %v1908_v41 = vpop.f32.mrb[3].mxu0 }
 0x17f   : > { %v1343_v42 = vadd.f32 %v1342_v40, %v1341_v39 }
 0x181   : > { %v1344_v43 = vmax.f32 %v1343_v42, 0.0 }
 0x183   : > { %v1345_v45 = vpack.c.bf16 %v1344_v43, %v1344_v43 }
 0x185   : > { %v1350_v46 = vsel %vm1348_vm3, %v1345_v45, %v1349_v44 }
 0x186   : > { %1351 = vst [vmem:[%s322_s28] sm:$0x1] %v1350_v46 }
 0x187 PF: > { %s17_s24 = sadd.s32 1, %s2027_s24  }
 0x188   : > { %p14_p4 = scmp.ge.s32.totalorder %s17_s24, 4  }
 0x18a   :  { %16 = sbr.rel (!%p14_p4) target bundleno = 1 (0x1), region = 97 }

</bundles_post_ra>
